<compile_context>
chip_gen: v7x
topology: tpu7x:2x2x1
jax: 0.10.0
libtpu: 0.0.40
codegen_flags: <defaults>
</compile_context>

<pallas_src>
import functools

import jax
import jax.numpy as jnp
from jax.experimental import pallas as pl
from jax.experimental.pallas import tpu as pltpu

BN_EPS = 1e-5


def primary_point_caps(x_bnc, W, gamma, beta, *, tile_n=None, tile_c=None):
    """Fused PrimaryPointCapsLayer forward.

    x_bnc : (B, N, Cin)  f32, channels-last point features (PyTorch NCW transposed)
    W     : (P, Cin, Cout) f32 conv weights (kernel_size=1)
    gamma, beta : (P, Cout) f32 BatchNorm affine params
    Returns (B, Cout, P) f32, matching PyTorch's squash(u.squeeze()).
    (The Conv1d bias is not needed: it cancels exactly under training-mode BN.)
    """
    B, N, Cin = map(int, x_bnc.shape)
    P, _, Cout = map(int, W.shape)

    # --- tile selection -----------------------------------------------------
    if tile_c is None:
        tile_c = 512 if Cout % 512 == 0 else Cout          # 2 column tiles for Cout=1024
    if tile_n is None:
        tile_n = N
        # keep the matmul M dim (B*tile_n) moderate so the f32 z tile stays small
        while tile_n > 8 and tile_n % 2 == 0 and B * tile_n > 512:
            tile_n //= 2
    assert N % tile_n == 0 and Cout % tile_c == 0
    num_c, num_n = Cout // tile_c, N // tile_n
    pc = P * tile_c                                         # fused columns per tile
    inv_count = 1.0 / float(B * N)                          # biased variance (training BN)

    # --- pack weights / BN params into the fused column layout ---------------
    # fused column index within a tile = p * tile_c + c_local
    Wf = (jnp.transpose(W, (1, 0, 2))                       # (Cin, P, Cout)
          .reshape(Cin, P, num_c, tile_c)
          .transpose(2, 0, 1, 3)                            # (num_c, Cin, P, tile_c)
          .reshape(num_c, Cin, pc)).astype(jnp.bfloat16)

    def arrange(v):                                         # (P, Cout) -> (num_c, pc)
        return (v.reshape(P, num_c, tile_c)
                .transpose(1, 0, 2)
                .reshape(num_c, pc)).astype(jnp.float32)

    gb = jnp.stack([arrange(gamma), arrange(beta)], axis=1)  # (num_c, 2, pc)
    x_bf = x_bnc.astype(jnp.bfloat16)                        # MXU operands in bf16

    # --- kernel ---------------------------------------------------------------
    def kernel(x_ref, w_ref, gb_ref, o_ref, sum_ref, ssq_ref, max_ref, min_ref):
        n = pl.program_id(1)

        @pl.when(n == 0)
        def _init():
            sum_ref[...] = jnp.zeros(sum_ref.shape, jnp.float32)
            ssq_ref[...] = jnp.zeros(ssq_ref.shape, jnp.float32)
            max_ref[...] = jnp.full(max_ref.shape, -jnp.inf, jnp.float32)
            min_ref[...] = jnp.full(min_ref.shape, jnp.inf, jnp.float32)

        # One wide matmul for all P capsules of this column tile.
        x = x_ref[...].reshape(B * tile_n, Cin)                       # bf16
        w = w_ref[0]                                                  # (Cin, pc) bf16
        z = jnp.dot(x, w, preferred_element_type=jnp.float32)        # (B*tile_n, pc) f32

        # Streaming BN statistics (per channel) and pool extrema (per batch, channel).
        sum_ref[...] += jnp.sum(z, axis=0, keepdims=True)
        ssq_ref[...] += jnp.sum(z * z, axis=0, keepdims=True)
        z3 = z.reshape(B, tile_n, pc)
        max_ref[...] = jnp.maximum(max_ref[...], jnp.max(z3, axis=1))
        min_ref[...] = jnp.minimum(min_ref[...], jnp.min(z3, axis=1))

        @pl.when(n == num_n - 1)
        def _finalize():
            mean = sum_ref[...] * inv_count                            # (1, pc)
            var = ssq_ref[...] * inv_count - mean * mean
            scale = gb_ref[0, 0:1, :] * jax.lax.rsqrt(var + BN_EPS)    # gamma / sqrt(var+eps)
            shift = gb_ref[0, 1:2, :] - scale * mean                   # beta - scale*mean
            # maxpool commutes with the per-channel affine (use min where scale < 0)
            pooled = jnp.where(scale >= 0.0,
                               scale * max_ref[...],
                               scale * min_ref[...]) + shift           # (B, pc)
            u = pooled.reshape(B, P, tile_c)
            sn = jnp.sum(u * u, axis=1, keepdims=True)                 # (B, 1, tile_c)
            # squash: u * sqrt(sn) / (1 + sn)   (same NaN-at-zero behavior as PyTorch)
            o_ref[...] = (u * (sn * jax.lax.rsqrt(sn))
                          * pl.reciprocal(1.0 + sn, approx=True))

        # TODO(synk): for very large B*N, sum/sumsq could be carried in f64-like
        # compensated form; f32 is ample at PointCapsNet scales.

    out_bpc = pl.pallas_call(
        kernel,
        out_shape=jax.ShapeDtypeStruct((B, P, Cout), jnp.float32),
        grid=(num_c, num_n),
        in_specs=[
            pl.BlockSpec((B, tile_n, Cin), lambda c, n: (0, n, 0)),
            pl.BlockSpec((1, Cin, pc), lambda c, n: (c, 0, 0)),
            pl.BlockSpec((1, 2, pc), lambda c, n: (c, 0, 0)),
        ],
        out_specs=pl.BlockSpec((B, P, tile_c), lambda c, n: (0, 0, c)),
        scratch_shapes=[
            pltpu.VMEM((1, pc), jnp.float32),   # sum(z)
            pltpu.VMEM((1, pc), jnp.float32),   # sum(z*z)
            pltpu.VMEM((B, pc), jnp.float32),   # max(z) per batch
            pltpu.VMEM((B, pc), jnp.float32),   # min(z) per batch
        ],
        compiler_params=pltpu.CompilerParams(
            dimension_semantics=("parallel", "arbitrary"),
        ),
    )(x_bf, Wf, gb)

    # (B, P, Cout) -> (B, Cout, P): matches PyTorch output (batch, 1024, prim_vec_size).
    # (Downstream consumers that accept (B, P, Cout) can skip this relayout.)
    return jnp.transpose(out_bpc, (0, 2, 1))


def reference(x_bnc, W, bias, gamma, beta):
    """Pure-JAX f32 reference of the PyTorch forward (training-mode BN, with conv bias)."""
    z = jnp.einsum("bnc,pco->pbno", x_bnc, W) + bias[:, None, None, :]
    mean = jnp.mean(z, axis=(1, 2), keepdims=True)
    var = jnp.mean((z - mean) ** 2, axis=(1, 2), keepdims=True)
    zn = (z - mean) / jnp.sqrt(var + BN_EPS) * gamma[:, None, None, :] + beta[:, None, None, :]
    u = jnp.max(zn, axis=2)                 # (P, B, Cout)
    u = jnp.transpose(u, (1, 2, 0))         # (B, Cout, P)
    sn = jnp.sum(u * u, axis=-1, keepdims=True)
    return sn * u / ((1.0 + sn) * jnp.sqrt(sn))


if __name__ == "__main__":
    # Small shapes consistent with the module: Conv1d(128 -> 1024) is architectural;
    # batch and num_points are shrunk.
    B, N, Cin, Cout, P = 2, 64, 128, 1024, 8   # N == num_points (MaxPool1d kernel)

    key = jax.random.PRNGKey(0)
    k1, k2, k3, k4, k5 = jax.random.split(key, 5)
    x_ncw = jax.random.normal(k1, (B, Cin, N), jnp.float32)          # PyTorch NCW input
    W = 0.05 * jax.random.normal(k2, (P, Cin, Cout), jnp.float32)    # conv weights (k=1)
    bias = 0.10 * jax.random.normal(k3, (P, Cout), jnp.float32)      # cancels under BN
    gamma = 1.0 + 0.10 * jax.random.normal(k4, (P, Cout), jnp.float32)
    beta = 0.10 * jax.random.normal(k5, (P, Cout), jnp.float32)

    x_bnc = jnp.transpose(x_ncw, (0, 2, 1))                          # NCW -> (B, N, C)

    out = primary_point_caps(x_bnc, W, gamma, beta)
    out = jax.block_until_ready(out)
    assert out.shape == (B, Cout, P), out.shape

    ref = jax.block_until_ready(reference(x_bnc, W, bias, gamma, beta))
    max_err = float(jnp.max(jnp.abs(out - ref)))
    assert jnp.allclose(out, ref, atol=3e-2, rtol=3e-2), max_err

    print("KERNEL_OK")
</pallas_src>

<mosaic_0001>
module attributes {stable_mosaic.version = 11 : i64} {
  func.func @kernel(%arg0: i32, %arg1: i32, %arg2: memref<2x64x128xbf16, #tpu.memory_space<vmem>>, %arg3: memref<1x128x4096xbf16, #tpu.memory_space<vmem>>, %arg4: memref<1x2x4096xf32, #tpu.memory_space<vmem>>, %arg5: memref<2x8x512xf32, #tpu.memory_space<vmem>>, %arg6: memref<1x4096xf32, #tpu.memory_space<vmem>>, %arg7: memref<1x4096xf32, #tpu.memory_space<vmem>>, %arg8: memref<2x4096xf32, #tpu.memory_space<vmem>>, %arg9: memref<2x4096xf32, #tpu.memory_space<vmem>>) attributes {dimension_semantics = [#tpu.dimension_semantics<parallel>, #tpu.dimension_semantics<arbitrary>], iteration_bounds = array<i64: 2, 1>, scalar_prefetch = 0 : i64, scratch_operands = 4 : i64, tpu.core_type = #tpu.core_type<tc>, window_params = [{transform_indices = @transform_0, window_bounds = array<i64: 2, 64, 128>}, {transform_indices = @transform_1, window_bounds = array<i64: 1, 128, 4096>}, {transform_indices = @transform_2, window_bounds = array<i64: 1, 2, 4096>}, {transform_indices = @transform_3, window_bounds = array<i64: 2, 8, 512>}]} {
    %c0_i32 = arith.constant 0 : i32
    %0 = arith.cmpi eq, %arg1, %c0_i32 : i32
    %1 = arith.extui %0 : i1 to i32
    %c0_i32_0 = arith.constant 0 : i32
    %2 = arith.cmpi ne, %1, %c0_i32_0 : i32
    scf.if %2 {
      %cst_28 = arith.constant 0.000000e+00 : f32
      %31 = vector.broadcast %cst_28 : f32 to vector<1x4096xf32>
      %c0_29 = arith.constant 0 : index
      %c0_30 = arith.constant 0 : index
      %32 = vector.load %arg6[%c0_29, %c0_30] : memref<1x4096xf32, #tpu.memory_space<vmem>>, vector<1x4096xf32>
      tpu.vector_store %arg6[%c0_29, %c0_30], %31 {strides = array<i32>} : memref<1x4096xf32, #tpu.memory_space<vmem>>, vector<1x4096xf32>,
      %cst_31 = arith.constant 0.000000e+00 : f32
      %33 = vector.broadcast %cst_31 : f32 to vector<1x4096xf32>
      %c0_32 = arith.constant 0 : index
      %c0_33 = arith.constant 0 : index
      %34 = vector.load %arg7[%c0_32, %c0_33] : memref<1x4096xf32, #tpu.memory_space<vmem>>, vector<1x4096xf32>
      tpu.vector_store %arg7[%c0_32, %c0_33], %33 {strides = array<i32>} : memref<1x4096xf32, #tpu.memory_space<vmem>>, vector<1x4096xf32>,
      %cst_34 = arith.constant 0xFF800000 : f32
      %35 = vector.broadcast %cst_34 : f32 to vector<2x4096xf32>
      %c0_35 = arith.constant 0 : index
      %c0_36 = arith.constant 0 : index
      %36 = vector.load %arg8[%c0_35, %c0_36] : memref<2x4096xf32, #tpu.memory_space<vmem>>, vector<2x4096xf32>
      tpu.vector_store %arg8[%c0_35, %c0_36], %35 {strides = array<i32>} : memref<2x4096xf32, #tpu.memory_space<vmem>>, vector<2x4096xf32>,
      %cst_37 = arith.constant 0x7F800000 : f32
      %37 = vector.broadcast %cst_37 : f32 to vector<2x4096xf32>
      %c0_38 = arith.constant 0 : index
      %c0_39 = arith.constant 0 : index
      %38 = vector.load %arg9[%c0_38, %c0_39] : memref<2x4096xf32, #tpu.memory_space<vmem>>, vector<2x4096xf32>
      tpu.vector_store %arg9[%c0_38, %c0_39], %37 {strides = array<i32>} : memref<2x4096xf32, #tpu.memory_space<vmem>>, vector<2x4096xf32>,
    } else {
    }
    %c0 = arith.constant 0 : index
    %c0_1 = arith.constant 0 : index
    %c0_2 = arith.constant 0 : index
    %3 = vector.load %arg2[%c0, %c0_1, %c0_2] : memref<2x64x128xbf16, #tpu.memory_space<vmem>>, vector<2x64x128xbf16>
    %4 = vector.shape_cast %3 : vector<2x64x128xbf16> to vector<128x128xbf16>
    %c0_3 = arith.constant 0 : index
    %c0_4 = arith.constant 0 : index
    %c0_5 = arith.constant 0 : index
    %5 = vector.load %arg3[%c0_3, %c0_4, %c0_5] : memref<1x128x4096xbf16, #tpu.memory_space<vmem>>, vector<1x128x4096xbf16>
    %6 = vector.shape_cast %5 : vector<1x128x4096xbf16> to vector<128x4096xbf16>
    %cst = arith.constant dense<0.000000e+00> : vector<128x4096xf32>
    %7 = tpu.matmul %4, %6, %cst {dimension_numbers = #tpu.dot_dimension_numbers<[1], [0], [0], [1], [0, 0, 1, 1], [], []>} : vector<128x128xbf16>, vector<128x4096xbf16>, vector<128x4096xf32> -> vector<128x4096xf32>
    %c0_6 = arith.constant 0 : index
    %c0_7 = arith.constant 0 : index
    %8 = vector.load %arg6[%c0_6, %c0_7] : memref<1x4096xf32, #tpu.memory_space<vmem>>, vector<1x4096xf32>
    %cst_8 = arith.constant dense<0.000000e+00> : vector<4096xf32>
    %9 = vector.multi_reduction <add>, %7, %cst_8 [0] : vector<128x4096xf32> to vector<4096xf32>
    %10 = vector.shape_cast %9 : vector<4096xf32> to vector<1x4096xf32>
    %11 = arith.addf %8, %10 : vector<1x4096xf32>
    %c0_9 = arith.constant 0 : index
    %c0_10 = arith.constant 0 : index
    %12 = vector.load %arg6[%c0_9, %c0_10] : memref<1x4096xf32, #tpu.memory_space<vmem>>, vector<1x4096xf32>
    tpu.vector_store %arg6[%c0_9, %c0_10], %11 {strides = array<i32>} : memref<1x4096xf32, #tpu.memory_space<vmem>>, vector<1x4096xf32>,
    %c0_11 = arith.constant 0 : index
    %c0_12 = arith.constant 0 : index
    %13 = vector.load %arg7[%c0_11, %c0_12] : memref<1x4096xf32, #tpu.memory_space<vmem>>, vector<1x4096xf32>
    %14 = arith.mulf %7, %7 : vector<128x4096xf32>
    %cst_13 = arith.constant dense<0.000000e+00> : vector<4096xf32>
    %15 = vector.multi_reduction <add>, %14, %cst_13 [0] : vector<128x4096xf32> to vector<4096xf32>
    %16 = vector.shape_cast %15 : vector<4096xf32> to vector<1x4096xf32>
    %17 = arith.addf %13, %16 : vector<1x4096xf32>
    %c0_14 = arith.constant 0 : index
    %c0_15 = arith.constant 0 : index
    %18 = vector.load %arg7[%c0_14, %c0_15] : memref<1x4096xf32, #tpu.memory_space<vmem>>, vector<1x4096xf32>
    tpu.vector_store %arg7[%c0_14, %c0_15], %17 {strides = array<i32>} : memref<1x4096xf32, #tpu.memory_space<vmem>>, vector<1x4096xf32>,
    %19 = vector.shape_cast %7 : vector<128x4096xf32> to vector<2x64x4096xf32>
    %c0_16 = arith.constant 0 : index
    %c0_17 = arith.constant 0 : index
    %20 = vector.load %arg8[%c0_16, %c0_17] : memref<2x4096xf32, #tpu.memory_space<vmem>>, vector<2x4096xf32>
    %cst_18 = arith.constant dense<0xFF800000> : vector<2x4096xf32>
    %21 = vector.multi_reduction <maximumf>, %19, %cst_18 [1] : vector<2x64x4096xf32> to vector<2x4096xf32>
    %22 = arith.maximumf %20, %21 : vector<2x4096xf32>
    %c0_19 = arith.constant 0 : index
    %c0_20 = arith.constant 0 : index
    %23 = vector.load %arg8[%c0_19, %c0_20] : memref<2x4096xf32, #tpu.memory_space<vmem>>, vector<2x4096xf32>
    tpu.vector_store %arg8[%c0_19, %c0_20], %22 {strides = array<i32>} : memref<2x4096xf32, #tpu.memory_space<vmem>>, vector<2x4096xf32>,
    %c0_21 = arith.constant 0 : index
    %c0_22 = arith.constant 0 : index
    %24 = vector.load %arg9[%c0_21, %c0_22] : memref<2x4096xf32, #tpu.memory_space<vmem>>, vector<2x4096xf32>
    %cst_23 = arith.constant dense<0x7F800000> : vector<2x4096xf32>
    %25 = vector.multi_reduction <minimumf>, %19, %cst_23 [1] : vector<2x64x4096xf32> to vector<2x4096xf32>
    %26 = arith.minimumf %24, %25 : vector<2x4096xf32>
    %c0_24 = arith.constant 0 : index
    %c0_25 = arith.constant 0 : index
    %27 = vector.load %arg9[%c0_24, %c0_25] : memref<2x4096xf32, #tpu.memory_space<vmem>>, vector<2x4096xf32>
    tpu.vector_store %arg9[%c0_24, %c0_25], %26 {strides = array<i32>} : memref<2x4096xf32, #tpu.memory_space<vmem>>, vector<2x4096xf32>,
    %c0_i32_26 = arith.constant 0 : i32
    %28 = arith.cmpi eq, %arg1, %c0_i32_26 : i32
    %29 = arith.extui %28 : i1 to i32
    %c0_i32_27 = arith.constant 0 : i32
    %30 = arith.cmpi ne, %29, %c0_i32_27 : i32
    scf.if %30 {
      %c0_28 = arith.constant 0 : index
      %c0_29 = arith.constant 0 : index
      %31 = vector.load %arg6[%c0_28, %c0_29] : memref<1x4096xf32, #tpu.memory_space<vmem>>, vector<1x4096xf32>
      %cst_30 = arith.constant 7.812500e-03 : f32
      %32 = vector.broadcast %cst_30 : f32 to vector<1x4096xf32>
      %33 = arith.mulf %31, %32 : vector<1x4096xf32>
      %c0_31 = arith.constant 0 : index
      %c0_32 = arith.constant 0 : index
      %34 = vector.load %arg7[%c0_31, %c0_32] : memref<1x4096xf32, #tpu.memory_space<vmem>>, vector<1x4096xf32>
      %cst_33 = arith.constant 7.812500e-03 : f32
      %35 = vector.broadcast %cst_33 : f32 to vector<1x4096xf32>
      %36 = arith.mulf %34, %35 : vector<1x4096xf32>
      %37 = arith.mulf %33, %33 : vector<1x4096xf32>
      %38 = arith.subf %36, %37 : vector<1x4096xf32>
      %c0_34 = arith.constant 0 : index
      %c0_35 = arith.constant 0 : index
      %c0_36 = arith.constant 0 : index
      %39 = vector.load %arg4[%c0_34, %c0_35, %c0_36] : memref<1x2x4096xf32, #tpu.memory_space<vmem>>, vector<1x1x4096xf32>
      %40 = vector.shape_cast %39 : vector<1x1x4096xf32> to vector<1x4096xf32>
      %cst_37 = arith.constant 9.99999974E-6 : f32
      %41 = vector.broadcast %cst_37 : f32 to vector<1x4096xf32>
      %42 = arith.addf %38, %41 : vector<1x4096xf32>
      %43 = math.rsqrt %42 : vector<1x4096xf32>
      %44 = arith.mulf %40, %43 : vector<1x4096xf32>
      %c0_38 = arith.constant 0 : index
      %c1 = arith.constant 1 : index
      %c0_39 = arith.constant 0 : index
      %45 = vector.load %arg4[%c0_38, %c1, %c0_39] : memref<1x2x4096xf32, #tpu.memory_space<vmem>>, vector<1x1x4096xf32>
      %46 = vector.shape_cast %45 : vector<1x1x4096xf32> to vector<1x4096xf32>
      %47 = arith.mulf %44, %33 : vector<1x4096xf32>
      %48 = arith.subf %46, %47 : vector<1x4096xf32>
      %cst_40 = arith.constant 0.000000e+00 : f32
      %49 = vector.broadcast %cst_40 : f32 to vector<1x4096xf32>
      %50 = arith.cmpf oge, %44, %49 : vector<1x4096xf32>
      %c0_41 = arith.constant 0 : index
      %c0_42 = arith.constant 0 : index
      %51 = vector.load %arg8[%c0_41, %c0_42] : memref<2x4096xf32, #tpu.memory_space<vmem>>, vector<2x4096xf32>
      %52 = vector.broadcast %44 : vector<1x4096xf32> to vector<2x4096xf32>
      %53 = arith.mulf %52, %51 : vector<2x4096xf32>
      %c0_43 = arith.constant 0 : index
      %c0_44 = arith.constant 0 : index
      %54 = vector.load %arg9[%c0_43, %c0_44] : memref<2x4096xf32, #tpu.memory_space<vmem>>, vector<2x4096xf32>
      %55 = vector.broadcast %44 : vector<1x4096xf32> to vector<2x4096xf32>
      %56 = arith.mulf %55, %54 : vector<2x4096xf32>
      %57 = vector.shape_cast %50 : vector<1x4096xi1> to vector<1x4096xi1>
      %58 = vector.broadcast %57 : vector<1x4096xi1> to vector<2x4096xi1>
      %59 = arith.select %58, %53, %56 : vector<2x4096xi1>, vector<2x4096xf32>
      %60 = vector.broadcast %48 : vector<1x4096xf32> to vector<2x4096xf32>
      %61 = arith.addf %59, %60 : vector<2x4096xf32>
      %62 = vector.shape_cast %61 : vector<2x4096xf32> to vector<2x8x512xf32>
      %63 = arith.mulf %62, %62 : vector<2x8x512xf32>
      %cst_45 = arith.constant dense<0.000000e+00> : vector<2x512xf32>
      %64 = vector.multi_reduction <add>, %63, %cst_45 [1] : vector<2x8x512xf32> to vector<2x512xf32>
      %65 = vector.shape_cast %64 : vector<2x512xf32> to vector<2x1x512xf32>
      %66 = math.rsqrt %65 : vector<2x1x512xf32>
      %67 = arith.mulf %65, %66 : vector<2x1x512xf32>
      %68 = vector.broadcast %67 : vector<2x1x512xf32> to vector<2x8x512xf32>
      %69 = arith.mulf %62, %68 : vector<2x8x512xf32>
      %cst_46 = arith.constant 1.000000e+00 : f32
      %70 = vector.broadcast %cst_46 : f32 to vector<2x1x512xf32>
      %71 = arith.addf %70, %65 : vector<2x1x512xf32>
      %72 = tpu.reciprocal %71 {approx = true} : vector<2x1x512xf32> -> vector<2x1x512xf32>
      %73 = vector.broadcast %72 : vector<2x1x512xf32> to vector<2x8x512xf32>
      %74 = arith.mulf %69, %73 : vector<2x8x512xf32>
      %c0_47 = arith.constant 0 : index
      %c0_48 = arith.constant 0 : index
      %c0_49 = arith.constant 0 : index
      %75 = vector.load %arg5[%c0_47, %c0_48, %c0_49] : memref<2x8x512xf32, #tpu.memory_space<vmem>>, vector<2x8x512xf32>
      tpu.vector_store %arg5[%c0_47, %c0_48, %c0_49], %74 {strides = array<i32>} : memref<2x8x512xf32, #tpu.memory_space<vmem>>, vector<2x8x512xf32>,
    } else {
    }
    return
  }
  func.func @transform_0(%arg0: i32, %arg1: i32) -> (i32, i32, i32) {
    %c0_i32 = arith.constant 0 : i32
    %c0_i32_0 = arith.constant 0 : i32
    %c0_i32_1 = arith.constant 0 : i32
    return %c0_i32, %arg1, %c0_i32_0 : i32, i32, i32
  }
  func.func @transform_1(%arg0: i32, %arg1: i32) -> (i32, i32, i32) {
    %c0_i32 = arith.constant 0 : i32
    %c0_i32_0 = arith.constant 0 : i32
    %c0_i32_1 = arith.constant 0 : i32
    return %arg0, %c0_i32, %c0_i32_0 : i32, i32, i32
  }
  func.func @transform_2(%arg0: i32, %arg1: i32) -> (i32, i32, i32) {
    %c0_i32 = arith.constant 0 : i32
    %c0_i32_0 = arith.constant 0 : i32
    %c0_i32_1 = arith.constant 0 : i32
    return %arg0, %c0_i32, %c0_i32_0 : i32, i32, i32
  }
  func.func @transform_3(%arg0: i32, %arg1: i32) -> (i32, i32, i32) {
    %c0_i32 = arith.constant 0 : i32
    %c0_i32_0 = arith.constant 0 : i32
    %c0_i32_1 = arith.constant 0 : i32
    return %c0_i32, %c0_i32_0, %arg0 : i32, i32, i32
  }
}

</mosaic_0001>

<bundles_post_ra>
// kernel: tpu_custom_call.1
= control target key start
LH: loop header
LB: loop body
LE: loop exit
PB: predicated region body
PF: predicated region fallthrough
CT: control target
= control target key end

     0   :  { %s17482_s0 = inlined_call_operand.hbm [shape: bf16[2,64,128], index: 0, kind: input, shape index: {}]   ;;  %s17483_s1 = inlined_call_operand.hbm [shape: bf16[2,128,4096], index: 1, kind: input, shape index: {}]   ;;  %s17484_s2 = inlined_call_operand.hbm [shape: f32[2,2,4096], index: 2, kind: input, shape index: {}]   ;;  %s17485_s3 = inlined_call_operand.hbm [shape: f32[2,8,1024], index: 3, kind: output, shape index: {}]  }
   0x1   :  { %17911 = sst [smem:[#allocation93_spill]] %s17483_s1 }
   0x2   :  { %8 = vsyncpa [#allocation7], 0 }
   0x3   :  { %9 = vsyncpa [#allocation10], 0 }
   0x4   :  { %11 = vsyncpa [#allocation10 + $0x1], 0 }
   0x5   :  { %12 = vsyncpa [#allocation8], 0 }
   0x6   :  { %14 = vsyncpa [#allocation8 + $0x1], 0  ;;  %s11140_s12 = smov 0   ;;  %s11142_s13 = smov 0  }
   0x7   :  { %s11144_s14 = smov 0   ;;  %s11146_s15 = smov 0  }
   0x8   :  { %s11148_s16 = smov 0   ;;  %s11150_s17 = smov 0  }
   0x9 LB: > { %s32_s18 = sadd.s32 1, %s11099_s16  ;;  %s65_s19 = sadd.s32 1, %s11091_s14  ;;  %s11103_s17 = sphi %s11150_s17, %s20_s17   ;;  %s11099_s16 = sphi %s11148_s16, %s18836_s16   ;;  %s11095_s15 = sphi %s11146_s15, %s18835_s15   ;;  %s11091_s14 = sphi %s11144_s14, %s18834_s14   ;;  %s11087_s13 = sphi %s11142_s13, %s18833_s13   ;;  %s11083_s12 = sphi %s11140_s12, %s18832_s12  }
   0xa   : > { %p34_p0 = scmp.ge.s32.totalorder %s32_s18, 2  ;;  %p72_p1 = scmp.ne.s32.totalorder %s11091_s14, %s11087_s13 }
   0xb   : > { %p73_p2 = scmp.eq.s32.totalorder %s11103_s17, 0  ;;  %p10784_p5 = scmp.lt.s32.totalorder %s11103_s17, 2 }
   0xc   : > { %s18838_s18 = smov (%p34_p0, %s32_s18), 0  ;;  %s170_s21 = sand.u32 1, %s11103_s17  }
   0xd   : > { %17912 = sst [smem:[#allocation16_spill]] %s18838_s18  ;;  %p74_p4 = por %p73_p2, %p72_p1 }
   0xe   : > { %s62_s20 = ssub.s32 %s11099_s16, %s18838_s18  ;;  %s172_s22 = sand.u32 1, %s11091_s14  }
   0xf   : > { %p63_p6 = scmp.eq.s32.totalorder %s62_s20, 0  ;;  %s10755_s23 = sshll.u32 %s11099_s16, 15 }
  0x10   : > { %s10460_s25 = sshll.u32 %s172_s22, 11  ;;  %s17913_s1 = sld [smem:[#allocation93_spill]] }
  0x11   : > { %s11188_s24 = scalar_select %p63_p6, %s11091_s14, %s65_s19  }
  0x12   : > { %p11197_p7 = pnand %p10784_p5, %p74_p4  ;;  %s174_s30 = scalar_lea.vmem [#allocation9], %s10460_s25 }
  0x13   : > { %s181_s4 = sshll.u32 %s174_s30, 4  ;;  %s11203_s5 = scalar_lea.sflag [#allocation10], %s170_s21  ;;  %s11201_s4 = int_to_ptr.vmem [resolvable:$true] %s181_s4 }
  0x14   : > { %s17914_s29 = scalar_select %p11197_p7, 1, 0 }
  0x15   : > { %p17488_p9 = pneg %p11197_p7 }
  0x16   : > { %s11195_s28 = scalar_lea.hbm %s17913_s1, %s10755_s23  ;;  %s10934_s9 = scalar_lea.hbm %s17913_s1, 65536 }
  0x17   : > { %s10929_s6 = scalar_lea.hbm %s11195_s28, 32768  ;;  %p10935_p12 = scmp.lt.u32.totalorder %s11195_s28, %s17913_s1 }
  0x18   : > { %p10930_p8 = scmp.ne.s32.totalorder %s11195_s28, %s10929_s6  ;;  %p10936_p13 = scmp.lt.u32.totalorder %s10934_s9, %s10929_s6 }
  0x19   : > { %p10938_p2 = scmp.lt.u32.totalorder %s10929_s6, %s11195_s28 }
  0x1a   : > { %p10932_p10 = pnand %p17488_p9, %p10930_p8  ;;  %p10937_p0 = por %p10936_p13, %p10935_p12 }
  0x1c   : > { %p10933_p11 = pneg %p10932_p10  ;;  %p10939_p4 = por %p10938_p2, %p10937_p0 }
  0x1e   : > { %p10940_p5 = pnand %p10939_p4, %p10933_p11 }
  0x20   : > { %10943 = shalt.err (!%p10940_p5)
}
  0x21   : > { %s10944_s19 = scalar_lea.vmem %s11201_s4, 32768  ;;  %s11105_s20 = smov [#allocation9]  }
  0x22   : > { %p10945_p6 = scmp.ne.s32.totalorder %s11201_s4, %s10944_s19  ;;  %s10949_s21 = sshll.u32 %s11105_s20, 4  ;;  %s10950_s21 = int_to_ptr.vmem [resolvable:$false] %s10949_s21 }
  0x23   : > { %s10951_s23 = scalar_lea.vmem %s10950_s21, 65536  ;;  %p10952_p3 = scmp.lt.s32.totalorder %s11201_s4, %s10950_s21 }
  0x24   : > { %p10947_p8 = pnand %p10945_p6, %p17488_p9  ;;  %p10953_p12 = scmp.lt.s32.totalorder %s10951_s23, %s10944_s19 }
  0x26   : > { %p10948_p10 = pneg %p10947_p8  ;;  %p10954_p13 = por %p10953_p12, %p10952_p3 }
  0x28   : > { %p10955_p0 = pnand %p10954_p13, %p10948_p10 }
  0x2a   : > { %10958 = shalt.err (!%p10955_p0)
}
  0x2b   : > { %s11106_s25 = smov 2048   ;;  %s11107_s26 = smov 128  }
  0x2c   : > { %10775 = dma.hbm_to_vmem [thread:$0]  (!%p11197_p7), %s11195_s28, 32768, %s11201_s4, %s11203_s5, %s11106_s25, %s11106_s25, %s11107_s26  }
  0x2d   : > { %s11232_s27 = sadd.s32 4294967295, %s11103_s17   ;;  %s10456_s30 = sadd.s32 4294967294, %s11103_s17  }
  0x2e   : > { %p78_p3 = scmp.ne.s32.totalorder %s11087_s13, %s11083_s12  ;;  %p17487_p11 = scmp.eq.s32.totalorder %s11232_s27, 0 }
  0x2f   : > { %p128_p2 = scmp.eq.s32.totalorder %s11232_s27, 1  ;;  %p134_p4 = scmp.eq.s32.totalorder %s10456_s30, 1 }
  0x30   : > { %p10457_p5 = scmp.ge.s32.totalorder %s11103_s17, 1  ;;  %p11242_p6 = por %p17487_p11, %p78_p3 }
  0x31   : > { %p11249_p8 = por %p128_p2, %p72_p1  ;;  %p11253_p10 = por %p134_p4, %p78_p3 }
  0x32   : > { %s17915_s6 = scalar_select %p11242_p6, 1, 0 }
  0x33   : > { %s17916_s28 = scalar_select %p11249_p8, 1, 0 }
  0x34   : > { %s17917_s4 = scalar_select %p11253_p10, 1, 0 }
  0x35   : > { %p141_p12 = scmp.lt.s32.totalorder %s11103_s17, 3  ;;  %s11108_s8 = smov [#allocation6]  }
  0x36   : > { %s156_s9 = sshll.u32 %s11108_s8, 4  ;;  %s10463_s10 = sshll.u32 %s172_s22, 6  ;;  %s11262_s9 = int_to_ptr.vmem [resolvable:$true] %s156_s9 }
  0x37   : > { %p11258_p13 = pnand %p10457_p5, %p141_p12  ;;  %s10756_s11 = sshll.u32 %s11099_s16, 10 }
  0x38   : > { %s11278_s23 = scalar_lea.hbm %s17484_s2, %s10756_s11  ;;  %s195_s25 = scalar_lea.vmem [#allocation11], %s10463_s10 }
  0x39   : > { %s17918_s7 = scalar_select %p11258_p13, 1, 0 }
  0x3a   : > { %p10768_p0 = pneg %p11258_p13  ;;  %s203_s26 = sshll.u32 %s195_s25, 4  ;;  %s11280_s26 = int_to_ptr.vmem [resolvable:$true] %s203_s26 }
  0x3b   : > { %s10959_s22 = scalar_lea.hbm %s17482_s0, 1024 }
  0x3c   : > { %p11271_p1 = pnand %p10768_p0, %p17487_p11  ;;  %p10960_p3 = scmp.ne.s32.totalorder %s17482_s0, %s10959_s22 }
  0x3d   : > { %p10966_p12 = scmp.lt.u32.totalorder %s10959_s22, %s17482_s0 }
  0x3e   : > { %p10961_p2 = pneg %p11271_p1 }
  0x40   : > { %p10962_p4 = pnand %p10961_p2, %p10960_p3 }
  0x42   : > { %p10963_p5 = pneg %p10962_p4 }
  0x44   : > { %p10968_p0 = pnand %p10966_p12, %p10963_p5 }
  0x46   : > { %10971 = shalt.err (!%p10968_p0)
}
  0x47   : > { %s10972_s10 = scalar_lea.vmem %s11262_s9, 1024  ;;  %p10980_p8 = scmp.lt.s32.totalorder %s11262_s9, %s11262_s9 }
  0x48   : > { %p10973_p11 = scmp.ne.s32.totalorder %s11262_s9, %s10972_s10  ;;  %p10981_p6 = scmp.lt.s32.totalorder %s10972_s10, %s10972_s10 }
  0x4a   : > { %p10975_p9 = pnand %p10973_p11, %p10961_p2  ;;  %p10982_p13 = por %p10981_p6, %p10980_p8 }
  0x4c   : > { %p10976_p10 = pneg %p10975_p9 }
  0x4e   : > { %p10983_p7 = pnand %p10982_p13, %p10976_p10 }
  0x50   : > { %10986 = shalt.err (!%p10983_p7)
}
  0x51   : > { %s11109_s1 = smov 64   ;;  %s11110_s18 = smov 4  }
  0x52   : > { %10771 = dma.hbm_to_vmem [thread:$0]  (!%p11271_p1), %s17482_s0, 1024, %s11262_s9, [#allocation7], %s11109_s1, %s11109_s1, %s11110_s18  }
  0x53   : > { %s10987_s30 = scalar_lea.hbm %s11278_s23, 1024  ;;  %p17920_p11 = scmp.ne.s32.totalorder %s17914_s29, 0 }
  0x54   : > { %p10988_p9 = scmp.ne.s32.totalorder %s11278_s23, %s10987_s30  ;;  %s10992_s20 = scalar_lea.hbm %s17484_s2, 2048 }
  0x55   : > { %p17921_p6 = pneg %p17920_p11  ;;  %p10993_p10 = scmp.lt.u32.totalorder %s11278_s23, %s17484_s2 }
  0x56   : > { %p10994_p13 = scmp.lt.u32.totalorder %s10992_s20, %s10987_s30  ;;  %p10996_p2 = scmp.lt.u32.totalorder %s10987_s30, %s11278_s23 }
  0x57   : > { %p10990_p8 = pnand %p10988_p9, %p17921_p6 }
  0x58   : > { %p10995_p3 = por %p10994_p13, %p10993_p10 }
  0x59   : > { %p10991_p7 = pneg %p10990_p8 }
  0x5a   : > { %p10997_p4 = por %p10996_p2, %p10995_p3 }
  0x5c   : > { %p10998_p5 = pnand %p10997_p4, %p10991_p7 }
  0x5e   : > { %11001 = shalt.err (!%p10998_p5)
}
  0x5f   : > { %s11002_s9 = scalar_lea.vmem %s11280_s26, 1024  ;;  %p17922_p12 = pmov %p17921_p6 }
  0x60   : > { %p11003_p1 = scmp.ne.s32.totalorder %s11280_s26, %s11002_s9  ;;  %s11111_s19 = smov [#allocation11]  }
  0x61   : > { %s11007_s1 = sshll.u32 %s11111_s19, 4  ;;  %s11008_s1 = int_to_ptr.vmem [resolvable:$false] %s11007_s1 }
  0x62   : > { %p11005_p0 = pnand %p11003_p1, %p17922_p12  ;;  %s11009_s18 = scalar_lea.vmem %s11008_s1, 2048 }
  0x63   : > { %p11010_p6 = scmp.lt.s32.totalorder %s11280_s26, %s11008_s1  ;;  %p11011_p8 = scmp.lt.s32.totalorder %s11009_s18, %s11002_s9 }
  0x64   : > { %p11006_p9 = pneg %p11005_p0 }
  0x65   : > { %p11012_p10 = por %p11011_p8, %p11010_p6 }
  0x67   : > { %p11013_p13 = pnand %p11012_p10, %p11006_p9 }
  0x69   : > { %11016 = shalt.err (!%p11013_p13)
}
  0x6a   : > { %10778 = dma.hbm_to_vmem [thread:$0]  (!%p17920_p11), %s11278_s23, 1024, %s11280_s26, %s11203_s5  }
  0x6b   : > { %p17923_p7 = scmp.ne.s32.totalorder %s17918_s7, 0 }
  0x6d   : > { %212 = sbr.rel (%p17923_p7) target bundleno = 1603 (0x643), region = 32 }
  0x74   : > { %p17924_p3 = scmp.eq.s32.totalorder %s11232_s27, 0 }
  0x76   : > { %11070 = dma.done.wait (%p17924_p3), [#allocation7], 1024   ;;  %p17925_p2 = pmov %p17924_p3 }
  0x77   : > { %s218_s11 = sand.u32 1, %s11232_s27   ;;  %s11335_s25 = sand.u32 1, %s11087_s13  }
  0x78   : > { %11072 = vsyncadd (%p17925_p2), [#allocation7], 4294966272  ;;  %s10468_s29 = sshll.u32 %s11335_s25, 11  ;;  %s219_s30 = scalar_lea.sflag [#allocation10], %s218_s11 }
  0x79   : > { %s11338_s8 = scalar_lea.vmem [#allocation9], %s10468_s29  ;;  %p17926_p11 = scmp.ne.s32.totalorder %s17915_s6, 0 }
  0x7b   : > { %11074 = dma.done.wait (%p17926_p11), %s219_s30, 33792  }
  0x7c   : > { %11076 = vsyncadd (%p17926_p11), %s219_s30, 4294933504  ;;  %v17494_v0 = vmov 0   ;;  %v306_v1 = vld [vmem:[%s11338_s8] sm:$0xff]  ;;  %v307_v3 = vld [vmem:[%s11338_s8 + $0x8] sm:$0xff]  ;;  %vm7223_vm0 = vcmask 1041409   ;;  %vm7225_vm1 = vcmask 1043459  }
  0x7d   : > { %1922 = vmatprep.mubr.bf16.mxu0 %v17494_v0  ;;  %2035 = vmatprep.mubr.bf16.mxu1 %v17494_v0  ;;  %v322_v2 = vld [vmem:[%s11338_s8 + $0x80] sm:$0xff]  ;;  %v323_v5 = vld [vmem:[%s11338_s8 + $0x88] sm:$0xff]  ;;  %v308_v63 = vld [vmem:[%s11338_s8 + $0x10] sm:$0xff]  ;;  %vm7227_vm2 = vcmask 1045509   ;;  %vm7229_vm3 = vcmask 1047559   ;;  %s10469_s5 = sshll.u32 %s11335_s25, 6 }
  0x7e   : > { %v10480_v4 = vcombine.high %v306_v1, %v322_v2  ;;  %v10479_v6 = vcombine.low %v306_v1, %v322_v2  ;;  %v338_v7 = vld [vmem:[%s11338_s8 + $0x100] sm:$0xff]  ;;  %v10482_v9 = vcombine.high %v307_v3, %v323_v5  ;;  %v10481_v10 = vcombine.low %v307_v3, %v323_v5  ;;  %v339_v12 = vld [vmem:[%s11338_s8 + $0x108] sm:$0xff]  ;;  %v324_v1 = vld [vmem:[%s11338_s8 + $0x90] sm:$0xff]  ;;  %s13243_s27 = scalar_lea.vmem [#allocation11], %s10469_s5  ;;  %s10757_s6 = sshll.u32 %s11095_s15, 9 }
  0x7f   : > { %v354_v8 = vld [vmem:[%s11338_s8 + $0x180] sm:$0xff]  ;;  %v355_v13 = vld [vmem:[%s11338_s8 + $0x188] sm:$0xff]  ;;  %v309_v2 = vld [vmem:[%s11338_s8 + $0x18] sm:$0xff]  ;;  %s258_s7 = scalar_lea.vmem [#allocation12], %s10469_s5  ;;  %s17431_s22 = scalar_lea.hbm %s17485_s3, %s10757_s6 }
  0x80   : > { %v10512_v11 = vcombine.high %v338_v7, %v354_v8  ;;  %v370_v14 = vld [vmem:[%s11338_s8 + $0x200] sm:$0xff]  ;;  %1890 = vmatprep.subr.bf16.mxu0 %v10480_v4  ;;  %v10514_v15 = vcombine.high %v339_v12, %v355_v13  ;;  %v371_v17 = vld [vmem:[%s11338_s8 + $0x208] sm:$0xff]  ;;  %2003 = vmatprep.subr.bf16.mxu1 %v10482_v9  ;;  %v10511_v19 = vcombine.low %v338_v7, %v354_v8  ;;  %v325_v3 = vld [vmem:[%s11338_s8 + $0x98] sm:$0xff]  ;;  %s10340_s23 = sshll.u32 %s258_s7, 4  ;;  %s10327_s20 = scalar_lea.sflag [#allocation8], %s11335_s25  ;;  %s17433_s23 = int_to_ptr.vmem [resolvable:$true] %s10340_s23 }
  0x81   : > { %v386_v16 = vld [vmem:[%s11338_s8 + $0x280] sm:$0xff]  ;;  %v387_v18 = vld [vmem:[%s11338_s8 + $0x288] sm:$0xff]  ;;  %1891 = vmatpush1.bf16.msra.mxu0 %v10479_v6  ;;  %2004 = vmatpush1.bf16.msra.mxu1 %v10481_v10  ;;  %v10513_v20 = vcombine.low %v339_v12, %v355_v13  ;;  %v10484_v6 = vcombine.high %v308_v63, %v324_v1  ;;  %v10486_v7 = vcombine.high %v309_v2, %v325_v3  ;;  %v340_v9 = vld [vmem:[%s11338_s8 + $0x110] sm:$0xff]  ;;  %s11017_s21 = scalar_lea.vmem %s17433_s23, 1024  ;;  %p18828_p5 = scmp.ne.s32.totalorder %s17916_s28, 0 }
  0x82   : > { %1892 = vmatprep.subr.bf16.mxu0 %v10512_v11  ;;  %v10544_v21 = vcombine.high %v370_v14, %v386_v16  ;;  %2005 = vmatprep.subr.bf16.mxu1 %v10514_v15  ;;  %v10546_v22 = vcombine.high %v371_v17, %v387_v18  ;;  %v402_v23 = vld [vmem:[%s11338_s8 + $0x300] sm:$0xff]  ;;  %v403_v25 = vld [vmem:[%s11338_s8 + $0x308] sm:$0xff]  ;;  %v10543_v27 = vcombine.low %v370_v14, %v386_v16  ;;  %v356_v10 = vld [vmem:[%s11338_s8 + $0x190] sm:$0xff]  ;;  %p11018_p4 = scmp.ne.s32.totalorder %s17433_s23, %s11017_s21  ;;  %s11116_s10 = smov [#allocation12]  }
  0x83   : > { %v418_v24 = vld [vmem:[%s11338_s8 + $0x380] sm:$0xff]  ;;  %v419_v26 = vld [vmem:[%s11338_s8 + $0x388] sm:$0xff]  ;;  %v10545_v28 = vcombine.low %v371_v17, %v387_v18  ;;  %v10483_v11 = vcombine.low %v308_v63, %v324_v1  ;;  %v341_v12 = vld [vmem:[%s11338_s8 + $0x118] sm:$0xff]  ;;  %v10485_v14 = vcombine.low %v309_v2, %v325_v3  ;;  %v10516_v15 = vcombine.high %v340_v9, %v356_v10  ;;  %s11021_s9 = sshll.u32 %s11116_s10, 4  ;;  %s11022_s9 = int_to_ptr.vmem [resolvable:$false] %s11021_s9 }
  0x84   : > { %v10576_v29 = vcombine.high %v402_v23, %v418_v24  ;;  %v10578_v30 = vcombine.high %v403_v25, %v419_v26  ;;  %v434_v31 = vld [vmem:[%s11338_s8 + $0x400] sm:$0xff]  ;;  %v435_v33 = vld [vmem:[%s11338_s8 + $0x408] sm:$0xff]  ;;  %v10575_v35 = vcombine.low %v402_v23, %v418_v24  ;;  %v10577_v36 = vcombine.low %v403_v25, %v419_v26  ;;  %v357_v13 = vld [vmem:[%s11338_s8 + $0x198] sm:$0xff]  ;;  %p11019_p1 = pnand %p11018_p4, %p18828_p5  ;;  %s11023_s19 = scalar_lea.vmem %s11022_s9, 2048 }
  0x85   : > { %1893 = vmatpush1.bf16.msra.mxu0 %v10511_v19  ;;  %2006 = vmatpush1.bf16.msra.mxu1 %v10513_v20  ;;  %v450_v32 = vld [vmem:[%s11338_s8 + $0x480] sm:$0xff]  ;;  %v451_v34 = vld [vmem:[%s11338_s8 + $0x488] sm:$0xff]  ;;  %v372_v16 = vld [vmem:[%s11338_s8 + $0x210] sm:$0xff]  ;;  %v10518_v18 = vcombine.high %v341_v12, %v357_v13  ;;  %p11024_p0 = scmp.lt.s32.totalorder %s17433_s23, %s11022_s9  ;;  %p11025_p9 = scmp.lt.s32.totalorder %s11023_s19, %s11017_s21 }
  0x86   : > { %1894 = vmatprep.subr.bf16.mxu0 %v10544_v21  ;;  %2007 = vmatprep.subr.bf16.mxu1 %v10546_v22  ;;  %v10608_v37 = vcombine.high %v434_v31, %v450_v32  ;;  %v10610_v38 = vcombine.high %v435_v33, %v451_v34  ;;  %v466_v39 = vld [vmem:[%s11338_s8 + $0x500] sm:$0xff]  ;;  %v467_v41 = vld [vmem:[%s11338_s8 + $0x508] sm:$0xff]  ;;  %v10607_v43 = vcombine.low %v434_v31, %v450_v32  ;;  %v388_v17 = vld [vmem:[%s11338_s8 + $0x290] sm:$0xff]  ;;  %p11020_p12 = pneg %p11019_p1 }
  0x87   : > { %v482_v40 = vld [vmem:[%s11338_s8 + $0x580] sm:$0xff]  ;;  %v483_v42 = vld [vmem:[%s11338_s8 + $0x588] sm:$0xff]  ;;  %v10609_v44 = vcombine.low %v435_v33, %v451_v34  ;;  %v373_v19 = vld [vmem:[%s11338_s8 + $0x218] sm:$0xff]  ;;  %v10515_v21 = vcombine.low %v340_v9, %v356_v10  ;;  %v10517_v22 = vcombine.low %v341_v12, %v357_v13  ;;  %v10548_v23 = vcombine.high %v372_v16, %v388_v17  ;;  %p11026_p6 = por %p11025_p9, %p11024_p0 }
  0x88   : > { %v10640_v45 = vcombine.high %v466_v39, %v482_v40  ;;  %v10642_v46 = vcombine.high %v467_v41, %v483_v42  ;;  %v498_v47 = vld [vmem:[%s11338_s8 + $0x600] sm:$0xff]  ;;  %v499_v49 = vld [vmem:[%s11338_s8 + $0x608] sm:$0xff]  ;;  %v10639_v51 = vcombine.low %v466_v39, %v482_v40  ;;  %v10641_v52 = vcombine.low %v467_v41, %v483_v42  ;;  %v389_v20 = vld [vmem:[%s11338_s8 + $0x298] sm:$0xff] }
  0x89   : > { %1895 = vmatpush1.bf16.msra.mxu0 %v10543_v27  ;;  %2008 = vmatpush1.bf16.msra.mxu1 %v10545_v28  ;;  %v514_v48 = vld [vmem:[%s11338_s8 + $0x680] sm:$0xff]  ;;  %v515_v50 = vld [vmem:[%s11338_s8 + $0x688] sm:$0xff]  ;;  %v10550_v24 = vcombine.high %v373_v19, %v389_v20  ;;  %v404_v26 = vld [vmem:[%s11338_s8 + $0x310] sm:$0xff]  ;;  %v10549_v31 = vcombine.low %v373_v19, %v389_v20  ;;  %p11027_p8 = pnand %p11026_p6, %p11020_p12 }
  0x8a   : > { %1896 = vmatprep.subr.bf16.mxu0 %v10576_v29  ;;  %2009 = vmatprep.subr.bf16.mxu1 %v10578_v30  ;;  %v10672_v53 = vcombine.high %v498_v47, %v514_v48  ;;  %v530_v54 = vld [vmem:[%s11338_s8 + $0x700] sm:$0xff]  ;;  %v10674_v55 = vcombine.high %v499_v49, %v515_v50  ;;  %v531_v57 = vld [vmem:[%s11338_s8 + $0x708] sm:$0xff]  ;;  %v10671_v59 = vcombine.low %v498_v47, %v514_v48  ;;  %v420_v27 = vld [vmem:[%s11338_s8 + $0x390] sm:$0xff] }
  0x8b   : > { %v546_v56 = vld [vmem:[%s11338_s8 + $0x780] sm:$0xff]  ;;  %v547_v58 = vld [vmem:[%s11338_s8 + $0x788] sm:$0xff]  ;;  %v10673_v60 = vcombine.low %v499_v49, %v515_v50  ;;  %v405_v28 = vld [vmem:[%s11338_s8 + $0x318] sm:$0xff]  ;;  %v10547_v30 = vcombine.low %v372_v16, %v388_v17  ;;  %v10580_v32 = vcombine.high %v404_v26, %v420_v27 }
  0x8c   : > { %v10704_v61 = vcombine.high %v530_v54, %v546_v56  ;;  %v10706_v62 = vcombine.high %v531_v57, %v547_v58  ;;  %v10703_v4 = vcombine.low %v530_v54, %v546_v56  ;;  %v10705_v5 = vcombine.low %v531_v57, %v547_v58  ;;  %v11382_v8 = vld [vmem:[#allocation6] sm:$0xff]   ;;  %v11396_v25 = vld [vmem:[#allocation6 + $0x8] sm:$0xff]   ;;  %v421_v29 = vld [vmem:[%s11338_s8 + $0x398] sm:$0xff] }
  0x8d   : > { %1897 = vmatpush1.bf16.msra.mxu0 %v10575_v35  ;;  %2010 = vmatpush1.bf16.msra.mxu1 %v10577_v36  ;;  %v10582_v33 = vcombine.high %v405_v28, %v421_v29  ;;  %v436_v34 = vld [vmem:[%s11338_s8 + $0x410] sm:$0xff]  ;;  %v437_v36 = vld [vmem:[%s11338_s8 + $0x418] sm:$0xff]  ;;  %v10581_v39 = vcombine.low %v405_v28, %v421_v29  ;;  %v327_v9 = vld [vmem:[%s11338_s8 + $0xa8] sm:$0xff] }
  0x8e   : > { %1898 = vmatprep.subr.bf16.mxu0 %v10608_v37  ;;  %2011 = vmatprep.subr.bf16.mxu1 %v10610_v38  ;;  %v452_v35 = vld [vmem:[%s11338_s8 + $0x490] sm:$0xff]  ;;  %v453_v37 = vld [vmem:[%s11338_s8 + $0x498] sm:$0xff]  ;;  %v10579_v38 = vcombine.low %v404_v26, %v420_v27  ;;  %v11438_v13 = vld [vmem:[#allocation6 + $0x20] sm:$0xff]  }
  0x8f   : > { %v10612_v40 = vcombine.high %v436_v34, %v452_v35  ;;  %v11410_v41 = vld [vmem:[#allocation6 + $0x10] sm:$0xff]   ;;  %v10614_v42 = vcombine.high %v437_v36, %v453_v37  ;;  %v10611_v47 = vcombine.low %v436_v34, %v452_v35  ;;  %v10613_v48 = vcombine.low %v437_v36, %v453_v37  ;;  %v517_v54 = vld [vmem:[%s11338_s8 + $0x698] sm:$0xff]  ;;  %v358_v19 = vld [vmem:[%s11338_s8 + $0x1a0] sm:$0xff] }
  0x90   : > { %v11424_v58 = vld [vmem:[#allocation6 + $0x18] sm:$0xff]   ;;  %v11450_v16 = vld [vmem:[#allocation6 + $0x30] sm:$0xff]   ;;  %v374_v26 = vld [vmem:[%s11338_s8 + $0x220] sm:$0xff] }
  0x91   : > { %1899 = vmatpush1.bf16.msra.mxu0 %v10607_v43  ;;  %2012 = vmatpush1.bf16.msra.mxu1 %v10609_v44  ;;  %v468_v43 = vld [vmem:[%s11338_s8 + $0x510] sm:$0xff]  ;;  %v549_v63 = vld [vmem:[%s11338_s8 + $0x798] sm:$0xff]  ;;  %v390_v27 = vld [vmem:[%s11338_s8 + $0x2a0] sm:$0xff] }
  0x92   : > { %1900 = vmatprep.subr.bf16.mxu0 %v10640_v45  ;;  %2013 = vmatprep.subr.bf16.mxu1 %v10642_v46  ;;  %v484_v44 = vld [vmem:[%s11338_s8 + $0x590] sm:$0xff]  ;;  %v469_v45 = vld [vmem:[%s11338_s8 + $0x518] sm:$0xff]  ;;  %v375_v29 = vld [vmem:[%s11338_s8 + $0x228] sm:$0xff] }
  0x93   : > { %v485_v46 = vld [vmem:[%s11338_s8 + $0x598] sm:$0xff]  ;;  %v10644_v49 = vcombine.high %v468_v43, %v484_v44  ;;  %v406_v35 = vld [vmem:[%s11338_s8 + $0x320] sm:$0xff]  ;;  %v407_v37 = vld [vmem:[%s11338_s8 + $0x328] sm:$0xff] }
  0x94   : > { %v10646_v50 = vcombine.high %v469_v45, %v485_v46  ;;  %v10645_v56 = vcombine.low %v469_v45, %v485_v46  ;;  %v11456_v17 = vld [vmem:[#allocation6 + $0x38] sm:$0xff]   ;;  %v422_v36 = vld [vmem:[%s11338_s8 + $0x3a0] sm:$0xff]  ;;  %v439_v46 = vld [vmem:[%s11338_s8 + $0x428] sm:$0xff] }
  0x95   : > { %1901 = vmatpush1.bf16.msra.mxu0 %v10639_v51  ;;  %2014 = vmatpush1.bf16.msra.mxu1 %v10641_v52  ;;  %v500_v51 = vld [vmem:[%s11338_s8 + $0x610] sm:$0xff]  ;;  %v454_v45 = vld [vmem:[%s11338_s8 + $0x4a0] sm:$0xff] }
  0x96   : > { %1902 = vmatprep.subr.bf16.mxu0 %v10672_v53  ;;  %2015 = vmatprep.subr.bf16.mxu1 %v10674_v55  ;;  %v516_v52 = vld [vmem:[%s11338_s8 + $0x690] sm:$0xff]  ;;  %v501_v53 = vld [vmem:[%s11338_s8 + $0x618] sm:$0xff]  ;;  %v10643_v55 = vcombine.low %v468_v43, %v484_v44  ;;  %v438_v44 = vld [vmem:[%s11338_s8 + $0x420] sm:$0xff] }
  0x97   : > { %v10676_v57 = vcombine.high %v500_v51, %v516_v52  ;;  %v10675_v1 = vcombine.low %v500_v51, %v516_v52  ;;  %v10677_v2 = vcombine.low %v501_v53, %v517_v54  ;;  %v470_v52 = vld [vmem:[%s11338_s8 + $0x520] sm:$0xff] }
  0x99   : > { %1903 = vmatpush1.bf16.msra.mxu0 %v10671_v59  ;;  %2016 = vmatpush1.bf16.msra.mxu1 %v10673_v60  ;;  %v10678_v59 = vcombine.high %v501_v53, %v517_v54  ;;  %v532_v60 = vld [vmem:[%s11338_s8 + $0x710] sm:$0xff]  ;;  %v486_v53 = vld [vmem:[%s11338_s8 + $0x5a0] sm:$0xff]  ;;  %v471_v54 = vld [vmem:[%s11338_s8 + $0x528] sm:$0xff] }
  0x9a   : > { %1904 = vmatprep.subr.bf16.mxu0 %v10704_v61  ;;  %2017 = vmatprep.subr.bf16.mxu1 %v10706_v62  ;;  %v548_v61 = vld [vmem:[%s11338_s8 + $0x790] sm:$0xff]  ;;  %v533_v62 = vld [vmem:[%s11338_s8 + $0x718] sm:$0xff] }
  0x9b   : > { %v10708_v3 = vcombine.high %v532_v60, %v548_v61  ;;  %v10707_v10 = vcombine.low %v532_v60, %v548_v61  ;;  %v502_v61 = vld [vmem:[%s11338_s8 + $0x620] sm:$0xff] }
  0x9d   : > { %1905 = vmatpush1.bf16.msra.mxu0 %v10703_v4  ;;  %2018 = vmatpush1.bf16.msra.mxu1 %v10705_v5  ;;  %v10710_v4 = vcombine.high %v533_v62, %v549_v63  ;;  %v310_v5 = vld [vmem:[%s11338_s8 + $0x20] sm:$0xff] }
  0x9e   : > { %2116 = vmatprep.subr.bf16.mxu0 %v10484_v6  ;;  %2229 = vmatprep.subr.bf16.mxu1 %v10486_v7  ;;  %v326_v6 = vld [vmem:[%s11338_s8 + $0xa0] sm:$0xff]  ;;  %v311_v7 = vld [vmem:[%s11338_s8 + $0x28] sm:$0xff] }
  0x9f   : > { %v10488_v12 = vcombine.high %v310_v5, %v326_v6  ;;  %v10487_v20 = vcombine.low %v310_v5, %v326_v6  ;;  %v534_v6 = vld [vmem:[%s11338_s8 + $0x720] sm:$0xff] }
  0xa0   : > { %1923 = vmatmul.mubr.bf16.vlgmr.msra.gmra.mrb[0].mxu0 %v11382_v8  ;;  %2036 = vmatmul.mubr.bf16.vlgmr.msra.gmra.mrb[0].mxu1 %v11382_v8 }
  0xa1   : > { %2117 = vmatpush1.bf16.msra.mxu0 %v10483_v11  ;;  %2230 = vmatpush1.bf16.msra.mxu1 %v10485_v14  ;;  %v10709_v11 = vcombine.low %v533_v62, %v549_v63  ;;  %v10490_v14 = vcombine.high %v311_v7, %v327_v9  ;;  %v518_v62 = vld [vmem:[%s11338_s8 + $0x6a0] sm:$0xff]  ;;  %v503_v63 = vld [vmem:[%s11338_s8 + $0x628] sm:$0xff] }
  0xa2   : > { %1932 = vmatprep.mubr.bf16.mxu0 %v17494_v0  ;;  %2045 = vmatprep.mubr.bf16.mxu1 %v17494_v0 }
  0xa3   : > { %2118 = vmatprep.subr.bf16.mxu0 %v10516_v15  ;;  %2231 = vmatprep.subr.bf16.mxu1 %v10518_v18  ;;  %v11444_v15 = vld [vmem:[#allocation6 + $0x28] sm:$0xff]   ;;  %v342_v18 = vld [vmem:[%s11338_s8 + $0x120] sm:$0xff] }
  0xa5   : > { %2119 = vmatpush1.bf16.msra.mxu0 %v10515_v21  ;;  %2232 = vmatpush1.bf16.msra.mxu1 %v10517_v22  ;;  %v343_v21 = vld [vmem:[%s11338_s8 + $0x128] sm:$0xff] }
  0xa6   : > { %2120 = vmatprep.subr.bf16.mxu0 %v10548_v23  ;;  %2233 = vmatprep.subr.bf16.mxu1 %v10550_v24  ;;  %v359_v22 = vld [vmem:[%s11338_s8 + $0x1a8] sm:$0xff]  ;;  %v10489_v23 = vcombine.low %v311_v7, %v327_v9  ;;  %v10520_v24 = vcombine.high %v342_v18, %v358_v19  ;;  %v550_v7 = vld [vmem:[%s11338_s8 + $0x7a0] sm:$0xff] }
  0xa7   : > { %v10522_v28 = vcombine.high %v343_v21, %v359_v22  ;;  %v535_v9 = vld [vmem:[%s11338_s8 + $0x728] sm:$0xff] }
  0xa8   : > { %1933 = vmatmul.mubr.bf16.gmra.mrb[4].mxu0 %v11396_v25  ;;  %2046 = vmatmul.mubr.bf16.gmra.mrb[4].mxu1 %v11396_v25 }
  0xa9   : > { %1942 = vmatprep.mubr.bf16.mxu0 %v17494_v0  ;;  %2055 = vmatprep.mubr.bf16.mxu1 %v17494_v0 }
  0xaa   : > { %2121 = vmatpush1.bf16.msra.mxu0 %v10547_v30  ;;  %2234 = vmatpush1.bf16.msra.mxu1 %v10549_v31  ;;  %v391_v30 = vld [vmem:[%s11338_s8 + $0x2a8] sm:$0xff]  ;;  %v10519_v31 = vcombine.low %v342_v18, %v358_v19  ;;  %v312_v19 = vld [vmem:[%s11338_s8 + $0x30] sm:$0xff] }
  0xab   : > { %2122 = vmatprep.subr.bf16.mxu0 %v10580_v32  ;;  %2235 = vmatprep.subr.bf16.mxu1 %v10582_v33  ;;  %v10521_v32 = vcombine.low %v343_v21, %v359_v22  ;;  %v10552_v33 = vcombine.high %v374_v26, %v390_v27  ;;  %v10554_v34 = vcombine.high %v375_v29, %v391_v30  ;;  %v313_v21 = vld [vmem:[%s11338_s8 + $0x38] sm:$0xff] }
  0xac   : > { %v329_v22 = vld [vmem:[%s11338_s8 + $0xb8] sm:$0xff] }
  0xae   : > { %2123 = vmatpush1.bf16.msra.mxu0 %v10579_v38  ;;  %2236 = vmatpush1.bf16.msra.mxu1 %v10581_v39  ;;  %v423_v38 = vld [vmem:[%s11338_s8 + $0x3a8] sm:$0xff]  ;;  %v10551_v39 = vcombine.low %v374_v26, %v390_v27  ;;  %v10494_v27 = vcombine.high %v313_v21, %v329_v22 }
  0xaf   : > { %2124 = vmatprep.subr.bf16.mxu0 %v10612_v40  ;;  %2237 = vmatprep.subr.bf16.mxu1 %v10614_v42  ;;  %v10553_v40 = vcombine.low %v375_v29, %v391_v30  ;;  %v10584_v42 = vcombine.high %v406_v35, %v422_v36  ;;  %v10586_v43 = vcombine.high %v407_v37, %v423_v38  ;;  %v360_v29 = vld [vmem:[%s11338_s8 + $0x1b0] sm:$0xff] }
  0xb0   : > { %1943 = vmatmul.mubr.bf16.gmra.mrb[8].mxu0 %v11410_v41  ;;  %2056 = vmatmul.mubr.bf16.gmra.mrb[8].mxu1 %v11410_v41 }
  0xb1   : > { %1952 = vmatprep.mubr.bf16.mxu0 %v17494_v0  ;;  %2065 = vmatprep.mubr.bf16.mxu1 %v17494_v0 }
  0xb2   : > { %2125 = vmatpush1.bf16.msra.mxu0 %v10611_v47  ;;  %2238 = vmatpush1.bf16.msra.mxu1 %v10613_v48  ;;  %v455_v47 = vld [vmem:[%s11338_s8 + $0x4a8] sm:$0xff]  ;;  %v10583_v48 = vcombine.low %v406_v35, %v422_v36  ;;  %v376_v35 = vld [vmem:[%s11338_s8 + $0x230] sm:$0xff] }
  0xb3   : > { %2126 = vmatprep.subr.bf16.mxu0 %v10644_v49  ;;  %2239 = vmatprep.subr.bf16.mxu1 %v10646_v50  ;;  %v10585_v49 = vcombine.low %v407_v37, %v423_v38  ;;  %v10616_v50 = vcombine.high %v438_v44, %v454_v45  ;;  %v10618_v51 = vcombine.high %v439_v46, %v455_v47  ;;  %v392_v36 = vld [vmem:[%s11338_s8 + $0x2b0] sm:$0xff]  ;;  %v377_v38 = vld [vmem:[%s11338_s8 + $0x238] sm:$0xff] }
  0xb6   : > { %2127 = vmatpush1.bf16.msra.mxu0 %v10643_v55  ;;  %2240 = vmatpush1.bf16.msra.mxu1 %v10645_v56  ;;  %v487_v55 = vld [vmem:[%s11338_s8 + $0x5a8] sm:$0xff]  ;;  %v10615_v56 = vcombine.low %v438_v44, %v454_v45  ;;  %v408_v45 = vld [vmem:[%s11338_s8 + $0x330] sm:$0xff] }
  0xb7   : > { %2128 = vmatprep.subr.bf16.mxu0 %v10676_v57  ;;  %2241 = vmatprep.subr.bf16.mxu1 %v10678_v59  ;;  %v10617_v57 = vcombine.low %v439_v46, %v455_v47  ;;  %v10648_v59 = vcombine.high %v470_v52, %v486_v53  ;;  %v10650_v60 = vcombine.high %v471_v54, %v487_v55  ;;  %v424_v46 = vld [vmem:[%s11338_s8 + $0x3b0] sm:$0xff]  ;;  %v409_v47 = vld [vmem:[%s11338_s8 + $0x338] sm:$0xff] }
  0xb8   : > { %1953 = vmatmul.mubr.bf16.gmra.mrb[12].mxu0 %v11424_v58  ;;  %2066 = vmatmul.mubr.bf16.gmra.mrb[12].mxu1 %v11424_v58 }
  0xb9   : > { %1962 = vmatprep.mubr.bf16.mxu0 %v17494_v0  ;;  %2075 = vmatprep.mubr.bf16.mxu1 %v17494_v0 }
  0xba   : > { %2129 = vmatpush1.bf16.msra.mxu0 %v10675_v1  ;;  %2242 = vmatpush1.bf16.msra.mxu1 %v10677_v2  ;;  %v519_v1 = vld [vmem:[%s11338_s8 + $0x6a8] sm:$0xff]  ;;  %v10647_v2 = vcombine.low %v470_v52, %v486_v53  ;;  %v440_v53 = vld [vmem:[%s11338_s8 + $0x430] sm:$0xff] }
  0xbb   : > { %2130 = vmatprep.subr.bf16.mxu0 %v10708_v3  ;;  %2243 = vmatprep.subr.bf16.mxu1 %v10710_v4  ;;  %v10649_v3 = vcombine.low %v471_v54, %v487_v55  ;;  %v10680_v4 = vcombine.high %v502_v61, %v518_v62  ;;  %v10682_v5 = vcombine.high %v503_v63, %v519_v1  ;;  %v456_v54 = vld [vmem:[%s11338_s8 + $0x4b0] sm:$0xff]  ;;  %v441_v55 = vld [vmem:[%s11338_s8 + $0x438] sm:$0xff] }
  0xbe   : > { %2131 = vmatpush1.bf16.msra.mxu0 %v10707_v10  ;;  %2244 = vmatpush1.bf16.msra.mxu1 %v10709_v11  ;;  %v551_v10 = vld [vmem:[%s11338_s8 + $0x7a8] sm:$0xff]  ;;  %v10679_v11 = vcombine.low %v502_v61, %v518_v62  ;;  %v472_v62 = vld [vmem:[%s11338_s8 + $0x530] sm:$0xff] }
  0xbf   : > { %2342 = vmatprep.subr.bf16.mxu0 %v10488_v12  ;;  %2455 = vmatprep.subr.bf16.mxu1 %v10490_v14  ;;  %v10681_v12 = vcombine.low %v503_v63, %v519_v1  ;;  %v10712_v14 = vcombine.high %v534_v6, %v550_v7  ;;  %v10714_v18 = vcombine.high %v535_v9, %v551_v10  ;;  %v488_v63 = vld [vmem:[%s11338_s8 + $0x5b0] sm:$0xff]  ;;  %v473_v1 = vld [vmem:[%s11338_s8 + $0x538] sm:$0xff] }
  0xc0   : > { %1963 = vmatmul.mubr.bf16.gmra.mrb[16].mxu0 %v11438_v13  ;;  %2076 = vmatmul.mubr.bf16.gmra.mrb[16].mxu1 %v11438_v13 }
  0xc1   : > { %1972 = vmatprep.mubr.bf16.mxu0 %v17494_v0  ;;  %2085 = vmatprep.mubr.bf16.mxu1 %v17494_v0 }
  0xc8   : > { %1973 = vmatmul.mubr.bf16.gmra.mrb[20].mxu0 %v11444_v15  ;;  %2086 = vmatmul.mubr.bf16.gmra.mrb[20].mxu1 %v11444_v15 }
  0xc9   : > { %1982 = vmatprep.mubr.bf16.mxu0 %v17494_v0  ;;  %2095 = vmatprep.mubr.bf16.mxu1 %v17494_v0 }
  0xd0   : > { %1983 = vmatmul.mubr.bf16.gmra.mrb[24].mxu0 %v11450_v16  ;;  %2096 = vmatmul.mubr.bf16.gmra.mrb[24].mxu1 %v11450_v16 }
  0xd1   : > { %1992 = vmatprep.mubr.bf16.mxu0 %v17494_v0  ;;  %2105 = vmatprep.mubr.bf16.mxu1 %v17494_v0 }
  0xd8   : > { %1993 = vmatmul.mubr.bf16.gmra.mrb[28].mxu0 %v11456_v17  ;;  %2106 = vmatmul.mubr.bf16.gmra.mrb[28].mxu1 %v11456_v17 }
  0xd9   : > { %2148 = vmatprep.mubr.bf16.mxu0 %v17494_v0  ;;  %2261 = vmatprep.mubr.bf16.mxu1 %v17494_v0 }
  0xe0   : > { %2149 = vmatmul.mubr.bf16.vlgmr.msra.gmra.mrb[32].mxu0 %v11382_v8  ;;  %2262 = vmatmul.mubr.bf16.vlgmr.msra.gmra.mrb[32].mxu1 %v11382_v8 }
  0xe1   : > { %2343 = vmatpush1.bf16.msra.mxu0 %v10487_v20  ;;  %2456 = vmatpush1.bf16.msra.mxu1 %v10489_v23  ;;  %v328_v20 = vld [vmem:[%s11338_s8 + $0xb0] sm:$0xff]  ;;  %v10711_v23 = vcombine.low %v534_v6, %v550_v7 }
  0xe2   : > { %2158 = vmatprep.mubr.bf16.mxu0 %v17494_v0  ;;  %2271 = vmatprep.mubr.bf16.mxu1 %v17494_v0  ;;  %v10492_v26 = vcombine.high %v312_v19, %v328_v20  ;;  %v10491_v30 = vcombine.low %v312_v19, %v328_v20  ;;  %v504_v7 = vld [vmem:[%s11338_s8 + $0x630] sm:$0xff] }
  0xe3   : > { %2344 = vmatprep.subr.bf16.mxu0 %v10520_v24  ;;  %2457 = vmatprep.subr.bf16.mxu1 %v10522_v28  ;;  %v10713_v24 = vcombine.low %v535_v9, %v551_v10  ;;  %v344_v28 = vld [vmem:[%s11338_s8 + $0x130] sm:$0xff]  ;;  %v505_v10 = vld [vmem:[%s11338_s8 + $0x638] sm:$0xff] }
  0xe4   : > { %v520_v9 = vld [vmem:[%s11338_s8 + $0x6b0] sm:$0xff] }
  0xe5   : > { %2345 = vmatpush1.bf16.msra.mxu0 %v10519_v31  ;;  %2458 = vmatpush1.bf16.msra.mxu1 %v10521_v32  ;;  %v345_v31 = vld [vmem:[%s11338_s8 + $0x138] sm:$0xff]  ;;  %v536_v20 = vld [vmem:[%s11338_s8 + $0x730] sm:$0xff] }
  0xe6   : > { %2346 = vmatprep.subr.bf16.mxu0 %v10552_v33  ;;  %2459 = vmatprep.subr.bf16.mxu1 %v10554_v34  ;;  %v361_v32 = vld [vmem:[%s11338_s8 + $0x1b8] sm:$0xff]  ;;  %v10493_v33 = vcombine.low %v313_v21, %v329_v22  ;;  %v10524_v34 = vcombine.high %v344_v28, %v360_v29  ;;  %v552_v21 = vld [vmem:[%s11338_s8 + $0x7b0] sm:$0xff] }
  0xe7   : > { %v10526_v37 = vcombine.high %v345_v31, %v361_v32  ;;  %v537_v22 = vld [vmem:[%s11338_s8 + $0x738] sm:$0xff] }
  0xe8   : > { %2159 = vmatmul.mubr.bf16.gmra.mrb[36].mxu0 %v11396_v25  ;;  %2272 = vmatmul.mubr.bf16.gmra.mrb[36].mxu1 %v11396_v25 }
  0xe9   : > { %2168 = vmatprep.mubr.bf16.mxu0 %v17494_v0  ;;  %2281 = vmatprep.mubr.bf16.mxu1 %v17494_v0 }
  0xea   : > { %2347 = vmatpush1.bf16.msra.mxu0 %v10551_v39  ;;  %2460 = vmatpush1.bf16.msra.mxu1 %v10553_v40  ;;  %v393_v39 = vld [vmem:[%s11338_s8 + $0x2b8] sm:$0xff]  ;;  %v10523_v40 = vcombine.low %v344_v28, %v360_v29  ;;  %v314_v29 = vld [vmem:[%s11338_s8 + $0x40] sm:$0xff] }
  0xeb   : > { %2348 = vmatprep.subr.bf16.mxu0 %v10584_v42  ;;  %2461 = vmatprep.subr.bf16.mxu1 %v10586_v43  ;;  %v10525_v42 = vcombine.low %v345_v31, %v361_v32  ;;  %v10556_v43 = vcombine.high %v376_v35, %v392_v36  ;;  %v10558_v44 = vcombine.high %v377_v38, %v393_v39  ;;  %v315_v31 = vld [vmem:[%s11338_s8 + $0x48] sm:$0xff] }
  0xec   : > { %v331_v32 = vld [vmem:[%s11338_s8 + $0xc8] sm:$0xff] }
  0xee   : > { %2349 = vmatpush1.bf16.msra.mxu0 %v10583_v48  ;;  %2462 = vmatpush1.bf16.msra.mxu1 %v10585_v49  ;;  %v425_v48 = vld [vmem:[%s11338_s8 + $0x3b8] sm:$0xff]  ;;  %v10555_v49 = vcombine.low %v376_v35, %v392_v36  ;;  %v10498_v36 = vcombine.high %v315_v31, %v331_v32 }
  0xef   : > { %2350 = vmatprep.subr.bf16.mxu0 %v10616_v50  ;;  %2463 = vmatprep.subr.bf16.mxu1 %v10618_v51  ;;  %v10557_v50 = vcombine.low %v377_v38, %v393_v39  ;;  %v10588_v51 = vcombine.high %v408_v45, %v424_v46  ;;  %v10590_v52 = vcombine.high %v409_v47, %v425_v48  ;;  %v347_v39 = vld [vmem:[%s11338_s8 + $0x148] sm:$0xff] }
  0xf0   : > { %2169 = vmatmul.mubr.bf16.gmra.mrb[40].mxu0 %v11410_v41  ;;  %2282 = vmatmul.mubr.bf16.gmra.mrb[40].mxu1 %v11410_v41 }
  0xf1   : > { %2178 = vmatprep.mubr.bf16.mxu0 %v17494_v0  ;;  %2291 = vmatprep.mubr.bf16.mxu1 %v17494_v0 }
  0xf2   : > { %2351 = vmatpush1.bf16.msra.mxu0 %v10615_v56  ;;  %2464 = vmatpush1.bf16.msra.mxu1 %v10617_v57  ;;  %v457_v56 = vld [vmem:[%s11338_s8 + $0x4b8] sm:$0xff]  ;;  %v10587_v57 = vcombine.low %v408_v45, %v424_v46  ;;  %v379_v46 = vld [vmem:[%s11338_s8 + $0x248] sm:$0xff] }
  0xf3   : > { %2352 = vmatprep.subr.bf16.mxu0 %v10648_v59  ;;  %2465 = vmatprep.subr.bf16.mxu1 %v10650_v60  ;;  %v10589_v59 = vcombine.low %v409_v47, %v425_v48  ;;  %v10620_v60 = vcombine.high %v440_v53, %v456_v54  ;;  %v10622_v61 = vcombine.high %v441_v55, %v457_v56 }
  0xf6   : > { %2353 = vmatpush1.bf16.msra.mxu0 %v10647_v2  ;;  %2466 = vmatpush1.bf16.msra.mxu1 %v10649_v3  ;;  %v489_v2 = vld [vmem:[%s11338_s8 + $0x5b8] sm:$0xff]  ;;  %v10619_v3 = vcombine.low %v440_v53, %v456_v54  ;;  %v411_v53 = vld [vmem:[%s11338_s8 + $0x348] sm:$0xff] }
  0xf7   : > { %2354 = vmatprep.subr.bf16.mxu0 %v10680_v4  ;;  %2467 = vmatprep.subr.bf16.mxu1 %v10682_v5  ;;  %v10621_v4 = vcombine.low %v441_v55, %v457_v56  ;;  %v10652_v5 = vcombine.high %v472_v62, %v488_v63  ;;  %v10654_v6 = vcombine.high %v473_v1, %v489_v2  ;;  %v427_v54 = vld [vmem:[%s11338_s8 + $0x3c8] sm:$0xff]  ;;  %v4413_v55 = vlaneseq }
  0xf8   : > { %2179 = vmatmul.mubr.bf16.gmra.mrb[44].mxu0 %v11424_v58  ;;  %2292 = vmatmul.mubr.bf16.gmra.mrb[44].mxu1 %v11424_v58  ;;  %v11113_v56 = vmov 1983009808  }
  0xf9   : > { %2188 = vmatprep.mubr.bf16.mxu0 %v17494_v0  ;;  %2301 = vmatprep.mubr.bf16.mxu1 %v17494_v0 }
  0xfa   : > { %2355 = vmatpush1.bf16.msra.mxu0 %v10679_v11  ;;  %2468 = vmatpush1.bf16.msra.mxu1 %v10681_v12  ;;  %v521_v11 = vld [vmem:[%s11338_s8 + $0x6b8] sm:$0xff]  ;;  %v10651_v12 = vcombine.low %v472_v62, %v488_v63  ;;  %v11608_v62 = vld [vmem:[%s11338_s8 + $0x440] sm:$0xff] }
  0xfb   : > { %2356 = vmatprep.subr.bf16.mxu0 %v10712_v14  ;;  %2469 = vmatprep.subr.bf16.mxu1 %v10714_v18  ;;  %v10653_v14 = vcombine.low %v473_v1, %v489_v2  ;;  %v10684_v18 = vcombine.high %v504_v7, %v520_v9  ;;  %v10686_v19 = vcombine.high %v505_v10, %v521_v11  ;;  %v11611_v63 = vld [vmem:[%s11338_s8 + $0x4c0] sm:$0xff]  ;;  %v11616_v1 = vld [vmem:[%s11338_s8 + $0x448] sm:$0xff] }
  0xfc   : > { %v11619_v2 = vld [vmem:[%s11338_s8 + $0x4c8] sm:$0xff] }
  0xfe   : > { %2357 = vmatpush1.bf16.msra.mxu0 %v10711_v23  ;;  %2470 = vmatpush1.bf16.msra.mxu1 %v10713_v24  ;;  %v553_v23 = vld [vmem:[%s11338_s8 + $0x7b8] sm:$0xff]  ;;  %v10683_v24 = vcombine.low %v504_v7, %v520_v9  ;;  %v10593_v9 = vcombine.low %v411_v53, %v427_v54 }
  0xff   : > { %2568 = vmatprep.subr.bf16.mxu0 %v10492_v26  ;;  %2681 = vmatprep.subr.bf16.mxu1 %v10494_v27  ;;  %v10685_v26 = vcombine.low %v505_v10, %v521_v11  ;;  %v10716_v27 = vcombine.high %v536_v20, %v552_v21  ;;  %v10718_v28 = vcombine.high %v537_v22, %v553_v23  ;;  %v11636_v11 = vld [vmem:[%s11338_s8 + $0x5c8] sm:$0xff] }
 0x100   : > { %2189 = vmatmul.mubr.bf16.gmra.mrb[48].mxu0 %v11438_v13  ;;  %2302 = vmatmul.mubr.bf16.gmra.mrb[48].mxu1 %v11438_v13  ;;  %v10624_v10 = vcombine.high %v11608_v62, %v11611_v63 }
 0x101   : > { %2198 = vmatprep.mubr.bf16.mxu0 %v17494_v0  ;;  %2311 = vmatprep.mubr.bf16.mxu1 %v17494_v0 }
 0x108   : > { %2199 = vmatmul.mubr.bf16.gmra.mrb[52].mxu0 %v11444_v15  ;;  %2312 = vmatmul.mubr.bf16.gmra.mrb[52].mxu1 %v11444_v15 }
 0x109   : > { %2208 = vmatprep.mubr.bf16.mxu0 %v17494_v0  ;;  %2321 = vmatprep.mubr.bf16.mxu1 %v17494_v0 }
 0x110   : > { %2209 = vmatmul.mubr.bf16.gmra.mrb[56].mxu0 %v11450_v16  ;;  %2322 = vmatmul.mubr.bf16.gmra.mrb[56].mxu1 %v11450_v16 }
 0x111   : > { %2218 = vmatprep.mubr.bf16.mxu0 %v17494_v0  ;;  %2331 = vmatprep.mubr.bf16.mxu1 %v17494_v0 }
 0x118   : > { %2219 = vmatmul.mubr.bf16.gmra.mrb[60].mxu0 %v11456_v17  ;;  %2332 = vmatmul.mubr.bf16.gmra.mrb[60].mxu1 %v11456_v17 }
 0x119   : > { %2374 = vmatprep.mubr.bf16.mxu0 %v17494_v0  ;;  %2487 = vmatprep.mubr.bf16.mxu1 %v17494_v0 }
 0x120   : > { %2375 = vmatmul.mubr.bf16.vlgmr.msra.gmra.mrb[64].mxu0 %v11382_v8  ;;  %2488 = vmatmul.mubr.bf16.vlgmr.msra.gmra.mrb[64].mxu1 %v11382_v8 }
 0x121   : > { %2569 = vmatpush1.bf16.msra.mxu0 %v10491_v30  ;;  %2682 = vmatpush1.bf16.msra.mxu1 %v10493_v33  ;;  %v330_v30 = vld [vmem:[%s11338_s8 + $0xc0] sm:$0xff]  ;;  %v10715_v33 = vcombine.low %v536_v20, %v552_v21  ;;  %v11650_v20 = vld [vmem:[%s11338_s8 + $0x6c8] sm:$0xff] }
 0x122   : > { %2384 = vmatprep.mubr.bf16.mxu0 %v17494_v0  ;;  %2497 = vmatprep.mubr.bf16.mxu1 %v17494_v0  ;;  %v10496_v35 = vcombine.high %v314_v29, %v330_v30  ;;  %v10495_v38 = vcombine.low %v314_v29, %v330_v30  ;;  %v11653_v21 = vld [vmem:[%s11338_s8 + $0x740] sm:$0xff]  ;;  %v11667_v30 = vld [vmem:[%s11338_s8 + $0x748] sm:$0xff] }
 0x123   : > { %2570 = vmatprep.subr.bf16.mxu0 %v10524_v34  ;;  %2683 = vmatprep.subr.bf16.mxu1 %v10526_v37  ;;  %v10717_v34 = vcombine.low %v537_v22, %v553_v23  ;;  %v362_v37 = vld [vmem:[%s11338_s8 + $0x1c0] sm:$0xff]  ;;  %v11114_v22 = vmov 1966171168  }
 0x124   : > { %v4411_v23 = vunpack.c.l.s4 %v11114_v22  ;;  %v11664_v29 = vld [vmem:[%s11338_s8 + $0x7c0] sm:$0xff] }
 0x125   : > { %2571 = vmatpush1.bf16.msra.mxu0 %v10523_v40  ;;  %2684 = vmatpush1.bf16.msra.mxu1 %v10525_v42  ;;  %v363_v40 = vld [vmem:[%s11338_s8 + $0x1c8] sm:$0xff] }
 0x126   : > { %2572 = vmatprep.subr.bf16.mxu0 %v10556_v43  ;;  %2685 = vmatprep.subr.bf16.mxu1 %v10558_v44  ;;  %v378_v43 = vld [vmem:[%s11338_s8 + $0x240] sm:$0xff]  ;;  %v10530_v45 = vcombine.high %v347_v39, %v363_v40  ;;  %v10529_v48 = vcombine.low %v347_v39, %v363_v40 }
 0x127   : > { %v394_v44 = vld [vmem:[%s11338_s8 + $0x2c0] sm:$0xff] }
 0x128   : > { %2385 = vmatmul.mubr.bf16.gmra.mrb[68].mxu0 %v11396_v25  ;;  %2498 = vmatmul.mubr.bf16.gmra.mrb[68].mxu1 %v11396_v25 }
 0x129   : > { %2394 = vmatprep.mubr.bf16.mxu0 %v17494_v0  ;;  %2507 = vmatprep.mubr.bf16.mxu1 %v17494_v0 }
 0x12a   : > { %2573 = vmatpush1.bf16.msra.mxu0 %v10555_v49  ;;  %2686 = vmatpush1.bf16.msra.mxu1 %v10557_v50  ;;  %v10560_v49 = vcombine.high %v378_v43, %v394_v44 }
 0x12b   : > { %2574 = vmatprep.subr.bf16.mxu0 %v10588_v51  ;;  %2687 = vmatprep.subr.bf16.mxu1 %v10590_v52  ;;  %v410_v51 = vld [vmem:[%s11338_s8 + $0x340] sm:$0xff] }
 0x12c   : > { %v426_v52 = vld [vmem:[%s11338_s8 + $0x3c0] sm:$0xff] }
 0x12e   : > { %2575 = vmatpush1.bf16.msra.mxu0 %v10587_v57  ;;  %2688 = vmatpush1.bf16.msra.mxu1 %v10589_v59  ;;  %v6949_v57 = vunpack.c.l.s4 %v11113_v56  ;;  %v11743_v56 = vld [vmem:[%s11338_s8 + $0x2d8] sm:$0xff] }
 0x12f   : > { %2576 = vmatprep.subr.bf16.mxu0 %v10620_v60  ;;  %2689 = vmatprep.subr.bf16.mxu1 %v10622_v61  ;;  %v10592_v60 = vcombine.high %v410_v51, %v426_v52  ;;  %v10594_v61 = vcombine.high %v411_v53, %v427_v54  ;;  %v11730_v53 = vld [vmem:[%s11338_s8 + $0x2d0] sm:$0xff]  ;;  %v11733_v54 = vld [vmem:[%s11338_s8 + $0x258] sm:$0xff] }
 0x130   : > { %2395 = vmatmul.mubr.bf16.gmra.mrb[72].mxu0 %v11410_v41  ;;  %2508 = vmatmul.mubr.bf16.gmra.mrb[72].mxu1 %v11410_v41  ;;  %v6950_v7 = vunpack.c.0.s8 %v6949_v57 }
 0x131   : > { %2404 = vmatprep.mubr.bf16.mxu0 %v17494_v0  ;;  %2517 = vmatprep.mubr.bf16.mxu1 %v17494_v0 }
 0x132   : > { %2577 = vmatpush1.bf16.msra.mxu0 %v10619_v3  ;;  %2690 = vmatpush1.bf16.msra.mxu1 %v10621_v4  ;;  %v10591_v3 = vcombine.low %v410_v51, %v426_v52  ;;  %v11623_v4 = vld [vmem:[%s11338_s8 + $0x540] sm:$0xff]  ;;  %v11727_v52 = vld [vmem:[%s11338_s8 + $0x250] sm:$0xff] }
 0x133   : > { %2578 = vmatprep.subr.bf16.mxu0 %v10652_v5  ;;  %2691 = vmatprep.subr.bf16.mxu1 %v10654_v6  ;;  %v11626_v5 = vld [vmem:[%s11338_s8 + $0x5c0] sm:$0xff]  ;;  %v11631_v6 = vshrl.u32 %v4413_v55, 7 }
 0x135   : > { %17927 = vst [vmem:[#allocation17_spill] sm:$0xff] %v11631_v6 }
 0x136   : > { %2579 = vmatpush1.bf16.msra.mxu0 %v10651_v12  ;;  %2692 = vmatpush1.bf16.msra.mxu1 %v10653_v14  ;;  %v11639_v12 = vld [vmem:[%s11338_s8 + $0x640] sm:$0xff] }
 0x137   : > { %2580 = vmatprep.subr.bf16.mxu0 %v10684_v18  ;;  %2693 = vmatprep.subr.bf16.mxu1 %v10686_v19  ;;  %v11642_v14 = vld [vmem:[%s11338_s8 + $0x6c0] sm:$0xff]  ;;  %v10626_v18 = vcombine.high %v11616_v1, %v11619_v2  ;;  %v11647_v19 = vld [vmem:[%s11338_s8 + $0x648] sm:$0xff] }
 0x138   : > { %2405 = vmatmul.mubr.bf16.gmra.mrb[76].mxu0 %v11424_v58  ;;  %2518 = vmatmul.mubr.bf16.gmra.mrb[76].mxu1 %v11424_v58  ;;  %v10689_v39 = vcombine.low %v11647_v19, %v11650_v20  ;;  %v10690_v40 = vcombine.high %v11647_v19, %v11650_v20 }
 0x139   : > { %2414 = vmatprep.mubr.bf16.mxu0 %v17494_v0  ;;  %2527 = vmatprep.mubr.bf16.mxu1 %v17494_v0 }
 0x13a   : > { %2581 = vmatpush1.bf16.msra.mxu0 %v10683_v24  ;;  %2694 = vmatpush1.bf16.msra.mxu1 %v10685_v26  ;;  %v10623_v24 = vcombine.low %v11608_v62, %v11611_v63  ;;  %v10625_v26 = vcombine.low %v11616_v1, %v11619_v2 }
 0x13b   : > { %2582 = vmatprep.subr.bf16.mxu0 %v10716_v27  ;;  %2695 = vmatprep.subr.bf16.mxu1 %v10718_v28  ;;  %v10655_v27 = vcombine.low %v11623_v4, %v11626_v5  ;;  %v10656_v28 = vcombine.high %v11623_v4, %v11626_v5 }
 0x13e   : > { %2583 = vmatpush1.bf16.msra.mxu0 %v10715_v33  ;;  %2696 = vmatpush1.bf16.msra.mxu1 %v10717_v34  ;;  %v11677_v34 = vsub.s32 %v6950_v7, %v11631_v6 }
 0x13f   : > { %2794 = vmatprep.subr.bf16.mxu0 %v10496_v35  ;;  %2907 = vmatprep.subr.bf16.mxu1 %v10498_v36  ;;  %v10688_v35 = vcombine.high %v11639_v12, %v11642_v14  ;;  %v11682_v36 = vld [vmem:[%s11338_s8 + $0x50] sm:$0xff] }
 0x140   : > { %2415 = vmatmul.mubr.bf16.gmra.mrb[80].mxu0 %v11438_v13  ;;  %2528 = vmatmul.mubr.bf16.gmra.mrb[80].mxu1 %v11438_v13 }
 0x141   : > { %2424 = vmatprep.mubr.bf16.mxu0 %v17494_v0  ;;  %2537 = vmatprep.mubr.bf16.mxu1 %v17494_v0 }
 0x148   : > { %2425 = vmatmul.mubr.bf16.gmra.mrb[84].mxu0 %v11444_v15  ;;  %2538 = vmatmul.mubr.bf16.gmra.mrb[84].mxu1 %v11444_v15  ;;  %v346_v15 = vld [vmem:[%s11338_s8 + $0x140] sm:$0xff] }
 0x149   : > { %2434 = vmatprep.mubr.bf16.mxu0 %v17494_v0  ;;  %2547 = vmatprep.mubr.bf16.mxu1 %v17494_v0  ;;  %v10528_v42 = vcombine.high %v346_v15, %v362_v37  ;;  %v10527_v47 = vcombine.low %v346_v15, %v362_v37  ;;  %v11685_v15 = vld [vmem:[%s11338_s8 + $0xd0] sm:$0xff]  ;;  %v11688_v37 = vld [vmem:[%s11338_s8 + $0x58] sm:$0xff] }
 0x150   : > { %2435 = vmatmul.mubr.bf16.gmra.mrb[88].mxu0 %v11450_v16  ;;  %2548 = vmatmul.mubr.bf16.gmra.mrb[88].mxu1 %v11450_v16  ;;  %v10497_v16 = vcombine.low %v315_v31, %v331_v32  ;;  %v11670_v31 = vld [vmem:[%s11338_s8 + $0x7c8] sm:$0xff] }
 0x151   : > { %2444 = vmatprep.mubr.bf16.mxu0 %v17494_v0  ;;  %2557 = vmatprep.mubr.bf16.mxu1 %v17494_v0 }
 0x158   : > { %2445 = vmatmul.mubr.bf16.gmra.mrb[92].mxu0 %v11456_v17  ;;  %2558 = vmatmul.mubr.bf16.gmra.mrb[92].mxu1 %v11456_v17  ;;  %v395_v17 = vld [vmem:[%s11338_s8 + $0x2c8] sm:$0xff] }
 0x159   : > { %2600 = vmatprep.mubr.bf16.mxu0 %v17494_v0  ;;  %2713 = vmatprep.mubr.bf16.mxu1 %v17494_v0  ;;  %v10562_v50 = vcombine.high %v379_v46, %v395_v17  ;;  %v10561_v59 = vcombine.low %v379_v46, %v395_v17  ;;  %v11713_v17 = vld [vmem:[%s11338_s8 + $0x158] sm:$0xff] }
 0x160   : > { %2601 = vmatmul.mubr.bf16.vlgmr.msra.gmra.mrb[96].mxu0 %v11382_v8  ;;  %2714 = vmatmul.mubr.bf16.vlgmr.msra.gmra.mrb[96].mxu1 %v11382_v8  ;;  %v10559_v8 = vcombine.low %v378_v43, %v394_v44  ;;  %v11703_v43 = vld [vmem:[%s11338_s8 + $0x1d0] sm:$0xff] }
 0x161   : > { %2795 = vmatpush1.bf16.msra.mxu0 %v10495_v38  ;;  %2908 = vmatpush1.bf16.msra.mxu1 %v10497_v16  ;;  %v10687_v38 = vcombine.low %v11639_v12, %v11642_v14  ;;  %v11697_v16 = vld [vmem:[%s11338_s8 + $0xd8] sm:$0xff] }
 0x162   : > { %2610 = vmatprep.mubr.bf16.mxu0 %v17494_v0  ;;  %2723 = vmatprep.mubr.bf16.mxu1 %v17494_v0 }
 0x163   : > { %2796 = vmatprep.subr.bf16.mxu0 %v10528_v42  ;;  %2909 = vmatprep.subr.bf16.mxu1 %v10530_v45  ;;  %v11700_v42 = vld [vmem:[%s11338_s8 + $0x150] sm:$0xff]  ;;  %v10720_v45 = vcombine.high %v11653_v21, %v11664_v29 }
 0x165   : > { %2797 = vmatpush1.bf16.msra.mxu0 %v10527_v47  ;;  %2910 = vmatpush1.bf16.msra.mxu1 %v10529_v48  ;;  %v11716_v47 = vld [vmem:[%s11338_s8 + $0x1d8] sm:$0xff]  ;;  %v4412_v48 = vunpack.c.0.s8 %v4411_v23 }
 0x166   : > { %2798 = vmatprep.subr.bf16.mxu0 %v10560_v49  ;;  %2911 = vmatprep.subr.bf16.mxu1 %v10562_v50 }
 0x167   : > { %v11758_v1 = vsub.s32 %v4412_v48, %v11631_v6 }
 0x168   : > { %2611 = vmatmul.mubr.bf16.gmra.mrb[100].mxu0 %v11396_v25  ;;  %2724 = vmatmul.mubr.bf16.gmra.mrb[100].mxu1 %v11396_v25  ;;  %v11629_v25 = vld [vmem:[%s11338_s8 + $0x548] sm:$0xff] }
 0x169   : > { %2620 = vmatprep.mubr.bf16.mxu0 %v17494_v0  ;;  %2733 = vmatprep.mubr.bf16.mxu1 %v17494_v0  ;;  %v10657_v32 = vcombine.low %v11629_v25, %v11636_v11  ;;  %v10658_v33 = vcombine.high %v11629_v25, %v11636_v11  ;;  %17928 = vst [vmem:[#allocation18_spill] sm:$0xff] %v11758_v1  ;;  %v11797_v25 = vld [vmem:[%s11338_s8 + $0x350] sm:$0xff] }
 0x16a   : > { %2799 = vmatpush1.bf16.msra.mxu0 %v10559_v8  ;;  %2912 = vmatpush1.bf16.msra.mxu1 %v10561_v59  ;;  %v11800_v11 = vld [vmem:[%s11338_s8 + $0x3d0] sm:$0xff] }
 0x16b   : > { %2800 = vmatprep.subr.bf16.mxu0 %v10592_v60  ;;  %2913 = vmatprep.subr.bf16.mxu1 %v10594_v61 }
 0x16e   : > { %2801 = vmatpush1.bf16.msra.mxu0 %v10591_v3  ;;  %2914 = vmatpush1.bf16.msra.mxu1 %v10593_v9 }
 0x16f   : > { %2802 = vmatprep.subr.bf16.mxu0 %v10624_v10  ;;  %2915 = vmatprep.subr.bf16.mxu1 %v10626_v18 }
 0x170   : > { %2621 = vmatmul.mubr.bf16.gmra.mrb[104].mxu0 %v11410_v41  ;;  %2734 = vmatmul.mubr.bf16.gmra.mrb[104].mxu1 %v11410_v41 }
 0x171   : > { %2630 = vmatprep.mubr.bf16.mxu0 %v17494_v0  ;;  %2743 = vmatprep.mubr.bf16.mxu1 %v17494_v0 }
 0x172   : > { %2803 = vmatpush1.bf16.msra.mxu0 %v10623_v24  ;;  %2916 = vmatpush1.bf16.msra.mxu1 %v10625_v26 }
 0x173   : > { %v11745_v57 = vpop.f32.mrb[0].mxu0  ;;  %2804 = vmatprep.subr.bf16.mxu0 %v10656_v28  ;;  %v11753_v62 = vpop.f32.mrb[0].mxu1  ;;  %2917 = vmatprep.subr.bf16.mxu1 %v10658_v33 }
 0x174   : > { %v11755_v63 = vpop.f32.mrb[1].mxu0  ;;  %v4618_v9 = vmul.f32 %v11745_v57, %v11745_v57  ;;  %v4620_v10 = vmul.f32 %v11753_v62, %v11753_v62  ;;  %v11772_v22 = vpop.f32.mrb[1].mxu1 }
 0x175   : > { %v4619_v18 = vmul.f32 %v11755_v63, %v11755_v63  ;;  %v1928_v23 = vpop.f32.mrb[2].mxu0  ;;  %v4621_v26 = vmul.f32 %v11772_v22, %v11772_v22  ;;  %v2041_v7 = vpop.f32.mrb[2].mxu1 }
 0x176   : > { %v3702_v28 = vadd.f32 %v1928_v23, %v11745_v57  ;;  %v4650_v33 = vmul.f32 %v1928_v23, %v1928_v23  ;;  %v6050_v48 = vmax.f32 %v11745_v57, %v1928_v23  ;;  %v1930_v2 = vpop.f32.mrb[3].mxu0  ;;  %2805 = vmatpush1.bf16.msra.mxu0 %v10655_v27  ;;  %v7312_v3 = vmin.f32 %v11745_v57, %v1928_v23  ;;  %v2043_v61 = vpop.f32.mrb[3].mxu1 }
 0x177   : > { %v3744_v60 = vadd.f32 %v2041_v7, %v11753_v62  ;;  %v4652_v24 = vmul.f32 %v2041_v7, %v2041_v7  ;;  %v6076_v55 = vmax.f32 %v11753_v62, %v2041_v7  ;;  %2918 = vmatpush1.bf16.msra.mxu1 %v10657_v32  ;;  %v7338_v41 = vmin.f32 %v11753_v62, %v2041_v7  ;;  %v11803_v32 = vld [vmem:[%s11338_s8 + $0x358] sm:$0xff] }
 0x178   : > { %v5130_v59 = vadd.f32 %v4650_v33, %v4618_v9  ;;  %v3723_v4 = vadd.f32 %v1930_v2, %v11755_v63  ;;  %v4651_v5 = vmul.f32 %v1930_v2, %v1930_v2  ;;  %2631 = vmatmul.mubr.bf16.gmra.mrb[108].mxu0 %v11424_v58  ;;  %v6063_v57 = vmax.f32 %v11755_v63, %v1930_v2 }
 0x179   : > { %v5172_v27 = vadd.f32 %v4652_v24, %v4620_v10  ;;  %v7325_v23 = vmin.f32 %v11755_v63, %v1930_v2  ;;  %v3765_v50 = vadd.f32 %v2043_v61, %v11772_v22  ;;  %2744 = vmatmul.mubr.bf16.gmra.mrb[108].mxu1 %v11424_v58  ;;  %17929 = vst [vmem:[#allocation19_spill] sm:$0xff] %v11803_v32  ;;  %v11809_v24 = vld [vmem:[%s11338_s8 + $0x3d8] sm:$0xff] }
 0x17a   : > { %v5151_v62 = vadd.f32 %v4651_v5, %v4619_v18  ;;  %v4653_v7 = vmul.f32 %v2043_v61, %v2043_v61  ;;  %v6089_v9 = vmax.f32 %v11772_v22, %v2043_v61  ;;  %v7351_v10 = vmin.f32 %v11772_v22, %v2043_v61  ;;  %2640 = vmatprep.mubr.bf16.mxu0 %v17494_v0 }
 0x17b   : > { %17930 = vst [vmem:[#allocation20_spill] sm:$0xff] %v11809_v24  ;;  %v1934_v63 = vpop.f32.mrb[4].mxu0  ;;  %2753 = vmatprep.mubr.bf16.mxu1 %v17494_v0  ;;  %2806 = vmatprep.subr.bf16.mxu0 %v10688_v35  ;;  %v2047_v8 = vpop.f32.mrb[4].mxu1 }
 0x17c   : > { %v5193_v18 = vadd.f32 %v4653_v7, %v4621_v26  ;;  %v3703_v22 = vadd.f32 %v3702_v28, %v1934_v63  ;;  %v4682_v33 = vmul.f32 %v1934_v63, %v1934_v63  ;;  %v6051_v5 = vmax.f32 %v6050_v48, %v1934_v63  ;;  %v1936_v51 = vpop.f32.mrb[5].mxu0  ;;  %2919 = vmatprep.subr.bf16.mxu1 %v10690_v40  ;;  %v2049_v49 = vpop.f32.mrb[5].mxu1 }
 0x17d   : > { %v7313_v35 = vmin.f32 %v7312_v3, %v1934_v63  ;;  %v3745_v46 = vadd.f32 %v3744_v60, %v2047_v8  ;;  %v4684_v44 = vmul.f32 %v2047_v8, %v2047_v8  ;;  %v11824_v58 = vmax.f32 %v6076_v55, %v2047_v8  ;;  %v1938_v2 = vpop.f32.mrb[6].mxu0  ;;  %2807 = vmatpush1.bf16.msra.mxu0 %v10687_v38  ;;  %v2051_v61 = vpop.f32.mrb[6].mxu1 }
 0x17e   : > { %v5131_v26 = vadd.f32 %v5130_v59, %v4682_v33  ;;  %v7339_v28 = vmin.f32 %v7338_v41, %v2047_v8  ;;  %v3724_v48 = vadd.f32 %v3723_v4, %v1936_v51  ;;  %v4683_v7 = vmul.f32 %v1936_v51, %v1936_v51  ;;  %v11829_v0 = vpop.f32.mrb[7].mxu0  ;;  %2920 = vmatpush1.bf16.msra.mxu1 %v10689_v39  ;;  %v11834_v63 = vpop.f32.mrb[7].mxu1 }
 0x17f   : > { %v5173_v40 = vadd.f32 %v5172_v27, %v4684_v44  ;;  %v6064_v55 = vmax.f32 %v6063_v57, %v1936_v51  ;;  %v7326_v60 = vmin.f32 %v7325_v23, %v1936_v51  ;;  %v3766_v3 = vadd.f32 %v3765_v50, %v2049_v49  ;;  %2808 = vmatprep.subr.bf16.mxu0 %v10720_v45 }
 0x180   : > { %v5152_v12 = vadd.f32 %v5151_v62, %v4683_v7  ;;  %v4685_v14 = vmul.f32 %v2049_v49, %v2049_v49  ;;  %v6090_v38 = vmax.f32 %v6089_v9, %v2049_v49  ;;  %v7352_v41 = vmin.f32 %v7351_v10, %v2049_v49  ;;  %2641 = vmatmul.mubr.bf16.gmra.mrb[112].mxu0 %v11438_v13 }
 0x181   : > { %v3704_v8 = vadd.f32 %v3703_v22, %v1938_v2  ;;  %v4714_v59 = vmul.f32 %v1938_v2, %v1938_v2  ;;  %v6052_v19 = vmax.f32 %v6051_v5, %v1938_v2  ;;  %v7314_v20 = vmin.f32 %v7313_v35, %v1938_v2  ;;  %2754 = vmatmul.mubr.bf16.gmra.mrb[112].mxu1 %v11438_v13 }
 0x182   : > { %v5194_v39 = vadd.f32 %v5193_v18, %v4685_v14  ;;  %v3746_v44 = vadd.f32 %v3745_v46, %v2051_v61  ;;  %v4716_v50 = vmul.f32 %v2051_v61, %v2051_v61  ;;  %v6078_v51 = vmax.f32 %v11824_v58, %v2051_v61 }
 0x183   : > { %v17931_v4 = vmov 0   ;;  %v5132_v45 = vadd.f32 %v5131_v26, %v4714_v59  ;;  %v7340_v27 = vmin.f32 %v7339_v28, %v2051_v61  ;;  %v3725_v57 = vadd.f32 %v3724_v48, %v11829_v0  ;;  %v1944_v23 = vpop.f32.mrb[8].mxu0  ;;  %v2057_v10 = vpop.f32.mrb[8].mxu1 }
 0x184   : > { %2650 = vmatprep.mubr.bf16.mxu0 %v17931_v4  ;;  %v4715_v49 = vmul.f32 %v11829_v0, %v11829_v0  ;;  %2763 = vmatprep.mubr.bf16.mxu1 %v17931_v4  ;;  %v5174_v62 = vadd.f32 %v5173_v40, %v4716_v50  ;;  %v6065_v13 = vmax.f32 %v6064_v55, %v11829_v0  ;;  %v1946_v58 = vpop.f32.mrb[9].mxu0  ;;  %v2059_v5 = vpop.f32.mrb[9].mxu1 }
 0x185   : > { %v7327_v46 = vmin.f32 %v7326_v60, %v11829_v0  ;;  %v3767_v9 = vadd.f32 %v3766_v3, %v11834_v63  ;;  %v17932_v2 = vcombine.high %v11667_v30, %v11670_v31  ;;  %v4717_v18 = vmul.f32 %v11834_v63, %v11834_v63  ;;  %v11857_v35 = vpop.f32.mrb[10].mxu0  ;;  %v11862_v40 = vpop.f32.mrb[10].mxu1 }
 0x186   : > { %v5153_v61 = vadd.f32 %v5152_v12, %v4715_v49  ;;  %v6091_v22 = vmax.f32 %v6090_v38, %v11834_v63  ;;  %v7353_v33 = vmin.f32 %v7352_v41, %v11834_v63  ;;  %v17933_v0 = vcombine.low %v11653_v21, %v11664_v29  ;;  %v11864_v55 = vpop.f32.mrb[11].mxu0  ;;  %v11869_v38 = vpop.f32.mrb[11].mxu1 }
 0x187   : > { %2921 = vmatprep.subr.bf16.mxu1 %v17932_v2  ;;  %v3705_v26 = vadd.f32 %v3704_v8, %v1944_v23  ;;  %v4746_v28 = vmul.f32 %v1944_v23, %v1944_v23  ;;  %v6053_v48 = vmax.f32 %v6052_v19, %v1944_v23  ;;  %v7315_v7 = vmin.f32 %v7314_v20, %v1944_v23  ;;  %v11874_v19 = vld [vmem:[#allocation6 + $0x28] sm:$0xff]  }
 0x188   : > { %2809 = vmatpush1.bf16.msra.mxu0 %v17933_v0  ;;  %v17934_v60 = vcombine.low %v11667_v30, %v11670_v31  ;;  %v5195_v3 = vadd.f32 %v5194_v39, %v4717_v18  ;;  %v3747_v63 = vadd.f32 %v3746_v44, %v2057_v10  ;;  %v4748_v12 = vmul.f32 %v2057_v10, %v2057_v10 }
 0x189   : > { %v6079_v14 = vmax.f32 %v6078_v51, %v2057_v10  ;;  %v17935_v21 = vcombine.high %v11682_v36, %v11685_v15  ;;  %v5133_v29 = vadd.f32 %v5132_v45, %v4746_v28  ;;  %v7341_v41 = vmin.f32 %v7340_v27, %v2057_v10  ;;  %17936 = vst [vmem:[#allocation21_spill] sm:$0xff] %v11874_v19 }
 0x18a   : > { %2922 = vmatpush1.bf16.msra.mxu1 %v17934_v60  ;;  %v3726_v8 = vadd.f32 %v3725_v57, %v1946_v58  ;;  %v4747_v59 = vmul.f32 %v1946_v58, %v1946_v58  ;;  %2651 = vmatmul.mubr.bf16.gmra.mrb[116].mxu0 %v11874_v19  ;;  %v5175_v30 = vadd.f32 %v5174_v62, %v4748_v12 }
 0x18b   : > { %3020 = vmatprep.subr.bf16.mxu0 %v17935_v21  ;;  %v6066_v31 = vmax.f32 %v6065_v13, %v1946_v58  ;;  %v7328_v20 = vmin.f32 %v7327_v46, %v1946_v58  ;;  %v3768_v39 = vadd.f32 %v3767_v9, %v2059_v5  ;;  %2764 = vmatmul.mubr.bf16.gmra.mrb[116].mxu1 %v11874_v19  ;;  %v1954_v62 = vpop.f32.mrb[12].mxu0  ;;  %v2067_v58 = vpop.f32.mrb[12].mxu1 }
 0x18c   : > { %v5154_v44 = vadd.f32 %v5153_v61, %v4747_v59  ;;  %v4749_v50 = vmul.f32 %v2059_v5, %v2059_v5  ;;  %v6092_v51 = vmax.f32 %v6091_v22, %v2059_v5  ;;  %v7354_v49 = vmin.f32 %v7353_v33, %v2059_v5  ;;  %2660 = vmatprep.mubr.bf16.mxu0 %v17931_v4  ;;  %v1956_v2 = vpop.f32.mrb[13].mxu0 }
 0x18d   : > { %v3706_v45 = vadd.f32 %v3705_v26, %v11857_v35  ;;  %v4778_v27 = vmul.f32 %v11857_v35, %v11857_v35  ;;  %v6054_v57 = vmax.f32 %v6053_v48, %v11857_v35  ;;  %v7316_v23 = vmin.f32 %v7315_v7, %v11857_v35  ;;  %2773 = vmatprep.mubr.bf16.mxu1 %v17931_v4  ;;  %v2069_v35 = vpop.f32.mrb[13].mxu1  ;;  %v1958_v0 = vpop.f32.mrb[14].mxu0 }
 0x18e   : > { %v5196_v13 = vadd.f32 %v5195_v3, %v4749_v50  ;;  %v3748_v46 = vadd.f32 %v3747_v63, %v11862_v40  ;;  %v4780_v9 = vmul.f32 %v11862_v40, %v11862_v40  ;;  %v6080_v10 = vmax.f32 %v6079_v14, %v11862_v40  ;;  %v2071_v60 = vpop.f32.mrb[14].mxu1  ;;  %v11899_v3 = vpop.f32.mrb[15].mxu0 }
 0x18f   : > { %v17937_v61 = vcombine.high %v11688_v37, %v11697_v16  ;;  %v5134_v18 = vadd.f32 %v5133_v29, %v4778_v27  ;;  %v7342_v22 = vmin.f32 %v7341_v41, %v11862_v40  ;;  %v3727_v33 = vadd.f32 %v3726_v8, %v11864_v55  ;;  %v11905_v21 = vpop.f32.mrb[15].mxu1 }
 0x190   : > { %v4779_v5 = vmul.f32 %v11864_v55, %v11864_v55  ;;  %v5176_v26 = vadd.f32 %v5175_v30, %v4780_v9  ;;  %v6067_v28 = vmax.f32 %v6066_v31, %v11864_v55  ;;  %v7329_v48 = vmin.f32 %v7328_v20, %v11864_v55  ;;  %v11907_v55 = vld [vmem:[#allocation6 + $0x30] sm:$0xff]  }
 0x191   : > { %3133 = vmatprep.subr.bf16.mxu1 %v17937_v61  ;;  %v3769_v7 = vadd.f32 %v3768_v39, %v11869_v38  ;;  %v4781_v40 = vmul.f32 %v11869_v38, %v11869_v38  ;;  %v6093_v12 = vmax.f32 %v6092_v51, %v11869_v38  ;;  %v7355_v14 = vmin.f32 %v7354_v49, %v11869_v38 }
 0x192   : > { %v5155_v63 = vadd.f32 %v5154_v44, %v4779_v5  ;;  %v3707_v29 = vadd.f32 %v3706_v45, %v1954_v62  ;;  %v4810_v41 = vmul.f32 %v1954_v62, %v1954_v62  ;;  %v6055_v8 = vmax.f32 %v6054_v57, %v1954_v62  ;;  %17938 = vst [vmem:[#allocation22_spill] sm:$0xff] %v11907_v55 }
 0x193   : > { %v7317_v59 = vmin.f32 %v7316_v23, %v1954_v62  ;;  %2661 = vmatmul.mubr.bf16.gmra.mrb[120].mxu0 %v11907_v55  ;;  %v5197_v30 = vadd.f32 %v5196_v13, %v4781_v40  ;;  %v3749_v31 = vadd.f32 %v3748_v46, %v2067_v58  ;;  %v4812_v20 = vmul.f32 %v2067_v58, %v2067_v58  ;;  %v11912_v23 = vpop.f32.mrb[16].mxu0 }
 0x194   : > { %v6081_v39 = vmax.f32 %v6080_v10, %v2067_v58  ;;  %2774 = vmatmul.mubr.bf16.gmra.mrb[120].mxu1 %v11907_v55  ;;  %v5135_v44 = vadd.f32 %v5134_v18, %v4810_v41  ;;  %v7343_v50 = vmin.f32 %v7342_v22, %v2067_v58  ;;  %v3728_v51 = vadd.f32 %v3727_v33, %v1956_v2  ;;  %v11917_v10 = vpop.f32.mrb[16].mxu1  ;;  %v11919_v58 = vpop.f32.mrb[17].mxu0 }
 0x195   : > { %v4811_v38 = vmul.f32 %v1956_v2, %v1956_v2  ;;  %2670 = vmatprep.mubr.bf16.mxu0 %v17931_v4  ;;  %v5177_v49 = vadd.f32 %v5176_v26, %v4812_v20  ;;  %v6068_v45 = vmax.f32 %v6067_v28, %v1956_v2  ;;  %v7330_v27 = vmin.f32 %v7329_v48, %v1956_v2  ;;  %v11923_v2 = vpop.f32.mrb[17].mxu1  ;;  %v11925_v5 = vpop.f32.mrb[18].mxu0 }
 0x196   : > { %v3770_v57 = vadd.f32 %v3769_v7, %v2069_v35  ;;  %2783 = vmatprep.mubr.bf16.mxu1 %v17931_v4  ;;  %v4813_v13 = vmul.f32 %v2069_v35, %v2069_v35  ;;  %v6094_v46 = vmax.f32 %v6093_v12, %v2069_v35  ;;  %v11915_v9 = vmin.f32 %v7355_v14, %v2069_v35  ;;  %v11929_v35 = vpop.f32.mrb[18].mxu1 }
 0x197   : > { %v5156_v62 = vadd.f32 %v5155_v63, %v4811_v38  ;;  %v11921_v61 = vadd.f32 %v3707_v29, %v1958_v0  ;;  %v4842_v18 = vmul.f32 %v1958_v0, %v1958_v0  ;;  %v6056_v22 = vmax.f32 %v6055_v8, %v1958_v0  ;;  %v11931_v63 = vpop.f32.mrb[19].mxu0  ;;  %v11935_v41 = vpop.f32.mrb[19].mxu1 }
 0x198   : > { %v7318_v33 = vmin.f32 %v7317_v59, %v1958_v0  ;;  %v5198_v26 = vadd.f32 %v5197_v30, %v4813_v13  ;;  %v11927_v28 = vadd.f32 %v3749_v31, %v2071_v60  ;;  %v4844_v48 = vmul.f32 %v2071_v60, %v2071_v60  ;;  %v11944_v31 = vld [vmem:[#allocation6 + $0x38] sm:$0xff]  }
 0x199   : > { %v6082_v7 = vmax.f32 %v6081_v39, %v2071_v60  ;;  %v11933_v40 = vadd.f32 %v5135_v44, %v4842_v18  ;;  %v6057_v12 = vrot.slane %v6056_v22, 4  ;;  %v7344_v29 = vmin.f32 %v7343_v50, %v2071_v60  ;;  %17939 = vst [vmem:[#allocation23_spill] sm:$0xff] %v11944_v31 }
 0x19a   : > { %v7319_v14 = vrot.slane %v7318_v33, 4  ;;  %v11937_v0 = vadd.f32 %v5177_v49, %v4844_v48  ;;  %v11940_v59 = vadd.f32 %v3728_v51, %v11899_v3  ;;  %v4843_v30 = vmul.f32 %v11899_v3, %v11899_v3 }
 0x19b   : > { %v6083_v8 = vrot.slane %v6082_v7, 4  ;;  %2671 = vmatmul.mubr.bf16.gmra.mrb[124].mxu0 %v11944_v31  ;;  %v6058_v20 = vmax.f32 %v6056_v22, %v6057_v12  ;;  %v7345_v44 = vrot.slane %v7344_v29, 4  ;;  %v6069_v60 = vmax.f32 %v6068_v45, %v11899_v3  ;;  %v11957_v48 = vpop.f32.mrb[20].mxu0 }
 0x19c   : > { %v7320_v39 = vmin.f32 %v7318_v33, %v7319_v14  ;;  %2784 = vmatmul.mubr.bf16.gmra.mrb[124].mxu1 %v11944_v31  ;;  %2826 = vmatprep.mubr.bf16.mxu0 %v17931_v4  ;;  %v11950_v38 = vadd.f32 %v5156_v62, %v4843_v30  ;;  %v7331_v51 = vmin.f32 %v7330_v27, %v11899_v3  ;;  %v11962_v14 = vpop.f32.mrb[20].mxu1  ;;  %v11964_v3 = vpop.f32.mrb[21].mxu0 }
 0x19d   : > { %v6084_v50 = vmax.f32 %v6082_v7, %v6083_v8  ;;  %v11954_v49 = vadd.f32 %v3770_v57, %v11905_v21  ;;  %2939 = vmatprep.mubr.bf16.mxu1 %v17931_v4  ;;  %v6059_v13 = vrot.slane %v6058_v20, 2  ;;  %v7346_v22 = vmin.f32 %v7344_v29, %v7345_v44  ;;  %17940 = vst [vmem:[#allocation24_spill] sm:$0xff] %v11964_v3  ;;  %v11966_v6 = vpop.f32.mrb[21].mxu1  ;;  %v11968_v29 = vpop.f32.mrb[22].mxu0 }
 0x19e   : > { %v7321_v18 = vrot.slane %v7320_v39, 2  ;;  %v6070_v33 = vrot.slane %v6069_v60, 4  ;;  %v7332_v12 = vrot.slane %v7331_v51, 4  ;;  %v4845_v7 = vmul.f32 %v11905_v21, %v11905_v21  ;;  %v11972_v31 = vpop.f32.mrb[22].mxu1 }
 0x19f   : > { %v6085_v45 = vrot.slane %v6084_v50, 2  ;;  %v6095_v62 = vmax.f32 %v6094_v46, %v11905_v21  ;;  %v6060_v27 = vmax.f32 %v6058_v20, %v6059_v13  ;;  %v7347_v8 = vrot.slane %v7346_v22, 2  ;;  %v11974_v46 = vpop.f32.mrb[23].mxu0 }
 0x1a0   : > { %v7322_v57 = vmin.f32 %v7320_v39, %v7321_v18  ;;  %v6071_v30 = vmax.f32 %v6069_v60, %v6070_v33  ;;  %v7333_v24 = vmin.f32 %v7331_v51, %v7332_v12  ;;  %v11970_v32 = vadd.f32 %v5198_v26, %v4845_v7  ;;  %17941 = vst [vmem:[#allocation25_spill] sm:$0xff] %v11974_v46  ;;  %v11976_v39 = vpop.f32.mrb[23].mxu1  ;;  %v10898_v51 = vld [vmem:[#allocation6] sm:$0xff]  }
 0x1a1   : > { %v6086_v44 = vmax.f32 %v6084_v50, %v6085_v45  ;;  %v6096_v1 = vrot.slane %v6095_v62, 4  ;;  %v6061_v55 = vrot.slane %v6060_v27, 1  ;;  %v7348_v3 = vmin.f32 %v7346_v22, %v7347_v8  ;;  %17942 = vst [vmem:[#allocation26_spill] sm:$0xff] %v11976_v39 }
 0x1a2   : > { %v7323_v19 = vrot.slane %v7322_v57, 1  ;;  %v6072_v20 = vrot.slane %v6071_v30, 2  ;;  %v7334_v13 = vrot.slane %v7333_v24, 2  ;;  %v7357_v50 = vmin.f32 %v11915_v9, %v11905_v21 }
 0x1a3   : > { %v6087_v60 = vrot.slane %v6086_v44, 1  ;;  %v6097_v18 = vmax.f32 %v6095_v62, %v6096_v1  ;;  %2827 = vmatmul.mubr.bf16.vlgmr.msra.gmra.mrb[128].mxu0 %v10898_v51  ;;  %v6062_v26 = vmax.f32 %v6060_v27, %v6061_v55  ;;  %v7349_v45 = vrot.slane %v7348_v3, 1 }
 0x1a4   : > { %v7324_v33 = vmin.f32 %v7322_v57, %v7323_v19  ;;  %v6073_v12 = vmax.f32 %v6071_v30, %v6072_v20  ;;  %2940 = vmatmul.mubr.bf16.vlgmr.msra.gmra.mrb[128].mxu1 %v10898_v51  ;;  %v17943_v7 = vcombine.low %v11682_v36, %v11685_v15  ;;  %v7335_v8 = vmin.f32 %v7333_v24, %v7334_v13  ;;  %v11995_v15 = vpop.f32.mrb[24].mxu0 }
 0x1a5   : > { %v11983_v22 = vmax.f32 %v6086_v44, %v6087_v60  ;;  %v6098_v39 = vrot.slane %v6097_v18, 2  ;;  %v7358_v46 = vrot.slane %v7357_v50, 4  ;;  %v17944_v1 = vcombine.low %v11688_v37, %v11697_v16  ;;  %2836 = vmatprep.mubr.bf16.mxu0 %v17931_v4  ;;  %2949 = vmatprep.mubr.bf16.mxu1 %v17931_v4 }
 0x1a6   : > { %3021 = vmatpush1.bf16.msra.mxu0 %v17943_v7  ;;  %v11989_v21 = vmin.f32 %v7348_v3, %v7349_v45  ;;  %v6074_v19 = vrot.slane %v6073_v12, 1  ;;  %v3709_v55 = vadd.f32 %v11921_v61, %v11912_v23  ;;  %v4874_v36 = vmul.f32 %v11912_v23, %v11912_v23  ;;  %v12003_v3 = vpop.f32.mrb[24].mxu1  ;;  %v12005_v61 = vpop.f32.mrb[25].mxu0 }
 0x1a7   : > { %3134 = vmatpush1.bf16.msra.mxu1 %v17944_v1  ;;  %v17945_v24 = vcombine.high %v11700_v42, %v11703_v43  ;;  %v7336_v37 = vrot.slane %v7335_v8, 1  ;;  %v6099_v16 = vmax.f32 %v6097_v18, %v6098_v39  ;;  %v7359_v9 = vmin.f32 %v7357_v50, %v7358_v46  ;;  %v12015_v20 = vpop.f32.mrb[25].mxu1 }
 0x1a8   : > { %v3751_v62 = vadd.f32 %v11927_v28, %v11917_v10  ;;  %v17946_v27 = vcombine.high %v11713_v17, %v11716_v47  ;;  %v6075_v57 = vmax.f32 %v6073_v12, %v6074_v19  ;;  %v5137_v30 = vadd.f32 %v11933_v40, %v4874_v36  ;;  %v12017_v28 = vpop.f32.mrb[26].mxu0  ;;  %v12024_v50 = vpop.f32.mrb[26].mxu1 }
 0x1a9   : > { %3022 = vmatprep.subr.bf16.mxu0 %v17945_v24  ;;  %v4876_v44 = vmul.f32 %v11917_v10, %v11917_v10  ;;  %v3730_v46 = vadd.f32 %v11940_v59, %v11919_v58  ;;  %v17947_v39 = vcombine.low %v11700_v42, %v11703_v43  ;;  %v7337_v60 = vmin.f32 %v7335_v8, %v7336_v37  ;;  %v12026_v51 = vpop.f32.mrb[27].mxu0  ;;  %v12039_v8 = vpop.f32.mrb[27].mxu1 }
 0x1aa   : > { %3135 = vmatprep.subr.bf16.mxu1 %v17946_v27  ;;  %v6100_v13 = vrot.slane %v6099_v16, 1  ;;  %v7360_v18 = vrot.slane %v7359_v9, 2  ;;  %v4875_v40 = vmul.f32 %v11919_v58, %v11919_v58  ;;  %v17948_v59 = vcombine.low %v11713_v17, %v11716_v47 }
 0x1ab   : > { %3023 = vmatpush1.bf16.msra.mxu0 %v17947_v39  ;;  %v17949_v45 = vcombine.high %v11727_v52, %v11730_v53  ;;  %v6946_v42 = vcombine.low %v6062_v26, %v6075_v57  ;;  %v5179_v43 = vadd.f32 %v11937_v0, %v4876_v44  ;;  %v3772_v12 = vadd.f32 %v11954_v49, %v11923_v2  ;;  %v10899_v26 = vld [vmem:[#allocation6 + $0x8] sm:$0xff]   ;;  %v12065_v44 = vpop.f32.mrb[28].mxu0 }
 0x1ac   : > { %3136 = vmatpush1.bf16.msra.mxu1 %v17948_v59  ;;  %v4877_v7 = vmul.f32 %v11923_v2, %v11923_v2  ;;  %v17950_v1 = vcombine.high %v11733_v54, %v11743_v56  ;;  %v8208_v17 = vcombine.low %v7324_v33, %v7337_v60  ;;  %v6101_v47 = vmax.f32 %v6099_v16, %v6100_v13 }
 0x1ad   : > { %3024 = vmatprep.subr.bf16.mxu0 %v17949_v45  ;;  %v7361_v19 = vmin.f32 %v7359_v9, %v7360_v18  ;;  %v5158_v36 = vadd.f32 %v11950_v38, %v4875_v40  ;;  %2837 = vmatmul.mubr.bf16.gmra.mrb[132].mxu0 %v10899_v26  ;;  %v12046_v0 = vrot.slane %v6946_v42, %v11677_v34 }
 0x1ae   : > { %3137 = vmatprep.subr.bf16.mxu1 %v17950_v1  ;;  %v5200_v49 = vadd.f32 %v11970_v32, %v4877_v7  ;;  %v3710_v24 = vadd.f32 %v3709_v55, %v11925_v5  ;;  %v4906_v37 = vmul.f32 %v11925_v5, %v11925_v5  ;;  %2950 = vmatmul.mubr.bf16.gmra.mrb[132].mxu1 %v10899_v26  ;;  %v10900_v26 = vld [vmem:[#allocation6 + $0x10] sm:$0xff]  }
 0x1af   : > { %v12053_v27 = vrot.slane %v8208_v17, %v11677_v34  ;;  %v6947_v33 = vcombine.low %v11983_v22, %v6101_v47  ;;  %v7362_v16 = vrot.slane %v7361_v19, 1  ;;  %v6466_v38 = vmax.f32 %v11912_v23, %v11925_v5  ;;  %2846 = vmatprep.mubr.bf16.mxu0 %v17931_v4  ;;  %2959 = vmatprep.mubr.bf16.mxu1 %v17931_v4 }
 0x1b0   : > { %v5138_v32 = vadd.f32 %v5137_v30, %v4906_v37  ;;  %v7728_v55 = vmin.f32 %v11912_v23, %v11925_v5  ;;  %v3752_v9 = vadd.f32 %v3751_v62, %v11929_v35  ;;  %v4908_v57 = vmul.f32 %v11929_v35, %v11929_v35  ;;  %v12077_v5 = vpop.f32.mrb[28].mxu1  ;;  %v12079_v62 = vpop.f32.mrb[29].mxu0 }
 0x1b1   : > { %v17951_v22 = vcombine.low %v11727_v52, %v11730_v53  ;;  %v12071_v39 = vrot.slane %v6947_v33, %v11677_v34  ;;  %v7363_v60 = vmin.f32 %v7361_v19, %v7362_v16  ;;  %v6492_v30 = vmax.f32 %v11917_v10, %v11929_v35  ;;  %v12089_v59 = vpop.f32.mrb[29].mxu1 }
 0x1b2   : > { %v7754_v23 = vmin.f32 %v11917_v10, %v11929_v35  ;;  %v17952_v13 = vcombine.low %v11733_v54, %v11743_v56  ;;  %v5180_v52 = vadd.f32 %v5179_v43, %v4908_v57  ;;  %v3731_v53 = vadd.f32 %v3730_v46, %v11931_v63  ;;  %v12091_v10 = vpop.f32.mrb[30].mxu0  ;;  %v12102_v42 = vpop.f32.mrb[30].mxu1 }
 0x1b3   : > { %3025 = vmatpush1.bf16.msra.mxu0 %v17951_v22  ;;  %v4907_v18 = vmul.f32 %v11931_v63, %v11931_v63  ;;  %v6479_v40 = vmax.f32 %v11919_v58, %v11931_v63  ;;  %v17953_v35 = vcombine.high %v11797_v25, %v11800_v11  ;;  %v8209_v56 = vcombine.low %v11989_v21, %v7363_v60  ;;  %v12104_v43 = vpop.f32.mrb[31].mxu0  ;;  %v12112_v21 = vpop.f32.mrb[31].mxu1 }
 0x1b4   : > { %3138 = vmatpush1.bf16.msra.mxu1 %v17952_v13  ;;  %v7741_v46 = vmin.f32 %v11919_v58, %v11931_v63  ;;  %v3773_v45 = vadd.f32 %v3772_v12, %v11935_v41  ;;  %v4909_v1 = vmul.f32 %v11935_v41, %v11935_v41  ;;  %v6505_v17 = vmax.f32 %v11923_v2, %v11935_v41 }
 0x1b5   : > { %3026 = vmatprep.subr.bf16.mxu0 %v17953_v35  ;;  %v5159_v7 = vadd.f32 %v5158_v36, %v4907_v18  ;;  %v7767_v47 = vmin.f32 %v11923_v2, %v11935_v41  ;;  %v17954_v58 = vcombine.low %v11797_v25, %v11800_v11  ;;  %v12118_v63 = vrot.slane %v8209_v56, %v11677_v34 }
 0x1b6   : > { %v3711_v12 = vadd.f32 %v3710_v24, %v11957_v48  ;;  %v4938_v19 = vmul.f32 %v11957_v48, %v11957_v48  ;;  %v6467_v36 = vmax.f32 %v6466_v38, %v11957_v48  ;;  %2847 = vmatmul.mubr.bf16.gmra.mrb[136].mxu0 %v10900_v26  ;;  %v5201_v37 = vadd.f32 %v5200_v49, %v4909_v1  ;;  %v17955_v49 = vld [vmem:[#allocation24_spill] sm:$0xff] }
 0x1b7   : > { %3027 = vmatpush1.bf16.msra.mxu0 %v17954_v58  ;;  %v7729_v2 = vmin.f32 %v7728_v55, %v11957_v48  ;;  %v3753_v41 = vadd.f32 %v3752_v9, %v11962_v14  ;;  %v4940_v25 = vmul.f32 %v11962_v14, %v11962_v14  ;;  %2960 = vmatmul.mubr.bf16.gmra.mrb[136].mxu1 %v10900_v26  ;;  %v12137_v9 = vpop.f32.mrb[32].mxu0  ;;  %v17956_v26 = vld [vmem:[#allocation25_spill] sm:$0xff] }
 0x1b8   : > { %v5139_v24 = vadd.f32 %v5138_v32, %v4938_v19  ;;  %v6493_v33 = vmax.f32 %v6492_v30, %v11962_v14  ;;  %v7755_v16 = vmin.f32 %v7754_v23, %v11962_v14  ;;  %2856 = vmatprep.mubr.bf16.mxu0 %v17931_v4  ;;  %v3732_v57 = vadd.f32 %v3731_v53, %v17955_v49  ;;  %v12145_v30 = vpop.f32.mrb[32].mxu1  ;;  %v12147_v23 = vpop.f32.mrb[33].mxu0 }
 0x1b9   : > { %v5181_v38 = vadd.f32 %v5180_v52, %v4940_v25  ;;  %v4939_v48 = vmul.f32 %v17955_v49, %v17955_v49  ;;  %v6480_v55 = vmax.f32 %v6479_v40, %v17955_v49  ;;  %2969 = vmatprep.mubr.bf16.mxu1 %v17931_v4  ;;  %v7742_v32 = vmin.f32 %v7741_v46, %v17955_v49  ;;  %v12153_v40 = vpop.f32.mrb[33].mxu1  ;;  %v12155_v35 = vpop.f32.mrb[34].mxu0 }
 0x1ba   : > { %v3774_v22 = vadd.f32 %v3773_v45, %v11966_v6  ;;  %v4941_v14 = vmul.f32 %v11966_v6, %v11966_v6  ;;  %v6506_v60 = vmax.f32 %v6505_v17, %v11966_v6  ;;  %v7768_v52 = vmin.f32 %v7767_v47, %v11966_v6  ;;  %v12160_v17 = vpop.f32.mrb[34].mxu1 }
 0x1bb   : > { %v5160_v13 = vadd.f32 %v5159_v7, %v4939_v48  ;;  %v3712_v53 = vadd.f32 %v3711_v12, %v11968_v29  ;;  %v4970_v18 = vmul.f32 %v11968_v29, %v11968_v29  ;;  %v6468_v46 = vmax.f32 %v6467_v36, %v11968_v29  ;;  %v12162_v7 = vpop.f32.mrb[35].mxu0  ;;  %v12168_v19 = vpop.f32.mrb[35].mxu1 }
 0x1bc   : > { %v5202_v56 = vadd.f32 %v5201_v37, %v4941_v14  ;;  %v7730_v45 = vmin.f32 %v7729_v2, %v11968_v29  ;;  %v3754_v1 = vadd.f32 %v3753_v41, %v11972_v31  ;;  %v4972_v47 = vmul.f32 %v11972_v31, %v11972_v31  ;;  %v10901_v41 = vld [vmem:[#allocation6 + $0x18] sm:$0xff]  }
 0x1bd   : > { %v5140_v6 = vadd.f32 %v5139_v24, %v4970_v18  ;;  %v6494_v58 = vmax.f32 %v6493_v33, %v11972_v31  ;;  %v7756_v12 = vmin.f32 %v7755_v16, %v11972_v31  ;;  %v3733_v36 = vadd.f32 %v3732_v57, %v17956_v26  ;;  %v17957_v24 = vld [vmem:[#allocation26_spill] sm:$0xff]  ;;  %v12187_v18 = vpop.f32.mrb[36].mxu0 }
 0x1be   : > { %v4971_v29 = vmul.f32 %v17956_v26, %v17956_v26  ;;  %v6481_v37 = vmax.f32 %v6480_v55, %v17956_v26  ;;  %v7743_v2 = vmin.f32 %v7742_v32, %v17956_v26  ;;  %2857 = vmatmul.mubr.bf16.gmra.mrb[140].mxu0 %v10901_v41  ;;  %v5182_v25 = vadd.f32 %v5181_v38, %v4972_v47  ;;  %v12194_v47 = vpop.f32.mrb[36].mxu1 }
 0x1bf   : > { %v3775_v49 = vadd.f32 %v3774_v22, %v17957_v24  ;;  %v4973_v33 = vmul.f32 %v17957_v24, %v17957_v24  ;;  %v6507_v31 = vmax.f32 %v6506_v60, %v17957_v24  ;;  %2970 = vmatmul.mubr.bf16.gmra.mrb[140].mxu1 %v10901_v41  ;;  %v7769_v57 = vmin.f32 %v7768_v52, %v17957_v24 }
 0x1c0   : > { %v5161_v16 = vadd.f32 %v5160_v13, %v4971_v29  ;;  %v3713_v48 = vadd.f32 %v3712_v53, %v11995_v15  ;;  %v5002_v55 = vmul.f32 %v11995_v15, %v11995_v15  ;;  %2866 = vmatprep.mubr.bf16.mxu0 %v17931_v4  ;;  %v6469_v38 = vmax.f32 %v6468_v46, %v11995_v15 }
 0x1c1   : > { %v5203_v32 = vadd.f32 %v5202_v56, %v4973_v33  ;;  %v7731_v22 = vmin.f32 %v7730_v45, %v11995_v15  ;;  %v3755_v14 = vadd.f32 %v3754_v1, %v12003_v3  ;;  %2979 = vmatprep.mubr.bf16.mxu1 %v17931_v4  ;;  %v5004_v13 = vmul.f32 %v12003_v3, %v12003_v3  ;;  %v12196_v56 = vpop.f32.mrb[37].mxu0 }
 0x1c2   : > { %v5141_v60 = vadd.f32 %v5140_v6, %v5002_v55  ;;  %v6495_v52 = vmax.f32 %v6494_v58, %v12003_v3  ;;  %v7757_v53 = vmin.f32 %v7756_v12, %v12003_v3  ;;  %v3734_v15 = vadd.f32 %v3733_v36, %v12005_v61  ;;  %v12203_v6 = vpop.f32.mrb[37].mxu1  ;;  %v12205_v26 = vpop.f32.mrb[38].mxu0 }
 0x1c3   : > { %v5003_v46 = vmul.f32 %v12005_v61, %v12005_v61  ;;  %v6482_v45 = vmax.f32 %v6481_v37, %v12005_v61  ;;  %v7744_v1 = vmin.f32 %v7743_v2, %v12005_v61  ;;  %v5183_v58 = vadd.f32 %v5182_v25, %v5004_v13  ;;  %v12211_v36 = vpop.f32.mrb[38].mxu1  ;;  %v12213_v41 = vpop.f32.mrb[39].mxu0  ;;  %v10902_v13 = vld [vmem:[#allocation6 + $0x20] sm:$0xff]  }
 0x1c4   : > { %v3776_v3 = vadd.f32 %v3775_v49, %v12015_v20  ;;  %v5005_v12 = vmul.f32 %v12015_v20, %v12015_v20  ;;  %v6508_v29 = vmax.f32 %v6507_v31, %v12015_v20  ;;  %v7770_v37 = vmin.f32 %v7769_v57, %v12015_v20  ;;  %v12219_v25 = vpop.f32.mrb[39].mxu1 }
 0x1c5   : > { %v5162_v24 = vadd.f32 %v5161_v16, %v5003_v46  ;;  %v3714_v61 = vadd.f32 %v3713_v48, %v12017_v28  ;;  %v5034_v2 = vmul.f32 %v12017_v28, %v12017_v28  ;;  %v6470_v33 = vmax.f32 %v6469_v38, %v12017_v28 }
 0x1c6   : > { %v5204_v49 = vadd.f32 %v5203_v32, %v5005_v12  ;;  %v7732_v55 = vmin.f32 %v7731_v22, %v12017_v28  ;;  %v3756_v31 = vadd.f32 %v3755_v14, %v12024_v50  ;;  %2867 = vmatmul.mubr.bf16.gmra.mrb[144].mxu0 %v10902_v13  ;;  %v5036_v20 = vmul.f32 %v12024_v50, %v12024_v50 }
 0x1c7   : > { %v5142_v11 = vadd.f32 %v5141_v60, %v5034_v2  ;;  %v6496_v16 = vmax.f32 %v6495_v52, %v12024_v50  ;;  %v7758_v57 = vmin.f32 %v7757_v53, %v12024_v50  ;;  %2980 = vmatmul.mubr.bf16.gmra.mrb[144].mxu1 %v10902_v13  ;;  %v3735_v48 = vadd.f32 %v3734_v15, %v12026_v51  ;;  %v12238_v52 = vpop.f32.mrb[40].mxu0 }
 0x1c8   : > { %v5035_v32 = vmul.f32 %v12026_v51, %v12026_v51  ;;  %v6483_v28 = vmax.f32 %v6482_v45, %v12026_v51  ;;  %v7745_v38 = vmin.f32 %v7744_v1, %v12026_v51  ;;  %2876 = vmatprep.mubr.bf16.mxu0 %v17931_v4  ;;  %v5184_v22 = vadd.f32 %v5183_v58, %v5036_v20  ;;  %v12245_v45 = vpop.f32.mrb[40].mxu1  ;;  %v12247_v1 = vpop.f32.mrb[41].mxu0 }
 0x1c9   : > { %v3777_v14 = vadd.f32 %v3776_v3, %v12039_v8  ;;  %v5037_v60 = vmul.f32 %v12039_v8, %v12039_v8  ;;  %v6509_v50 = vmax.f32 %v6508_v29, %v12039_v8  ;;  %2989 = vmatprep.mubr.bf16.mxu1 %v17931_v4  ;;  %v7771_v15 = vmin.f32 %v7770_v37, %v12039_v8  ;;  %v12252_v2 = vpop.f32.mrb[41].mxu1 }
 0x1ca   : > { %v5163_v53 = vadd.f32 %v5162_v24, %v5035_v32  ;;  %v3715_v46 = vadd.f32 %v3714_v61, %v12065_v44  ;;  %v5066_v51 = vmul.f32 %v12065_v44, %v12065_v44  ;;  %17958 = vst [vmem:[#allocation24_spill] sm:$0xff] %v12247_v1  ;;  %v6471_v3 = vmax.f32 %v6470_v33, %v12065_v44  ;;  %v12254_v24 = vpop.f32.mrb[42].mxu0  ;;  %v12260_v20 = vpop.f32.mrb[42].mxu1  ;;  %v17964_v32 = vld [vmem:[#allocation21_spill] sm:$0xff]  ;;  %v17972_v1 = vld [vmem:[#allocation22_spill] sm:$0xff] }
 0x1cb   : > { %v5205_v58 = vadd.f32 %v5204_v49, %v5037_v60  ;;  %v7733_v12 = vmin.f32 %v7732_v55, %v12065_v44  ;;  %v3757_v29 = vadd.f32 %v3756_v31, %v12077_v5  ;;  %17959 = vst [vmem:[#allocation25_spill] sm:$0xff] %v12252_v2  ;;  %17960 = vst [vmem:[#allocation26_spill] sm:$0xff] %v12254_v24  ;;  %v12262_v49 = vpop.f32.mrb[43].mxu0  ;;  %v12275_v31 = vpop.f32.mrb[43].mxu1 }
 0x1cc   : > { %v5143_v8 = vadd.f32 %v5142_v11, %v5066_v51  ;;  %v5068_v37 = vmul.f32 %v12077_v5, %v12077_v5  ;;  %v6497_v61 = vmax.f32 %v6496_v16, %v12077_v5  ;;  %v7759_v13 = vmin.f32 %v7758_v57, %v12077_v5  ;;  %17961 = vst [vmem:[#allocation27_spill] sm:$0xff] %v12260_v20 }
 0x1cd   : > { %17962 = vst [vmem:[#allocation28_spill] sm:$0xff] %v12262_v49  ;;  %v12265_v44 = vadd.f32 %v3735_v48, %v12079_v62  ;;  %v5067_v33 = vmul.f32 %v12079_v62, %v12079_v62  ;;  %v12270_v55 = vmax.f32 %v6483_v28, %v12079_v62  ;;  %v12273_v11 = vmin.f32 %v7745_v38, %v12079_v62 }
 0x1ce   : > { %17963 = vst [vmem:[#allocation29_spill] sm:$0xff] %v12275_v31  ;;  %v5185_v16 = vadd.f32 %v5184_v22, %v5068_v37  ;;  %v12278_v5 = vadd.f32 %v3777_v14, %v12089_v59  ;;  %v5069_v57 = vmul.f32 %v12089_v59, %v12089_v59  ;;  %v12283_v48 = vmax.f32 %v6509_v50, %v12089_v59  ;;  %v12304_v37 = vpop.f32.mrb[44].mxu0 }
 0x1cf   : > { %2877 = vmatmul.mubr.bf16.gmra.mrb[148].mxu0 %v17964_v32  ;;  %v12286_v60 = vadd.f32 %v5163_v53, %v5067_v33  ;;  %v12289_v28 = vmin.f32 %v7771_v15, %v12089_v59  ;;  %v3716_v62 = vadd.f32 %v3715_v46, %v12091_v10  ;;  %v5098_v38 = vmul.f32 %v12091_v10, %v12091_v10 }
 0x1d0   : > { %2990 = vmatmul.mubr.bf16.gmra.mrb[148].mxu1 %v17964_v32  ;;  %v12295_v22 = vadd.f32 %v5205_v58, %v5069_v57  ;;  %v6472_v14 = vmax.f32 %v6471_v3, %v12091_v10  ;;  %v7734_v50 = vmin.f32 %v7733_v12, %v12091_v10  ;;  %v3758_v51 = vadd.f32 %v3757_v29, %v12102_v42  ;;  %v12308_v12 = vpop.f32.mrb[44].mxu1  ;;  %v12310_v29 = vpop.f32.mrb[45].mxu0 }
 0x1d1   : > { %2886 = vmatprep.mubr.bf16.mxu0 %v17931_v4  ;;  %v3717_v53 = vrot.slane %v3716_v62, 4  ;;  %v5144_v59 = vadd.f32 %v5143_v8, %v5098_v38  ;;  %v5100_v15 = vmul.f32 %v12102_v42, %v12102_v42  ;;  %v6498_v46 = vmax.f32 %v6497_v61, %v12102_v42  ;;  %17965 = vst [vmem:[#allocation21_spill] sm:$0xff] %v12304_v37  ;;  %v12312_v54 = vpop.f32.mrb[45].mxu1  ;;  %v12314_v61 = vpop.f32.mrb[46].mxu0 }
 0x1d2   : > { %2999 = vmatprep.mubr.bf16.mxu1 %v17931_v4  ;;  %v6473_v58 = vrot.slane %v6472_v14, 4  ;;  %v7735_v33 = vrot.slane %v7734_v50, 4  ;;  %v3759_v3 = vrot.slane %v3758_v51, 4  ;;  %v7760_v10 = vmin.f32 %v7759_v13, %v12102_v42  ;;  %17966 = vst [vmem:[#allocation30_spill] sm:$0xff] %v12308_v12  ;;  %17967 = vst [vmem:[#allocation31_spill] sm:$0xff] %v12310_v29  ;;  %v12316_v24 = vpop.f32.mrb[46].mxu1 }
 0x1d3   : > { %v3718_v57 = vadd.f32 %v3717_v53, %v3716_v62  ;;  %v5145_v8 = vrot.slane %v5144_v59, 4  ;;  %v5186_v32 = vadd.f32 %v5185_v16, %v5100_v15  ;;  %v6499_v38 = vrot.slane %v6498_v46, 4  ;;  %17968 = vst [vmem:[#allocation32_spill] sm:$0xff] %v12312_v54  ;;  %17969 = vst [vmem:[#allocation33_spill] sm:$0xff] %v12316_v24  ;;  %v12318_v2 = vpop.f32.mrb[47].mxu0  ;;  %v12320_v62 = vpop.f32.mrb[47].mxu1 }
 0x1d4   : > { %v6474_v37 = vmax.f32 %v6472_v14, %v6473_v58  ;;  %v7736_v31 = vmin.f32 %v7734_v50, %v7735_v33  ;;  %v3760_v49 = vadd.f32 %v3759_v3, %v3758_v51  ;;  %v7761_v20 = vrot.slane %v7760_v10, 4  ;;  %17970 = vst [vmem:[#allocation34_spill] sm:$0xff] %v12318_v2  ;;  %17971 = vst [vmem:[#allocation35_spill] sm:$0xff] %v12320_v62  ;;  %v12328_v2 = vpop.f32.mrb[48].mxu1 }
 0x1d5   : > { %v3719_v42 = vrot.slane %v3718_v57, 2  ;;  %v5146_v13 = vadd.f32 %v5145_v8, %v5144_v59  ;;  %v5187_v12 = vrot.slane %v5186_v32, 4  ;;  %v6500_v29 = vmax.f32 %v6498_v46, %v6499_v38  ;;  %17974 = vst [vmem:[#allocation36_spill] sm:$0xff] %v12328_v2 }
 0x1d6   : > { %v6475_v16 = vrot.slane %v6474_v37, 2  ;;  %v7737_v53 = vrot.slane %v7736_v31, 2  ;;  %v3761_v15 = vrot.slane %v3760_v49, 2  ;;  %v7762_v54 = vmin.f32 %v7760_v10, %v7761_v20  ;;  %v12326_v10 = vpop.f32.mrb[48].mxu0 }
 0x1d7   : > { %2887 = vmatmul.mubr.bf16.gmra.mrb[152].mxu0 %v17972_v1  ;;  %v3720_v14 = vadd.f32 %v3719_v42, %v3718_v57  ;;  %v5147_v50 = vrot.slane %v5146_v13, 2  ;;  %v5188_v51 = vadd.f32 %v5187_v12, %v5186_v32  ;;  %v6501_v58 = vrot.slane %v6500_v29, 2  ;;  %17973 = vst [vmem:[#allocation22_spill] sm:$0xff] %v12326_v10 }
 0x1d8   : > { %3000 = vmatmul.mubr.bf16.gmra.mrb[152].mxu1 %v17972_v1  ;;  %2896 = vmatprep.mubr.bf16.mxu0 %v17931_v4  ;;  %v6476_v33 = vmax.f32 %v6474_v37, %v6475_v16  ;;  %v7738_v59 = vmin.f32 %v7736_v31, %v7737_v53  ;;  %v3762_v3 = vadd.f32 %v3761_v15, %v3760_v49  ;;  %v7763_v46 = vrot.slane %v7762_v54, 2  ;;  %v12330_v1 = vpop.f32.mrb[49].mxu0  ;;  %v12334_v53 = vpop.f32.mrb[49].mxu1 }
 0x1d9   : > { %3009 = vmatprep.mubr.bf16.mxu1 %v17931_v4  ;;  %v3721_v8 = vrot.slane %v3720_v14, 1  ;;  %v5148_v38 = vadd.f32 %v5147_v50, %v5146_v13  ;;  %v5189_v62 = vrot.slane %v5188_v51, 2  ;;  %v6502_v20 = vmax.f32 %v6500_v29, %v6501_v58  ;;  %17975 = vst [vmem:[#allocation37_spill] sm:$0xff] %v12330_v1  ;;  %17976 = vst [vmem:[#allocation38_spill] sm:$0xff] %v12334_v53  ;;  %v12336_v13 = vpop.f32.mrb[50].mxu0  ;;  %v12344_v58 = vpop.f32.mrb[50].mxu1 }
 0x1da   : > { %v6477_v57 = vrot.slane %v6476_v33, 1  ;;  %v7739_v42 = vrot.slane %v7738_v59, 1  ;;  %v3763_v12 = vrot.slane %v3762_v3, 1  ;;  %v7764_v32 = vmin.f32 %v7762_v54, %v7763_v46  ;;  %17977 = vst [vmem:[#allocation39_spill] sm:$0xff] %v12336_v13  ;;  %17978 = vst [vmem:[#allocation40_spill] sm:$0xff] %v12344_v58  ;;  %v12346_v46 = vpop.f32.mrb[51].mxu0 }
 0x1db   : > { %v12332_v37 = vadd.f32 %v3721_v8, %v3720_v14  ;;  %v5149_v49 = vrot.slane %v5148_v38, 1  ;;  %v5190_v31 = vadd.f32 %v5189_v62, %v5188_v51  ;;  %v6503_v16 = vrot.slane %v6502_v20, 1  ;;  %17979 = vst [vmem:[#allocation41_spill] sm:$0xff] %v12346_v46  ;;  %v12354_v13 = vpop.f32.mrb[51].mxu1 }
 0x1dc   : > { %v12338_v29 = vmax.f32 %v6476_v33, %v6477_v57  ;;  %v12340_v15 = vmin.f32 %v7738_v59, %v7739_v42  ;;  %v12342_v50 = vadd.f32 %v3763_v12, %v3762_v3  ;;  %v7765_v54 = vrot.slane %v7764_v32, 1  ;;  %17980 = vst [vmem:[#allocation42_spill] sm:$0xff] %v12354_v13  ;;  %v17981_v57 = vld [vmem:[#allocation23_spill] sm:$0xff] }
 0x1dd   : > { %v12348_v14 = vadd.f32 %v5149_v49, %v5148_v38  ;;  %v5191_v8 = vrot.slane %v5190_v31, 1  ;;  %v12350_v62 = vmax.f32 %v6502_v20, %v6503_v16  ;;  %v3737_v51 = vadd.f32 %v12265_v44, %v12104_v43 }
 0x1de   : > { %v12356_v33 = vmin.f32 %v7764_v32, %v7765_v54  ;;  %v5099_v59 = vmul.f32 %v12104_v43, %v12104_v43  ;;  %v6485_v3 = vmax.f32 %v12270_v55, %v12104_v43  ;;  %v7747_v38 = vmin.f32 %v12273_v11, %v12104_v43  ;;  %v12380_v54 = vpop.f32.mrb[52].mxu0 }
 0x1df   : > { %2897 = vmatmul.mubr.bf16.gmra.mrb[156].mxu0 %v17981_v57  ;;  %v12365_v20 = vadd.f32 %v5191_v8, %v5190_v31  ;;  %v3738_v42 = vrot.slane %v3737_v51, 4  ;;  %v3779_v44 = vadd.f32 %v12278_v5, %v12112_v21  ;;  %v5101_v12 = vmul.f32 %v12112_v21, %v12112_v21  ;;  %17982 = vst [vmem:[#allocation23_spill] sm:$0xff] %v12380_v54  ;;  %v12384_v46 = vpop.f32.mrb[53].mxu0 }
 0x1e0   : > { %3010 = vmatmul.mubr.bf16.gmra.mrb[156].mxu1 %v17981_v57  ;;  %3052 = vmatprep.mubr.bf16.mxu0 %v17931_v4  ;;  %v5165_v55 = vadd.f32 %v12286_v60, %v5099_v59  ;;  %v6486_v32 = vrot.slane %v6485_v3, 4  ;;  %v7748_v49 = vrot.slane %v7747_v38, 4  ;;  %v6511_v43 = vmax.f32 %v12283_v48, %v12112_v21  ;;  %v12382_v59 = vpop.f32.mrb[52].mxu1  ;;  %17984 = vst [vmem:[#allocation44_spill] sm:$0xff] %v12384_v46 }
 0x1e1   : > { %3165 = vmatprep.mubr.bf16.mxu1 %v17931_v4  ;;  %v3739_v11 = vadd.f32 %v3738_v42, %v3737_v51  ;;  %v3780_v31 = vrot.slane %v3779_v44, 4  ;;  %v5207_v5 = vadd.f32 %v12295_v22, %v5101_v12  ;;  %v7773_v16 = vmin.f32 %v12289_v28, %v12112_v21  ;;  %17983 = vst [vmem:[#allocation43_spill] sm:$0xff] %v12382_v59  ;;  %v12386_v42 = vpop.f32.mrb[53].mxu1  ;;  %v12388_v22 = vpop.f32.mrb[54].mxu0 }
 0x1e2   : > { %v5166_v8 = vrot.slane %v5165_v55, 4  ;;  %v6487_v57 = vmax.f32 %v6485_v3, %v6486_v32  ;;  %v7749_v13 = vmin.f32 %v7747_v38, %v7748_v49  ;;  %v6512_v60 = vrot.slane %v6511_v43, 4  ;;  %17985 = vst [vmem:[#allocation45_spill] sm:$0xff] %v12386_v42  ;;  %17986 = vst [vmem:[#allocation46_spill] sm:$0xff] %v12388_v22  ;;  %v12390_v53 = vpop.f32.mrb[54].mxu1  ;;  %v12392_v3 = vpop.f32.mrb[55].mxu0 }
 0x1e3   : > { %v3740_v48 = vrot.slane %v3739_v11, 2  ;;  %v3781_v58 = vadd.f32 %v3780_v31, %v3779_v44  ;;  %v5208_v4 = vrot.slane %v5207_v5, 4  ;;  %v7774_v51 = vrot.slane %v7773_v16, 4  ;;  %17987 = vst [vmem:[#allocation47_spill] sm:$0xff] %v12390_v53  ;;  %17988 = vst [vmem:[#allocation48_spill] sm:$0xff] %v12392_v3  ;;  %v12394_v59 = vpop.f32.mrb[55].mxu1 }
 0x1e4   : > { %v5167_v12 = vadd.f32 %v5166_v8, %v5165_v55  ;;  %v6488_v21 = vrot.slane %v6487_v57, 2  ;;  %v7750_v28 = vrot.slane %v7749_v13, 2  ;;  %v6513_v54 = vmax.f32 %v6511_v43, %v6512_v60 }
 0x1e5   : > { %v3741_v38 = vadd.f32 %v3740_v48, %v3739_v11  ;;  %v3782_v32 = vrot.slane %v3781_v58, 2  ;;  %v5209_v49 = vadd.f32 %v5208_v4, %v5207_v5  ;;  %v7775_v46 = vmin.f32 %v7773_v16, %v7774_v51  ;;  %v12396_v4 = vpop.f32.mrb[56].mxu0 }
 0x1e6   : > { %v5168_v44 = vrot.slane %v5167_v12, 2  ;;  %v6489_v31 = vmax.f32 %v6487_v57, %v6488_v21  ;;  %v7751_v1 = vmin.f32 %v7749_v13, %v7750_v28  ;;  %v6514_v42 = vrot.slane %v6513_v54, 2  ;;  %v12398_v13 = vpop.f32.mrb[56].mxu1  ;;  %v12400_v21 = vpop.f32.mrb[57].mxu0 }
 0x1e7   : > { %v3742_v2 = vrot.slane %v3741_v38, 1  ;;  %v3783_v22 = vadd.f32 %v3782_v32, %v3781_v58  ;;  %v5210_v55 = vrot.slane %v5209_v49, 2  ;;  %v7776_v8 = vrot.slane %v7775_v46, 2 }
 0x1e8   : > { %v5169_v10 = vadd.f32 %v5168_v44, %v5167_v12  ;;  %v6490_v43 = vrot.slane %v6489_v31, 1  ;;  %v7752_v60 = vrot.slane %v7751_v1, 1  ;;  %v6515_v53 = vmax.f32 %v6513_v54, %v6514_v42  ;;  %v12405_v42 = vpop.f32.mrb[58].mxu0 }
 0x1e9   : > { %v3743_v24 = vadd.f32 %v3742_v2, %v3741_v38  ;;  %v3784_v3 = vrot.slane %v3783_v22, 1  ;;  %v5211_v11 = vadd.f32 %v5210_v55, %v5209_v49  ;;  %v7777_v48 = vmin.f32 %v7775_v46, %v7776_v8  ;;  %v12403_v2 = vpop.f32.mrb[57].mxu1  ;;  %v12411_v44 = vpop.f32.mrb[59].mxu0 }
 0x1ea   : > { %v5170_v5 = vrot.slane %v5169_v10, 1  ;;  %v6491_v16 = vmax.f32 %v6489_v31, %v6490_v43  ;;  %v7753_v51 = vmin.f32 %v7751_v1, %v7752_v60  ;;  %v6516_v57 = vrot.slane %v6515_v53, 1  ;;  %v12409_v49 = vpop.f32.mrb[58].mxu1 }
 0x1eb   : > { %v4406_v58 = vcombine.low %v12332_v37, %v3743_v24  ;;  %v3785_v12 = vadd.f32 %v3784_v3, %v3783_v22  ;;  %v5212_v28 = vrot.slane %v5211_v11, 1  ;;  %v7778_v54 = vrot.slane %v7777_v48, 1  ;;  %v17989_v24 = vld [vmem:[#allocation18_spill] sm:$0xff]  ;;  %v12415_v55 = vpop.f32.mrb[59].mxu1 }
 0x1ec   : > { %v5171_v46 = vadd.f32 %v5170_v5, %v5169_v10  ;;  %v7082_v38 = vcombine.low %v12338_v29, %v6491_v16  ;;  %v8344_v1 = vcombine.low %v12340_v15, %v7753_v51  ;;  %v6517_v32 = vmax.f32 %v6515_v53, %v6516_v57  ;;  %v12436_v51 = vpop.f32.mrb[60].mxu0 }
 0x1ed   : > { %v4416_v37 = vrot.slane %v4406_v58, %v17989_v24  ;;  %v4407_v22 = vcombine.low %v12342_v50, %v3785_v12  ;;  %v5213_v3 = vadd.f32 %v5212_v28, %v5211_v11  ;;  %v7779_v31 = vmin.f32 %v7777_v48, %v7778_v54  ;;  %v12444_v54 = vpop.f32.mrb[60].mxu1 }
 0x1ee   : > { %v5834_v10 = vcombine.low %v12348_v14, %v5171_v46  ;;  %v7090_v29 = vrot.slane %v7082_v38, %v11677_v34  ;;  %v8352_v53 = vrot.slane %v8344_v1, %v11677_v34  ;;  %v7083_v15 = vcombine.low %v12350_v62, %v6517_v32  ;;  %v12446_v46 = vpop.f32.mrb[61].mxu0 }
 0x1ef   : > { %v4423_v8 = vrot.slane %v4407_v22, %v17989_v24  ;;  %v5835_v43 = vcombine.low %v12365_v20, %v5213_v3  ;;  %v8345_v50 = vcombine.low %v12356_v33, %v7779_v31  ;;  %v4622_v60 = vmul.f32 %v12137_v9, %v12137_v9  ;;  %v12453_v22 = vpop.f32.mrb[61].mxu1  ;;  %v12455_v3 = vpop.f32.mrb[62].mxu0 }
 0x1f0   : > { %v5844_v11 = vrot.slane %v5834_v10, %v17989_v24  ;;  %v7097_v14 = vrot.slane %v7083_v15, %v11677_v34  ;;  %v4624_v48 = vmul.f32 %v12145_v30, %v12145_v30  ;;  %v4623_v62 = vmul.f32 %v12147_v23, %v12147_v23 }
 0x1f1   : > { %v4438_v5 = vcombine.low %v4416_v37, %v4423_v8  ;;  %v5851_v16 = vrot.slane %v5835_v43, %v17989_v24  ;;  %v8359_v20 = vrot.slane %v8345_v50, %v11677_v34  ;;  %v4625_v33 = vmul.f32 %v12153_v40, %v12153_v40  ;;  %v12461_v8 = vpop.f32.mrb[62].mxu1  ;;  %v12463_v43 = vpop.f32.mrb[63].mxu0 }
 0x1f2   : > { %v7098_v57 = vcombine.low %v7090_v29, %v7097_v14  ;;  %v3786_v58 = vadd.f32 %v12155_v35, %v12137_v9  ;;  %v4654_v12 = vmul.f32 %v12155_v35, %v12155_v35  ;;  %v6102_v28 = vmax.f32 %v12137_v9, %v12155_v35 }
 0x1f3   : > { %v12449_v38 = vrot.slane %v4438_v5, %v17989_v24  ;;  %v5866_v1 = vcombine.low %v5844_v11, %v5851_v16  ;;  %v8360_v32 = vcombine.low %v8352_v53, %v8359_v20  ;;  %v7364_v37 = vmin.f32 %v12137_v9, %v12155_v35 }
 0x1f4   : > { %v7222_v31 = vrot.slane %v7098_v57, 7  ;;  %v5214_v10 = vadd.f32 %v4654_v12, %v4622_v60  ;;  %v3828_v29 = vadd.f32 %v12160_v17, %v12145_v30  ;;  %v4656_v15 = vmul.f32 %v12160_v17, %v12160_v17  ;;  %v12472_v60 = vpop.f32.mrb[63].mxu1 }
 0x1f5   : > { %17990 = vst [vmem:[#allocation49_spill] sm:$0xff] %v12449_v38  ;;  %v12466_v53 = vrot.slane %v5866_v1, %v17989_v24  ;;  %v8482_v9 = vrot.slane %v8360_v32, 7  ;;  %v6128_v35 = vmax.f32 %v12145_v30, %v12160_v17  ;;  %v7390_v50 = vmin.f32 %v12145_v30, %v12160_v17 }
 0x1f6   : > { %v17992_v11 = vcombine.low %v12046_v0, %v12071_v39  ;;  %v5256_v5 = vadd.f32 %v4656_v15, %v4624_v48  ;;  %v3807_v16 = vadd.f32 %v12162_v7, %v12147_v23  ;;  %v4655_v20 = vmul.f32 %v12162_v7, %v12162_v7 }
 0x1f7   : > { %17991 = vst [vmem:[#allocation50_spill] sm:$0xff] %v12466_v53  ;;  %v17993_v12 = vcombine.low %v12053_v27, %v12118_v63  ;;  %v6115_v17 = vmax.f32 %v12147_v23, %v12162_v7  ;;  %v7377_v0 = vmin.f32 %v12147_v23, %v12162_v7  ;;  %v3849_v32 = vadd.f32 %v12168_v19, %v12153_v40  ;;  %v12501_v7 = vpop.f32.mrb[64].mxu0  ;;  %v10904_v53 = vld [vmem:[%s11338_s8 + $0x3d8] sm:$0xff] }
 0x1f8   : > { %v7224_v14 = vsel %vm7223_vm0, %v7222_v31, %v17992_v11  ;;  %v5235_v1 = vadd.f32 %v4655_v20, %v4623_v62  ;;  %v4657_v15 = vmul.f32 %v12168_v19, %v12168_v19  ;;  %v6141_v23 = vmax.f32 %v12153_v40, %v12168_v19 }
 0x1f9   : > { %v7226_v57 = vsel %vm7225_vm1, %v7222_v31, %v7224_v14  ;;  %v8483_v30 = vsel %vm7223_vm0, %v8482_v9, %v17993_v12  ;;  %v7403_v20 = vmin.f32 %v12153_v40, %v12168_v19  ;;  %v3787_v19 = vadd.f32 %v3786_v58, %v12187_v18  ;;  %v18000_v58 = vld [vmem:[#allocation19_spill] sm:$0xff] }
 0x1fa   : > { %v7228_v39 = vsel %vm7227_vm2, %v7222_v31, %v7226_v57  ;;  %v8484_v48 = vsel %vm7225_vm1, %v8482_v9, %v8483_v30  ;;  %v12511_v57 = vpop.f32.mrb[65].mxu0 }
 0x1fb   : > { %v7230_v27 = vsel %vm7229_vm3, %v7222_v31, %v7228_v39  ;;  %v8485_v63 = vsel %vm7227_vm2, %v8482_v9, %v8484_v48  ;;  %v12509_v31 = vpop.f32.mrb[64].mxu1  ;;  %v5277_v39 = vadd.f32 %v4657_v15, %v4625_v33  ;;  %v10903_v48 = vld [vmem:[%s11338_s8 + $0x358] sm:$0xff]  ;;  %v6103_v15 = vmax.f32 %v6102_v28, %v12187_v18  ;;  %v460_v28 = vld [vmem:[%s11338_s8 + $0x4d0] sm:$0xff] }
 0x1fc   : > { %v8486_v11 = vsel %vm7229_vm3, %v8482_v9, %v8485_v63  ;;  %v8806_v62 = vcombine.high %v7230_v27, %v7230_v27  ;;  %v12505_v14 = vrot.slane %v7230_v27, %v11677_v34  ;;  %v10598_v38 = vcombine.high %v10903_v48, %v10904_v53  ;;  %v12518_v9 = vpop.f32.mrb[65].mxu1  ;;  %v12520_v63 = vpop.f32.mrb[66].mxu0 }
 0x1fd   : > { %v9022_v12 = vcombine.high %v8486_v11, %v8486_v11  ;;  %v12514_v30 = vrot.slane %v8486_v11, %v11677_v34  ;;  %17996 = vst [vmem:[#allocation53_spill] sm:$0xff] %v12518_v9  ;;  %17997 = vst [vmem:[#allocation54_spill] sm:$0xff] %v12520_v63  ;;  %v4686_v11 = vmul.f32 %v12187_v18, %v12187_v18  ;;  %v12537_v48 = vpop.f32.mrb[66].mxu1 }
 0x1fe   : > { %17994 = vst [vmem:[#allocation51_spill] sm:$0xff] %v12505_v14  ;;  %v12523_v27 = vrot.slane %v8806_v62, %v11677_v34  ;;  %3139 = vmatprep.subr.bf16.mxu1 %v10598_v38  ;;  %v7365_v62 = vmin.f32 %v7364_v37, %v12187_v18  ;;  %v18001_v14 = vld [vmem:[#allocation20_spill] sm:$0xff]  ;;  %v4688_v53 = vmul.f32 %v12194_v47, %v12194_v47 }
 0x1ff   : > { %17995 = vst [vmem:[#allocation52_spill] sm:$0xff] %v12514_v30  ;;  %v12531_v33 = vrot.slane %v9022_v12, %v11677_v34  ;;  %v18002_v63 = vcombine.low %v18000_v58, %v18001_v14  ;;  %v5215_v9 = vadd.f32 %v5214_v10, %v4686_v11  ;;  %v3829_v12 = vadd.f32 %v3828_v29, %v12194_v47 }
 0x200   : > { %17998 = vst [vmem:[#allocation55_spill] sm:$0xff] %v12523_v27  ;;  %v6129_v18 = vmax.f32 %v6128_v35, %v12194_v47  ;;  %v7391_v38 = vmin.f32 %v7390_v50, %v12194_v47  ;;  %v3808_v37 = vadd.f32 %v3807_v16, %v12196_v56  ;;  %v5257_v40 = vadd.f32 %v5256_v5, %v4688_v53  ;;  %v12561_v50 = vpop.f32.mrb[67].mxu0  ;;  %v444_v53 = vld [vmem:[%s11338_s8 + $0x450] sm:$0xff] }
 0x201   : > { %17999 = vst [vmem:[#allocation56_spill] sm:$0xff] %v12531_v33  ;;  %3140 = vmatpush1.bf16.msra.mxu1 %v18002_v63  ;;  %v4687_v14 = vmul.f32 %v12196_v56, %v12196_v56  ;;  %v6116_v10 = vmax.f32 %v6115_v17, %v12196_v56  ;;  %v7378_v29 = vmin.f32 %v7377_v0, %v12196_v56  ;;  %18003 = vst [vmem:[#allocation19_spill] sm:$0xff] %v12561_v50  ;;  %v12567_v0 = vpop.f32.mrb[67].mxu1  ;;  %v461_v33 = vld [vmem:[%s11338_s8 + $0x4d8] sm:$0xff] }
 0x202   : > { %v3850_v63 = vadd.f32 %v3849_v32, %v12203_v6  ;;  %v4689_v11 = vmul.f32 %v12203_v6, %v12203_v6  ;;  %v6142_v35 = vmax.f32 %v6141_v23, %v12203_v6  ;;  %v7404_v47 = vmin.f32 %v7403_v20, %v12203_v6  ;;  %18004 = vst [vmem:[#allocation20_spill] sm:$0xff] %v12567_v0 }
 0x203   : > { %v5236_v5 = vadd.f32 %v5235_v1, %v4687_v14  ;;  %v3788_v16 = vadd.f32 %v3787_v19, %v12205_v26  ;;  %v4718_v56 = vmul.f32 %v12205_v26, %v12205_v26  ;;  %v6104_v17 = vmax.f32 %v6103_v15, %v12205_v26  ;;  %v445_v15 = vld [vmem:[%s11338_s8 + $0x458] sm:$0xff] }
 0x204   : > { %v5278_v32 = vadd.f32 %v5277_v39, %v4689_v11  ;;  %v7366_v23 = vmin.f32 %v7365_v62, %v12205_v26  ;;  %v3830_v6 = vadd.f32 %v3829_v12, %v12211_v36  ;;  %v4720_v20 = vmul.f32 %v12211_v36, %v12211_v36 }
 0x205   : > { %v5216_v1 = vadd.f32 %v5215_v9, %v4718_v56  ;;  %v6130_v58 = vmax.f32 %v6129_v18, %v12211_v36  ;;  %v7392_v19 = vmin.f32 %v7391_v38, %v12211_v36  ;;  %v3809_v14 = vadd.f32 %v3808_v37, %v12213_v41 }
 0x206   : > { %v5258_v30 = vadd.f32 %v5257_v40, %v4720_v20  ;;  %v4719_v26 = vmul.f32 %v12213_v41, %v12213_v41  ;;  %v6117_v39 = vmax.f32 %v6116_v10, %v12213_v41  ;;  %v7379_v62 = vmin.f32 %v7378_v29, %v12213_v41  ;;  %v12592_v10 = vpop.f32.mrb[68].mxu0  ;;  %v12594_v29 = vpop.f32.mrb[68].mxu1 }
 0x207   : > { %v3851_v12 = vadd.f32 %v3850_v63, %v12219_v25  ;;  %v4721_v9 = vmul.f32 %v12219_v25, %v12219_v25  ;;  %v6143_v36 = vmax.f32 %v6142_v35, %v12219_v25  ;;  %v7405_v18 = vmin.f32 %v7404_v47, %v12219_v25  ;;  %18005 = vst [vmem:[#allocation57_spill] sm:$0xff] %v12592_v10  ;;  %v12603_v47 = vpop.f32.mrb[69].mxu1 }
 0x208   : > { %v5237_v38 = vadd.f32 %v5236_v5, %v4719_v26  ;;  %v10627_v37 = vcombine.low %v444_v53, %v460_v28  ;;  %v10628_v11 = vcombine.high %v444_v53, %v460_v28  ;;  %v10629_v40 = vcombine.low %v445_v15, %v461_v33  ;;  %18006 = vst [vmem:[#allocation58_spill] sm:$0xff] %v12594_v29  ;;  %v12613_v26 = vpop.f32.mrb[70].mxu1  ;;  %v18018_v29 = vld [vmem:[#allocation21_spill] sm:$0xff] }
 0x209   : > { %v5279_v56 = vadd.f32 %v5278_v32, %v4721_v9  ;;  %v10630_v20 = vcombine.high %v445_v15, %v461_v33  ;;  %v3789_v27 = vadd.f32 %v3788_v16, %v12238_v52  ;;  %v4750_v41 = vmul.f32 %v12238_v52, %v12238_v52  ;;  %v12601_v33 = vpop.f32.mrb[69].mxu0  ;;  %18008 = vst [vmem:[#allocation60_spill] sm:$0xff] %v12603_v47 }
 0x20a   : > { %3028 = vmatprep.subr.bf16.mxu0 %v10628_v11  ;;  %v6105_v63 = vmax.f32 %v6104_v17, %v12238_v52  ;;  %v7367_v25 = vmin.f32 %v7366_v23, %v12238_v52  ;;  %v3831_v35 = vadd.f32 %v3830_v6, %v12245_v45  ;;  %v4752_v28 = vmul.f32 %v12245_v45, %v12245_v45  ;;  %v12607_v53 = vpop.f32.mrb[70].mxu0  ;;  %v18010_v17 = vld [vmem:[#allocation24_spill] sm:$0xff] }
 0x20b   : > { %18007 = vst [vmem:[#allocation59_spill] sm:$0xff] %v12601_v33  ;;  %3141 = vmatprep.subr.bf16.mxu1 %v10630_v20  ;;  %3029 = vmatpush1.bf16.msra.mxu0 %v10627_v37  ;;  %v5217_v5 = vadd.f32 %v5216_v1, %v4750_v41  ;;  %v6131_v16 = vmax.f32 %v6130_v58, %v12245_v45  ;;  %18009 = vst [vmem:[#allocation61_spill] sm:$0xff] %v12607_v53  ;;  %v18012_v1 = vld [vmem:[#allocation25_spill] sm:$0xff]  ;;  %v18015_v41 = vld [vmem:[#allocation27_spill] sm:$0xff] }
 0x20c   : > { %v7393_v32 = vmin.f32 %v7392_v19, %v12245_v45  ;;  %3142 = vmatpush1.bf16.msra.mxu1 %v10629_v40  ;;  %v5259_v52 = vadd.f32 %v5258_v30, %v4752_v28  ;;  %v3810_v23 = vadd.f32 %v3809_v14, %v18010_v17  ;;  %v4751_v6 = vmul.f32 %v18010_v17, %v18010_v17  ;;  %v18013_v14 = vld [vmem:[#allocation26_spill] sm:$0xff]  ;;  %v12624_v40 = vpop.f32.mrb[71].mxu0 }
 0x20d   : > { %v6118_v15 = vmax.f32 %v6117_v39, %v18010_v17  ;;  %18011 = vst [vmem:[#allocation24_spill] sm:$0xff] %v12613_v26  ;;  %v7380_v9 = vmin.f32 %v7379_v62, %v18010_v17  ;;  %v3852_v37 = vadd.f32 %v3851_v12, %v18012_v1  ;;  %v4753_v45 = vmul.f32 %v18012_v1, %v18012_v1  ;;  %v476_v17 = vld [vmem:[%s11338_s8 + $0x550] sm:$0xff] }
 0x20e   : > { %v6144_v30 = vmax.f32 %v6143_v36, %v18012_v1  ;;  %v5238_v58 = vadd.f32 %v5237_v38, %v4751_v6  ;;  %v7406_v19 = vmin.f32 %v7405_v18, %v18012_v1  ;;  %v3790_v11 = vadd.f32 %v3789_v27, %v18013_v14  ;;  %18014 = vst [vmem:[#allocation25_spill] sm:$0xff] %v12624_v40  ;;  %v492_v6 = vld [vmem:[%s11338_s8 + $0x5d0] sm:$0xff]  ;;  %v18016_v1 = vld [vmem:[#allocation28_spill] sm:$0xff] }
 0x20f   : > { %v4782_v39 = vmul.f32 %v18013_v14, %v18013_v14  ;;  %v5280_v62 = vadd.f32 %v5279_v56, %v4753_v45  ;;  %v6106_v12 = vmax.f32 %v6105_v63, %v18013_v14  ;;  %v7368_v20 = vmin.f32 %v7367_v25, %v18013_v14  ;;  %v18017_v14 = vld [vmem:[#allocation29_spill] sm:$0xff] }
 0x210   : > { %v3832_v28 = vadd.f32 %v3831_v35, %v18015_v41  ;;  %v4784_v18 = vmul.f32 %v18015_v41, %v18015_v41  ;;  %v6132_v27 = vmax.f32 %v6131_v16, %v18015_v41  ;;  %v7394_v38 = vmin.f32 %v7393_v32, %v18015_v41  ;;  %v477_v35 = vld [vmem:[%s11338_s8 + $0x558] sm:$0xff] }
 0x211   : > { %v5218_v36 = vadd.f32 %v5217_v5, %v4782_v39  ;;  %v3811_v40 = vadd.f32 %v3810_v23, %v18016_v1  ;;  %v4783_v56 = vmul.f32 %v18016_v1, %v18016_v1  ;;  %v6119_v63 = vmax.f32 %v6118_v15, %v18016_v1  ;;  %v493_v5 = vld [vmem:[%s11338_s8 + $0x5d8] sm:$0xff] }
 0x212   : > { %v7381_v25 = vmin.f32 %v7380_v9, %v18016_v1  ;;  %v5260_v45 = vadd.f32 %v5259_v52, %v4784_v18  ;;  %v3853_v39 = vadd.f32 %v3852_v37, %v18017_v14  ;;  %v4785_v16 = vmul.f32 %v18017_v14, %v18017_v14  ;;  %v18019_v1 = vld [vmem:[#allocation30_spill] sm:$0xff] }
 0x213   : > { %v6145_v32 = vmax.f32 %v6144_v30, %v18017_v14  ;;  %v5239_v41 = vadd.f32 %v5238_v58, %v4783_v56  ;;  %v7407_v23 = vmin.f32 %v7406_v19, %v18017_v14  ;;  %v10659_v26 = vcombine.low %v476_v17, %v492_v6 }
 0x214   : > { %v10660_v53 = vcombine.high %v476_v17, %v492_v6  ;;  %v5281_v47 = vadd.f32 %v5280_v62, %v4785_v16  ;;  %v10661_v33 = vcombine.low %v477_v35, %v493_v5  ;;  %v10662_v15 = vcombine.high %v477_v35, %v493_v5  ;;  %v18022_v5 = vld [vmem:[#allocation33_spill] sm:$0xff] }
 0x215   : > { %v3791_v9 = vadd.f32 %v3790_v11, %v18018_v29  ;;  %v4814_v52 = vmul.f32 %v18018_v29, %v18018_v29  ;;  %v6107_v37 = vmax.f32 %v6106_v12, %v18018_v29  ;;  %v7369_v18 = vmin.f32 %v7368_v20, %v18018_v29  ;;  %v18020_v11 = vld [vmem:[#allocation31_spill] sm:$0xff] }
 0x216   : > { %3030 = vmatprep.subr.bf16.mxu0 %v10660_v53  ;;  %v3833_v30 = vadd.f32 %v3832_v28, %v18019_v1  ;;  %3143 = vmatprep.subr.bf16.mxu1 %v10662_v15  ;;  %v4816_v58 = vmul.f32 %v18019_v1, %v18019_v1  ;;  %v6133_v19 = vmax.f32 %v6132_v27, %v18019_v1 }
 0x217   : > { %3031 = vmatpush1.bf16.msra.mxu0 %v10659_v26  ;;  %v7395_v62 = vmin.f32 %v7394_v38, %v18019_v1  ;;  %3144 = vmatpush1.bf16.msra.mxu1 %v10661_v33  ;;  %v5219_v53 = vadd.f32 %v5218_v36, %v4814_v52  ;;  %v3812_v17 = vadd.f32 %v3811_v40, %v18020_v11  ;;  %v18021_v26 = vld [vmem:[#allocation32_spill] sm:$0xff] }
 0x218   : > { %v4815_v12 = vmul.f32 %v18020_v11, %v18020_v11  ;;  %v6120_v29 = vmax.f32 %v6119_v63, %v18020_v11  ;;  %v5261_v20 = vadd.f32 %v5260_v45, %v4816_v58  ;;  %v7382_v28 = vmin.f32 %v7381_v25, %v18020_v11  ;;  %v18024_v11 = vld [vmem:[#allocation35_spill] sm:$0xff] }
 0x219   : > { %v3854_v6 = vadd.f32 %v3853_v39, %v18021_v26  ;;  %v4817_v56 = vmul.f32 %v18021_v26, %v18021_v26  ;;  %v6146_v38 = vmax.f32 %v6145_v32, %v18021_v26  ;;  %v7408_v33 = vmin.f32 %v7407_v23, %v18021_v26  ;;  %v18023_v23 = vld [vmem:[#allocation34_spill] sm:$0xff] }
 0x21a   : > { %v5240_v27 = vadd.f32 %v5239_v41, %v4815_v12  ;;  %v12668_v40 = vadd.f32 %v3791_v9, %v12314_v61  ;;  %v4846_v63 = vmul.f32 %v12314_v61, %v12314_v61  ;;  %v6108_v35 = vmax.f32 %v6107_v37, %v12314_v61 }
 0x21b   : > { %v5282_v36 = vadd.f32 %v5281_v47, %v4817_v56  ;;  %v7370_v25 = vmin.f32 %v7369_v18, %v12314_v61  ;;  %v12675_v45 = vadd.f32 %v3833_v30, %v18022_v5  ;;  %v4848_v14 = vmul.f32 %v18022_v5, %v18022_v5 }
 0x21c   : > { %v6134_v39 = vmax.f32 %v6133_v19, %v18022_v5  ;;  %v7396_v16 = vmin.f32 %v7395_v62, %v18022_v5  ;;  %v12681_v32 = vadd.f32 %v5219_v53, %v4846_v63  ;;  %v6109_v47 = vrot.slane %v6108_v35, 4  ;;  %v12697_v63 = vpop.f32.mrb[71].mxu1 }
 0x21d   : > { %v7371_v41 = vrot.slane %v7370_v25, 4  ;;  %v12684_v15 = vadd.f32 %v3812_v17, %v18023_v23  ;;  %v12686_v9 = vadd.f32 %v5261_v20, %v4848_v14  ;;  %v4847_v37 = vmul.f32 %v18023_v23, %v18023_v23  ;;  %18025 = vst [vmem:[#allocation26_spill] sm:$0xff] %v12697_v63  ;;  %v12713_v0 = vpop.f32.mrb[72].mxu1 }
 0x21e   : > { %v6135_v61 = vrot.slane %v6134_v39, 4  ;;  %v7397_v52 = vrot.slane %v7396_v16, 4  ;;  %v6110_v18 = vmax.f32 %v6108_v35, %v6109_v47  ;;  %v6121_v30 = vmax.f32 %v6120_v29, %v18023_v23 }
 0x21f   : > { %v7372_v1 = vmin.f32 %v7370_v25, %v7371_v41  ;;  %v7383_v58 = vmin.f32 %v7382_v28, %v18023_v23  ;;  %v12692_v53 = vadd.f32 %v5240_v27, %v4847_v37  ;;  %v12695_v17 = vadd.f32 %v3854_v6, %v18024_v11 }
 0x220   : > { %v6136_v19 = vmax.f32 %v6134_v39, %v6135_v61  ;;  %v7398_v62 = vmin.f32 %v7396_v16, %v7397_v52  ;;  %v6111_v12 = vrot.slane %v6110_v18, 2  ;;  %v6122_v26 = vrot.slane %v6121_v30, 4 }
 0x221   : > { %v7373_v20 = vrot.slane %v7372_v1, 2  ;;  %v7384_v56 = vrot.slane %v7383_v58, 4  ;;  %v4849_v29 = vmul.f32 %v18024_v11, %v18024_v11  ;;  %v6147_v28 = vmax.f32 %v6146_v38, %v18024_v11 }
 0x222   : > { %v6137_v5 = vrot.slane %v6136_v19, 2  ;;  %v7399_v35 = vrot.slane %v7398_v62, 2  ;;  %v6112_v25 = vmax.f32 %v6110_v18, %v6111_v12  ;;  %v6123_v14 = vmax.f32 %v6121_v30, %v6122_v26  ;;  %v524_v12 = vld [vmem:[%s11338_s8 + $0x6d0] sm:$0xff] }
 0x223   : > { %v7374_v27 = vmin.f32 %v7372_v1, %v7373_v20  ;;  %v7385_v6 = vmin.f32 %v7383_v58, %v7384_v56  ;;  %v12702_v47 = vadd.f32 %v5282_v36, %v4849_v29  ;;  %v6148_v41 = vrot.slane %v6147_v28, 4  ;;  %v508_v1 = vld [vmem:[%s11338_s8 + $0x650] sm:$0xff]  ;;  %v509_v36 = vld [vmem:[%s11338_s8 + $0x658] sm:$0xff]  ;;  %v12711_v29 = vpop.f32.mrb[72].mxu0 }
 0x224   : > { %v6138_v39 = vmax.f32 %v6136_v19, %v6137_v5  ;;  %v7400_v16 = vmin.f32 %v7398_v62, %v7399_v35  ;;  %v6113_v23 = vrot.slane %v6112_v25, 1  ;;  %v6124_v52 = vrot.slane %v6123_v14, 2  ;;  %v525_v20 = vld [vmem:[%s11338_s8 + $0x6d8] sm:$0xff] }
 0x225   : > { %v7375_v61 = vrot.slane %v7374_v27, 1  ;;  %v7386_v37 = vrot.slane %v7385_v6, 2  ;;  %v6149_v38 = vmax.f32 %v6147_v28, %v6148_v41  ;;  %v7409_v18 = vmin.f32 %v7408_v33, %v18024_v11 }
 0x226   : > { %v6139_v63 = vrot.slane %v6138_v39, 1  ;;  %v7401_v10 = vrot.slane %v7400_v16, 1  ;;  %v6114_v30 = vmax.f32 %v6112_v25, %v6113_v23  ;;  %v6125_v19 = vmax.f32 %v6123_v14, %v6124_v52 }
 0x227   : > { %v7376_v58 = vmin.f32 %v7374_v27, %v7375_v61  ;;  %v7387_v62 = vmin.f32 %v7385_v6, %v7386_v37  ;;  %v6150_v5 = vrot.slane %v6149_v38, 2  ;;  %v7410_v35 = vrot.slane %v7409_v18, 4  ;;  %v12715_v6 = vpop.f32.mrb[73].mxu0  ;;  %v12721_v61 = vpop.f32.mrb[73].mxu1 }
 0x228   : > { %v6140_v26 = vmax.f32 %v6138_v39, %v6139_v63  ;;  %v12709_v56 = vmin.f32 %v7400_v16, %v7401_v10  ;;  %v6126_v28 = vrot.slane %v6125_v19, 1  ;;  %v10691_v33 = vcombine.low %v508_v1, %v524_v12  ;;  %18026 = vst [vmem:[#allocation27_spill] sm:$0xff] %v12715_v6  ;;  %v18027_v10 = vld [vmem:[#allocation22_spill] sm:$0xff]  ;;  %18028 = vst [vmem:[#allocation28_spill] sm:$0xff] %v12721_v61 }
 0x229   : > { %v7388_v41 = vrot.slane %v7387_v62, 1  ;;  %v10692_v11 = vcombine.high %v508_v1, %v524_v12  ;;  %v6151_v50 = vmax.f32 %v6149_v38, %v6150_v5  ;;  %v7411_v25 = vmin.f32 %v7409_v18, %v7410_v35  ;;  %v18029_v38 = vld [vmem:[#allocation36_spill] sm:$0xff] }
 0x22a   : > { %v10693_v27 = vcombine.low %v509_v36, %v525_v20  ;;  %v10694_v14 = vcombine.high %v509_v36, %v525_v20  ;;  %v6127_v23 = vmax.f32 %v6125_v19, %v6126_v28  ;;  %v3793_v39 = vadd.f32 %v12668_v40, %v18027_v10  ;;  %v12730_v20 = vpop.f32.mrb[74].mxu0 }
 0x22b   : > { %v7389_v63 = vmin.f32 %v7387_v62, %v7388_v41  ;;  %3032 = vmatprep.subr.bf16.mxu0 %v10692_v11  ;;  %v4878_v16 = vmul.f32 %v18027_v10, %v18027_v10  ;;  %v6152_v52 = vrot.slane %v6151_v50, 1  ;;  %v7412_v37 = vrot.slane %v7411_v25, 2  ;;  %v18030_v62 = vld [vmem:[#allocation37_spill] sm:$0xff]  ;;  %18031 = vst [vmem:[#allocation29_spill] sm:$0xff] %v12730_v20  ;;  %v12735_v41 = vpop.f32.mrb[74].mxu1 }
 0x22c   : > { %3145 = vmatprep.subr.bf16.mxu1 %v10694_v14  ;;  %3033 = vmatpush1.bf16.msra.mxu0 %v10691_v33  ;;  %v3835_v18 = vadd.f32 %v12675_v45, %v18029_v38  ;;  %v4880_v1 = vmul.f32 %v18029_v38, %v18029_v38  ;;  %v6963_v12 = vcombine.low %v6114_v30, %v6127_v23  ;;  %v12749_v14 = vpop.f32.mrb[75].mxu0  ;;  %v12751_v23 = vpop.f32.mrb[75].mxu1 }
 0x22d   : > { %v8225_v19 = vcombine.low %v7376_v58, %v7389_v63  ;;  %3146 = vmatpush1.bf16.msra.mxu1 %v10693_v27  ;;  %v5221_v40 = vadd.f32 %v12681_v32, %v4878_v16  ;;  %v3814_v36 = vadd.f32 %v12684_v15, %v18030_v62  ;;  %v6153_v5 = vmax.f32 %v6151_v50, %v6152_v52  ;;  %v18033_v32 = vld [vmem:[#allocation38_spill] sm:$0xff]  ;;  %v18037_v52 = vld [vmem:[#allocation40_spill] sm:$0xff] }
 0x22e   : > { %v7413_v35 = vmin.f32 %v7411_v25, %v7412_v37  ;;  %v5263_v28 = vadd.f32 %v12686_v9, %v4880_v1  ;;  %v4879_v45 = vmul.f32 %v18030_v62, %v18030_v62  ;;  %18032 = vst [vmem:[#allocation21_spill] sm:$0xff] %v12735_v41  ;;  %v12738_v30 = vrot.slane %v6963_v12, %v11677_v34  ;;  %v18034_v25 = vld [vmem:[#allocation39_spill] sm:$0xff] }
 0x22f   : > { %v12741_v58 = vrot.slane %v8225_v19, %v11677_v34  ;;  %v3856_v15 = vadd.f32 %v12695_v17, %v18033_v32  ;;  %v4881_v50 = vmul.f32 %v18033_v32, %v18033_v32  ;;  %v6964_v33 = vcombine.low %v6140_v26, %v6153_v5  ;;  %18035 = vst [vmem:[#allocation30_spill] sm:$0xff] %v12749_v14  ;;  %v18038_v5 = vld [vmem:[#allocation41_spill] sm:$0xff]  ;;  %v12796_v14 = vpop.f32.mrb[76].mxu1 }
 0x230   : > { %v7414_v11 = vrot.slane %v7413_v35, 1  ;;  %v5242_v9 = vadd.f32 %v12692_v53, %v4879_v45  ;;  %v3794_v27 = vadd.f32 %v3793_v39, %v18034_v25  ;;  %18036 = vst [vmem:[#allocation31_spill] sm:$0xff] %v12751_v23  ;;  %v4910_v16 = vmul.f32 %v18034_v25, %v18034_v25  ;;  %v12794_v23 = vpop.f32.mrb[76].mxu0  ;;  %18041 = vst [vmem:[#allocation33_spill] sm:$0xff] %v12796_v14  ;;  %v12800_v61 = vpop.f32.mrb[77].mxu1 }
 0x231   : > { %v5284_v63 = vadd.f32 %v12702_v47, %v4881_v50  ;;  %v6518_v17 = vmax.f32 %v18027_v10, %v18034_v25  ;;  %v7780_v53 = vmin.f32 %v18027_v10, %v18034_v25  ;;  %v12761_v26 = vrot.slane %v6964_v33, %v11677_v34  ;;  %v540_v10 = vld [vmem:[%s11338_s8 + $0x750] sm:$0xff]  ;;  %v557_v25 = vld [vmem:[%s11338_s8 + $0x7d8] sm:$0xff]  ;;  %18040 = vst [vmem:[#allocation32_spill] sm:$0xff] %v12794_v23  ;;  %v12798_v20 = vpop.f32.mrb[77].mxu0 }
 0x232   : > { %v7415_v39 = vmin.f32 %v7413_v35, %v7414_v11  ;;  %v3836_v37 = vadd.f32 %v3835_v18, %v18037_v52  ;;  %v4912_v47 = vmul.f32 %v18037_v52, %v18037_v52  ;;  %v5222_v1 = vadd.f32 %v5221_v40, %v4910_v16  ;;  %v556_v11 = vld [vmem:[%s11338_s8 + $0x7d0] sm:$0xff]  ;;  %v541_v40 = vld [vmem:[%s11338_s8 + $0x758] sm:$0xff]  ;;  %18042 = vst [vmem:[#allocation34_spill] sm:$0xff] %v12798_v20  ;;  %v12814_v20 = vpop.f32.mrb[78].mxu1 }
 0x233   : > { %v6544_v12 = vmax.f32 %v18029_v38, %v18037_v52  ;;  %v7806_v19 = vmin.f32 %v18029_v38, %v18037_v52  ;;  %v3815_v45 = vadd.f32 %v3814_v36, %v18038_v5  ;;  %v4911_v18 = vmul.f32 %v18038_v5, %v18038_v5  ;;  %v18039_v36 = vld [vmem:[#allocation42_spill] sm:$0xff]  ;;  %18043 = vst [vmem:[#allocation35_spill] sm:$0xff] %v12800_v61  ;;  %v12812_v61 = vpop.f32.mrb[78].mxu0 }
 0x234   : > { %v8226_v35 = vcombine.low %v12709_v56, %v7415_v39  ;;  %v5264_v33 = vadd.f32 %v5263_v28, %v4912_v47  ;;  %v6531_v16 = vmax.f32 %v18030_v62, %v18038_v5  ;;  %v7793_v38 = vmin.f32 %v18030_v62, %v18038_v5  ;;  %18046 = vst [vmem:[#allocation22_spill] sm:$0xff] %v12812_v61 }
 0x235   : > { %v3857_v52 = vadd.f32 %v3856_v15, %v18039_v36  ;;  %v4913_v50 = vmul.f32 %v18039_v36, %v18039_v36  ;;  %v5243_v28 = vadd.f32 %v5242_v9, %v4911_v18  ;;  %v6557_v39 = vmax.f32 %v18033_v32, %v18039_v36  ;;  %v18044_v18 = vld [vmem:[#allocation23_spill] sm:$0xff]  ;;  %18047 = vst [vmem:[#allocation36_spill] sm:$0xff] %v12814_v20  ;;  %v12822_v9 = vpop.f32.mrb[79].mxu0 }
 0x236   : > { %v12788_v56 = vrot.slane %v8226_v35, %v11677_v34  ;;  %v7819_v47 = vmin.f32 %v18033_v32, %v18039_v36  ;;  %v10723_v5 = vcombine.low %v540_v10, %v556_v11  ;;  %v10724_v15 = vcombine.high %v540_v10, %v556_v11  ;;  %v18045_v10 = vld [vmem:[#allocation43_spill] sm:$0xff]  ;;  %18049 = vst [vmem:[#allocation37_spill] sm:$0xff] %v12822_v9 }
 0x237   : > { %v5285_v62 = vadd.f32 %v5284_v63, %v4913_v50  ;;  %v10725_v41 = vcombine.low %v541_v40, %v557_v25  ;;  %v10726_v35 = vcombine.high %v541_v40, %v557_v25  ;;  %v3795_v6 = vadd.f32 %v3794_v27, %v18044_v18 }
 0x238   : > { %v4942_v32 = vmul.f32 %v18044_v18, %v18044_v18  ;;  %3034 = vmatprep.subr.bf16.mxu0 %v10724_v15  ;;  %v6519_v36 = vmax.f32 %v6518_v17, %v18044_v18  ;;  %v7781_v63 = vmin.f32 %v7780_v53, %v18044_v18  ;;  %v3837_v50 = vadd.f32 %v3836_v37, %v18045_v10  ;;  %v18048_v15 = vld [vmem:[#allocation44_spill] sm:$0xff] }
 0x239   : > { %v4944_v11 = vmul.f32 %v18045_v10, %v18045_v10  ;;  %3147 = vmatprep.subr.bf16.mxu1 %v10726_v35  ;;  %3035 = vmatpush1.bf16.msra.mxu0 %v10723_v5  ;;  %v6545_v40 = vmax.f32 %v6544_v12, %v18045_v10  ;;  %v7807_v25 = vmin.f32 %v7806_v19, %v18045_v10  ;;  %v18050_v35 = vld [vmem:[#allocation45_spill] sm:$0xff] }
 0x23a   : > { %v5223_v27 = vadd.f32 %v5222_v1, %v4942_v32  ;;  %3148 = vmatpush1.bf16.msra.mxu1 %v10725_v41  ;;  %v3816_v53 = vadd.f32 %v3815_v45, %v18048_v15  ;;  %v4943_v37 = vmul.f32 %v18048_v15, %v18048_v15  ;;  %v6532_v18 = vmax.f32 %v6531_v16, %v18048_v15  ;;  %v18051_v45 = vld [vmem:[#allocation46_spill] sm:$0xff]  ;;  %v10905_v32 = vld [vmem:[#allocation6] sm:$0xff]  }
 0x23b   : > { %v5265_v17 = vadd.f32 %v5264_v33, %v4944_v11  ;;  %v7794_v20 = vmin.f32 %v7793_v38, %v18048_v15  ;;  %v3858_v5 = vadd.f32 %v3857_v52, %v18050_v35  ;;  %v4945_v1 = vmul.f32 %v18050_v35, %v18050_v35  ;;  %v12833_v38 = vpop.f32.mrb[79].mxu1 }
 0x23c   : > { %v6558_v12 = vmax.f32 %v6557_v39, %v18050_v35  ;;  %v5244_v41 = vadd.f32 %v5243_v28, %v4943_v37  ;;  %v7820_v19 = vmin.f32 %v7819_v47, %v18050_v35  ;;  %v3796_v33 = vadd.f32 %v3795_v6, %v18051_v45  ;;  %3053 = vmatmul.mubr.bf16.vlgmr.msra.gmra.mrb[160].mxu0 %v10905_v32  ;;  %v18053_v39 = vld [vmem:[#allocation47_spill] sm:$0xff]  ;;  %v318_v35 = vld [vmem:[%s11338_s8 + $0x60] sm:$0xff] }
 0x23d   : > { %v4974_v16 = vmul.f32 %v18051_v45, %v18051_v45  ;;  %18052 = vst [vmem:[#allocation38_spill] sm:$0xff] %v12833_v38  ;;  %v5286_v52 = vadd.f32 %v5285_v62, %v4945_v1  ;;  %v6520_v10 = vmax.f32 %v6519_v36, %v18051_v45  ;;  %v7782_v28 = vmin.f32 %v7781_v63, %v18051_v45  ;;  %v334_v38 = vld [vmem:[%s11338_s8 + $0xe0] sm:$0xff]  ;;  %v18055_v1 = vld [vmem:[#allocation48_spill] sm:$0xff]  ;;  %v319_v45 = vld [vmem:[%s11338_s8 + $0x68] sm:$0xff] }
 0x23e   : > { %v3838_v11 = vadd.f32 %v3837_v50, %v18053_v39  ;;  %3166 = vmatmul.mubr.bf16.vlgmr.msra.gmra.mrb[160].mxu1 %v10905_v32  ;;  %v4976_v6 = vmul.f32 %v18053_v39, %v18053_v39  ;;  %v6546_v15 = vmax.f32 %v6545_v40, %v18053_v39  ;;  %v7808_v37 = vmin.f32 %v7807_v25, %v18053_v39 }
 0x23f   : > { %v5224_v47 = vadd.f32 %v5223_v27, %v4974_v16  ;;  %v18054_v62 = vmov 0   ;;  %v3817_v36 = vadd.f32 %v3816_v53, %v18055_v1  ;;  %v4975_v63 = vmul.f32 %v18055_v1, %v18055_v1  ;;  %v335_v16 = vld [vmem:[%s11338_s8 + $0xe8] sm:$0xff] }
 0x240   : > { %3062 = vmatprep.mubr.bf16.mxu0 %v18054_v62  ;;  %v6533_v50 = vmax.f32 %v6532_v18, %v18055_v1  ;;  %v7795_v27 = vmin.f32 %v7794_v20, %v18055_v1  ;;  %3175 = vmatprep.mubr.bf16.mxu1 %v18054_v62  ;;  %v5266_v40 = vadd.f32 %v5265_v17, %v4976_v6 }
 0x241   : > { %v3859_v25 = vadd.f32 %v3858_v5, %v12394_v59  ;;  %v4977_v32 = vmul.f32 %v12394_v59, %v12394_v59  ;;  %v6559_v39 = vmax.f32 %v6558_v12, %v12394_v59  ;;  %v5245_v53 = vadd.f32 %v5244_v41, %v4975_v63 }
 0x242   : > { %v7821_v9 = vmin.f32 %v7820_v19, %v12394_v59  ;;  %v10503_v61 = vcombine.low %v318_v35, %v334_v38  ;;  %v10504_v14 = vcombine.high %v318_v35, %v334_v38  ;;  %v10505_v23 = vcombine.low %v319_v45, %v335_v16 }
 0x243   : > { %v5287_v18 = vadd.f32 %v5286_v52, %v4977_v32  ;;  %v10506_v20 = vcombine.high %v319_v45, %v335_v16  ;;  %v3797_v1 = vadd.f32 %v3796_v33, %v12396_v4  ;;  %v5006_v17 = vmul.f32 %v12396_v4, %v12396_v4  ;;  %v350_v16 = vld [vmem:[%s11338_s8 + $0x160] sm:$0xff] }
 0x244   : > { %3246 = vmatprep.subr.bf16.mxu0 %v10504_v14  ;;  %v6521_v5 = vmax.f32 %v6520_v10, %v12396_v4  ;;  %v7783_v6 = vmin.f32 %v7782_v28, %v12396_v4  ;;  %v3839_v12 = vadd.f32 %v3838_v11, %v12398_v13  ;;  %v5008_v59 = vmul.f32 %v12398_v13, %v12398_v13  ;;  %v10906_v28 = vld [vmem:[#allocation6 + $0x8] sm:$0xff]  }
 0x245   : > { %3359 = vmatprep.subr.bf16.mxu1 %v10506_v20  ;;  %3247 = vmatpush1.bf16.msra.mxu0 %v10503_v61  ;;  %v12867_v41 = vmax.f32 %v6546_v15, %v12398_v13  ;;  %v12870_v19 = vmin.f32 %v7808_v37, %v12398_v13  ;;  %v5225_v14 = vadd.f32 %v5224_v47, %v5006_v17 }
 0x246   : > { %3360 = vmatpush1.bf16.msra.mxu1 %v10505_v23  ;;  %v3818_v33 = vadd.f32 %v3817_v36, %v12400_v21  ;;  %v5007_v4 = vmul.f32 %v12400_v21, %v12400_v21  ;;  %v12876_v38 = vmax.f32 %v6533_v50, %v12400_v21  ;;  %v5267_v61 = vadd.f32 %v5266_v40, %v5008_v59  ;;  %v12898_v50 = vpop.f32.mrb[80].mxu1  ;;  %v366_v40 = vld [vmem:[%s11338_s8 + $0x1e0] sm:$0xff] }
 0x247   : > { %v12879_v52 = vmin.f32 %v7795_v27, %v12400_v21  ;;  %v3860_v10 = vadd.f32 %v3859_v25, %v12403_v2  ;;  %v5009_v13 = vmul.f32 %v12403_v2, %v12403_v2  ;;  %3063 = vmatmul.mubr.bf16.gmra.mrb[164].mxu0 %v10906_v28  ;;  %v12885_v11 = vmax.f32 %v6559_v39, %v12403_v2  ;;  %v12891_v21 = vpop.f32.mrb[80].mxu0 }
 0x248   : > { %v5246_v23 = vadd.f32 %v5245_v53, %v5007_v4  ;;  %v12888_v47 = vmin.f32 %v7821_v9, %v12403_v2  ;;  %v3798_v15 = vadd.f32 %v3797_v1, %v12405_v42  ;;  %3176 = vmatmul.mubr.bf16.gmra.mrb[164].mxu1 %v10906_v28  ;;  %18056 = vst [vmem:[#allocation39_spill] sm:$0xff] %v12891_v21  ;;  %18057 = vst [vmem:[#allocation40_spill] sm:$0xff] %v12898_v50  ;;  %v351_v53 = vld [vmem:[%s11338_s8 + $0x168] sm:$0xff]  ;;  %v12917_v20 = vpop.f32.mrb[81].mxu0  ;;  %v10907_v28 = vld [vmem:[#allocation6 + $0x10] sm:$0xff]  }
 0x249   : > { %v5288_v37 = vadd.f32 %v5287_v18, %v5009_v13  ;;  %v5038_v35 = vmul.f32 %v12405_v42, %v12405_v42  ;;  %v6522_v36 = vmax.f32 %v6521_v5, %v12405_v42  ;;  %v7784_v63 = vmin.f32 %v7783_v6, %v12405_v42  ;;  %3072 = vmatprep.mubr.bf16.mxu0 %v18054_v62  ;;  %v367_v18 = vld [vmem:[%s11338_s8 + $0x1e8] sm:$0xff]  ;;  %v12924_v6 = vpop.f32.mrb[81].mxu1  ;;  %v18127_v21 = vld [vmem:[#allocation56_spill] sm:$0xff] }
 0x24a   : > { %v3840_v2 = vadd.f32 %v3839_v12, %v12409_v49  ;;  %v5040_v9 = vmul.f32 %v12409_v49, %v12409_v49  ;;  %v6548_v27 = vmax.f32 %v12867_v41, %v12409_v49  ;;  %v7810_v45 = vmin.f32 %v12870_v19, %v12409_v49  ;;  %3185 = vmatprep.mubr.bf16.mxu1 %v18054_v62 }
 0x24b   : > { %v5226_v42 = vadd.f32 %v5225_v14, %v5038_v35  ;;  %v3819_v25 = vadd.f32 %v3818_v33, %v12411_v44  ;;  %v5039_v32 = vmul.f32 %v12411_v44, %v12411_v44  ;;  %v6535_v39 = vmax.f32 %v12876_v38, %v12411_v44  ;;  %18058 = vst [vmem:[#allocation41_spill] sm:$0xff] %v12917_v20 }
 0x24c   : > { %v5268_v1 = vadd.f32 %v5267_v61, %v5040_v9  ;;  %v7797_v49 = vmin.f32 %v12879_v52, %v12411_v44  ;;  %v3861_v17 = vadd.f32 %v3860_v10, %v12415_v55  ;;  %v5041_v5 = vmul.f32 %v12415_v55, %v12415_v55  ;;  %18059 = vst [vmem:[#allocation42_spill] sm:$0xff] %v12924_v6  ;;  %v12930_v44 = vpop.f32.mrb[82].mxu0  ;;  %v18123_v6 = vld [vmem:[#allocation52_spill] sm:$0xff] }
 0x24d   : > { %v5247_v12 = vadd.f32 %v5246_v23, %v5039_v32  ;;  %v6561_v59 = vmax.f32 %v12885_v11, %v12415_v55  ;;  %v7823_v41 = vmin.f32 %v12888_v47, %v12415_v55  ;;  %v10535_v19 = vcombine.low %v350_v16, %v366_v40  ;;  %18060 = vst [vmem:[#allocation23_spill] sm:$0xff] %v12930_v44  ;;  %v12937_v23 = vpop.f32.mrb[82].mxu1 }
 0x24e   : > { %v5289_v14 = vadd.f32 %v5288_v37, %v5041_v5  ;;  %v10536_v33 = vcombine.high %v350_v16, %v366_v40  ;;  %v10537_v4 = vcombine.low %v351_v53, %v367_v18  ;;  %v10538_v38 = vcombine.high %v351_v53, %v367_v18  ;;  %18061 = vst [vmem:[#allocation43_spill] sm:$0xff] %v12937_v23  ;;  %v12961_v40 = vpop.f32.mrb[83].mxu0  ;;  %v12975_v32 = vpop.f32.mrb[83].mxu1 }
 0x24f   : > { %v3799_v61 = vadd.f32 %v3798_v15, %v12436_v51  ;;  %v5070_v52 = vmul.f32 %v12436_v51, %v12436_v51  ;;  %v6523_v10 = vmax.f32 %v6522_v36, %v12436_v51  ;;  %v7785_v13 = vmin.f32 %v7784_v63, %v12436_v51  ;;  %3073 = vmatmul.mubr.bf16.gmra.mrb[168].mxu0 %v10907_v28  ;;  %v18062_v15 = vld [vmem:[#allocation17_spill] sm:$0xff] }
 0x250   : > { %3248 = vmatprep.subr.bf16.mxu0 %v10536_v33  ;;  %3361 = vmatprep.subr.bf16.mxu1 %v10538_v38  ;;  %v3841_v55 = vadd.f32 %v3840_v2, %v12444_v54  ;;  %v5072_v11 = vmul.f32 %v12444_v54, %v12444_v54  ;;  %v6549_v47 = vmax.f32 %v6548_v27, %v12444_v54  ;;  %v12944_v37 = vsub.s32 0, %v18062_v15 }
 0x251   : > { %3249 = vmatpush1.bf16.msra.mxu0 %v10535_v19  ;;  %3362 = vmatpush1.bf16.msra.mxu1 %v10537_v4  ;;  %v5227_v35 = vadd.f32 %v5226_v42, %v5070_v52  ;;  %v7811_v51 = vmin.f32 %v7810_v45, %v12444_v54  ;;  %v12948_v36 = vadd.f32 %v3819_v25, %v12446_v46  ;;  %v12951_v63 = vsub.s32 1, %v18062_v15 }
 0x252   : > { %18063 = vst [vmem:[#allocation44_spill] sm:$0xff] %v12944_v37  ;;  %v5269_v2 = vadd.f32 %v5268_v1, %v5072_v11  ;;  %v5071_v9 = vmul.f32 %v12446_v46, %v12446_v46  ;;  %v12956_v27 = vmax.f32 %v6535_v39, %v12446_v46  ;;  %v12959_v16 = vmin.f32 %v7797_v49, %v12446_v46 }
 0x253   : > { %18064 = vst [vmem:[#allocation45_spill] sm:$0xff] %v12951_v63  ;;  %3186 = vmatmul.mubr.bf16.gmra.mrb[168].mxu1 %v10907_v28  ;;  %18065 = vst [vmem:[#allocation46_spill] sm:$0xff] %v12961_v40  ;;  %v12964_v54 = vadd.f32 %v3861_v17, %v12453_v22  ;;  %v5073_v45 = vmul.f32 %v12453_v22, %v12453_v22  ;;  %v12969_v42 = vmax.f32 %v6561_v59, %v12453_v22 }
 0x254   : > { %v12972_v25 = vmin.f32 %v7823_v41, %v12453_v22  ;;  %3082 = vmatprep.mubr.bf16.mxu0 %v18054_v62  ;;  %18066 = vst [vmem:[#allocation47_spill] sm:$0xff] %v12975_v32  ;;  %v12977_v46 = vadd.f32 %v5247_v12, %v5071_v9  ;;  %v3800_v39 = vadd.f32 %v3799_v61, %v12455_v3  ;;  %v10908_v61 = vld [vmem:[#allocation6 + $0x18] sm:$0xff]  }
 0x255   : > { %v5102_v53 = vmul.f32 %v12455_v3, %v12455_v3  ;;  %v6524_v18 = vmax.f32 %v6523_v10, %v12455_v3  ;;  %3195 = vmatprep.mubr.bf16.mxu1 %v18054_v62  ;;  %v12984_v1 = vadd.f32 %v5289_v14, %v5073_v45  ;;  %v7786_v22 = vmin.f32 %v7785_v13, %v12455_v3 }
 0x256   : > { %v3842_v49 = vadd.f32 %v3841_v55, %v12461_v8  ;;  %v5104_v17 = vmul.f32 %v12461_v8, %v12461_v8  ;;  %v3801_v5 = vrot.slane %v3800_v39, 4  ;;  %v6550_v41 = vmax.f32 %v6549_v47, %v12461_v8  ;;  %v12995_v47 = vpop.f32.mrb[84].mxu1 }
 0x257   : > { %v5228_v12 = vadd.f32 %v5227_v35, %v5102_v53  ;;  %v6525_v59 = vrot.slane %v6524_v18, 4  ;;  %v7787_v19 = vrot.slane %v7786_v22, 4  ;;  %v7812_v38 = vmin.f32 %v7811_v51, %v12461_v8  ;;  %3083 = vmatmul.mubr.bf16.gmra.mrb[172].mxu0 %v10908_v61  ;;  %v12993_v35 = vpop.f32.mrb[84].mxu0  ;;  %18068 = vst [vmem:[#allocation17_spill] sm:$0xff] %v12995_v47 }
 0x258   : > { %v3843_v33 = vrot.slane %v3842_v49, 4  ;;  %v5270_v4 = vadd.f32 %v5269_v2, %v5104_v17  ;;  %v3802_v14 = vadd.f32 %v3801_v5, %v3800_v39  ;;  %v6551_v10 = vrot.slane %v6550_v41, 4  ;;  %3092 = vmatprep.mubr.bf16.mxu0 %v18054_v62  ;;  %18067 = vst [vmem:[#allocation48_spill] sm:$0xff] %v12993_v35  ;;  %v12997_v51 = vpop.f32.mrb[85].mxu0  ;;  %v12999_v39 = vpop.f32.mrb[85].mxu1 }
 0x259   : > { %v5229_v52 = vrot.slane %v5228_v12, 4  ;;  %v6526_v3 = vmax.f32 %v6524_v18, %v6525_v59  ;;  %v7788_v13 = vmin.f32 %v7786_v22, %v7787_v19  ;;  %v7813_v11 = vrot.slane %v7812_v38, 4  ;;  %18069 = vst [vmem:[#allocation62_spill] sm:$0xff] %v12997_v51  ;;  %18070 = vst [vmem:[#allocation63_spill] sm:$0xff] %v12999_v39 }
 0x25a   : > { %v3844_v28 = vadd.f32 %v3843_v33, %v3842_v49  ;;  %v5271_v55 = vrot.slane %v5270_v4, 4  ;;  %v3803_v9 = vrot.slane %v3802_v14, 2  ;;  %v6552_v8 = vmax.f32 %v6550_v41, %v6551_v10  ;;  %v13002_v49 = vpop.f32.mrb[86].mxu0 }
 0x25b   : > { %v5230_v2 = vadd.f32 %v5229_v52, %v5228_v12  ;;  %v6527_v45 = vrot.slane %v6526_v3, 2  ;;  %3196 = vmatmul.mubr.bf16.gmra.mrb[172].mxu1 %v10908_v61  ;;  %v7789_v53 = vrot.slane %v7788_v13, 2  ;;  %v7814_v22 = vmin.f32 %v7812_v38, %v7813_v11  ;;  %18071 = vst [vmem:[#allocation64_spill] sm:$0xff] %v13002_v49  ;;  %v13004_v12 = vpop.f32.mrb[86].mxu1 }
 0x25c   : > { %v3845_v18 = vrot.slane %v3844_v28, 2  ;;  %v5272_v17 = vadd.f32 %v5271_v55, %v5270_v4  ;;  %3205 = vmatprep.mubr.bf16.mxu1 %v18054_v62  ;;  %v3804_v5 = vadd.f32 %v3803_v9, %v3802_v14  ;;  %v6553_v33 = vrot.slane %v6552_v8, 2  ;;  %18072 = vst [vmem:[#allocation65_spill] sm:$0xff] %v13004_v12  ;;  %v13006_v4 = vpop.f32.mrb[87].mxu0  ;;  %v13008_v38 = vpop.f32.mrb[87].mxu1 }
 0x25d   : > { %v5231_v59 = vrot.slane %v5230_v2, 2  ;;  %v6528_v19 = vmax.f32 %v6526_v3, %v6527_v45  ;;  %v7790_v41 = vmin.f32 %v7788_v13, %v7789_v53  ;;  %v7815_v10 = vrot.slane %v7814_v22, 2  ;;  %18073 = vst [vmem:[#allocation66_spill] sm:$0xff] %v13006_v4  ;;  %18074 = vst [vmem:[#allocation67_spill] sm:$0xff] %v13008_v38  ;;  %v10909_v3 = vld [vmem:[#allocation6 + $0x20] sm:$0xff]  }
 0x25e   : > { %v3846_v61 = vadd.f32 %v3845_v18, %v3844_v28  ;;  %v5273_v52 = vrot.slane %v5272_v17, 2  ;;  %v3805_v51 = vrot.slane %v3804_v5, 1  ;;  %v6554_v35 = vmax.f32 %v6552_v8, %v6553_v33 }
 0x25f   : > { %v5232_v39 = vadd.f32 %v5231_v59, %v5230_v2  ;;  %v6529_v47 = vrot.slane %v6528_v19, 1  ;;  %v7791_v55 = vrot.slane %v7790_v41, 1  ;;  %v7816_v9 = vmin.f32 %v7814_v22, %v7815_v10  ;;  %3093 = vmatmul.mubr.bf16.gmra.mrb[176].mxu0 %v10909_v3  ;;  %v13043_v10 = vpop.f32.mrb[88].mxu1 }
 0x260   : > { %v3847_v11 = vrot.slane %v3846_v61, 1  ;;  %v5274_v14 = vadd.f32 %v5273_v52, %v5272_v17  ;;  %v13010_v45 = vadd.f32 %v3805_v51, %v3804_v5  ;;  %v6555_v53 = vrot.slane %v6554_v35, 1  ;;  %3102 = vmatprep.mubr.bf16.mxu0 %v18054_v62  ;;  %v13041_v52 = vpop.f32.mrb[88].mxu0  ;;  %18076 = vst [vmem:[#allocation69_spill] sm:$0xff] %v13043_v10 }
 0x261   : > { %v5233_v13 = vrot.slane %v5232_v39, 1  ;;  %v13012_v28 = vmax.f32 %v6528_v19, %v6529_v47  ;;  %v13015_v2 = vmin.f32 %v7790_v41, %v7791_v55  ;;  %v7817_v59 = vrot.slane %v7816_v9, 1  ;;  %18075 = vst [vmem:[#allocation68_spill] sm:$0xff] %v13041_v52 }
 0x262   : > { %v13017_v8 = vadd.f32 %v3847_v11, %v3846_v61  ;;  %v5275_v18 = vrot.slane %v5274_v14, 1  ;;  %v13021_v17 = vmax.f32 %v6554_v35, %v6555_v53  ;;  %v3821_v51 = vadd.f32 %v12948_v36, %v12463_v43  ;;  %v13049_v11 = vpop.f32.mrb[89].mxu0 }
 0x263   : > { %v13019_v33 = vadd.f32 %v5233_v13, %v5232_v39  ;;  %v5103_v47 = vmul.f32 %v12463_v43, %v12463_v43  ;;  %3206 = vmatmul.mubr.bf16.gmra.mrb[176].mxu1 %v10909_v3  ;;  %v13029_v5 = vmin.f32 %v7816_v9, %v7817_v59  ;;  %v6537_v19 = vmax.f32 %v12956_v27, %v12463_v43  ;;  %v13054_v10 = vpop.f32.mrb[90].mxu0 }
 0x264   : > { %v13027_v22 = vadd.f32 %v5275_v18, %v5274_v14  ;;  %v7799_v39 = vmin.f32 %v12959_v16, %v12463_v43  ;;  %3215 = vmatprep.mubr.bf16.mxu1 %v18054_v62  ;;  %v3822_v35 = vrot.slane %v3821_v51, 4  ;;  %v3863_v36 = vadd.f32 %v12964_v54, %v12472_v60  ;;  %18077 = vst [vmem:[#allocation70_spill] sm:$0xff] %v13049_v11 }
 0x265   : > { %v5249_v41 = vadd.f32 %v12977_v46, %v5103_v47  ;;  %v5105_v61 = vmul.f32 %v12472_v60, %v12472_v60  ;;  %v6538_v55 = vrot.slane %v6537_v19, 4  ;;  %v6563_v43 = vmax.f32 %v12969_v42, %v12472_v60  ;;  %v13051_v46 = vpop.f32.mrb[89].mxu1  ;;  %v10910_v47 = vld [vmem:[#allocation6 + $0x28] sm:$0xff]   ;;  %18079 = vst [vmem:[#allocation72_spill] sm:$0xff] %v13054_v10 }
 0x266   : > { %v7800_v27 = vrot.slane %v7799_v39, 4  ;;  %v7825_v16 = vmin.f32 %v12972_v25, %v12472_v60  ;;  %18078 = vst [vmem:[#allocation71_spill] sm:$0xff] %v13051_v46  ;;  %v3823_v54 = vadd.f32 %v3822_v35, %v3821_v51  ;;  %v3864_v9 = vrot.slane %v3863_v36, 4  ;;  %v13056_v42 = vpop.f32.mrb[90].mxu1 }
 0x267   : > { %v5250_v14 = vrot.slane %v5249_v41, 4  ;;  %v5291_v3 = vadd.f32 %v12984_v1, %v5105_v61  ;;  %v6539_v13 = vmax.f32 %v6537_v19, %v6538_v55  ;;  %v6564_v18 = vrot.slane %v6563_v43, 4  ;;  %3103 = vmatmul.mubr.bf16.gmra.mrb[180].mxu0 %v10910_v47  ;;  %18080 = vst [vmem:[#allocation73_spill] sm:$0xff] %v13056_v42  ;;  %v13059_v19 = vpop.f32.mrb[91].mxu0 }
 0x268   : > { %v7801_v53 = vmin.f32 %v7799_v39, %v7800_v27  ;;  %v7826_v59 = vrot.slane %v7825_v16, 4  ;;  %v3824_v60 = vrot.slane %v3823_v54, 2  ;;  %v3865_v11 = vadd.f32 %v3864_v9, %v3863_v36  ;;  %3112 = vmatprep.mubr.bf16.mxu0 %v18054_v62  ;;  %18081 = vst [vmem:[#allocation74_spill] sm:$0xff] %v13059_v19  ;;  %v13061_v39 = vpop.f32.mrb[91].mxu1 }
 0x269   : > { %v5251_v25 = vadd.f32 %v5250_v14, %v5249_v41  ;;  %v5292_v52 = vrot.slane %v5291_v3, 4  ;;  %v6540_v51 = vrot.slane %v6539_v13, 2  ;;  %v6565_v46 = vmax.f32 %v6563_v43, %v6564_v18  ;;  %18082 = vst [vmem:[#allocation75_spill] sm:$0xff] %v13061_v39 }
 0x26a   : > { %v7802_v35 = vrot.slane %v7801_v53, 2  ;;  %v7827_v1 = vmin.f32 %v7825_v16, %v7826_v59  ;;  %v3825_v61 = vadd.f32 %v3824_v60, %v3823_v54  ;;  %v3866_v27 = vrot.slane %v3865_v11, 2 }
 0x26b   : > { %v5252_v55 = vrot.slane %v5251_v25, 2  ;;  %v5293_v10 = vadd.f32 %v5292_v52, %v5291_v3  ;;  %3216 = vmatmul.mubr.bf16.gmra.mrb[180].mxu1 %v10910_v47  ;;  %v6541_v42 = vmax.f32 %v6539_v13, %v6540_v51  ;;  %v6566_v41 = vrot.slane %v6565_v46, 2  ;;  %v10911_v47 = vld [vmem:[#allocation6 + $0x30] sm:$0xff]  }
 0x26c   : > { %v7803_v38 = vmin.f32 %v7801_v53, %v7802_v35  ;;  %v7828_v36 = vrot.slane %v7827_v1, 2  ;;  %3225 = vmatprep.mubr.bf16.mxu1 %v18054_v62  ;;  %v3826_v14 = vrot.slane %v3825_v61, 1  ;;  %v3867_v4 = vadd.f32 %v3866_v27, %v3865_v11 }
 0x26d   : > { %v5253_v9 = vadd.f32 %v5252_v55, %v5251_v25  ;;  %v5294_v43 = vrot.slane %v5293_v10, 2  ;;  %v6542_v16 = vrot.slane %v6541_v42, 1  ;;  %v6567_v59 = vmax.f32 %v6565_v46, %v6566_v41  ;;  %v13066_v55 = vpop.f32.mrb[92].mxu0  ;;  %v13068_v46 = vpop.f32.mrb[92].mxu1 }
 0x26e   : > { %v7804_v18 = vrot.slane %v7803_v38, 1  ;;  %v7829_v19 = vmin.f32 %v7827_v1, %v7828_v36  ;;  %v3827_v39 = vadd.f32 %v3826_v14, %v3825_v61  ;;  %v3868_v60 = vrot.slane %v3867_v4, 1  ;;  %18083 = vst [vmem:[#allocation76_spill] sm:$0xff] %v13066_v55  ;;  %18084 = vst [vmem:[#allocation77_spill] sm:$0xff] %v13068_v46  ;;  %v13072_v61 = vpop.f32.mrb[93].mxu0  ;;  %v18118_v46 = vld [vmem:[#allocation55_spill] sm:$0xff] }
 0x26f   : > { %v5254_v54 = vrot.slane %v5253_v9, 1  ;;  %v5295_v12 = vadd.f32 %v5294_v43, %v5293_v10  ;;  %v6543_v52 = vmax.f32 %v6541_v42, %v6542_v16  ;;  %v6568_v13 = vrot.slane %v6567_v59, 1  ;;  %3113 = vmatmul.mubr.bf16.gmra.mrb[184].mxu0 %v10911_v47  ;;  %18085 = vst [vmem:[#allocation78_spill] sm:$0xff] %v13072_v61  ;;  %v13079_v36 = vpop.f32.mrb[94].mxu0  ;;  %v382_v43 = vld [vmem:[%s11338_s8 + $0x260] sm:$0xff] }
 0x270   : > { %v7805_v3 = vmin.f32 %v7803_v38, %v7804_v18  ;;  %v7830_v53 = vrot.slane %v7829_v19, 1  ;;  %v4408_v51 = vcombine.low %v13010_v45, %v3827_v39  ;;  %v3869_v25 = vadd.f32 %v3868_v60, %v3867_v4  ;;  %3122 = vmatprep.mubr.bf16.mxu0 %v18054_v62  ;;  %v13074_v45 = vpop.f32.mrb[93].mxu1  ;;  %18087 = vst [vmem:[#allocation80_spill] sm:$0xff] %v13079_v36  ;;  %v383_v60 = vld [vmem:[%s11338_s8 + $0x268] sm:$0xff] }
 0x271   : > { %v5255_v35 = vadd.f32 %v5254_v54, %v5253_v9  ;;  %v5296_v11 = vrot.slane %v5295_v12, 1  ;;  %v7099_v1 = vcombine.low %v13012_v28, %v6543_v52  ;;  %v6569_v38 = vmax.f32 %v6567_v59, %v6568_v13  ;;  %18086 = vst [vmem:[#allocation79_spill] sm:$0xff] %v13074_v45  ;;  %v13081_v28 = vpop.f32.mrb[94].mxu1  ;;  %v399_v52 = vld [vmem:[%s11338_s8 + $0x2e8] sm:$0xff] }
 0x272   : > { %v8361_v10 = vcombine.low %v13015_v2, %v7805_v3  ;;  %v7831_v42 = vmin.f32 %v7829_v19, %v7830_v53  ;;  %v4430_v4 = vrot.slane %v4408_v51, %v17989_v24  ;;  %v4409_v27 = vcombine.low %v13017_v8, %v3869_v25  ;;  %18088 = vst [vmem:[#allocation81_spill] sm:$0xff] %v13081_v28  ;;  %v13106_v3 = vpop.f32.mrb[95].mxu0 }
 0x273   : > { %v5836_v39 = vcombine.low %v13019_v33, %v5255_v35  ;;  %v5297_v41 = vadd.f32 %v5296_v11, %v5295_v12  ;;  %3226 = vmatmul.mubr.bf16.gmra.mrb[184].mxu1 %v10911_v47  ;;  %v7107_v2 = vrot.slane %v7099_v1, %v11677_v34  ;;  %v7100_v14 = vcombine.low %v13021_v17, %v6569_v38  ;;  %v398_v33 = vld [vmem:[%s11338_s8 + $0x2e0] sm:$0xff]  ;;  %v10912_v1 = vld [vmem:[#allocation6 + $0x38] sm:$0xff]  }
 0x274   : > { %v8369_v19 = vrot.slane %v8361_v10, %v11677_v34  ;;  %v8362_v9 = vcombine.low %v13029_v5, %v7831_v42  ;;  %3235 = vmatprep.mubr.bf16.mxu1 %v18054_v62  ;;  %v4437_v8 = vrot.slane %v4409_v27, %v17989_v24  ;;  %v13094_v18 = vsub.s32 2, %v18062_v15  ;;  %18092 = vst [vmem:[#allocation85_spill] sm:$0xff] %v13106_v3 }
 0x275   : > { %v5858_v12 = vrot.slane %v5836_v39, %v17989_v24  ;;  %v5837_v16 = vcombine.low %v13027_v22, %v5297_v41  ;;  %v7114_v59 = vrot.slane %v7100_v14, %v11677_v34  ;;  %v13099_v17 = vsub.s32 3, %v18062_v15 }
 0x276   : > { %18089 = vst [vmem:[#allocation82_spill] sm:$0xff] %v13094_v18  ;;  %v8376_v54 = vrot.slane %v8362_v9, %v11677_v34  ;;  %v13102_v5 = vsub.s32 4, %v18062_v15  ;;  %v4439_v13 = vcombine.low %v4430_v4, %v4437_v8  ;;  %v10567_v53 = vcombine.low %v382_v43, %v398_v33 }
 0x277   : > { %18090 = vst [vmem:[#allocation83_spill] sm:$0xff] %v13099_v17  ;;  %v5865_v22 = vrot.slane %v5837_v16, %v17989_v24  ;;  %v7115_v47 = vcombine.low %v7107_v2, %v7114_v59  ;;  %v11115_v35 = vmov 1934713408   ;;  %v10568_v11 = vcombine.high %v382_v43, %v398_v33  ;;  %3123 = vmatmul.mubr.bf16.gmra.mrb[188].mxu0 %v10912_v1 }
 0x278   : > { %18091 = vst [vmem:[#allocation84_spill] sm:$0xff] %v13102_v5  ;;  %v8377_v51 = vcombine.low %v8369_v19, %v8376_v54  ;;  %v9793_v25 = vunpack.c.l.s4 %v11115_v35  ;;  %v4453_v10 = vrot.slane %v4439_v13, %v17989_v24  ;;  %v10569_v42 = vcombine.low %v383_v60, %v399_v52  ;;  %3278 = vmatprep.mubr.bf16.mxu0 %v18054_v62  ;;  %v18093_v19 = vld [vmem:[#allocation49_spill] sm:$0xff] }
 0x279   : > { %v5867_v38 = vcombine.low %v5858_v12, %v5865_v22  ;;  %v10570_v39 = vcombine.high %v383_v60, %v399_v52  ;;  %v7233_v27 = vrot.slane %v7115_v47, 7  ;;  %3250 = vmatprep.subr.bf16.mxu0 %v10568_v11  ;;  %v4626_v2 = vmul.f32 %v12501_v7, %v12501_v7  ;;  %v18098_v52 = vld [vmem:[#allocation50_spill] sm:$0xff] }
 0x27a   : > { %v8489_v41 = vrot.slane %v8377_v51, 7  ;;  %v9794_v4 = vunpack.c.0.s8 %v9793_v25  ;;  %v4454_v14 = vcombine.low %v18093_v19, %v4453_v10  ;;  %v13116_v43 = vsub.s32 5, %v18062_v15  ;;  %3251 = vmatpush1.bf16.msra.mxu0 %v10567_v53  ;;  %v18099_v53 = vld [vmem:[#allocation53_spill] sm:$0xff]  ;;  %v18100_v51 = vld [vmem:[#allocation54_spill] sm:$0xff] }
 0x27b   : > { %v5881_v9 = vrot.slane %v5867_v38, %v17989_v24  ;;  %3363 = vmatprep.subr.bf16.mxu1 %v10570_v39  ;;  %v4628_v33 = vmul.f32 %v12509_v31, %v12509_v31  ;;  %v18095_v12 = vcombine.low %v12738_v30, %v12761_v26  ;;  %v18096_v16 = vcombine.low %v12741_v58, %v12788_v56 }
 0x27c   : > { %18094 = vst [vmem:[#allocation49_spill] sm:$0xff] %v13116_v43  ;;  %v13129_v54 = vsub.s32 %v9794_v4, %v18062_v15  ;;  %3364 = vmatpush1.bf16.msra.mxu1 %v10569_v42  ;;  %v4627_v60 = vmul.f32 %v12511_v57, %v12511_v57  ;;  %v13136_v26 = vmul.f32 0.0078125, %v4454_v14  ;;  %v4629_v47 = vmul.f32 %v18099_v53, %v18099_v53 }
 0x27d   : > { %v7234_v8 = vsel %vm7223_vm0, %v7233_v27, %v18095_v12  ;;  %v8490_v59 = vsel %vm7223_vm0, %v8489_v41, %v18096_v16  ;;  %v5882_v13 = vcombine.low %v18098_v52, %v5881_v9  ;;  %3236 = vmatmul.mubr.bf16.gmra.mrb[188].mxu1 %v10912_v1  ;;  %v3870_v35 = vadd.f32 %v18100_v51, %v12501_v7 }
 0x27e   : > { %18097 = vst [vmem:[#allocation86_spill] sm:$0xff] %v13129_v54  ;;  %v7235_v22 = vsel %vm7225_vm1, %v7233_v27, %v7234_v8  ;;  %v8491_v30 = vsel %vm7225_vm1, %v8489_v41, %v8490_v59  ;;  %3391 = vmatprep.mubr.bf16.mxu1 %v18054_v62  ;;  %v8579_v1 = vmul.f32 %v13136_v26, %v13136_v26  ;;  %v13171_v59 = vpop.f32.mrb[95].mxu1 }
 0x27f   : > { %v7236_v58 = vsel %vm7227_vm2, %v7233_v27, %v7235_v22  ;;  %v8492_v56 = vsel %vm7227_vm2, %v8489_v41, %v8491_v30  ;;  %v8575_v10 = vmul.f32 0.0078125, %v5882_v13  ;;  %v4658_v14 = vmul.f32 %v18100_v51, %v18100_v51  ;;  %18101 = vst [vmem:[#allocation50_spill] sm:$0xff] %v13171_v59 }
 0x280   : > { %v7237_v25 = vsel %vm7229_vm3, %v7233_v27, %v7236_v58  ;;  %v8493_v11 = vsel %vm7229_vm3, %v8489_v41, %v8492_v56  ;;  %v6154_v27 = vmax.f32 %v12501_v7, %v18100_v51  ;;  %v7416_v41 = vmin.f32 %v12501_v7, %v18100_v51 }
 0x281   : > { %v8823_v38 = vcombine.high %v7237_v25, %v7237_v25  ;;  %v13150_v42 = vrot.slane %v7237_v25, %v11677_v34  ;;  %v9039_v39 = vcombine.high %v8493_v11, %v8493_v11  ;;  %v13153_v4 = vrot.slane %v8493_v11, %v11677_v34  ;;  %v430_v25 = vld [vmem:[%s11338_s8 + $0x3e0] sm:$0xff] }
 0x282   : > { %v8583_v19 = vsub.f32 %v8575_v10, %v8579_v1  ;;  %v5298_v13 = vadd.f32 %v4658_v14, %v4626_v2  ;;  %v3912_v7 = vadd.f32 %v12537_v48, %v12509_v31  ;;  %v4660_v22 = vmul.f32 %v12537_v48, %v12537_v48  ;;  %v414_v2 = vld [vmem:[%s11338_s8 + $0x360] sm:$0xff]  ;;  %v18102_v10 = vld [vmem:[#allocation19_spill] sm:$0xff] }
 0x283   : > { %v13162_v9 = vrot.slane %v8823_v38, %v11677_v34  ;;  %v13167_v8 = vrot.slane %v9039_v39, %v11677_v34  ;;  %v6180_v56 = vmax.f32 %v12509_v31, %v12537_v48  ;;  %v7442_v51 = vmin.f32 %v12509_v31, %v12537_v48  ;;  %v415_v39 = vld [vmem:[%s11338_s8 + $0x368] sm:$0xff]  ;;  %v18103_v31 = vld [vmem:[#allocation20_spill] sm:$0xff] }
 0x284   : > { %v8594_v52 = vadd.f32 1e-05, %v8583_v19  ;;  %v5340_v11 = vadd.f32 %v4660_v22, %v4628_v33  ;;  %v3891_v1 = vadd.f32 %v18102_v10, %v12511_v57  ;;  %v4659_v38 = vmul.f32 %v18102_v10, %v18102_v10  ;;  %v431_v19 = vld [vmem:[%s11338_s8 + $0x3e8] sm:$0xff] }
 0x285   : > { %v6167_v14 = vmax.f32 %v12511_v57, %v18102_v10  ;;  %v7429_v58 = vmin.f32 %v12511_v57, %v18102_v10  ;;  %v3933_v48 = vadd.f32 %v18103_v31, %v18099_v53  ;;  %v4661_v33 = vmul.f32 %v18103_v31, %v18103_v31  ;;  %v18104_v57 = vld [vmem:[#allocation57_spill] sm:$0xff] }
 0x286   : > { %10855 = vrsqrt.f32 %v8594_v52  ;;  %v5319_v52 = vadd.f32 %v4659_v38, %v4627_v60  ;;  %v6193_v22 = vmax.f32 %v18099_v53, %v18103_v31  ;;  %v7455_v16 = vmin.f32 %v18099_v53, %v18103_v31  ;;  %v13215_v38 = vpop.f32.mrb[96].mxu0 }
 0x287   : > { %v10599_v30 = vcombine.low %v414_v2, %v430_v25  ;;  %v5361_v12 = vadd.f32 %v4661_v33, %v4629_v47  ;;  %v10600_v24 = vcombine.high %v414_v2, %v430_v25  ;;  %v10601_v59 = vcombine.low %v415_v39, %v431_v19  ;;  %18105 = vst [vmem:[#allocation53_spill] sm:$0xff] %v13215_v38  ;;  %v18107_v47 = vld [vmem:[#allocation58_spill] sm:$0xff]  ;;  %v13323_v50 = vpop.f32.mrb[97].mxu0 }
 0x288   : > { %v10602_v3 = vcombine.high %v415_v39, %v431_v19  ;;  %v3871_v10 = vadd.f32 %v3870_v35, %v18104_v57  ;;  %v4690_v28 = vmul.f32 %v18104_v57, %v18104_v57  ;;  %v13210_v36 = vmax.f32 %v6154_v27, %v18104_v57  ;;  %v18109_v19 = vld [vmem:[#allocation59_spill] sm:$0xff] }
 0x289   : > { %v13213_v60 = vmin.f32 %v7416_v41, %v18104_v57  ;;  %v13218_v53 = vsub.s32 6, %v18062_v15  ;;  %3252 = vmatprep.subr.bf16.mxu0 %v10600_v24  ;;  %v3913_v2 = vadd.f32 %v3912_v7, %v18107_v47  ;;  %v4692_v35 = vmul.f32 %v18107_v47, %v18107_v47  ;;  %18124 = vst [vmem:[#allocation59_spill] sm:$0xff] %v13323_v50 }
 0x28a   : > { %3365 = vmatprep.subr.bf16.mxu1 %v10602_v3  ;;  %v13224_v25 = vmax.f32 %v6180_v56, %v18107_v47  ;;  %v13227_v27 = vsub.s32 7, %v18062_v15  ;;  %3253 = vmatpush1.bf16.msra.mxu0 %v10599_v30  ;;  %v5299_v41 = vadd.f32 %v5298_v13, %v4690_v28  ;;  %v13230_v39 = vmin.f32 %v7442_v51, %v18107_v47  ;;  %v8587_v15 = vld [vmem:[%s13243_s27] ss:$2 sm:$0xff]  ;;  %v18111_v28 = vld [vmem:[#allocation60_spill] sm:$0xff] }
 0x28b   : > { %18106 = vst [vmem:[#allocation54_spill] sm:$0xff] %v13218_v53  ;;  %3366 = vmatpush1.bf16.msra.mxu1 %v10601_v59  ;;  %v3892_v24 = vadd.f32 %v3891_v1, %v18109_v19  ;;  %v5341_v3 = vadd.f32 %v5340_v11, %v4692_v35  ;;  %v4691_v7 = vmul.f32 %v18109_v19, %v18109_v19  ;;  %v18112_v11 = vld [vmem:[#allocation61_spill] sm:$0xff]  ;;  %v18113_v47 = vld [vmem:[#allocation24_spill] sm:$0xff] }
 0x28c   : > { %18108 = vst [vmem:[#allocation19_spill] sm:$0xff] %v13227_v27  ;;  %v13236_v31 = vmax.f32 %v6167_v14, %v18109_v19  ;;  %v13239_v56 = vmin.f32 %v7429_v58, %v18109_v19  ;;  %v13247_v59 = vadd.f32 %v3933_v48, %v18111_v28  ;;  %v4693_v13 = vmul.f32 %v18111_v28, %v18111_v28 }
 0x28d   : > { %v13252_v30 = vmax.f32 %v6193_v22, %v18111_v28  ;;  %v13255_v51 = vmin.f32 %v7455_v16, %v18111_v28  ;;  %v13257_v58 = vadd.f32 %v5319_v52, %v4691_v7  ;;  %v13260_v1 = vadd.f32 %v3871_v10, %v18112_v11 }
 0x28e   : > { %18110 = vst [vmem:[#allocation20_spill] sm:$0xff] %v13236_v31  ;;  %v4722_v14 = vmul.f32 %v18112_v11, %v18112_v11  ;;  %v13266_v57 = vadd.f32 %v5361_v12, %v4693_v13  ;;  %v13271_v16 = vadd.f32 %v3913_v2, %v18113_v47  ;;  %v4724_v52 = vmul.f32 %v18113_v47, %v18113_v47  ;;  %v10738_v12 = vld [vmem:[%s13243_s27 + $0x1] ss:$2 sm:$0xff] }
 0x28f   : > { %v18114_v13 = vld [vmem:[#allocation25_spill] sm:$0xff]  ;;  %v18119_v49 = vcombine.high %v18118_v46, %v18118_v46 }
 0x290   : > { %v10856_v33 = vpop.eup %10855  ;;  %v13275_v35 = vadd.f32 %v5299_v41, %v4722_v14  ;;  %v13282_v28 = vadd.f32 %v5341_v3, %v4724_v52  ;;  %v13285_v22 = vadd.f32 %v3892_v24, %v18114_v13  ;;  %v13289_v2 = vmul.f32 %v18114_v13, %v18114_v13 }
 0x291   : > { %v8602_v10 = vmul.f32 %v10856_v33, %v8587_v15 }
 0x292   : > { %18115 = vst [vmem:[#allocation57_spill] sm:$0xff] %v13285_v22 }
 0x293   : > { %v8614_v15 = vmul.f32 %v8602_v10, %v13136_v26  ;;  %vm8622_vm4 = vcmp.ge.f32.partialorder %v8602_v10, 0.0  ;;  %v8641_v14 = vrot.slane %v8602_v10, %v12944_v37  ;;  %v8645_v33 = vrot.slane %v8602_v10, %v12951_v63  ;;  %v18116_v26 = vld [vmem:[#allocation51_spill] sm:$0xff] }
 0x294   : > { %v8649_v3 = vrot.slane %v8602_v10, %v13094_v18  ;;  %v8653_v52 = vrot.slane %v8602_v10, %v13099_v17  ;;  %v8657_v24 = vrot.slane %v8602_v10, %v13102_v5  ;;  %v8661_v7 = vrot.slane %v8602_v10, %v13116_v43 }
 0x295   : > { %v13300_v19 = vsub.f32 %v10738_v12, %v8614_v15  ;;  %v8665_v48 = vrot.slane %v8602_v10, %v13218_v53  ;;  %v8669_v41 = vrot.slane %v8602_v10, %v13227_v27  ;;  %v8974_v38 = vmul.f32 %v18116_v26, %v8641_v14  ;;  %v13313_v12 = vpop.f32.mrb[96].mxu1 }
 0x296   : > { %v18117_v45 = vcombine.high %v18116_v26, %v18116_v26  ;;  %v8976_v55 = vmul.f32 %v18118_v46, %v8649_v3  ;;  %v8977_v32 = vmul.f32 %v18119_v49, %v8653_v52  ;;  %v8978_v40 = vmul.f32 %v13150_v42, %v8657_v24  ;;  %18120 = vst [vmem:[#allocation58_spill] sm:$0xff] %v13313_v12  ;;  %v13325_v46 = vpop.f32.mrb[97].mxu1 }
 0x297   : > { %v18121_v15 = vcombine.high %v13150_v42, %v13150_v42  ;;  %v8980_v44 = vmul.f32 %v13162_v9, %v8665_v48  ;;  %v18122_v26 = vcombine.high %v13162_v9, %v13162_v9  ;;  %v9190_v20 = vmul.f32 %v18123_v6, %v8641_v14  ;;  %18125 = vst [vmem:[#allocation60_spill] sm:$0xff] %v13325_v46 }
 0x298   : > { %v8975_v61 = vmul.f32 %v18117_v45, %v8645_v33  ;;  %v18126_v49 = vcombine.high %v18123_v6, %v18123_v6  ;;  %v9192_v31 = vmul.f32 %v18127_v21, %v8649_v3  ;;  %v18128_v42 = vcombine.high %v18127_v21, %v18127_v21  ;;  %v13346_v3 = vpop.f32.mrb[98].mxu1 }
 0x299   : > { %v8979_v23 = vmul.f32 %v18121_v15, %v8661_v7  ;;  %v8981_v45 = vmul.f32 %v18122_v26, %v8669_v41  ;;  %v9194_v22 = vmul.f32 %v13153_v4, %v8657_v24  ;;  %v18129_v9 = vcombine.high %v13153_v4, %v13153_v4  ;;  %18131 = vst [vmem:[#allocation61_spill] sm:$0xff] %v13346_v3 }
 0x29a   : > { %v9191_v12 = vmul.f32 %v18126_v49, %v8645_v33  ;;  %v9193_v15 = vmul.f32 %v18128_v42, %v8653_v52  ;;  %v9196_v26 = vmul.f32 %v13167_v8, %v8665_v48  ;;  %v18130_v46 = vcombine.high %v13167_v8, %v13167_v8  ;;  %v13344_v33 = vpop.f32.mrb[98].mxu0 }
 0x29b   : > { %v9195_v14 = vmul.f32 %v18129_v9, %v8661_v7  ;;  %v9222_v6 = vsel %vm8622_vm4, 1, %v18054_v62 }
 0x29c   : > { %v9197_v50 = vmul.f32 %v18130_v46, %v8669_v41  ;;  %v9229_v21 = vrot.slane %v9222_v6, %v12944_v37  ;;  %v9233_v52 = vrot.slane %v9222_v6, %v12951_v63  ;;  %v9237_v4 = vrot.slane %v9222_v6, %v13094_v18 }
 0x29d   : > { %v9241_v7 = vrot.slane %v9222_v6, %v13099_v17  ;;  %v9245_v48 = vrot.slane %v9222_v6, %v13102_v5  ;;  %v9249_v8 = vrot.slane %v9222_v6, %v13116_v43  ;;  %v9253_v41 = vrot.slane %v9222_v6, %v13218_v53 }
 0x29e   : > { %v9257_v10 = vrot.slane %v9222_v6, %v13227_v27  ;;  %vm13356_vm5 = vcmp.eq.s32.totalorder %v9229_v21, 1  ;;  %vm13360_vm6 = vcmp.eq.s32.totalorder %v9233_v52, 1  ;;  %vm13364_vm7 = vcmp.eq.s32.totalorder %v9237_v4, 1  ;;  %v446_v52 = vld [vmem:[%s11338_s8 + $0x460] sm:$0xff] }
 0x29f   : > { %vm13368_vm8 = vcmp.eq.s32.totalorder %v9241_v7, 1  ;;  %vm13372_vm9 = vcmp.eq.s32.totalorder %v9245_v48, 1  ;;  %vm13376_vm10 = vcmp.eq.s32.totalorder %v9249_v8, 1  ;;  %vm13380_vm11 = vcmp.eq.s32.totalorder %v9253_v41, 1  ;;  %v13396_v41 = vpop.f32.mrb[99].mxu0 }
 0x2a0   : > { %vm13384_vm12 = vcmp.eq.s32.totalorder %v9257_v10, 1  ;;  %v9386_v4 = vsel %vm13356_vm5, %v8974_v38, %v9190_v20  ;;  %v9387_v7 = vsel %vm13360_vm6, %v8975_v61, %v9191_v12  ;;  %v9388_v48 = vsel %vm13364_vm7, %v8976_v55, %v9192_v31  ;;  %v13406_v38 = vpop.f32.mrb[99].mxu1 }
 0x2a1   : > { %v9389_v8 = vsel %vm13368_vm8, %v8977_v32, %v9193_v15  ;;  %v9390_v10 = vsel %vm13372_vm9, %v8978_v40, %v9194_v22  ;;  %v9391_v3 = vsel %vm13376_vm10, %v8979_v23, %v9195_v14  ;;  %v9392_v20 = vsel %vm13380_vm11, %v8980_v44, %v9196_v26 }
 0x2a2   : > { %v9393_v61 = vsel %vm13384_vm12, %v8981_v45, %v9197_v50  ;;  %v9425_v55 = vrot.slane %v13300_v19, %v12944_v37  ;;  %v9429_v32 = vrot.slane %v13300_v19, %v12951_v63  ;;  %v9433_v40 = vrot.slane %v13300_v19, %v13094_v18 }
 0x2a3   : > { %v9437_v23 = vrot.slane %v13300_v19, %v13099_v17  ;;  %v9441_v44 = vrot.slane %v13300_v19, %v13102_v5  ;;  %v9445_v50 = vrot.slane %v13300_v19, %v13116_v43  ;;  %v9449_v31 = vrot.slane %v13300_v19, %v13218_v53  ;;  %v18180_v5 = vld [vmem:[#allocation38_spill] sm:$0xff] }
 0x2a4   : > { %v9453_v22 = vrot.slane %v13300_v19, %v13227_v27  ;;  %v9582_v12 = vadd.f32 %v9425_v55, %v9386_v4  ;;  %v9583_v45 = vadd.f32 %v9429_v32, %v9387_v7  ;;  %v9584_v15 = vadd.f32 %v9433_v40, %v9388_v48  ;;  %v462_v19 = vld [vmem:[%s11338_s8 + $0x4e0] sm:$0xff]  ;;  %v18148_v48 = vld [vmem:[#allocation26_spill] sm:$0xff]  ;;  %v13444_v32 = vpop.f32.mrb[100].mxu1 }
 0x2a5   : > { %v9585_v14 = vadd.f32 %v9437_v23, %v9389_v8  ;;  %v9586_v26 = vadd.f32 %v9441_v44, %v9390_v10  ;;  %v9587_v24 = vadd.f32 %v9445_v50, %v9391_v3  ;;  %v9588_v46 = vadd.f32 %v9449_v31, %v9392_v20  ;;  %v447_v10 = vld [vmem:[%s11338_s8 + $0x468] sm:$0xff]  ;;  %v13451_v31 = vpop.f32.mrb[101].mxu1 }
 0x2a6   : > { %v9589_v49 = vadd.f32 %v9453_v22, %v9393_v61  ;;  %v9646_v42 = vcombine.low %v9582_v12, %v9583_v45  ;;  %v5321_v6 = vadd.f32 %v13257_v58, %v13289_v2  ;;  %v7431_v21 = vmin.f32 %v13239_v56, %v18114_v13  ;;  %v463_v20 = vld [vmem:[%s11338_s8 + $0x4e8] sm:$0xff]  ;;  %v13442_v2 = vpop.f32.mrb[100].mxu0 }
 0x2a7   : > { %v9647_v9 = vcombine.low %v9584_v15, %v9585_v14  ;;  %v9663_v4 = vcombine.low %v9586_v26, %v9587_v24  ;;  %v3935_v8 = vadd.f32 %v13247_v59, %v18148_v48  ;;  %v4725_v3 = vmul.f32 %v18148_v48, %v18148_v48  ;;  %v13449_v50 = vpop.f32.mrb[101].mxu0 }
 0x2a8   : > { %v9664_v7 = vcombine.low %v9588_v46, %v9589_v49  ;;  %v9654_v61 = vrot.slane %v9646_v42, %v11677_v34  ;;  %v6195_v58 = vmax.f32 %v13252_v30, %v18148_v48  ;;  %v7457_v56 = vmin.f32 %v13255_v51, %v18148_v48  ;;  %v13463_v24 = vpop.f32.mrb[102].mxu0  ;;  %v13465_v46 = vpop.f32.mrb[102].mxu1  ;;  %v18153_v48 = vld [vmem:[#allocation27_spill] sm:$0xff] }
 0x2a9   : > { %v9661_v55 = vrot.slane %v9647_v9, %v11677_v34  ;;  %v9671_v59 = vrot.slane %v9663_v4, %v11677_v34  ;;  %v5363_v23 = vadd.f32 %v13266_v57, %v4725_v3  ;;  %v10631_v44 = vcombine.low %v446_v52, %v462_v19  ;;  %v13480_v4 = vpop.f32.mrb[103].mxu0  ;;  %v18154_v3 = vld [vmem:[#allocation57_spill] sm:$0xff] }
 0x2aa   : > { %v9678_v40 = vrot.slane %v9664_v7, %v11677_v34  ;;  %v10632_v22 = vcombine.high %v446_v52, %v462_v19  ;;  %v10633_v30 = vcombine.low %v447_v10, %v463_v20  ;;  %v10634_v12 = vcombine.high %v447_v10, %v463_v20 }
 0x2ab   : > { %v3873_v51 = vadd.f32 %v13260_v1, %v12711_v29  ;;  %v10742_v45 = vcombine.low %v9654_v61, %v9671_v59  ;;  %v4754_v14 = vmul.f32 %v12711_v29, %v12711_v29  ;;  %v18149_v57 = vmax.f32 %v13210_v36, %v18112_v11  ;;  %v18157_v61 = vld [vmem:[#allocation20_spill] sm:$0xff] }
 0x2ac   : > { %v10743_v15 = vcombine.low %v9661_v55, %v9678_v40  ;;  %3254 = vmatprep.subr.bf16.mxu0 %v10632_v22  ;;  %3367 = vmatprep.subr.bf16.mxu1 %v10634_v12  ;;  %v18150_v1 = vmin.f32 %v13213_v60, %v18112_v11  ;;  %v3915_v42 = vadd.f32 %v13271_v16, %v12713_v0  ;;  %v18162_v12 = vld [vmem:[#allocation29_spill] sm:$0xff] }
 0x2ad   : > { %v13461_v26 = vmax.f32 %v18149_v57, %v12711_v29  ;;  %v4756_v36 = vmul.f32 %v12713_v0, %v12713_v0  ;;  %v9798_v9 = vrot.slane %v10742_v45, %v13129_v54  ;;  %3255 = vmatpush1.bf16.msra.mxu0 %v10631_v44  ;;  %3368 = vmatpush1.bf16.msra.mxu1 %v10633_v30  ;;  %v18163_v57 = vld [vmem:[#allocation21_spill] sm:$0xff] }
 0x2ae   : > { %v13471_v49 = vmin.f32 %v18150_v1, %v12711_v29  ;;  %v9805_v52 = vrot.slane %v10743_v15, %v13129_v54  ;;  %v5301_v19 = vadd.f32 %v13275_v35, %v4754_v14  ;;  %v18151_v29 = vmax.f32 %v13224_v25, %v18113_v47  ;;  %v13497_v35 = vpop.f32.mrb[103].mxu1 }
 0x2af   : > { %v5343_v60 = vadd.f32 %v13282_v28, %v4756_v36  ;;  %v18152_v16 = vmin.f32 %v13230_v39, %v18113_v47  ;;  %v3894_v10 = vadd.f32 %v18154_v3, %v18153_v48  ;;  %v4755_v25 = vmul.f32 %v18153_v48, %v18153_v48  ;;  %v18159_v39 = vld [vmem:[#allocation28_spill] sm:$0xff] }
 0x2b0   : > { %v13487_v11 = vmax.f32 %v18151_v29, %v12713_v0  ;;  %v13499_v20 = vcombine.low %v9798_v9, %v9805_v52  ;;  %v13501_v28 = vcombine.high %v9798_v9, %v9805_v52  ;;  %v18158_v55 = vmax.f32 %v18157_v61, %v18114_v13  ;;  %v18164_v9 = vld [vmem:[#allocation30_spill] sm:$0xff]  ;;  %v494_v29 = vld [vmem:[%s11338_s8 + $0x5e0] sm:$0xff] }
 0x2b1   : > { %v13493_v7 = vmin.f32 %v18152_v16, %v12713_v0  ;;  %v13512_v0 = vmin.f32 %v7431_v21, %v18153_v48  ;;  %v3936_v47 = vadd.f32 %v3935_v8, %v18159_v39  ;;  %v4757_v40 = vmul.f32 %v18159_v39, %v18159_v39  ;;  %v495_v16 = vld [vmem:[%s11338_s8 + $0x5e8] sm:$0xff] }
 0x2b2   : > { %18155 = vst [vmem:[#allocation24_spill] sm:$0xff] %v13499_v20  ;;  %18156 = vst [vmem:[#allocation25_spill] sm:$0xff] %v13501_v28  ;;  %v13509_v59 = vmax.f32 %v18158_v55, %v18153_v48  ;;  %v13518_v44 = vmax.f32 %v6195_v58, %v18159_v39  ;;  %v13522_v22 = vmul.f32 %v13499_v20, %v13499_v20  ;;  %v13552_v48 = vpop.f32.mrb[104].mxu1 }
 0x2b3   : > { %v13526_v13 = vmul.f32 %v13501_v28, %v13501_v28  ;;  %v5322_v21 = vadd.f32 %v5321_v6, %v4755_v25  ;;  %v7458_v30 = vmin.f32 %v7457_v56, %v18159_v39  ;;  %v5364_v8 = vadd.f32 %v5363_v23, %v4757_v40  ;;  %v478_v23 = vld [vmem:[%s11338_s8 + $0x560] sm:$0xff]  ;;  %v13561_v61 = vpop.f32.mrb[105].mxu1 }
 0x2b4   : > { %18160 = vst [vmem:[#allocation51_spill] sm:$0xff] %v13522_v22  ;;  %v3874_v45 = vadd.f32 %v3873_v51, %v18162_v12  ;;  %v4786_v58 = vmul.f32 %v18162_v12, %v18162_v12  ;;  %v6158_v15 = vmax.f32 %v13461_v26, %v18162_v12  ;;  %v7420_v14 = vmin.f32 %v13471_v49, %v18162_v12  ;;  %v479_v49 = vld [vmem:[%s11338_s8 + $0x568] sm:$0xff] }
 0x2b5   : > { %18161 = vst [vmem:[#allocation55_spill] sm:$0xff] %v13526_v13  ;;  %v3916_v1 = vadd.f32 %v3915_v42, %v18163_v57  ;;  %v4788_v6 = vmul.f32 %v18163_v57, %v18163_v57  ;;  %v6184_v56 = vmax.f32 %v13487_v11, %v18163_v57  ;;  %v7446_v51 = vmin.f32 %v13493_v7, %v18163_v57  ;;  %v13550_v42 = vpop.f32.mrb[104].mxu0  ;;  %v18165_v7 = vld [vmem:[#allocation31_spill] sm:$0xff] }
 0x2b6   : > { %v5302_v36 = vadd.f32 %v5301_v19, %v4786_v58  ;;  %v3895_v52 = vadd.f32 %v3894_v10, %v18164_v9  ;;  %v4787_v26 = vmul.f32 %v18164_v9, %v18164_v9  ;;  %v6171_v11 = vmax.f32 %v13509_v59, %v18164_v9  ;;  %v13559_v10 = vpop.f32.mrb[105].mxu0 }
 0x2b7   : > { %v5344_v3 = vadd.f32 %v5343_v60, %v4788_v6  ;;  %v7433_v19 = vmin.f32 %v13512_v0, %v18164_v9  ;;  %v3937_v25 = vadd.f32 %v3936_v47, %v18165_v7  ;;  %v4789_v39 = vmul.f32 %v18165_v7, %v18165_v7  ;;  %v13568_v12 = vpop.f32.mrb[106].mxu0  ;;  %v13570_v47 = vpop.f32.mrb[106].mxu1  ;;  %v18166_v9 = vld [vmem:[#allocation32_spill] sm:$0xff] }
 0x2b8   : > { %v5323_v55 = vadd.f32 %v5322_v21, %v4787_v26  ;;  %v6197_v40 = vmax.f32 %v13518_v44, %v18165_v7  ;;  %v7459_v60 = vmin.f32 %v7458_v30, %v18165_v7  ;;  %v10663_v59 = vcombine.low %v478_v23, %v494_v29  ;;  %v18167_v30 = vld [vmem:[#allocation33_spill] sm:$0xff] }
 0x2b9   : > { %v10664_v58 = vcombine.high %v478_v23, %v494_v29  ;;  %v10665_v0 = vcombine.low %v479_v49, %v495_v16  ;;  %v10666_v57 = vcombine.high %v479_v49, %v495_v16  ;;  %v5365_v6 = vadd.f32 %v5364_v8, %v4789_v39  ;;  %v13580_v29 = vpop.f32.mrb[107].mxu0  ;;  %v13582_v49 = vpop.f32.mrb[107].mxu1  ;;  %v18169_v39 = vld [vmem:[#allocation34_spill] sm:$0xff] }
 0x2ba   : > { %v3875_v28 = vadd.f32 %v3874_v45, %v18166_v9  ;;  %v4818_v21 = vmul.f32 %v18166_v9, %v18166_v9  ;;  %v6159_v26 = vmax.f32 %v6158_v15, %v18166_v9  ;;  %v7421_v44 = vmin.f32 %v7420_v14, %v18166_v9  ;;  %18168 = vst [vmem:[#allocation52_spill] sm:$0xff] %v13582_v49  ;;  %v18170_v9 = vld [vmem:[#allocation35_spill] sm:$0xff] }
 0x2bb   : > { %3256 = vmatprep.subr.bf16.mxu0 %v10664_v58  ;;  %3369 = vmatprep.subr.bf16.mxu1 %v10666_v57  ;;  %v3917_v7 = vadd.f32 %v3916_v1, %v18167_v30  ;;  %v4820_v23 = vmul.f32 %v18167_v30, %v18167_v30  ;;  %v6185_v45 = vmax.f32 %v6184_v56, %v18167_v30 }
 0x2bc   : > { %3257 = vmatpush1.bf16.msra.mxu0 %v10663_v59  ;;  %3370 = vmatpush1.bf16.msra.mxu1 %v10665_v0  ;;  %v5303_v8 = vadd.f32 %v5302_v36, %v4818_v21  ;;  %v7447_v15 = vmin.f32 %v7446_v51, %v18167_v30  ;;  %v3896_v58 = vadd.f32 %v3895_v52, %v18169_v39 }
 0x2bd   : > { %v5345_v16 = vadd.f32 %v5344_v3, %v4820_v23  ;;  %v4819_v14 = vmul.f32 %v18169_v39, %v18169_v39  ;;  %v6172_v1 = vmax.f32 %v6171_v11, %v18169_v39  ;;  %v7434_v57 = vmin.f32 %v7433_v19, %v18169_v39  ;;  %v18171_v3 = vld [vmem:[#allocation22_spill] sm:$0xff]  ;;  %v13614_v39 = vpop.f32.mrb[108].mxu1 }
 0x2be   : > { %v3938_v20 = vadd.f32 %v3937_v25, %v18170_v9  ;;  %v4821_v59 = vmul.f32 %v18170_v9, %v18170_v9  ;;  %v6198_v36 = vmax.f32 %v6197_v40, %v18170_v9  ;;  %v7460_v51 = vmin.f32 %v7459_v60, %v18170_v9  ;;  %v18172_v25 = vld [vmem:[#allocation36_spill] sm:$0xff]  ;;  %v13612_v60 = vpop.f32.mrb[108].mxu0  ;;  %18174 = vst [vmem:[#allocation26_spill] sm:$0xff] %v13614_v39  ;;  %v13623_v9 = vpop.f32.mrb[109].mxu1 }
 0x2bf   : > { %v5324_v56 = vadd.f32 %v5323_v55, %v4819_v14  ;;  %v13597_v0 = vadd.f32 %v3875_v28, %v18171_v3  ;;  %v4850_v52 = vmul.f32 %v18171_v3, %v18171_v3  ;;  %v6160_v11 = vmax.f32 %v6159_v26, %v18171_v3  ;;  %18173 = vst [vmem:[#allocation56_spill] sm:$0xff] %v13612_v60  ;;  %v18175_v14 = vld [vmem:[#allocation37_spill] sm:$0xff]  ;;  %v13633_v54 = vpop.f32.mrb[110].mxu1  ;;  %v10916_v60 = vld [vmem:[#allocation6 + $0x18] sm:$0xff]  }
 0x2c0   : > { %v5366_v21 = vadd.f32 %v5365_v6, %v4821_v59  ;;  %v7422_v19 = vmin.f32 %v7421_v44, %v18171_v3  ;;  %v13604_v30 = vadd.f32 %v3917_v7, %v18172_v25  ;;  %v4852_v55 = vmul.f32 %v18172_v25, %v18172_v25  ;;  %18177 = vst [vmem:[#allocation57_spill] sm:$0xff] %v13623_v9 }
 0x2c1   : > { %v13606_v23 = vadd.f32 %v5303_v8, %v4850_v52  ;;  %v6186_v40 = vmax.f32 %v6185_v45, %v18172_v25  ;;  %v7448_v28 = vmin.f32 %v7447_v15, %v18172_v25  ;;  %v6161_v6 = vrot.slane %v6160_v11, 4  ;;  %v13621_v8 = vpop.f32.mrb[109].mxu0  ;;  %18179 = vst [vmem:[#allocation28_spill] sm:$0xff] %v13633_v54 }
 0x2c2   : > { %v7423_v26 = vrot.slane %v7422_v19, 4  ;;  %v13617_v44 = vadd.f32 %v3896_v58, %v18175_v14  ;;  %v4851_v7 = vmul.f32 %v18175_v14, %v18175_v14  ;;  %18176 = vst [vmem:[#allocation27_spill] sm:$0xff] %v13621_v8  ;;  %v13625_v59 = vadd.f32 %v5345_v16, %v4852_v55  ;;  %v13631_v22 = vpop.f32.mrb[110].mxu0 }
 0x2c3   : > { %v6187_v45 = vrot.slane %v6186_v40, 4  ;;  %v7449_v15 = vrot.slane %v7448_v28, 4  ;;  %v6173_v3 = vmax.f32 %v6172_v1, %v18175_v14  ;;  %v6162_v52 = vmax.f32 %v6160_v11, %v6161_v6  ;;  %18178 = vst [vmem:[#allocation20_spill] sm:$0xff] %v13631_v22 }
 0x2c4   : > { %v7424_v25 = vmin.f32 %v7422_v19, %v7423_v26  ;;  %v13628_v13 = vadd.f32 %v5324_v56, %v4851_v7  ;;  %v7435_v58 = vmin.f32 %v7434_v57, %v18175_v14  ;;  %v13636_v16 = vadd.f32 %v3938_v20, %v18180_v5  ;;  %v13640_v56 = vpop.f32.mrb[111].mxu0  ;;  %v13645_v14 = vpop.f32.mrb[111].mxu1 }
 0x2c5   : > { %v6188_v27 = vmax.f32 %v6186_v40, %v6187_v45  ;;  %v7450_v53 = vmin.f32 %v7448_v28, %v7449_v15  ;;  %v6174_v43 = vrot.slane %v6173_v3, 4  ;;  %v6163_v55 = vrot.slane %v6162_v52, 2  ;;  %18181 = vst [vmem:[#allocation29_spill] sm:$0xff] %v13640_v56  ;;  %18182 = vst [vmem:[#allocation21_spill] sm:$0xff] %v13645_v14 }
 0x2c6   : > { %v7425_v17 = vrot.slane %v7424_v25, 2  ;;  %v7436_v18 = vrot.slane %v7435_v58, 4  ;;  %v4853_v1 = vmul.f32 %v18180_v5, %v18180_v5  ;;  %v6199_v6 = vmax.f32 %v6198_v36, %v18180_v5 }
 0x2c7   : > { %v6189_v11 = vrot.slane %v6188_v27, 2  ;;  %v7451_v57 = vrot.slane %v7450_v53, 2  ;;  %v6175_v19 = vmax.f32 %v6173_v3, %v6174_v43  ;;  %v6164_v26 = vmax.f32 %v6162_v52, %v6163_v55 }
 0x2c8   : > { %v7426_v40 = vmin.f32 %v7424_v25, %v7425_v17  ;;  %v7437_v28 = vmin.f32 %v7435_v58, %v7436_v18  ;;  %v13643_v20 = vadd.f32 %v5366_v21, %v4853_v1  ;;  %v6200_v63 = vrot.slane %v6199_v6, 4  ;;  %v510_v25 = vld [vmem:[%s11338_s8 + $0x660] sm:$0xff] }
 0x2c9   : > { %v6190_v7 = vmax.f32 %v6188_v27, %v6189_v11  ;;  %v7452_v45 = vmin.f32 %v7450_v53, %v7451_v57  ;;  %v6176_v15 = vrot.slane %v6175_v19, 2  ;;  %v6165_v37 = vrot.slane %v6164_v26, 1  ;;  %v526_v21 = vld [vmem:[%s11338_s8 + $0x6e0] sm:$0xff]  ;;  %v511_v53 = vld [vmem:[%s11338_s8 + $0x668] sm:$0xff] }
 0x2ca   : > { %v7427_v56 = vrot.slane %v7426_v40, 1  ;;  %v7438_v43 = vrot.slane %v7437_v28, 2  ;;  %v7461_v36 = vmin.f32 %v7460_v51, %v18180_v5  ;;  %v6201_v18 = vmax.f32 %v6199_v6, %v6200_v63  ;;  %v527_v11 = vld [vmem:[%s11338_s8 + $0x6e8] sm:$0xff] }
 0x2cb   : > { %v6191_v3 = vrot.slane %v6190_v7, 1  ;;  %v7453_v17 = vrot.slane %v7452_v45, 1  ;;  %v6177_v52 = vmax.f32 %v6175_v19, %v6176_v15  ;;  %v6166_v58 = vmax.f32 %v6164_v26, %v6165_v37 }
 0x2cc   : > { %v7428_v55 = vmin.f32 %v7426_v40, %v7427_v56  ;;  %v7439_v1 = vmin.f32 %v7437_v28, %v7438_v43  ;;  %v7462_v27 = vrot.slane %v7461_v36, 4  ;;  %v6202_v22 = vrot.slane %v6201_v18, 2  ;;  %v18183_v56 = vld [vmem:[#allocation39_spill] sm:$0xff] }
 0x2cd   : > { %v6192_v57 = vmax.f32 %v6190_v7, %v6191_v3  ;;  %v13652_v14 = vmin.f32 %v7452_v45, %v7453_v17  ;;  %v6178_v54 = vrot.slane %v6177_v52, 1  ;;  %v10695_v5 = vcombine.low %v510_v25, %v526_v21  ;;  %v18184_v45 = vld [vmem:[#allocation40_spill] sm:$0xff]  ;;  %v18185_v3 = vld [vmem:[#allocation41_spill] sm:$0xff] }
 0x2ce   : > { %v7440_v9 = vrot.slane %v7439_v1, 1  ;;  %v7463_v8 = vmin.f32 %v7461_v36, %v7462_v27  ;;  %v10696_v51 = vcombine.high %v510_v25, %v526_v21  ;;  %v6203_v19 = vmax.f32 %v6201_v18, %v6202_v22  ;;  %v13671_v18 = vpop.f32.mrb[112].mxu0  ;;  %v18187_v21 = vld [vmem:[#allocation42_spill] sm:$0xff] }
 0x2cf   : > { %v6179_v39 = vmax.f32 %v6177_v52, %v6178_v54  ;;  %v10697_v63 = vcombine.low %v511_v53, %v527_v11  ;;  %v10698_v6 = vcombine.high %v511_v53, %v527_v11  ;;  %v3877_v26 = vadd.f32 %v13597_v0, %v18183_v56  ;;  %18186 = vst [vmem:[#allocation30_spill] sm:$0xff] %v13671_v18 }
 0x2d0   : > { %v7441_v15 = vmin.f32 %v7439_v1, %v7440_v9  ;;  %v7464_v37 = vrot.slane %v7463_v8, 2  ;;  %3258 = vmatprep.subr.bf16.mxu0 %v10696_v51  ;;  %v4882_v40 = vmul.f32 %v18183_v56, %v18183_v56  ;;  %v6204_v7 = vrot.slane %v6203_v19, 1  ;;  %v18189_v1 = vld [vmem:[#allocation23_spill] sm:$0xff] }
 0x2d1   : > { %v6980_v28 = vcombine.low %v6166_v58, %v6179_v39  ;;  %3371 = vmatprep.subr.bf16.mxu1 %v10698_v6  ;;  %3259 = vmatpush1.bf16.msra.mxu0 %v10695_v5  ;;  %v3919_v43 = vadd.f32 %v13604_v30, %v18184_v45  ;;  %v4884_v54 = vmul.f32 %v18184_v45, %v18184_v45  ;;  %v13680_v58 = vpop.f32.mrb[112].mxu1 }
 0x2d2   : > { %v8242_v22 = vcombine.low %v7428_v55, %v7441_v15  ;;  %v7465_v9 = vmin.f32 %v7463_v8, %v7464_v37  ;;  %3372 = vmatpush1.bf16.msra.mxu1 %v10697_v63  ;;  %v5305_v36 = vadd.f32 %v13606_v23, %v4882_v40  ;;  %v3898_v0 = vadd.f32 %v13617_v44, %v18185_v3  ;;  %v18191_v63 = vld [vmem:[#allocation43_spill] sm:$0xff]  ;;  %v18193_v40 = vld [vmem:[#allocation46_spill] sm:$0xff] }
 0x2d3   : > { %v13666_v17 = vrot.slane %v6980_v28, %v11677_v34  ;;  %v6205_v39 = vmax.f32 %v6203_v19, %v6204_v7  ;;  %v5347_v52 = vadd.f32 %v13625_v59, %v4884_v54  ;;  %v4883_v30 = vmul.f32 %v18185_v3, %v18185_v3  ;;  %18188 = vst [vmem:[#allocation31_spill] sm:$0xff] %v13680_v58  ;;  %v13691_v19 = vpop.f32.mrb[113].mxu0  ;;  %v542_v7 = vld [vmem:[%s11338_s8 + $0x760] sm:$0xff] }
 0x2d4   : > { %v13674_v25 = vrot.slane %v8242_v22, %v11677_v34  ;;  %v7466_v8 = vrot.slane %v7465_v9, 1  ;;  %v3940_v23 = vadd.f32 %v13636_v16, %v18187_v21  ;;  %v4885_v44 = vmul.f32 %v18187_v21, %v18187_v21  ;;  %18190 = vst [vmem:[#allocation32_spill] sm:$0xff] %v13691_v19  ;;  %v558_v54 = vld [vmem:[%s11338_s8 + $0x7e0] sm:$0xff] }
 0x2d5   : > { %v6981_v55 = vcombine.low %v6192_v57, %v6205_v39  ;;  %v5326_v59 = vadd.f32 %v13628_v13, %v4883_v30  ;;  %v3878_v27 = vadd.f32 %v3877_v26, %v18189_v1  ;;  %v4914_v53 = vmul.f32 %v18189_v1, %v18189_v1  ;;  %v559_v39 = vld [vmem:[%s11338_s8 + $0x7e8] sm:$0xff]  ;;  %v13717_v30 = vpop.f32.mrb[114].mxu0 }
 0x2d6   : > { %v7467_v11 = vmin.f32 %v7465_v9, %v7466_v8  ;;  %v5368_v5 = vadd.f32 %v13643_v20, %v4885_v44  ;;  %v6570_v16 = vmax.f32 %v18183_v56, %v18189_v1  ;;  %v7832_v51 = vmin.f32 %v18183_v56, %v18189_v1  ;;  %v13699_v20 = vpop.f32.mrb[113].mxu1  ;;  %18194 = vst [vmem:[#allocation34_spill] sm:$0xff] %v13717_v30  ;;  %v18195_v8 = vld [vmem:[#allocation47_spill] sm:$0xff] }
 0x2d7   : > { %v13694_v13 = vrot.slane %v6981_v55, %v11677_v34  ;;  %v5306_v57 = vadd.f32 %v5305_v36, %v4914_v53  ;;  %v3920_v6 = vadd.f32 %v3919_v43, %v18191_v63  ;;  %v4916_v15 = vmul.f32 %v18191_v63, %v18191_v63  ;;  %18192 = vst [vmem:[#allocation33_spill] sm:$0xff] %v13699_v20  ;;  %v543_v36 = vld [vmem:[%s11338_s8 + $0x768] sm:$0xff]  ;;  %v13727_v55 = vpop.f32.mrb[114].mxu1  ;;  %v18197_v43 = vld [vmem:[#allocation48_spill] sm:$0xff] }
 0x2d8   : > { %v8243_v37 = vcombine.low %v13652_v14, %v7467_v11  ;;  %v6596_v56 = vmax.f32 %v18184_v45, %v18191_v63  ;;  %v7858_v26 = vmin.f32 %v18184_v45, %v18191_v63  ;;  %v3899_v28 = vadd.f32 %v3898_v0, %v18193_v40  ;;  %18196 = vst [vmem:[#allocation35_spill] sm:$0xff] %v13727_v55 }
 0x2d9   : > { %v5348_v22 = vadd.f32 %v5347_v52, %v4916_v15  ;;  %v4915_v9 = vmul.f32 %v18193_v40, %v18193_v40  ;;  %v6583_v14 = vmax.f32 %v18185_v3, %v18193_v40  ;;  %v7845_v0 = vmin.f32 %v18185_v3, %v18193_v40 }
 0x2da   : > { %v13720_v45 = vrot.slane %v8243_v37, %v11677_v34  ;;  %v3941_v44 = vadd.f32 %v3940_v23, %v18195_v8  ;;  %v4917_v52 = vmul.f32 %v18195_v8, %v18195_v8  ;;  %v6609_v53 = vmax.f32 %v18187_v21, %v18195_v8 }
 0x2db   : > { %v5327_v1 = vadd.f32 %v5326_v59, %v4915_v9  ;;  %v7871_v11 = vmin.f32 %v18187_v21, %v18195_v8  ;;  %v10727_v63 = vcombine.low %v542_v7, %v558_v54  ;;  %v10728_v3 = vcombine.high %v542_v7, %v558_v54  ;;  %v13741_v9 = vpop.f32.mrb[115].mxu0  ;;  %v18199_v8 = vld [vmem:[#allocation17_spill] sm:$0xff] }
 0x2dc   : > { %v5369_v37 = vadd.f32 %v5368_v5, %v4917_v52  ;;  %v10729_v40 = vcombine.low %v543_v36, %v559_v39  ;;  %v10730_v23 = vcombine.high %v543_v36, %v559_v39  ;;  %v3879_v30 = vadd.f32 %v3878_v27, %v18197_v43  ;;  %18198 = vst [vmem:[#allocation22_spill] sm:$0xff] %v13741_v9  ;;  %v13752_v27 = vpop.f32.mrb[115].mxu1  ;;  %v18201_v36 = vld [vmem:[#allocation62_spill] sm:$0xff]  ;;  %v18202_v52 = vld [vmem:[#allocation63_spill] sm:$0xff] }
 0x2dd   : > { %v4946_v55 = vmul.f32 %v18197_v43, %v18197_v43  ;;  %v13739_v59 = vmax.f32 %v6570_v16, %v18197_v43  ;;  %3260 = vmatprep.subr.bf16.mxu0 %v10728_v3  ;;  %v13744_v21 = vmin.f32 %v7832_v51, %v18197_v43  ;;  %v3921_v15 = vadd.f32 %v3920_v6, %v18199_v8  ;;  %v10913_v3 = vld [vmem:[#allocation6] sm:$0xff]  }
 0x2de   : > { %v4948_v5 = vmul.f32 %v18199_v8, %v18199_v8  ;;  %v13750_v7 = vmax.f32 %v6596_v56, %v18199_v8  ;;  %18200 = vst [vmem:[#allocation36_spill] sm:$0xff] %v13752_v27  ;;  %3373 = vmatprep.subr.bf16.mxu1 %v10730_v23  ;;  %3261 = vmatpush1.bf16.msra.mxu0 %v10727_v63 }
 0x2df   : > { %v5307_v16 = vadd.f32 %v5306_v57, %v4946_v55  ;;  %v13755_v54 = vmin.f32 %v7858_v26, %v18199_v8  ;;  %v3900_v39 = vadd.f32 %v3899_v28, %v18201_v36  ;;  %3374 = vmatpush1.bf16.msra.mxu1 %v10729_v40  ;;  %v4947_v6 = vmul.f32 %v18201_v36, %v18201_v36  ;;  %v18203_v55 = vld [vmem:[#allocation64_spill] sm:$0xff] }
 0x2e0   : > { %v5349_v51 = vadd.f32 %v5348_v22, %v4948_v5  ;;  %v13761_v43 = vmax.f32 %v6583_v14, %v18201_v36  ;;  %v13764_v56 = vmin.f32 %v7845_v0, %v18201_v36  ;;  %v3942_v63 = vadd.f32 %v3941_v44, %v18202_v52  ;;  %v18205_v36 = vld [vmem:[#allocation66_spill] sm:$0xff] }
 0x2e1   : > { %v4949_v57 = vmul.f32 %v18202_v52, %v18202_v52  ;;  %v13770_v26 = vmax.f32 %v6609_v53, %v18202_v52  ;;  %v13773_v28 = vmin.f32 %v7871_v11, %v18202_v52  ;;  %v5328_v22 = vadd.f32 %v5327_v1, %v4947_v6  ;;  %3279 = vmatmul.mubr.bf16.vlgmr.msra.gmra.mrb[192].mxu0 %v10913_v3  ;;  %v18204_v11 = vld [vmem:[#allocation65_spill] sm:$0xff]  ;;  %v321_v52 = vld [vmem:[%s11338_s8 + $0x78] sm:$0xff] }
 0x2e2   : > { %v3880_v14 = vadd.f32 %v3879_v30, %v18203_v55  ;;  %v4978_v0 = vmul.f32 %v18203_v55, %v18203_v55  ;;  %v6572_v44 = vmax.f32 %v13739_v59, %v18203_v55  ;;  %v7834_v53 = vmin.f32 %v13744_v21, %v18203_v55  ;;  %3392 = vmatmul.mubr.bf16.vlgmr.msra.gmra.mrb[192].mxu1 %v10913_v3  ;;  %v320_v30 = vld [vmem:[%s11338_s8 + $0x70] sm:$0xff]  ;;  %v13797_v21 = vpop.f32.mrb[116].mxu1 }
 0x2e3   : > { %v5370_v40 = vadd.f32 %v5369_v37, %v4949_v57  ;;  %v3922_v23 = vadd.f32 %v3921_v15, %v18204_v11  ;;  %v4980_v1 = vmul.f32 %v18204_v11, %v18204_v11  ;;  %v6598_v5 = vmax.f32 %v13750_v7, %v18204_v11  ;;  %v336_v37 = vld [vmem:[%s11338_s8 + $0xf0] sm:$0xff]  ;;  %v337_v57 = vld [vmem:[%s11338_s8 + $0xf8] sm:$0xff]  ;;  %3288 = vmatprep.mubr.bf16.mxu0 %v18054_v62  ;;  %v13795_v15 = vpop.f32.mrb[116].mxu0 }
 0x2e4   : > { %v5308_v8 = vadd.f32 %v5307_v16, %v4978_v0  ;;  %v7860_v59 = vmin.f32 %v13755_v54, %v18204_v11  ;;  %v3901_v6 = vadd.f32 %v3900_v39, %v18205_v36  ;;  %18206 = vst [vmem:[#allocation37_spill] sm:$0xff] %v13795_v15  ;;  %18207 = vst [vmem:[#allocation38_spill] sm:$0xff] %v13797_v21  ;;  %3401 = vmatprep.mubr.bf16.mxu1 %v18054_v62  ;;  %v13806_v39 = vpop.f32.mrb[117].mxu0  ;;  %v13808_v0 = vpop.f32.mrb[117].mxu1  ;;  %v18210_v3 = vld [vmem:[#allocation67_spill] sm:$0xff] }
 0x2e5   : > { %v5350_v55 = vadd.f32 %v5349_v51, %v4980_v1  ;;  %v4979_v16 = vmul.f32 %v18205_v36, %v18205_v36  ;;  %v6585_v7 = vmax.f32 %v13761_v43, %v18205_v36  ;;  %v7847_v54 = vmin.f32 %v13764_v56, %v18205_v36  ;;  %18208 = vst [vmem:[#allocation39_spill] sm:$0xff] %v13806_v39  ;;  %v13817_v21 = vpop.f32.mrb[118].mxu0  ;;  %v13819_v39 = vpop.f32.mrb[118].mxu1 }
 0x2e6   : > { %18209 = vst [vmem:[#allocation40_spill] sm:$0xff] %v13808_v0  ;;  %v3943_v11 = vadd.f32 %v3942_v63, %v18210_v3  ;;  %v4981_v51 = vmul.f32 %v18210_v3, %v18210_v3  ;;  %v6611_v1 = vmax.f32 %v13770_v26, %v18210_v3  ;;  %v7873_v43 = vmin.f32 %v13773_v28, %v18210_v3  ;;  %v18213_v63 = vld [vmem:[#allocation68_spill] sm:$0xff] }
 0x2e7   : > { %18211 = vst [vmem:[#allocation41_spill] sm:$0xff] %v13817_v21  ;;  %v5329_v56 = vadd.f32 %v5328_v22, %v4979_v16  ;;  %v10507_v36 = vcombine.low %v320_v30, %v336_v37  ;;  %v10508_v15 = vcombine.high %v320_v30, %v336_v37  ;;  %v10509_v27 = vcombine.low %v321_v52, %v337_v57  ;;  %v18214_v22 = vld [vmem:[#allocation69_spill] sm:$0xff]  ;;  %v13833_v37 = vpop.f32.mrb[119].mxu0 }
 0x2e8   : > { %18212 = vst [vmem:[#allocation42_spill] sm:$0xff] %v13819_v39  ;;  %v5371_v0 = vadd.f32 %v5370_v40, %v4981_v51  ;;  %v10510_v9 = vcombine.high %v321_v52, %v337_v57  ;;  %v3881_v20 = vadd.f32 %v3880_v14, %v18213_v63  ;;  %v5010_v19 = vmul.f32 %v18213_v63, %v18213_v63  ;;  %v13835_v40 = vpop.f32.mrb[119].mxu1  ;;  %v18217_v57 = vld [vmem:[#allocation70_spill] sm:$0xff] }
 0x2e9   : > { %3472 = vmatprep.subr.bf16.mxu0 %v10508_v15  ;;  %v13825_v26 = vmax.f32 %v6572_v44, %v18213_v63  ;;  %v13828_v28 = vmin.f32 %v7834_v53, %v18213_v63  ;;  %v3923_v16 = vadd.f32 %v3922_v23, %v18214_v22  ;;  %v5012_v30 = vmul.f32 %v18214_v22, %v18214_v22  ;;  %v18221_v63 = vld [vmem:[#allocation73_spill] sm:$0xff] }
 0x2ea   : > { %18215 = vst [vmem:[#allocation23_spill] sm:$0xff] %v13833_v37  ;;  %18216 = vst [vmem:[#allocation43_spill] sm:$0xff] %v13835_v40  ;;  %3585 = vmatprep.subr.bf16.mxu1 %v10510_v9  ;;  %3473 = vmatpush1.bf16.msra.mxu0 %v10507_v36  ;;  %v5309_v14 = vadd.f32 %v5308_v8, %v5010_v19  ;;  %v13838_v52 = vmax.f32 %v6598_v5, %v18214_v22  ;;  %v18218_v19 = vld [vmem:[#allocation71_spill] sm:$0xff] }
 0x2eb   : > { %v13841_v44 = vmin.f32 %v7860_v59, %v18214_v22  ;;  %3586 = vmatpush1.bf16.msra.mxu1 %v10509_v27  ;;  %v5351_v53 = vadd.f32 %v5350_v55, %v5012_v30  ;;  %v3902_v23 = vadd.f32 %v3901_v6, %v18217_v57  ;;  %v5011_v15 = vmul.f32 %v18217_v57, %v18217_v57  ;;  %v10914_v27 = vld [vmem:[#allocation6 + $0x8] sm:$0xff]  }
 0x2ec   : > { %v13847_v3 = vmax.f32 %v6585_v7, %v18217_v57  ;;  %v13850_v9 = vmin.f32 %v7847_v54, %v18217_v57  ;;  %v3944_v8 = vadd.f32 %v3943_v11, %v18218_v19  ;;  %v5013_v5 = vmul.f32 %v18218_v19, %v18218_v19  ;;  %3289 = vmatmul.mubr.bf16.gmra.mrb[196].mxu0 %v10914_v27  ;;  %v18219_v7 = vld [vmem:[#allocation72_spill] sm:$0xff]  ;;  %v13864_v11 = vpop.f32.mrb[120].mxu0  ;;  %v352_v57 = vld [vmem:[%s11338_s8 + $0x170] sm:$0xff] }
 0x2ed   : > { %v13856_v59 = vmax.f32 %v6611_v1, %v18218_v19  ;;  %v5330_v6 = vadd.f32 %v5329_v56, %v5011_v15  ;;  %v13859_v55 = vmin.f32 %v7873_v43, %v18218_v19  ;;  %v3882_v51 = vadd.f32 %v3881_v20, %v18219_v7  ;;  %3402 = vmatmul.mubr.bf16.gmra.mrb[196].mxu1 %v10914_v27  ;;  %v13872_v20 = vpop.f32.mrb[120].mxu1  ;;  %v18224_v15 = vld [vmem:[#allocation74_spill] sm:$0xff]  ;;  %v353_v27 = vld [vmem:[%s11338_s8 + $0x178] sm:$0xff] }
 0x2ee   : > { %v5042_v54 = vmul.f32 %v18219_v7, %v18219_v7  ;;  %18220 = vst [vmem:[#allocation46_spill] sm:$0xff] %v13864_v11  ;;  %v5372_v36 = vadd.f32 %v5371_v0, %v5013_v5  ;;  %v6574_v1 = vmax.f32 %v13825_v26, %v18219_v7  ;;  %v7836_v56 = vmin.f32 %v13828_v28, %v18219_v7  ;;  %v368_v28 = vld [vmem:[%s11338_s8 + $0x1f0] sm:$0xff]  ;;  %v369_v7 = vld [vmem:[%s11338_s8 + $0x1f8] sm:$0xff] }
 0x2ef   : > { %v3924_v43 = vadd.f32 %v3923_v16, %v18221_v63  ;;  %3298 = vmatprep.mubr.bf16.mxu0 %v18054_v62  ;;  %18222 = vst [vmem:[#allocation47_spill] sm:$0xff] %v13872_v20  ;;  %v5044_v30 = vmul.f32 %v18221_v63, %v18221_v63  ;;  %v6600_v0 = vmax.f32 %v13838_v52, %v18221_v63  ;;  %v13883_v16 = vpop.f32.mrb[121].mxu0 }
 0x2f0   : > { %v5310_v22 = vadd.f32 %v5309_v14, %v5042_v54  ;;  %v7862_v26 = vmin.f32 %v13841_v44, %v18221_v63  ;;  %3411 = vmatprep.mubr.bf16.mxu1 %v18054_v62  ;;  %18223 = vst [vmem:[#allocation48_spill] sm:$0xff] %v13883_v16  ;;  %v3903_v19 = vadd.f32 %v3902_v23, %v18224_v15  ;;  %v13894_v44 = vpop.f32.mrb[121].mxu1  ;;  %v18226_v63 = vld [vmem:[#allocation75_spill] sm:$0xff]  ;;  %v13901_v11 = vpop.f32.mrb[122].mxu0 }
 0x2f1   : > { %v5043_v14 = vmul.f32 %v18224_v15, %v18224_v15  ;;  %v6587_v5 = vmax.f32 %v13847_v3, %v18224_v15  ;;  %v7849_v52 = vmin.f32 %v13850_v9, %v18224_v15  ;;  %18225 = vst [vmem:[#allocation17_spill] sm:$0xff] %v13894_v44  ;;  %v5352_v54 = vadd.f32 %v5351_v53, %v5044_v30  ;;  %v13903_v40 = vpop.f32.mrb[122].mxu1  ;;  %v13908_v21 = vpop.f32.mrb[123].mxu0 }
 0x2f2   : > { %v3945_v20 = vadd.f32 %v3944_v8, %v18226_v63  ;;  %v5045_v16 = vmul.f32 %v18226_v63, %v18226_v63  ;;  %v6613_v23 = vmax.f32 %v13856_v59, %v18226_v63  ;;  %18227 = vst [vmem:[#allocation62_spill] sm:$0xff] %v13901_v11  ;;  %18228 = vst [vmem:[#allocation63_spill] sm:$0xff] %v13903_v40  ;;  %v18229_v8 = vld [vmem:[#allocation76_spill] sm:$0xff]  ;;  %v13910_v58 = vpop.f32.mrb[123].mxu1 }
 0x2f3   : > { %v5331_v3 = vadd.f32 %v5330_v6, %v5043_v14  ;;  %v7875_v9 = vmin.f32 %v13859_v55, %v18226_v63  ;;  %v10539_v15 = vcombine.low %v352_v57, %v368_v28  ;;  %v10540_v37 = vcombine.high %v352_v57, %v368_v28  ;;  %18230 = vst [vmem:[#allocation64_spill] sm:$0xff] %v13908_v21  ;;  %v18232_v55 = vld [vmem:[#allocation77_spill] sm:$0xff]  ;;  %v18233_v28 = vld [vmem:[#allocation78_spill] sm:$0xff] }
 0x2f4   : > { %v5373_v44 = vadd.f32 %v5372_v36, %v5045_v16  ;;  %v10541_v53 = vcombine.low %v353_v27, %v369_v7  ;;  %v10542_v30 = vcombine.high %v353_v27, %v369_v7  ;;  %v3883_v39 = vadd.f32 %v3882_v51, %v18229_v8  ;;  %18231 = vst [vmem:[#allocation65_spill] sm:$0xff] %v13910_v58  ;;  %v18234_v7 = vld [vmem:[#allocation79_spill] sm:$0xff] }
 0x2f5   : > { %3474 = vmatprep.subr.bf16.mxu0 %v10540_v37  ;;  %v5074_v59 = vmul.f32 %v18229_v8, %v18229_v8  ;;  %v6575_v6 = vmax.f32 %v6574_v1, %v18229_v8  ;;  %v7837_v14 = vmin.f32 %v7836_v56, %v18229_v8  ;;  %v3925_v63 = vadd.f32 %v3924_v43, %v18232_v55 }
 0x2f6   : > { %3587 = vmatprep.subr.bf16.mxu1 %v10542_v30  ;;  %3475 = vmatpush1.bf16.msra.mxu0 %v10539_v15  ;;  %v5076_v36 = vmul.f32 %v18232_v55, %v18232_v55  ;;  %v6601_v51 = vmax.f32 %v6600_v0, %v18232_v55  ;;  %v7863_v57 = vmin.f32 %v7862_v26, %v18232_v55  ;;  %v13937_v26 = vpop.f32.mrb[124].mxu0  ;;  %v18239_v55 = vld [vmem:[#allocation81_spill] sm:$0xff] }
 0x2f7   : > { %3588 = vmatpush1.bf16.msra.mxu1 %v10541_v53  ;;  %v5311_v37 = vadd.f32 %v5310_v22, %v5074_v59  ;;  %v13922_v16 = vadd.f32 %v3903_v19, %v18233_v28  ;;  %v5075_v1 = vmul.f32 %v18233_v28, %v18233_v28  ;;  %v13927_v56 = vmax.f32 %v6587_v5, %v18233_v28  ;;  %v10915_v22 = vld [vmem:[#allocation6 + $0x10] sm:$0xff]  }
 0x2f8   : > { %v5353_v43 = vadd.f32 %v5352_v54, %v5076_v36  ;;  %v13930_v27 = vmin.f32 %v7849_v52, %v18233_v28  ;;  %v13933_v15 = vadd.f32 %v3945_v20, %v18234_v7  ;;  %v5077_v0 = vmul.f32 %v18234_v7, %v18234_v7  ;;  %3299 = vmatmul.mubr.bf16.gmra.mrb[200].mxu0 %v10915_v22  ;;  %v18236_v52 = vld [vmem:[#allocation80_spill] sm:$0xff]  ;;  %v13948_v20 = vpop.f32.mrb[124].mxu1 }
 0x2f9   : > { %18235 = vst [vmem:[#allocation66_spill] sm:$0xff] %v13937_v26  ;;  %v13939_v19 = vadd.f32 %v5331_v3, %v5075_v1  ;;  %v13942_v53 = vmax.f32 %v6613_v23, %v18234_v7  ;;  %v13945_v5 = vmin.f32 %v7875_v9, %v18234_v7  ;;  %v3884_v54 = vadd.f32 %v3883_v39, %v18236_v52  ;;  %v13957_v23 = vpop.f32.mrb[125].mxu0  ;;  %v13964_v28 = vpop.f32.mrb[125].mxu1 }
 0x2fa   : > { %3412 = vmatmul.mubr.bf16.gmra.mrb[200].mxu1 %v10915_v22  ;;  %18237 = vst [vmem:[#allocation67_spill] sm:$0xff] %v13948_v20  ;;  %v13950_v30 = vadd.f32 %v5373_v44, %v5077_v0  ;;  %v5106_v8 = vmul.f32 %v18236_v52, %v18236_v52  ;;  %v6576_v59 = vmax.f32 %v6575_v6, %v18236_v52  ;;  %18238 = vst [vmem:[#allocation68_spill] sm:$0xff] %v13957_v23  ;;  %v13967_v0 = vpop.f32.mrb[126].mxu0  ;;  %v13969_v22 = vpop.f32.mrb[126].mxu1 }
 0x2fb   : > { %v7838_v3 = vmin.f32 %v7837_v14, %v18236_v52  ;;  %3308 = vmatprep.mubr.bf16.mxu0 %v18054_v62  ;;  %v3885_v9 = vrot.slane %v3884_v54, 4  ;;  %v3926_v36 = vadd.f32 %v3925_v63, %v18239_v55  ;;  %v5108_v39 = vmul.f32 %v18239_v55, %v18239_v55  ;;  %3421 = vmatprep.mubr.bf16.mxu1 %v18054_v62 }
 0x2fc   : > { %v6602_v44 = vmax.f32 %v6601_v51, %v18239_v55  ;;  %18240 = vst [vmem:[#allocation69_spill] sm:$0xff] %v13964_v28  ;;  %v5312_v1 = vadd.f32 %v5311_v37, %v5106_v8  ;;  %v6577_v6 = vrot.slane %v6576_v59, 4  ;;  %v7864_v14 = vmin.f32 %v7863_v57, %v18239_v55  ;;  %18241 = vst [vmem:[#allocation70_spill] sm:$0xff] %v13967_v0  ;;  %v13971_v8 = vpop.f32.mrb[127].mxu0 }
 0x2fd   : > { %v7839_v7 = vrot.slane %v7838_v3, 4  ;;  %18242 = vst [vmem:[#allocation71_spill] sm:$0xff] %v13969_v22  ;;  %v3886_v52 = vadd.f32 %v3885_v9, %v3884_v54  ;;  %v3927_v63 = vrot.slane %v3926_v36, 4  ;;  %v5354_v23 = vadd.f32 %v5353_v43, %v5108_v39  ;;  %18243 = vst [vmem:[#allocation72_spill] sm:$0xff] %v13971_v8 }
 0x2fe   : > { %v6603_v20 = vrot.slane %v6602_v44, 4  ;;  %v5313_v26 = vrot.slane %v5312_v1, 4  ;;  %v6578_v58 = vmax.f32 %v6576_v59, %v6577_v6  ;;  %v7865_v21 = vrot.slane %v7864_v14, 4 }
 0x2ff   : > { %v7840_v51 = vmin.f32 %v7838_v3, %v7839_v7  ;;  %v3887_v40 = vrot.slane %v3886_v52, 2  ;;  %v3928_v11 = vadd.f32 %v3927_v63, %v3926_v36  ;;  %v5355_v28 = vrot.slane %v5354_v23, 4 }
 0x300   : > { %v6604_v37 = vmax.f32 %v6602_v44, %v6603_v20  ;;  %v5314_v18 = vadd.f32 %v5313_v26, %v5312_v1  ;;  %v6579_v57 = vrot.slane %v6578_v58, 2  ;;  %v7866_v0 = vmin.f32 %v7864_v14, %v7865_v21  ;;  %3309 = vmatmul.mubr.bf16.gmra.mrb[204].mxu0 %v10916_v60 }
 0x301   : > { %v7841_v55 = vrot.slane %v7840_v51, 2  ;;  %v3888_v54 = vadd.f32 %v3887_v40, %v3886_v52  ;;  %v3929_v9 = vrot.slane %v3928_v11, 2  ;;  %v5356_v43 = vadd.f32 %v5355_v28, %v5354_v23  ;;  %3318 = vmatprep.mubr.bf16.mxu0 %v18054_v62 }
 0x302   : > { %v6605_v39 = vrot.slane %v6604_v37, 2  ;;  %3422 = vmatmul.mubr.bf16.gmra.mrb[204].mxu1 %v10916_v60  ;;  %v5315_v59 = vrot.slane %v5314_v18, 2  ;;  %v6580_v3 = vmax.f32 %v6578_v58, %v6579_v57  ;;  %v7867_v6 = vrot.slane %v7866_v0, 2 }
 0x303   : > { %v7842_v36 = vmin.f32 %v7840_v51, %v7841_v55  ;;  %3431 = vmatprep.mubr.bf16.mxu1 %v18054_v62  ;;  %v3889_v20 = vrot.slane %v3888_v54, 1  ;;  %v3930_v26 = vadd.f32 %v3929_v9, %v3928_v11  ;;  %v5357_v44 = vrot.slane %v5356_v43, 2 }
 0x304   : > { %v6606_v1 = vmax.f32 %v6604_v37, %v6605_v39  ;;  %v5316_v21 = vadd.f32 %v5315_v59, %v5314_v18  ;;  %v6581_v7 = vrot.slane %v6580_v3, 1  ;;  %v7868_v40 = vmin.f32 %v7866_v0, %v7867_v6  ;;  %v18244_v18 = vld [vmem:[#allocation85_spill] sm:$0xff]  ;;  %v18245_v6 = vld [vmem:[#allocation50_spill] sm:$0xff] }
 0x305   : > { %v7843_v14 = vrot.slane %v7842_v36, 1  ;;  %v13975_v52 = vadd.f32 %v3889_v20, %v3888_v54  ;;  %v3931_v23 = vrot.slane %v3930_v26, 1  ;;  %v5358_v60 = vadd.f32 %v5357_v44, %v5356_v43  ;;  %v10917_v39 = vld [vmem:[#allocation6 + $0x20] sm:$0xff]  }
 0x306   : > { %v6607_v28 = vrot.slane %v6606_v1, 1  ;;  %v5317_v63 = vrot.slane %v5316_v21, 1  ;;  %v13977_v8 = vmax.f32 %v6580_v3, %v6581_v7  ;;  %v7869_v51 = vrot.slane %v7868_v40, 1 }
 0x307   : > { %v13979_v58 = vmin.f32 %v7842_v36, %v7843_v14  ;;  %v13981_v57 = vadd.f32 %v3931_v23, %v3930_v26  ;;  %v5359_v11 = vrot.slane %v5358_v60, 1  ;;  %v3905_v37 = vadd.f32 %v13922_v16, %v18244_v18 }
 0x308   : > { %v13983_v55 = vmax.f32 %v6606_v1, %v6607_v28  ;;  %v13987_v0 = vadd.f32 %v5317_v63, %v5316_v21  ;;  %v13989_v54 = vmin.f32 %v7868_v40, %v7869_v51  ;;  %v5107_v9 = vmul.f32 %v18244_v18, %v18244_v18  ;;  %3319 = vmatmul.mubr.bf16.gmra.mrb[208].mxu0 %v10917_v39  ;;  %v14008_v1 = vpop.f32.mrb[127].mxu1 }
 0x309   : > { %v6589_v43 = vmax.f32 %v13927_v56, %v18244_v18  ;;  %v13995_v59 = vadd.f32 %v5359_v11, %v5358_v60  ;;  %v3906_v3 = vrot.slane %v3905_v37, 4  ;;  %v7851_v36 = vmin.f32 %v13930_v27, %v18244_v18  ;;  %3328 = vmatprep.mubr.bf16.mxu0 %v18054_v62  ;;  %18246 = vst [vmem:[#allocation73_spill] sm:$0xff] %v14008_v1 }
 0x30a   : > { %v3947_v16 = vadd.f32 %v13933_v15, %v18245_v6  ;;  %3432 = vmatmul.mubr.bf16.gmra.mrb[208].mxu1 %v10917_v39  ;;  %v5333_v20 = vadd.f32 %v13939_v19, %v5107_v9  ;;  %v5109_v56 = vmul.f32 %v18245_v6, %v18245_v6  ;;  %v6615_v44 = vmax.f32 %v13942_v53, %v18245_v6 }
 0x30b   : > { %v6590_v26 = vrot.slane %v6589_v43, 4  ;;  %3441 = vmatprep.mubr.bf16.mxu1 %v18054_v62  ;;  %v3907_v27 = vadd.f32 %v3906_v3, %v3905_v37  ;;  %v7852_v21 = vrot.slane %v7851_v36, 4  ;;  %v7877_v15 = vmin.f32 %v13945_v5, %v18245_v6 }
 0x30c   : > { %v3948_v7 = vrot.slane %v3947_v16, 4  ;;  %v5334_v14 = vrot.slane %v5333_v20, 4  ;;  %v5375_v19 = vadd.f32 %v13950_v30, %v5109_v56  ;;  %v6616_v23 = vrot.slane %v6615_v44, 4 }
 0x30d   : > { %v6591_v40 = vmax.f32 %v6589_v43, %v6590_v26  ;;  %v3908_v60 = vrot.slane %v3907_v27, 2  ;;  %v7853_v28 = vmin.f32 %v7851_v36, %v7852_v21  ;;  %v7878_v51 = vrot.slane %v7877_v15, 4  ;;  %v10918_v43 = vld [vmem:[#allocation6 + $0x28] sm:$0xff]  }
 0x30e   : > { %v3949_v63 = vadd.f32 %v3948_v7, %v3947_v16  ;;  %v5335_v53 = vadd.f32 %v5334_v14, %v5333_v20  ;;  %v5376_v18 = vrot.slane %v5375_v19, 4  ;;  %v6617_v9 = vmax.f32 %v6615_v44, %v6616_v23 }
 0x30f   : > { %v6592_v11 = vrot.slane %v6591_v40, 2  ;;  %v3909_v39 = vadd.f32 %v3908_v60, %v3907_v27  ;;  %v7854_v37 = vrot.slane %v7853_v28, 2  ;;  %v7879_v1 = vmin.f32 %v7877_v15, %v7878_v51 }
 0x310   : > { %v3950_v3 = vrot.slane %v3949_v63, 2  ;;  %v5336_v22 = vrot.slane %v5335_v53, 2  ;;  %v5377_v5 = vadd.f32 %v5376_v18, %v5375_v19  ;;  %v6618_v6 = vrot.slane %v6617_v9, 2  ;;  %3329 = vmatmul.mubr.bf16.gmra.mrb[212].mxu0 %v10918_v43 }
 0x311   : > { %v6593_v49 = vmax.f32 %v6591_v40, %v6592_v11  ;;  %v3910_v30 = vrot.slane %v3909_v39, 1  ;;  %v7855_v26 = vmin.f32 %v7853_v28, %v7854_v37  ;;  %v7880_v36 = vrot.slane %v7879_v1, 2  ;;  %3338 = vmatprep.mubr.bf16.mxu0 %v18054_v62  ;;  %v400_v37 = vld [vmem:[%s11338_s8 + $0x2f0] sm:$0xff] }
 0x312   : > { %v3951_v56 = vadd.f32 %v3950_v3, %v3949_v63  ;;  %3442 = vmatmul.mubr.bf16.gmra.mrb[212].mxu1 %v10918_v43  ;;  %v5337_v16 = vadd.f32 %v5336_v22, %v5335_v53  ;;  %v5378_v44 = vrot.slane %v5377_v5, 2  ;;  %v6619_v27 = vmax.f32 %v6617_v9, %v6618_v6  ;;  %v18247_v3 = vld [vmem:[#allocation18_spill] sm:$0xff] }
 0x313   : > { %v6594_v20 = vrot.slane %v6593_v49, 1  ;;  %3451 = vmatprep.mubr.bf16.mxu1 %v18054_v62  ;;  %v3911_v21 = vadd.f32 %v3910_v30, %v3909_v39  ;;  %v7856_v7 = vrot.slane %v7855_v26, 1  ;;  %v7881_v14 = vmin.f32 %v7879_v1, %v7880_v36  ;;  %v384_v39 = vld [vmem:[%s11338_s8 + $0x270] sm:$0xff] }
 0x314   : > { %v3952_v15 = vrot.slane %v3951_v56, 1  ;;  %v5338_v40 = vrot.slane %v5337_v16, 1  ;;  %v5379_v23 = vadd.f32 %v5378_v44, %v5377_v5  ;;  %v6620_v60 = vrot.slane %v6619_v27, 1  ;;  %v10919_v36 = vld [vmem:[#allocation6 + $0x30] sm:$0xff]  }
 0x315   : > { %v6595_v19 = vmax.f32 %v6593_v49, %v6594_v20  ;;  %v4455_v28 = vcombine.low %v13975_v52, %v3911_v21  ;;  %v7857_v63 = vmin.f32 %v7855_v26, %v7856_v7  ;;  %v7882_v22 = vrot.slane %v7881_v14, 1 }
 0x316   : > { %v3953_v51 = vadd.f32 %v3952_v15, %v3951_v56  ;;  %v5339_v53 = vadd.f32 %v5338_v40, %v5337_v16  ;;  %v5380_v18 = vrot.slane %v5379_v23, 1  ;;  %v6621_v9 = vmax.f32 %v6619_v27, %v6620_v60  ;;  %v385_v56 = vld [vmem:[%s11338_s8 + $0x278] sm:$0xff] }
 0x317   : > { %v7116_v11 = vcombine.low %v13977_v8, %v6595_v19  ;;  %v4465_v1 = vrot.slane %v4455_v28, %v18247_v3  ;;  %v8378_v49 = vcombine.low %v13979_v58, %v7857_v63  ;;  %v7883_v6 = vmin.f32 %v7881_v14, %v7882_v22  ;;  %v401_v8 = vld [vmem:[%s11338_s8 + $0x2f8] sm:$0xff]  ;;  %v18249_v28 = vld [vmem:[#allocation58_spill] sm:$0xff] }
 0x318   : > { %v4456_v5 = vcombine.low %v13981_v57, %v3953_v51  ;;  %v5883_v52 = vcombine.low %v13987_v0, %v5339_v53  ;;  %v5381_v30 = vadd.f32 %v5380_v18, %v5379_v23  ;;  %v7117_v26 = vcombine.low %v13983_v55, %v6621_v9  ;;  %3339 = vmatmul.mubr.bf16.gmra.mrb[216].mxu0 %v10919_v36  ;;  %v14034_v55 = vpop.f32.mrb[128].mxu0  ;;  %v18250_v53 = vld [vmem:[#allocation59_spill] sm:$0xff] }
 0x319   : > { %v7124_v43 = vrot.slane %v7116_v11, %v11677_v34  ;;  %v8386_v16 = vrot.slane %v8378_v49, %v11677_v34  ;;  %v8379_v58 = vcombine.low %v13989_v54, %v7883_v6  ;;  %v10571_v44 = vcombine.low %v384_v39, %v400_v37  ;;  %3348 = vmatprep.mubr.bf16.mxu0 %v18054_v62  ;;  %v14038_v54 = vpop.f32.mrb[128].mxu1  ;;  %v14050_v18 = vpop.f32.mrb[129].mxu0 }
 0x31a   : > { %v4472_v20 = vrot.slane %v4456_v5, %v18247_v3  ;;  %3452 = vmatmul.mubr.bf16.gmra.mrb[216].mxu1 %v10919_v36  ;;  %v5893_v57 = vrot.slane %v5883_v52, %v18247_v3  ;;  %v5884_v0 = vcombine.low %v13995_v59, %v5381_v30  ;;  %v7131_v27 = vrot.slane %v7117_v26, %v11677_v34  ;;  %v18248_v59 = vld [vmem:[#allocation53_spill] sm:$0xff]  ;;  %v14052_v9 = vpop.f32.mrb[129].mxu1  ;;  %v14058_v6 = vpop.f32.mrb[130].mxu0 }
 0x31b   : > { %v10572_v21 = vcombine.high %v384_v39, %v400_v37  ;;  %v8393_v15 = vrot.slane %v8379_v58, %v11677_v34  ;;  %v10573_v14 = vcombine.low %v385_v56, %v401_v8  ;;  %v10574_v40 = vcombine.high %v385_v56, %v401_v8  ;;  %3461 = vmatprep.mubr.bf16.mxu1 %v18054_v62  ;;  %v14066_v56 = vpop.f32.mrb[130].mxu1 }
 0x31c   : > { %v4487_v7 = vcombine.low %v4465_v1, %v4472_v20  ;;  %v5900_v19 = vrot.slane %v5884_v0, %v18247_v3  ;;  %v7132_v23 = vcombine.low %v7124_v43, %v7131_v27  ;;  %v4630_v60 = vmul.f32 %v18248_v59, %v18248_v59  ;;  %v18251_v1 = vld [vmem:[#allocation60_spill] sm:$0xff]  ;;  %v18253_v20 = vld [vmem:[#allocation61_spill] sm:$0xff] }
 0x31d   : > { %3476 = vmatprep.subr.bf16.mxu0 %v10572_v21  ;;  %v4632_v63 = vmul.f32 %v18249_v28, %v18249_v28  ;;  %v8394_v22 = vcombine.low %v8386_v16, %v8393_v15  ;;  %3589 = vmatprep.subr.bf16.mxu1 %v10574_v40  ;;  %v4631_v11 = vmul.f32 %v18250_v53, %v18250_v53 }
 0x31e   : > { %v14046_v51 = vrot.slane %v4487_v7, %v18247_v3  ;;  %3477 = vmatpush1.bf16.msra.mxu0 %v10571_v44  ;;  %v5915_v39 = vcombine.low %v5893_v57, %v5900_v19  ;;  %v7240_v37 = vrot.slane %v7132_v23, 7  ;;  %3590 = vmatpush1.bf16.msra.mxu1 %v10573_v14  ;;  %v4633_v49 = vmul.f32 %v18251_v1, %v18251_v1  ;;  %v10920_v57 = vld [vmem:[#allocation6 + $0x38] sm:$0xff]  }
 0x31f   : > { %v3954_v5 = vadd.f32 %v13344_v33, %v18248_v59  ;;  %v8496_v52 = vrot.slane %v8394_v22, 7  ;;  %v4662_v43 = vmul.f32 %v13344_v33, %v13344_v33  ;;  %v6206_v30 = vmax.f32 %v18248_v59, %v13344_v33 }
 0x320   : > { %v7468_v26 = vmin.f32 %v18248_v59, %v13344_v33  ;;  %v14069_v8 = vrot.slane %v5915_v39, %v18247_v3  ;;  %v18252_v36 = vcombine.low %v13666_v17, %v13694_v13  ;;  %v3996_v58 = vadd.f32 %v18253_v20, %v18249_v28  ;;  %3349 = vmatmul.mubr.bf16.gmra.mrb[220].mxu0 %v10920_v57 }
 0x321   : > { %v4664_v44 = vmul.f32 %v18253_v20, %v18253_v20  ;;  %v18254_v0 = vcombine.low %v13674_v25, %v13720_v45  ;;  %v5382_v21 = vadd.f32 %v4662_v43, %v4630_v60  ;;  %v6232_v17 = vmax.f32 %v18249_v28, %v18253_v20  ;;  %3504 = vmatprep.mubr.bf16.mxu0 %v18054_v62  ;;  %v14091_v25 = vpop.f32.mrb[131].mxu0 }
 0x322   : > { %v7241_v16 = vsel %vm7223_vm0, %v7240_v37, %v18252_v36  ;;  %3462 = vmatmul.mubr.bf16.gmra.mrb[220].mxu1 %v10920_v57  ;;  %v7494_v14 = vmin.f32 %v18249_v28, %v18253_v20  ;;  %v3975_v19 = vadd.f32 %v13396_v41, %v18250_v53  ;;  %v4663_v23 = vmul.f32 %v13396_v41, %v13396_v41  ;;  %v416_v36 = vld [vmem:[%s11338_s8 + $0x370] sm:$0xff] }
 0x323   : > { %v7242_v33 = vsel %vm7225_vm1, %v7240_v37, %v7241_v16  ;;  %v8497_v27 = vsel %vm7223_vm0, %v8496_v52, %v18254_v0  ;;  %v5424_v15 = vadd.f32 %v4664_v44, %v4632_v63  ;;  %3617 = vmatprep.mubr.bf16.mxu1 %v18054_v62  ;;  %v6219_v63 = vmax.f32 %v18250_v53, %v13396_v41  ;;  %v432_v16 = vld [vmem:[%s11338_s8 + $0x3f0] sm:$0xff]  ;;  %v433_v0 = vld [vmem:[%s11338_s8 + $0x3f8] sm:$0xff] }
 0x324   : > { %v7243_v13 = vsel %vm7227_vm2, %v7240_v37, %v7242_v33  ;;  %v8498_v7 = vsel %vm7225_vm1, %v8496_v52, %v8497_v27  ;;  %v7481_v43 = vmin.f32 %v18250_v53, %v13396_v41  ;;  %v4017_v44 = vadd.f32 %v13406_v38, %v18251_v1  ;;  %v417_v33 = vld [vmem:[%s11338_s8 + $0x378] sm:$0xff] }
 0x325   : > { %v7244_v45 = vsel %vm7229_vm3, %v7240_v37, %v7243_v13  ;;  %v8499_v40 = vsel %vm7227_vm2, %v8496_v52, %v8498_v7  ;;  %v5403_v37 = vadd.f32 %v4663_v23, %v4631_v11  ;;  %v4665_v57 = vmul.f32 %v13406_v38, %v13406_v38  ;;  %v14133_v13 = vpop.f32.mrb[131].mxu1 }
 0x326   : > { %v8500_v59 = vsel %vm7229_vm3, %v8496_v52, %v8499_v40  ;;  %v8840_v60 = vcombine.high %v7244_v45, %v7244_v45  ;;  %v14102_v28 = vrot.slane %v7244_v45, %v11677_v34  ;;  %v6245_v53 = vmax.f32 %v18251_v1, %v13406_v38 }
 0x327   : > { %v9056_v22 = vcombine.high %v8500_v59, %v8500_v59  ;;  %v14107_v39 = vrot.slane %v8500_v59, %v11677_v34  ;;  %v7507_v27 = vmin.f32 %v18251_v1, %v13406_v38  ;;  %v5445_v45 = vadd.f32 %v4665_v57, %v4633_v49 }
 0x328   : > { %18255 = vst [vmem:[#allocation74_spill] sm:$0xff] %v14102_v28  ;;  %v14114_v20 = vrot.slane %v8840_v60, %v11677_v34  ;;  %v10603_v40 = vcombine.low %v416_v36, %v432_v16  ;;  %v10604_v23 = vcombine.high %v416_v36, %v432_v16  ;;  %v10605_v60 = vcombine.low %v417_v33, %v433_v0 }
 0x329   : > { %18256 = vst [vmem:[#allocation75_spill] sm:$0xff] %v14107_v39  ;;  %v14125_v11 = vrot.slane %v9056_v22, %v11677_v34  ;;  %v10606_v22 = vcombine.high %v417_v33, %v433_v0  ;;  %v3955_v41 = vadd.f32 %v3954_v5, %v13442_v2  ;;  %v4694_v52 = vmul.f32 %v13442_v2, %v13442_v2 }
 0x32a   : > { %18257 = vst [vmem:[#allocation76_spill] sm:$0xff] %v14114_v20  ;;  %3478 = vmatprep.subr.bf16.mxu0 %v10604_v23  ;;  %v6207_v38 = vmax.f32 %v6206_v30, %v13442_v2  ;;  %v7469_v1 = vmin.f32 %v7468_v26, %v13442_v2  ;;  %v3997_v7 = vadd.f32 %v3996_v58, %v13444_v32 }
 0x32b   : > { %18258 = vst [vmem:[#allocation77_spill] sm:$0xff] %v14125_v11  ;;  %3591 = vmatprep.subr.bf16.mxu1 %v10606_v22  ;;  %3479 = vmatpush1.bf16.msra.mxu0 %v10603_v40  ;;  %v4696_v49 = vmul.f32 %v13444_v32, %v13444_v32  ;;  %v6233_v36 = vmax.f32 %v6232_v17, %v13444_v32  ;;  %v464_v40 = vld [vmem:[%s11338_s8 + $0x4f0] sm:$0xff] }
 0x32c   : > { %v14149_v16 = vmin.f32 %v7494_v14, %v13444_v32  ;;  %3592 = vmatpush1.bf16.msra.mxu1 %v10605_v60  ;;  %v5383_v5 = vadd.f32 %v5382_v21, %v4694_v52  ;;  %v3976_v57 = vadd.f32 %v3975_v19, %v13449_v50  ;;  %v4695_v30 = vmul.f32 %v13449_v50, %v13449_v50  ;;  %v14162_v19 = vpop.f32.mrb[132].mxu0 }
 0x32d   : > { %v6220_v2 = vmax.f32 %v6219_v63, %v13449_v50  ;;  %v5425_v26 = vadd.f32 %v5424_v15, %v4696_v49  ;;  %v7482_v58 = vmin.f32 %v7481_v43, %v13449_v50  ;;  %v4018_v33 = vadd.f32 %v4017_v44, %v13451_v31  ;;  %v14164_v63 = vpop.f32.mrb[132].mxu1  ;;  %v14170_v52 = vpop.f32.mrb[133].mxu0  ;;  %v465_v49 = vld [vmem:[%s11338_s8 + $0x4f8] sm:$0xff] }
 0x32e   : > { %v4697_v17 = vmul.f32 %v13451_v31, %v13451_v31  ;;  %v5404_v0 = vadd.f32 %v5403_v37, %v4695_v30  ;;  %v6246_v32 = vmax.f32 %v6245_v53, %v13451_v31  ;;  %v7508_v21 = vmin.f32 %v7507_v27, %v13451_v31  ;;  %v14172_v44 = vpop.f32.mrb[133].mxu1  ;;  %v14182_v23 = vpop.f32.mrb[134].mxu0 }
 0x32f   : > { %v3956_v14 = vadd.f32 %v3955_v41, %v13463_v24  ;;  %v4726_v50 = vmul.f32 %v13463_v24, %v13463_v24  ;;  %v6208_v43 = vmax.f32 %v6207_v38, %v13463_v24  ;;  %v7470_v37 = vmin.f32 %v7469_v1, %v13463_v24  ;;  %v14184_v24 = vpop.f32.mrb[134].mxu1  ;;  %v449_v1 = vld [vmem:[%s11338_s8 + $0x478] sm:$0xff] }
 0x330   : > { %v5446_v15 = vadd.f32 %v5445_v45, %v4697_v17  ;;  %v3998_v31 = vadd.f32 %v3997_v7, %v13465_v46  ;;  %v4728_v41 = vmul.f32 %v13465_v46, %v13465_v46  ;;  %v6234_v53 = vmax.f32 %v6233_v36, %v13465_v46  ;;  %v448_v45 = vld [vmem:[%s11338_s8 + $0x470] sm:$0xff]  ;;  %v14196_v17 = vpop.f32.mrb[135].mxu0  ;;  %v14200_v11 = vpop.f32.mrb[135].mxu1 }
 0x331   : > { %v7496_v27 = vmin.f32 %v14149_v16, %v13465_v46  ;;  %v5384_v60 = vadd.f32 %v5383_v5, %v4726_v50  ;;  %v3977_v22 = vadd.f32 %v3976_v57, %v13480_v4  ;;  %v4727_v7 = vmul.f32 %v13480_v4, %v13480_v4  ;;  %18259 = vst [vmem:[#allocation78_spill] sm:$0xff] %v14200_v11 }
 0x332   : > { %v6221_v38 = vmax.f32 %v6220_v2, %v13480_v4  ;;  %v5426_v36 = vadd.f32 %v5425_v26, %v4728_v41  ;;  %v7483_v30 = vmin.f32 %v7482_v58, %v13480_v4  ;;  %v4019_v46 = vadd.f32 %v4018_v33, %v13497_v35 }
 0x333   : > { %v4729_v16 = vmul.f32 %v13497_v35, %v13497_v35  ;;  %v5405_v5 = vadd.f32 %v5404_v0, %v4727_v7  ;;  %v6247_v57 = vmax.f32 %v6246_v32, %v13497_v35  ;;  %v7509_v50 = vmin.f32 %v7508_v21, %v13497_v35 }
 0x334   : > { %v10635_v59 = vcombine.low %v448_v45, %v464_v40  ;;  %v10636_v39 = vcombine.high %v448_v45, %v464_v40  ;;  %v10637_v26 = vcombine.low %v449_v1, %v465_v49  ;;  %v10638_v41 = vcombine.high %v449_v1, %v465_v49 }
 0x335   : > { %v5447_v2 = vadd.f32 %v5446_v15, %v4729_v16  ;;  %v3957_v4 = vadd.f32 %v3956_v14, %v13550_v42  ;;  %v4758_v58 = vmul.f32 %v13550_v42, %v13550_v42  ;;  %v6209_v33 = vmax.f32 %v6208_v43, %v13550_v42 }
 0x336   : > { %v7471_v0 = vmin.f32 %v7470_v37, %v13550_v42  ;;  %3480 = vmatprep.subr.bf16.mxu0 %v10636_v39  ;;  %3593 = vmatprep.subr.bf16.mxu1 %v10638_v41  ;;  %v3999_v35 = vadd.f32 %v3998_v31, %v13552_v48  ;;  %v4760_v32 = vmul.f32 %v13552_v48, %v13552_v48 }
 0x337   : > { %v6235_v21 = vmax.f32 %v6234_v53, %v13552_v48  ;;  %3481 = vmatpush1.bf16.msra.mxu0 %v10635_v59  ;;  %3594 = vmatpush1.bf16.msra.mxu1 %v10637_v26  ;;  %v5385_v15 = vadd.f32 %v5384_v60, %v4758_v58  ;;  %v7497_v14 = vmin.f32 %v7496_v27, %v13552_v48  ;;  %v14222_v53 = vpop.f32.mrb[136].mxu0  ;;  %v14224_v27 = vpop.f32.mrb[136].mxu1  ;;  %v497_v26 = vld [vmem:[%s11338_s8 + $0x5f8] sm:$0xff] }
 0x338   : > { %v3978_v45 = vadd.f32 %v3977_v22, %v13559_v10  ;;  %v5427_v40 = vadd.f32 %v5426_v36, %v4760_v32  ;;  %v4759_v42 = vmul.f32 %v13559_v10, %v13559_v10  ;;  %v6222_v39 = vmax.f32 %v6221_v38, %v13559_v10  ;;  %18260 = vst [vmem:[#allocation79_spill] sm:$0xff] %v14222_v53  ;;  %v480_v36 = vld [vmem:[%s11338_s8 + $0x570] sm:$0xff]  ;;  %v18262_v58 = vld [vmem:[#allocation52_spill] sm:$0xff] }
 0x339   : > { %v7484_v43 = vmin.f32 %v7483_v30, %v13559_v10  ;;  %v4020_v37 = vadd.f32 %v4019_v46, %v13561_v61  ;;  %v4761_v59 = vmul.f32 %v13561_v61, %v13561_v61  ;;  %v6248_v31 = vmax.f32 %v6247_v57, %v13561_v61  ;;  %18261 = vst [vmem:[#allocation80_spill] sm:$0xff] %v14224_v27  ;;  %v496_v57 = vld [vmem:[%s11338_s8 + $0x5f0] sm:$0xff] }
 0x33a   : > { %v7510_v48 = vmin.f32 %v7509_v50, %v13561_v61  ;;  %v5406_v60 = vadd.f32 %v5405_v5, %v4759_v42  ;;  %v3958_v22 = vadd.f32 %v3957_v4, %v13568_v12  ;;  %v4790_v10 = vmul.f32 %v13568_v12, %v13568_v12  ;;  %v481_v50 = vld [vmem:[%s11338_s8 + $0x578] sm:$0xff] }
 0x33b   : > { %v6210_v7 = vmax.f32 %v6209_v33, %v13568_v12  ;;  %v5448_v38 = vadd.f32 %v5447_v2, %v4761_v59  ;;  %v7472_v1 = vmin.f32 %v7471_v0, %v13568_v12  ;;  %v4000_v61 = vadd.f32 %v3999_v35, %v13570_v47  ;;  %v18263_v42 = vld [vmem:[#allocation56_spill] sm:$0xff] }
 0x33c   : > { %v4792_v49 = vmul.f32 %v13570_v47, %v13570_v47  ;;  %v5386_v30 = vadd.f32 %v5385_v15, %v4790_v10  ;;  %v6236_v46 = vmax.f32 %v6235_v21, %v13570_v47  ;;  %v7498_v16 = vmin.f32 %v7497_v14, %v13570_v47 }
 0x33d   : > { %v3979_v5 = vadd.f32 %v3978_v45, %v13580_v29  ;;  %v4791_v12 = vmul.f32 %v13580_v29, %v13580_v29  ;;  %v6223_v2 = vmax.f32 %v6222_v39, %v13580_v29  ;;  %v7485_v4 = vmin.f32 %v7484_v43, %v13580_v29 }
 0x33e   : > { %v5428_v41 = vadd.f32 %v5427_v40, %v4792_v49  ;;  %v4021_v33 = vadd.f32 %v4020_v37, %v18262_v58  ;;  %v4793_v0 = vmul.f32 %v18262_v58, %v18262_v58  ;;  %v6249_v47 = vmax.f32 %v6248_v31, %v18262_v58  ;;  %v18264_v37 = vld [vmem:[#allocation26_spill] sm:$0xff]  ;;  %v18265_v49 = vld [vmem:[#allocation27_spill] sm:$0xff] }
 0x33f   : > { %v7511_v35 = vmin.f32 %v7510_v48, %v18262_v58  ;;  %v5407_v32 = vadd.f32 %v5406_v60, %v4791_v12  ;;  %v10667_v21 = vcombine.low %v480_v36, %v496_v57  ;;  %v10668_v15 = vcombine.high %v480_v36, %v496_v57  ;;  %v18266_v57 = vld [vmem:[#allocation57_spill] sm:$0xff] }
 0x340   : > { %v10669_v14 = vcombine.low %v481_v50, %v497_v26  ;;  %v5449_v45 = vadd.f32 %v5448_v38, %v4793_v0  ;;  %v10670_v40 = vcombine.high %v481_v50, %v497_v26  ;;  %v3959_v59 = vadd.f32 %v3958_v22, %v18263_v42 }
 0x341   : > { %v4822_v29 = vmul.f32 %v18263_v42, %v18263_v42  ;;  %3482 = vmatprep.subr.bf16.mxu0 %v10668_v15  ;;  %v6211_v39 = vmax.f32 %v6210_v7, %v18263_v42  ;;  %v7473_v43 = vmin.f32 %v7472_v1, %v18263_v42  ;;  %v4001_v31 = vadd.f32 %v4000_v61, %v18264_v37 }
 0x342   : > { %v4824_v48 = vmul.f32 %v18264_v37, %v18264_v37  ;;  %3595 = vmatprep.subr.bf16.mxu1 %v10670_v40  ;;  %3483 = vmatpush1.bf16.msra.mxu0 %v10667_v21  ;;  %v6237_v10 = vmax.f32 %v6236_v46, %v18264_v37  ;;  %v7499_v22 = vmin.f32 %v7498_v16, %v18264_v37  ;;  %v18269_v40 = vld [vmem:[#allocation29_spill] sm:$0xff] }
 0x343   : > { %v5387_v60 = vadd.f32 %v5386_v30, %v4822_v29  ;;  %3596 = vmatpush1.bf16.msra.mxu1 %v10669_v14  ;;  %v3980_v36 = vadd.f32 %v3979_v5, %v18265_v49  ;;  %v4823_v7 = vmul.f32 %v18265_v49, %v18265_v49  ;;  %v6224_v1 = vmax.f32 %v6223_v2, %v18265_v49 }
 0x344   : > { %v5429_v38 = vadd.f32 %v5428_v41, %v4824_v48  ;;  %v7486_v61 = vmin.f32 %v7485_v4, %v18265_v49  ;;  %v4022_v50 = vadd.f32 %v4021_v33, %v18266_v57  ;;  %v4825_v30 = vmul.f32 %v18266_v57, %v18266_v57  ;;  %v18267_v41 = vld [vmem:[#allocation20_spill] sm:$0xff] }
 0x345   : > { %v6250_v46 = vmax.f32 %v6249_v47, %v18266_v57  ;;  %v5408_v26 = vadd.f32 %v5407_v32, %v4823_v7  ;;  %v7512_v16 = vmin.f32 %v7511_v35, %v18266_v57  ;;  %v14271_v12 = vadd.f32 %v3959_v59, %v18267_v41  ;;  %v18268_v33 = vld [vmem:[#allocation28_spill] sm:$0xff]  ;;  %v14291_v59 = vpop.f32.mrb[137].mxu0  ;;  %v18272_v57 = vld [vmem:[#allocation21_spill] sm:$0xff] }
 0x346   : > { %v4854_v5 = vmul.f32 %v18267_v41, %v18267_v41  ;;  %v5450_v58 = vadd.f32 %v5449_v45, %v4825_v30  ;;  %v6212_v2 = vmax.f32 %v6211_v39, %v18267_v41  ;;  %v7474_v4 = vmin.f32 %v7473_v43, %v18267_v41  ;;  %18270 = vst [vmem:[#allocation81_spill] sm:$0xff] %v14291_v59 }
 0x347   : > { %v14278_v0 = vadd.f32 %v4001_v31, %v18268_v33  ;;  %v4856_v47 = vmul.f32 %v18268_v33, %v18268_v33  ;;  %v6238_v35 = vmax.f32 %v6237_v10, %v18268_v33  ;;  %v7500_v32 = vmin.f32 %v7499_v22, %v18268_v33  ;;  %v14299_v22 = vpop.f32.mrb[137].mxu1 }
 0x348   : > { %v14280_v21 = vadd.f32 %v5387_v60, %v4854_v5  ;;  %v6213_v15 = vrot.slane %v6212_v2, 4  ;;  %v7475_v14 = vrot.slane %v7474_v4, 4  ;;  %v14287_v45 = vadd.f32 %v3980_v36, %v18269_v40  ;;  %18271 = vst [vmem:[#allocation85_spill] sm:$0xff] %v14299_v22 }
 0x349   : > { %v4855_v42 = vmul.f32 %v18269_v40, %v18269_v40  ;;  %v14293_v29 = vadd.f32 %v5429_v38, %v4856_v47  ;;  %v6239_v39 = vrot.slane %v6238_v35, 4  ;;  %v7501_v43 = vrot.slane %v7500_v32, 4 }
 0x34a   : > { %v6225_v37 = vmax.f32 %v6224_v1, %v18269_v40  ;;  %v6214_v31 = vmax.f32 %v6212_v2, %v6213_v15  ;;  %v7476_v48 = vmin.f32 %v7474_v4, %v7475_v14  ;;  %v7487_v10 = vmin.f32 %v7486_v61, %v18269_v40  ;;  %v14307_v61 = vpop.f32.mrb[138].mxu0 }
 0x34b   : > { %v14296_v60 = vadd.f32 %v5408_v26, %v4855_v42  ;;  %v6240_v49 = vmax.f32 %v6238_v35, %v6239_v39  ;;  %v7502_v36 = vmin.f32 %v7500_v32, %v7501_v43  ;;  %v14302_v30 = vadd.f32 %v4022_v50, %v18272_v57  ;;  %18273 = vst [vmem:[#allocation50_spill] sm:$0xff] %v14307_v61  ;;  %v14311_v50 = vpop.f32.mrb[138].mxu1  ;;  %v529_v61 = vld [vmem:[%s11338_s8 + $0x6f8] sm:$0xff] }
 0x34c   : > { %v6226_v7 = vrot.slane %v6225_v37, 4  ;;  %v6215_v38 = vrot.slane %v6214_v31, 2  ;;  %v7477_v41 = vrot.slane %v7476_v48, 2  ;;  %v7488_v5 = vrot.slane %v7487_v10, 4  ;;  %18274 = vst [vmem:[#allocation53_spill] sm:$0xff] %v14311_v50  ;;  %v513_v50 = vld [vmem:[%s11338_s8 + $0x678] sm:$0xff] }
 0x34d   : > { %v4857_v1 = vmul.f32 %v18272_v57, %v18272_v57  ;;  %v6241_v2 = vrot.slane %v6240_v49, 2  ;;  %v7503_v4 = vrot.slane %v7502_v36, 2  ;;  %v6251_v33 = vmax.f32 %v6250_v46, %v18272_v57 }
 0x34e   : > { %v6227_v26 = vmax.f32 %v6225_v37, %v6226_v7  ;;  %v6216_v47 = vmax.f32 %v6214_v31, %v6215_v38  ;;  %v7478_v35 = vmin.f32 %v7476_v48, %v7477_v41  ;;  %v7489_v32 = vmin.f32 %v7487_v10, %v7488_v5  ;;  %v14314_v31 = vpop.f32.mrb[139].mxu0  ;;  %v512_v41 = vld [vmem:[%s11338_s8 + $0x670] sm:$0xff] }
 0x34f   : > { %v14309_v15 = vadd.f32 %v5450_v58, %v4857_v1  ;;  %v6242_v14 = vmax.f32 %v6240_v49, %v6241_v2  ;;  %v7504_v40 = vmin.f32 %v7502_v36, %v7503_v4  ;;  %v6252_v39 = vrot.slane %v6251_v33, 4  ;;  %18275 = vst [vmem:[#allocation58_spill] sm:$0xff] %v14314_v31  ;;  %v528_v5 = vld [vmem:[%s11338_s8 + $0x6f0] sm:$0xff]  ;;  %v14318_v1 = vpop.f32.mrb[139].mxu1 }
 0x350   : > { %v6228_v42 = vrot.slane %v6227_v26, 2  ;;  %v6217_v43 = vrot.slane %v6216_v47, 1  ;;  %v7479_v37 = vrot.slane %v7478_v35, 1  ;;  %v7490_v46 = vrot.slane %v7489_v32, 2  ;;  %18276 = vst [vmem:[#allocation59_spill] sm:$0xff] %v14318_v1 }
 0x351   : > { %v7513_v7 = vmin.f32 %v7512_v16, %v18272_v57  ;;  %v6243_v48 = vrot.slane %v6242_v14, 1  ;;  %v7505_v10 = vrot.slane %v7504_v40, 1  ;;  %v6253_v38 = vmax.f32 %v6251_v33, %v6252_v39 }
 0x352   : > { %v6229_v58 = vmax.f32 %v6227_v26, %v6228_v42  ;;  %v6218_v49 = vmax.f32 %v6216_v47, %v6217_v43  ;;  %v7480_v36 = vmin.f32 %v7478_v35, %v7479_v37  ;;  %v7491_v2 = vmin.f32 %v7489_v32, %v7490_v46  ;;  %v18277_v35 = vld [vmem:[#allocation30_spill] sm:$0xff]  ;;  %v18278_v37 = vld [vmem:[#allocation31_spill] sm:$0xff] }
 0x353   : > { %v7514_v4 = vrot.slane %v7513_v7, 4  ;;  %v6244_v22 = vmax.f32 %v6242_v14, %v6243_v48  ;;  %v14322_v20 = vmin.f32 %v7504_v40, %v7505_v10  ;;  %v6254_v57 = vrot.slane %v6253_v38, 2  ;;  %v18279_v48 = vld [vmem:[#allocation32_spill] sm:$0xff]  ;;  %v14335_v10 = vpop.f32.mrb[140].mxu0 }
 0x354   : > { %v6230_v16 = vrot.slane %v6229_v58, 1  ;;  %v7492_v31 = vrot.slane %v7491_v2, 1  ;;  %v10699_v59 = vcombine.low %v512_v41, %v528_v5  ;;  %v10700_v26 = vcombine.high %v512_v41, %v528_v5  ;;  %18280 = vst [vmem:[#allocation60_spill] sm:$0xff] %v14335_v10  ;;  %v18284_v5 = vld [vmem:[#allocation33_spill] sm:$0xff] }
 0x355   : > { %v7515_v28 = vmin.f32 %v7513_v7, %v7514_v4  ;;  %v6255_v42 = vmax.f32 %v6253_v38, %v6254_v57  ;;  %v10701_v39 = vcombine.low %v513_v50, %v529_v61  ;;  %v10702_v27 = vcombine.high %v513_v50, %v529_v61 }
 0x356   : > { %v6231_v33 = vmax.f32 %v6229_v58, %v6230_v16  ;;  %v7493_v1 = vmin.f32 %v7491_v2, %v7492_v31  ;;  %3484 = vmatprep.subr.bf16.mxu0 %v10700_v26  ;;  %v3961_v32 = vadd.f32 %v14271_v12, %v18277_v35  ;;  %v4886_v14 = vmul.f32 %v18277_v35, %v18277_v35  ;;  %v14337_v58 = vpop.f32.mrb[140].mxu1  ;;  %v18285_v2 = vld [vmem:[#allocation34_spill] sm:$0xff] }
 0x357   : > { %v7516_v47 = vrot.slane %v7515_v28, 2  ;;  %v6256_v43 = vrot.slane %v6255_v42, 1  ;;  %3597 = vmatprep.subr.bf16.mxu1 %v10702_v27  ;;  %3485 = vmatpush1.bf16.msra.mxu0 %v10699_v59  ;;  %v4003_v46 = vadd.f32 %v14278_v0, %v18278_v37  ;;  %v4888_v7 = vmul.f32 %v18278_v37, %v18278_v37  ;;  %18281 = vst [vmem:[#allocation61_spill] sm:$0xff] %v14337_v58  ;;  %v14347_v41 = vpop.f32.mrb[141].mxu1 }
 0x358   : > { %v6997_v40 = vcombine.low %v6218_v49, %v6231_v33  ;;  %v8259_v61 = vcombine.low %v7480_v36, %v7493_v1  ;;  %3598 = vmatpush1.bf16.msra.mxu1 %v10701_v39  ;;  %v5389_v31 = vadd.f32 %v14280_v21, %v4886_v14  ;;  %v3982_v12 = vadd.f32 %v14287_v45, %v18279_v48  ;;  %v14362_v26 = vpop.f32.mrb[142].mxu1 }
 0x359   : > { %v7517_v50 = vmin.f32 %v7515_v28, %v7516_v47  ;;  %v6257_v59 = vmax.f32 %v6255_v42, %v6256_v43  ;;  %v5431_v0 = vadd.f32 %v14293_v29, %v4888_v7  ;;  %v4887_v38 = vmul.f32 %v18279_v48, %v18279_v48  ;;  %v14345_v28 = vpop.f32.mrb[141].mxu0  ;;  %18283 = vst [vmem:[#allocation56_spill] sm:$0xff] %v14347_v41  ;;  %v18288_v47 = vld [vmem:[#allocation35_spill] sm:$0xff]  ;;  %v18294_v41 = vld [vmem:[#allocation38_spill] sm:$0xff] }
 0x35a   : > { %v14340_v27 = vrot.slane %v6997_v40, %v11677_v34  ;;  %18282 = vst [vmem:[#allocation52_spill] sm:$0xff] %v14345_v28  ;;  %v14350_v21 = vrot.slane %v8259_v61, %v11677_v34  ;;  %v4024_v1 = vadd.f32 %v14302_v30, %v18284_v5  ;;  %v4889_v49 = vmul.f32 %v18284_v5, %v18284_v5  ;;  %v14360_v57 = vpop.f32.mrb[142].mxu0  ;;  %v544_v61 = vld [vmem:[%s11338_s8 + $0x770] sm:$0xff] }
 0x35b   : > { %v7518_v45 = vrot.slane %v7517_v50, 1  ;;  %v6998_v36 = vcombine.low %v6244_v22, %v6257_v59  ;;  %v5410_v29 = vadd.f32 %v14296_v60, %v4887_v38  ;;  %v3962_v4 = vadd.f32 %v3961_v32, %v18285_v2  ;;  %18286 = vst [vmem:[#allocation26_spill] sm:$0xff] %v14360_v57  ;;  %18287 = vst [vmem:[#allocation27_spill] sm:$0xff] %v14362_v26  ;;  %v14383_v59 = vpop.f32.mrb[143].mxu0  ;;  %v18293_v26 = vld [vmem:[#allocation37_spill] sm:$0xff] }
 0x35c   : > { %v4918_v16 = vmul.f32 %v18285_v2, %v18285_v2  ;;  %v5452_v30 = vadd.f32 %v14309_v15, %v4889_v49  ;;  %v6622_v42 = vmax.f32 %v18277_v35, %v18285_v2  ;;  %v7884_v60 = vmin.f32 %v18277_v35, %v18285_v2  ;;  %v18289_v35 = vld [vmem:[#allocation22_spill] sm:$0xff]  ;;  %18290 = vst [vmem:[#allocation57_spill] sm:$0xff] %v14383_v59  ;;  %v561_v49 = vld [vmem:[%s11338_s8 + $0x7f8] sm:$0xff] }
 0x35d   : > { %v7519_v33 = vmin.f32 %v7517_v50, %v7518_v45  ;;  %v14370_v22 = vrot.slane %v6998_v36, %v11677_v34  ;;  %v4004_v32 = vadd.f32 %v4003_v46, %v18288_v47  ;;  %v4920_v14 = vmul.f32 %v18288_v47, %v18288_v47  ;;  %v560_v50 = vld [vmem:[%s11338_s8 + $0x7f0] sm:$0xff]  ;;  %v545_v45 = vld [vmem:[%s11338_s8 + $0x778] sm:$0xff] }
 0x35e   : > { %v5390_v39 = vadd.f32 %v5389_v31, %v4918_v16  ;;  %v6648_v15 = vmax.f32 %v18278_v37, %v18288_v47  ;;  %v7910_v43 = vmin.f32 %v18278_v37, %v18288_v47  ;;  %v3983_v7 = vadd.f32 %v3982_v12, %v18289_v35  ;;  %v18291_v36 = vld [vmem:[#allocation36_spill] sm:$0xff] }
 0x35f   : > { %v8260_v40 = vcombine.low %v14322_v20, %v7519_v33  ;;  %v5432_v31 = vadd.f32 %v5431_v0, %v4920_v14  ;;  %v4919_v38 = vmul.f32 %v18289_v35, %v18289_v35  ;;  %v6635_v20 = vmax.f32 %v18279_v48, %v18289_v35  ;;  %v14401_v0 = vpop.f32.mrb[143].mxu1 }
 0x360   : > { %v7897_v12 = vmin.f32 %v18279_v48, %v18289_v35  ;;  %v4025_v2 = vadd.f32 %v4024_v1, %v18291_v36  ;;  %v4921_v16 = vmul.f32 %v18291_v36, %v18291_v36  ;;  %18292 = vst [vmem:[#allocation20_spill] sm:$0xff] %v14401_v0  ;;  %v6661_v47 = vmax.f32 %v18284_v5, %v18291_v36 }
 0x361   : > { %v14394_v37 = vrot.slane %v8260_v40, %v11677_v34  ;;  %v5411_v33 = vadd.f32 %v5410_v29, %v4919_v38  ;;  %v7923_v14 = vmin.f32 %v18284_v5, %v18291_v36  ;;  %v10731_v46 = vcombine.low %v544_v61, %v560_v50 }
 0x362   : > { %v5453_v59 = vadd.f32 %v5452_v30, %v4921_v16  ;;  %v10732_v48 = vcombine.high %v544_v61, %v560_v50  ;;  %v10733_v35 = vcombine.low %v545_v45, %v561_v49  ;;  %v10734_v1 = vcombine.high %v545_v45, %v561_v49  ;;  %v18295_v50 = vld [vmem:[#allocation39_spill] sm:$0xff] }
 0x363   : > { %v3963_v57 = vadd.f32 %v3962_v4, %v18293_v26  ;;  %v4950_v0 = vmul.f32 %v18293_v26, %v18293_v26  ;;  %v6623_v29 = vmax.f32 %v6622_v42, %v18293_v26  ;;  %v7885_v38 = vmin.f32 %v7884_v60, %v18293_v26 }
 0x364   : > { %3486 = vmatprep.subr.bf16.mxu0 %v10732_v48  ;;  %v4005_v5 = vadd.f32 %v4004_v32, %v18294_v41  ;;  %v4952_v36 = vmul.f32 %v18294_v41, %v18294_v41  ;;  %v6649_v30 = vmax.f32 %v6648_v15, %v18294_v41  ;;  %3599 = vmatprep.subr.bf16.mxu1 %v10734_v1  ;;  %v18296_v32 = vld [vmem:[#allocation40_spill] sm:$0xff]  ;;  %v18298_v48 = vld [vmem:[#allocation42_spill] sm:$0xff]  ;;  %v18299_v1 = vld [vmem:[#allocation23_spill] sm:$0xff] }
 0x365   : > { %3487 = vmatpush1.bf16.msra.mxu0 %v10731_v46  ;;  %v5391_v61 = vadd.f32 %v5390_v39, %v4950_v0  ;;  %v7911_v4 = vmin.f32 %v7910_v43, %v18294_v41  ;;  %v3984_v45 = vadd.f32 %v3983_v7, %v18295_v50  ;;  %3600 = vmatpush1.bf16.msra.mxu1 %v10733_v35  ;;  %v18297_v7 = vld [vmem:[#allocation41_spill] sm:$0xff] }
 0x366   : > { %v5433_v49 = vadd.f32 %v5432_v31, %v4952_v36  ;;  %v4951_v42 = vmul.f32 %v18295_v50, %v18295_v50  ;;  %v6636_v26 = vmax.f32 %v6635_v20, %v18295_v50  ;;  %v7898_v60 = vmin.f32 %v7897_v12, %v18295_v50  ;;  %v10921_v20 = vld [vmem:[#allocation6] sm:$0xff]   ;;  %v14446_v50 = vpop.f32.mrb[144].mxu0 }
 0x367   : > { %v4026_v16 = vadd.f32 %v4025_v2, %v18296_v32  ;;  %v4953_v15 = vmul.f32 %v18296_v32, %v18296_v32  ;;  %v6662_v39 = vmax.f32 %v6661_v47, %v18296_v32  ;;  %v7924_v41 = vmin.f32 %v7923_v14, %v18296_v32  ;;  %18300 = vst [vmem:[#allocation28_spill] sm:$0xff] %v14446_v50  ;;  %v14455_v32 = vpop.f32.mrb[145].mxu0 }
 0x368   : > { %v5412_v43 = vadd.f32 %v5411_v33, %v4951_v42  ;;  %v3964_v46 = vadd.f32 %v3963_v57, %v18297_v7  ;;  %v4982_v31 = vmul.f32 %v18297_v7, %v18297_v7  ;;  %v6624_v0 = vmax.f32 %v6623_v29, %v18297_v7  ;;  %3505 = vmatmul.mubr.bf16.vlgmr.msra.gmra.mrb[224].mxu0 %v10921_v20 }
 0x369   : > { %v5454_v12 = vadd.f32 %v5453_v59, %v4953_v15  ;;  %v7886_v2 = vmin.f32 %v7885_v38, %v18297_v7  ;;  %v4006_v35 = vadd.f32 %v4005_v5, %v18298_v48  ;;  %v4984_v47 = vmul.f32 %v18298_v48, %v18298_v48  ;;  %3618 = vmatmul.mubr.bf16.vlgmr.msra.gmra.mrb[224].mxu1 %v10921_v20  ;;  %v18305_v15 = vld [vmem:[#allocation46_spill] sm:$0xff] }
 0x36a   : > { %v5392_v14 = vadd.f32 %v5391_v61, %v4982_v31  ;;  %v6650_v33 = vmax.f32 %v6649_v30, %v18298_v48  ;;  %v7912_v57 = vmin.f32 %v7911_v4, %v18298_v48  ;;  %v3985_v36 = vadd.f32 %v3984_v45, %v18299_v1  ;;  %3514 = vmatprep.mubr.bf16.mxu0 %v18054_v62  ;;  %v14448_v61 = vpop.f32.mrb[144].mxu1  ;;  %v18302_v30 = vld [vmem:[#allocation43_spill] sm:$0xff] }
 0x36b   : > { %v5434_v29 = vadd.f32 %v5433_v49, %v4984_v47  ;;  %v4983_v59 = vmul.f32 %v18299_v1, %v18299_v1  ;;  %v6637_v38 = vmax.f32 %v6636_v26, %v18299_v1  ;;  %v7899_v5 = vmin.f32 %v7898_v60, %v18299_v1  ;;  %3627 = vmatprep.mubr.bf16.mxu1 %v18054_v62  ;;  %v14457_v26 = vpop.f32.mrb[145].mxu1  ;;  %v18306_v47 = vld [vmem:[#allocation47_spill] sm:$0xff] }
 0x36c   : > { %18301 = vst [vmem:[#allocation29_spill] sm:$0xff] %v14448_v61  ;;  %v4027_v4 = vadd.f32 %v4026_v16, %v18302_v30  ;;  %v4985_v45 = vmul.f32 %v18302_v30, %v18302_v30  ;;  %v6663_v49 = vmax.f32 %v6662_v39, %v18302_v30  ;;  %v7925_v42 = vmin.f32 %v7924_v41, %v18302_v30  ;;  %v14467_v41 = vpop.f32.mrb[146].mxu0  ;;  %v10924_v61 = vld [vmem:[#allocation6 + $0x18] sm:$0xff]  }
 0x36d   : > { %18303 = vst [vmem:[#allocation21_spill] sm:$0xff] %v14455_v32  ;;  %18304 = vst [vmem:[#allocation30_spill] sm:$0xff] %v14457_v26  ;;  %v5413_v60 = vadd.f32 %v5412_v43, %v4983_v59  ;;  %v3965_v7 = vadd.f32 %v3964_v46, %v18305_v15  ;;  %v5014_v31 = vmul.f32 %v18305_v15, %v18305_v15  ;;  %v18308_v59 = vld [vmem:[#allocation48_spill] sm:$0xff] }
 0x36e   : > { %v6625_v20 = vmax.f32 %v6624_v0, %v18305_v15  ;;  %v5455_v16 = vadd.f32 %v5454_v12, %v4985_v45  ;;  %v7887_v48 = vmin.f32 %v7886_v2, %v18305_v15  ;;  %v4007_v1 = vadd.f32 %v4006_v35, %v18306_v47  ;;  %18307 = vst [vmem:[#allocation31_spill] sm:$0xff] %v14467_v41  ;;  %v10922_v35 = vld [vmem:[#allocation6 + $0x8] sm:$0xff]   ;;  %v18309_v45 = vld [vmem:[#allocation17_spill] sm:$0xff] }
 0x36f   : > { %v5016_v39 = vmul.f32 %v18306_v47, %v18306_v47  ;;  %v5393_v30 = vadd.f32 %v5392_v14, %v5014_v31  ;;  %v6651_v43 = vmax.f32 %v6650_v33, %v18306_v47  ;;  %v7913_v46 = vmin.f32 %v7912_v57, %v18306_v47  ;;  %v18311_v31 = vld [vmem:[#allocation62_spill] sm:$0xff] }
 0x370   : > { %v3986_v40 = vadd.f32 %v3985_v36, %v18308_v59  ;;  %v5015_v0 = vmul.f32 %v18308_v59, %v18308_v59  ;;  %v6638_v12 = vmax.f32 %v6637_v38, %v18308_v59  ;;  %v7900_v2 = vmin.f32 %v7899_v5, %v18308_v59  ;;  %3515 = vmatmul.mubr.bf16.gmra.mrb[228].mxu0 %v10922_v35  ;;  %v14481_v36 = vpop.f32.mrb[146].mxu1  ;;  %v18312_v59 = vld [vmem:[#allocation63_spill] sm:$0xff] }
 0x371   : > { %v5435_v26 = vadd.f32 %v5434_v29, %v5016_v39  ;;  %v4028_v15 = vadd.f32 %v4027_v4, %v18309_v45  ;;  %v5017_v14 = vmul.f32 %v18309_v45, %v18309_v45  ;;  %v6664_v33 = vmax.f32 %v6663_v49, %v18309_v45  ;;  %3628 = vmatmul.mubr.bf16.gmra.mrb[228].mxu1 %v10922_v35 }
 0x372   : > { %v7926_v57 = vmin.f32 %v7925_v42, %v18309_v45  ;;  %18310 = vst [vmem:[#allocation32_spill] sm:$0xff] %v14481_v36  ;;  %v5414_v29 = vadd.f32 %v5413_v60, %v5015_v0  ;;  %v3966_v47 = vadd.f32 %v3965_v7, %v18311_v31  ;;  %v5046_v38 = vmul.f32 %v18311_v31, %v18311_v31  ;;  %v14493_v60 = vpop.f32.mrb[147].mxu0  ;;  %v14498_v36 = vpop.f32.mrb[147].mxu1 }
 0x373   : > { %v6626_v5 = vmax.f32 %v6625_v20, %v18311_v31  ;;  %3524 = vmatprep.mubr.bf16.mxu0 %v18054_v62  ;;  %v5456_v4 = vadd.f32 %v5455_v16, %v5017_v14  ;;  %v7888_v39 = vmin.f32 %v7887_v48, %v18311_v31  ;;  %v4008_v49 = vadd.f32 %v4007_v1, %v18312_v59  ;;  %v18314_v20 = vld [vmem:[#allocation64_spill] sm:$0xff]  ;;  %v18316_v31 = vld [vmem:[#allocation65_spill] sm:$0xff] }
 0x374   : > { %v5048_v42 = vmul.f32 %v18312_v59, %v18312_v59  ;;  %3637 = vmatprep.mubr.bf16.mxu1 %v18054_v62  ;;  %18313 = vst [vmem:[#allocation33_spill] sm:$0xff] %v14493_v60  ;;  %v5394_v7 = vadd.f32 %v5393_v30, %v5046_v38  ;;  %v6652_v0 = vmax.f32 %v6651_v43, %v18312_v59  ;;  %18315 = vst [vmem:[#allocation34_spill] sm:$0xff] %v14498_v36  ;;  %v18317_v38 = vld [vmem:[#allocation66_spill] sm:$0xff]  ;;  %v10923_v60 = vld [vmem:[#allocation6 + $0x10] sm:$0xff]  }
 0x375   : > { %v7914_v35 = vmin.f32 %v7913_v46, %v18312_v59  ;;  %v3987_v45 = vadd.f32 %v3986_v40, %v18314_v20  ;;  %v5047_v48 = vmul.f32 %v18314_v20, %v18314_v20  ;;  %v6639_v1 = vmax.f32 %v6638_v12, %v18314_v20 }
 0x376   : > { %v5436_v16 = vadd.f32 %v5435_v26, %v5048_v42  ;;  %v7901_v14 = vmin.f32 %v7900_v2, %v18314_v20  ;;  %v4029_v41 = vadd.f32 %v4028_v15, %v18316_v31  ;;  %v5049_v30 = vmul.f32 %v18316_v31, %v18316_v31  ;;  %v18318_v20 = vld [vmem:[#allocation67_spill] sm:$0xff] }
 0x377   : > { %v6665_v43 = vmax.f32 %v6664_v33, %v18316_v31  ;;  %v7927_v46 = vmin.f32 %v7926_v57, %v18316_v31  ;;  %v5415_v40 = vadd.f32 %v5414_v29, %v5047_v48  ;;  %v3967_v59 = vadd.f32 %v3966_v47, %v18317_v38  ;;  %v18319_v47 = vld [vmem:[#allocation68_spill] sm:$0xff] }
 0x378   : > { %v5078_v26 = vmul.f32 %v18317_v38, %v18317_v38  ;;  %v6627_v42 = vmax.f32 %v6626_v5, %v18317_v38  ;;  %v5457_v12 = vadd.f32 %v5456_v4, %v5049_v30  ;;  %v7889_v2 = vmin.f32 %v7888_v39, %v18317_v38  ;;  %3525 = vmatmul.mubr.bf16.gmra.mrb[232].mxu0 %v10923_v60  ;;  %v14522_v5 = vpop.f32.mrb[148].mxu0  ;;  %v14524_v4 = vpop.f32.mrb[148].mxu1  ;;  %v18325_v30 = vld [vmem:[#allocation70_spill] sm:$0xff] }
 0x379   : > { %v4009_v15 = vadd.f32 %v4008_v49, %v18318_v20  ;;  %v5080_v36 = vmul.f32 %v18318_v20, %v18318_v20  ;;  %v6653_v57 = vmax.f32 %v6652_v0, %v18318_v20  ;;  %v7915_v29 = vmin.f32 %v7914_v35, %v18318_v20  ;;  %3638 = vmatmul.mubr.bf16.gmra.mrb[232].mxu1 %v10923_v60  ;;  %v14535_v0 = vpop.f32.mrb[149].mxu0  ;;  %v18323_v35 = vld [vmem:[#allocation69_spill] sm:$0xff] }
 0x37a   : > { %v5395_v33 = vadd.f32 %v5394_v7, %v5078_v26  ;;  %v14520_v48 = vadd.f32 %v3987_v45, %v18319_v47  ;;  %18320 = vst [vmem:[#allocation35_spill] sm:$0xff] %v14522_v5  ;;  %18321 = vst [vmem:[#allocation22_spill] sm:$0xff] %v14524_v4  ;;  %v5079_v49 = vmul.f32 %v18319_v47, %v18319_v47  ;;  %3534 = vmatprep.mubr.bf16.mxu0 %v18054_v62  ;;  %v14557_v20 = vpop.f32.mrb[150].mxu0 }
 0x37b   : > { %v5437_v39 = vadd.f32 %v5436_v16, %v5080_v36  ;;  %v14529_v31 = vmax.f32 %v6639_v1, %v18319_v47  ;;  %v14532_v7 = vmin.f32 %v7901_v14, %v18319_v47  ;;  %18322 = vst [vmem:[#allocation36_spill] sm:$0xff] %v14535_v0  ;;  %v14538_v60 = vadd.f32 %v4029_v41, %v18323_v35  ;;  %v14549_v1 = vpop.f32.mrb[149].mxu1  ;;  %v14568_v5 = vpop.f32.mrb[151].mxu0 }
 0x37c   : > { %v5081_v45 = vmul.f32 %v18323_v35, %v18323_v35  ;;  %v14543_v36 = vmax.f32 %v6665_v43, %v18323_v35  ;;  %v14546_v16 = vmin.f32 %v7927_v46, %v18323_v35  ;;  %3647 = vmatprep.mubr.bf16.mxu1 %v18054_v62  ;;  %18324 = vst [vmem:[#allocation37_spill] sm:$0xff] %v14549_v1  ;;  %18326 = vst [vmem:[#allocation38_spill] sm:$0xff] %v14557_v20  ;;  %v14559_v43 = vpop.f32.mrb[150].mxu1  ;;  %v18328_v35 = vld [vmem:[#allocation71_spill] sm:$0xff] }
 0x37d   : > { %v14551_v14 = vadd.f32 %v5415_v40, %v5079_v49  ;;  %v3968_v38 = vadd.f32 %v3967_v59, %v18325_v30  ;;  %v5110_v41 = vmul.f32 %v18325_v30, %v18325_v30  ;;  %v6628_v26 = vmax.f32 %v6627_v42, %v18325_v30  ;;  %18327 = vst [vmem:[#allocation39_spill] sm:$0xff] %v14559_v43  ;;  %v14570_v42 = vpop.f32.mrb[151].mxu1 }
 0x37e   : > { %v14561_v47 = vadd.f32 %v5457_v12, %v5081_v45  ;;  %v7890_v46 = vmin.f32 %v7889_v2, %v18325_v30  ;;  %v4010_v0 = vadd.f32 %v4009_v15, %v18328_v35  ;;  %v5112_v40 = vmul.f32 %v18328_v35, %v18328_v35  ;;  %18329 = vst [vmem:[#allocation40_spill] sm:$0xff] %v14568_v5 }
 0x37f   : > { %v3969_v49 = vrot.slane %v3968_v38, 4  ;;  %v5396_v59 = vadd.f32 %v5395_v33, %v5110_v41  ;;  %v6629_v1 = vrot.slane %v6628_v26, 4  ;;  %v6654_v4 = vmax.f32 %v6653_v57, %v18328_v35  ;;  %18330 = vst [vmem:[#allocation41_spill] sm:$0xff] %v14570_v42 }
 0x380   : > { %v7891_v20 = vrot.slane %v7890_v46, 4  ;;  %v4011_v43 = vrot.slane %v4010_v0, 4  ;;  %v5438_v12 = vadd.f32 %v5437_v39, %v5112_v40  ;;  %v7916_v45 = vmin.f32 %v7915_v29, %v18328_v35  ;;  %3535 = vmatmul.mubr.bf16.gmra.mrb[236].mxu0 %v10924_v61  ;;  %v14575_v29 = vpop.f32.mrb[152].mxu0  ;;  %v14577_v35 = vpop.f32.mrb[152].mxu1 }
 0x381   : > { %v3970_v2 = vadd.f32 %v3969_v49, %v3968_v38  ;;  %v5397_v30 = vrot.slane %v5396_v59, 4  ;;  %v6630_v15 = vmax.f32 %v6628_v26, %v6629_v1  ;;  %v6655_v32 = vrot.slane %v6654_v4, 4  ;;  %3648 = vmatmul.mubr.bf16.gmra.mrb[236].mxu1 %v10924_v61  ;;  %3544 = vmatprep.mubr.bf16.mxu0 %v18054_v62  ;;  %18331 = vst [vmem:[#allocation42_spill] sm:$0xff] %v14575_v29  ;;  %v14581_v53 = vpop.f32.mrb[153].mxu1 }
 0x382   : > { %v7892_v50 = vmin.f32 %v7890_v46, %v7891_v20  ;;  %v4012_v33 = vadd.f32 %v4011_v43, %v4010_v0  ;;  %v5439_v41 = vrot.slane %v5438_v12, 4  ;;  %v7917_v28 = vrot.slane %v7916_v45, 4  ;;  %3657 = vmatprep.mubr.bf16.mxu1 %v18054_v62  ;;  %18332 = vst [vmem:[#allocation23_spill] sm:$0xff] %v14577_v35  ;;  %18334 = vst [vmem:[#allocation46_spill] sm:$0xff] %v14581_v53  ;;  %v10926_v53 = vld [vmem:[#allocation6 + $0x28] sm:$0xff]  }
 0x383   : > { %v3971_v57 = vrot.slane %v3970_v2, 2  ;;  %v5398_v42 = vadd.f32 %v5397_v30, %v5396_v59  ;;  %v6631_v5 = vrot.slane %v6630_v15, 2  ;;  %v6656_v58 = vmax.f32 %v6654_v4, %v6655_v32  ;;  %v14579_v30 = vpop.f32.mrb[153].mxu0 }
 0x384   : > { %v7893_v39 = vrot.slane %v7892_v50, 2  ;;  %v4013_v1 = vrot.slane %v4012_v33, 2  ;;  %v5440_v38 = vadd.f32 %v5439_v41, %v5438_v12  ;;  %v7918_v26 = vmin.f32 %v7916_v45, %v7917_v28  ;;  %18333 = vst [vmem:[#allocation43_spill] sm:$0xff] %v14579_v30 }
 0x385   : > { %v3972_v0 = vadd.f32 %v3971_v57, %v3970_v2  ;;  %v5399_v20 = vrot.slane %v5398_v42, 2  ;;  %v6632_v43 = vmax.f32 %v6630_v15, %v6631_v5  ;;  %v6657_v61 = vrot.slane %v6656_v58, 2  ;;  %v14583_v2 = vpop.f32.mrb[154].mxu0  ;;  %v14585_v5 = vpop.f32.mrb[154].mxu1 }
 0x386   : > { %v7894_v46 = vmin.f32 %v7892_v50, %v7893_v39  ;;  %v4014_v40 = vadd.f32 %v4013_v1, %v4012_v33  ;;  %v5441_v49 = vrot.slane %v5440_v38, 2  ;;  %v7919_v59 = vrot.slane %v7918_v26, 2  ;;  %18335 = vst [vmem:[#allocation47_spill] sm:$0xff] %v14583_v2  ;;  %18336 = vst [vmem:[#allocation48_spill] sm:$0xff] %v14585_v5  ;;  %v10925_v39 = vld [vmem:[#allocation6 + $0x20] sm:$0xff]  }
 0x387   : > { %v3973_v32 = vrot.slane %v3972_v0, 1  ;;  %v5400_v4 = vadd.f32 %v5399_v20, %v5398_v42  ;;  %v6633_v10 = vrot.slane %v6632_v43, 1  ;;  %v6658_v29 = vmax.f32 %v6656_v58, %v6657_v61  ;;  %v14591_v42 = vpop.f32.mrb[155].mxu0  ;;  %v14593_v58 = vpop.f32.mrb[155].mxu1 }
 0x388   : > { %v7895_v12 = vrot.slane %v7894_v46, 1  ;;  %v4015_v28 = vrot.slane %v4014_v40, 1  ;;  %v5442_v45 = vadd.f32 %v5441_v49, %v5440_v38  ;;  %v7920_v41 = vmin.f32 %v7918_v26, %v7919_v59  ;;  %3545 = vmatmul.mubr.bf16.gmra.mrb[240].mxu0 %v10925_v39  ;;  %18337 = vst [vmem:[#allocation17_spill] sm:$0xff] %v14591_v42  ;;  %18338 = vst [vmem:[#allocation62_spill] sm:$0xff] %v14593_v58 }
 0x389   : > { %v14587_v50 = vadd.f32 %v3973_v32, %v3972_v0  ;;  %v5401_v15 = vrot.slane %v5400_v4, 1  ;;  %v14589_v33 = vmax.f32 %v6632_v43, %v6633_v10  ;;  %v6659_v57 = vrot.slane %v6658_v29, 1  ;;  %3658 = vmatmul.mubr.bf16.gmra.mrb[240].mxu1 %v10925_v39  ;;  %3554 = vmatprep.mubr.bf16.mxu0 %v18054_v62  ;;  %v18339_v43 = vld [vmem:[#allocation72_spill] sm:$0xff] }
 0x38a   : > { %v14595_v1 = vmin.f32 %v7894_v46, %v7895_v12  ;;  %v14597_v38 = vadd.f32 %v4015_v28, %v4014_v40  ;;  %v5443_v26 = vrot.slane %v5442_v45, 1  ;;  %v7921_v20 = vrot.slane %v7920_v41, 1  ;;  %3667 = vmatprep.mubr.bf16.mxu1 %v18054_v62  ;;  %v18340_v12 = vld [vmem:[#allocation73_spill] sm:$0xff] }
 0x38b   : > { %v14600_v0 = vadd.f32 %v5401_v15, %v5400_v4  ;;  %v14602_v10 = vmax.f32 %v6658_v29, %v6659_v57  ;;  %v3989_v61 = vadd.f32 %v14520_v48, %v18339_v43  ;;  %v5111_v49 = vmul.f32 %v18339_v43, %v18339_v43  ;;  %v14622_v15 = vpop.f32.mrb[156].mxu0 }
 0x38c   : > { %v14609_v46 = vadd.f32 %v5443_v26, %v5442_v45  ;;  %v14611_v40 = vmin.f32 %v7920_v41, %v7921_v20  ;;  %v6641_v59 = vmax.f32 %v14529_v31, %v18339_v43  ;;  %v7903_v32 = vmin.f32 %v14532_v7, %v18339_v43  ;;  %18341 = vst [vmem:[#allocation63_spill] sm:$0xff] %v14622_v15  ;;  %v14628_v7 = vpop.f32.mrb[156].mxu1  ;;  %v14631_v15 = vpop.f32.mrb[157].mxu0 }
 0x38d   : > { %v3990_v29 = vrot.slane %v3989_v61, 4  ;;  %v5417_v4 = vadd.f32 %v14551_v14, %v5111_v49  ;;  %v4031_v48 = vadd.f32 %v14538_v60, %v18340_v12  ;;  %v5113_v28 = vmul.f32 %v18340_v12, %v18340_v12  ;;  %18342 = vst [vmem:[#allocation64_spill] sm:$0xff] %v14628_v7  ;;  %18343 = vst [vmem:[#allocation65_spill] sm:$0xff] %v14631_v15 }
 0x38e   : > { %v6642_v45 = vrot.slane %v6641_v59, 4  ;;  %v7904_v41 = vrot.slane %v7903_v32, 4  ;;  %v6667_v57 = vmax.f32 %v14543_v36, %v18340_v12  ;;  %v7929_v31 = vmin.f32 %v14546_v16, %v18340_v12  ;;  %v14633_v16 = vpop.f32.mrb[157].mxu1 }
 0x38f   : > { %v3991_v39 = vadd.f32 %v3990_v29, %v3989_v61  ;;  %v5418_v14 = vrot.slane %v5417_v4, 4  ;;  %v4032_v26 = vrot.slane %v4031_v48, 4  ;;  %v5459_v60 = vadd.f32 %v14561_v47, %v5113_v28  ;;  %18344 = vst [vmem:[#allocation66_spill] sm:$0xff] %v14633_v16  ;;  %v14636_v47 = vpop.f32.mrb[158].mxu0 }
 0x390   : > { %v6643_v20 = vmax.f32 %v6641_v59, %v6642_v45  ;;  %v7905_v43 = vmin.f32 %v7903_v32, %v7904_v41  ;;  %v6668_v49 = vrot.slane %v6667_v57, 4  ;;  %v7930_v58 = vrot.slane %v7929_v31, 4  ;;  %3555 = vmatmul.mubr.bf16.gmra.mrb[244].mxu0 %v10926_v53  ;;  %18345 = vst [vmem:[#allocation67_spill] sm:$0xff] %v14636_v47  ;;  %v14638_v59 = vpop.f32.mrb[158].mxu1  ;;  %v14641_v16 = vpop.f32.mrb[159].mxu0 }
 0x391   : > { %v3992_v42 = vrot.slane %v3991_v39, 2  ;;  %v5419_v5 = vadd.f32 %v5418_v14, %v5417_v4  ;;  %v4033_v2 = vadd.f32 %v4032_v26, %v4031_v48  ;;  %v5460_v36 = vrot.slane %v5459_v60, 4  ;;  %3668 = vmatmul.mubr.bf16.gmra.mrb[244].mxu1 %v10926_v53  ;;  %3564 = vmatprep.mubr.bf16.mxu0 %v18054_v62  ;;  %18346 = vst [vmem:[#allocation68_spill] sm:$0xff] %v14638_v59 }
 0x392   : > { %v6644_v12 = vrot.slane %v6643_v20, 2  ;;  %v7906_v61 = vrot.slane %v7905_v43, 2  ;;  %v6669_v29 = vmax.f32 %v6667_v57, %v6668_v49  ;;  %v7931_v7 = vmin.f32 %v7929_v31, %v7930_v58  ;;  %3677 = vmatprep.mubr.bf16.mxu1 %v18054_v62  ;;  %18347 = vst [vmem:[#allocation69_spill] sm:$0xff] %v14641_v16 }
 0x393   : > { %v3993_v32 = vadd.f32 %v3992_v42, %v3991_v39  ;;  %v5420_v28 = vrot.slane %v5419_v5, 2  ;;  %v4034_v4 = vrot.slane %v4033_v2, 2  ;;  %v5461_v48 = vadd.f32 %v5460_v36, %v5459_v60 }
 0x394   : > { %v6645_v45 = vmax.f32 %v6643_v20, %v6644_v12  ;;  %v7907_v41 = vmin.f32 %v7905_v43, %v7906_v61  ;;  %v6670_v14 = vrot.slane %v6669_v29, 2  ;;  %v7932_v26 = vrot.slane %v7931_v7, 2 }
 0x395   : > { %v3994_v58 = vrot.slane %v3993_v32, 1  ;;  %v5421_v53 = vadd.f32 %v5420_v28, %v5419_v5  ;;  %v4035_v57 = vadd.f32 %v4034_v4, %v4033_v2  ;;  %v5462_v31 = vrot.slane %v5461_v48, 2  ;;  %v10927_v5 = vld [vmem:[#allocation6 + $0x30] sm:$0xff]  }
 0x396   : > { %v6646_v49 = vrot.slane %v6645_v45, 1  ;;  %v7908_v47 = vrot.slane %v7907_v41, 1  ;;  %v6671_v15 = vmax.f32 %v6669_v29, %v6670_v14  ;;  %v7933_v59 = vmin.f32 %v7931_v7, %v7932_v26  ;;  %v14671_v14 = vpop.f32.mrb[159].mxu1 }
 0x397   : > { %v3995_v42 = vadd.f32 %v3994_v58, %v3993_v32  ;;  %v5422_v39 = vrot.slane %v5421_v53, 1  ;;  %v4036_v30 = vrot.slane %v4035_v57, 1  ;;  %v5463_v60 = vadd.f32 %v5462_v31, %v5461_v48  ;;  %18348 = vst [vmem:[#allocation70_spill] sm:$0xff] %v14671_v14 }
 0x398   : > { %v6647_v36 = vmax.f32 %v6645_v45, %v6646_v49  ;;  %v7909_v35 = vmin.f32 %v7907_v41, %v7908_v47  ;;  %v6672_v20 = vrot.slane %v6671_v15, 1  ;;  %v7934_v43 = vrot.slane %v7933_v59, 1  ;;  %3565 = vmatmul.mubr.bf16.gmra.mrb[248].mxu0 %v10927_v5 }
 0x399   : > { %v4457_v12 = vcombine.low %v14587_v50, %v3995_v42  ;;  %v5423_v61 = vadd.f32 %v5422_v39, %v5421_v53  ;;  %v4037_v16 = vadd.f32 %v4036_v30, %v4035_v57  ;;  %v5464_v11 = vrot.slane %v5463_v60, 1  ;;  %3678 = vmatmul.mubr.bf16.gmra.mrb[248].mxu1 %v10927_v5  ;;  %3574 = vmatprep.mubr.bf16.mxu0 %v18054_v62 }
 0x39a   : > { %v7133_v2 = vcombine.low %v14589_v33, %v6647_v36  ;;  %v8395_v29 = vcombine.low %v14595_v1, %v7909_v35  ;;  %v6673_v7 = vmax.f32 %v6671_v15, %v6672_v20  ;;  %v7935_v32 = vmin.f32 %v7933_v59, %v7934_v43  ;;  %3687 = vmatprep.mubr.bf16.mxu1 %v18054_v62 }
 0x39b   : > { %v4479_v28 = vrot.slane %v4457_v12, %v18247_v3  ;;  %v5885_v47 = vcombine.low %v14600_v0, %v5423_v61  ;;  %v4458_v4 = vcombine.low %v14597_v38, %v4037_v16  ;;  %v5465_v48 = vadd.f32 %v5464_v11, %v5463_v60  ;;  %v10928_v60 = vld [vmem:[#allocation6 + $0x38] sm:$0xff]  }
 0x39c   : > { %v7141_v30 = vrot.slane %v7133_v2, %v11677_v34  ;;  %v8403_v50 = vrot.slane %v8395_v29, %v11677_v34  ;;  %v7134_v33 = vcombine.low %v14602_v10, %v6673_v7  ;;  %v8396_v35 = vcombine.low %v14611_v40, %v7935_v32 }
 0x39d   : > { %v5907_v1 = vrot.slane %v5885_v47, %v18247_v3  ;;  %v4486_v15 = vrot.slane %v4458_v4, %v18247_v3  ;;  %v5886_v0 = vcombine.low %v14609_v46, %v5465_v48  ;;  %v4634_v11 = vmul.f32 %v14034_v55, %v14034_v55 }
 0x39e   : > { %v7148_v38 = vrot.slane %v7134_v33, %v11677_v34  ;;  %v8410_v16 = vrot.slane %v8396_v35, %v11677_v34  ;;  %v4636_v10 = vmul.f32 %v14038_v54, %v14038_v54  ;;  %v4635_v40 = vmul.f32 %v14050_v18, %v14050_v18  ;;  %v14715_v33 = vpop.f32.mrb[160].mxu0 }
 0x39f   : > { %v4488_v59 = vcombine.low %v4479_v28, %v4486_v15  ;;  %v5914_v45 = vrot.slane %v5886_v0, %v18247_v3  ;;  %v4637_v41 = vmul.f32 %v14052_v9, %v14052_v9  ;;  %v4038_v46 = vadd.f32 %v14058_v6, %v14034_v55  ;;  %18351 = vst [vmem:[#allocation71_spill] sm:$0xff] %v14715_v33 }
 0x3a0   : > { %v7149_v26 = vcombine.low %v7141_v30, %v7148_v38  ;;  %v8411_v58 = vcombine.low %v8403_v50, %v8410_v16  ;;  %v4666_v53 = vmul.f32 %v14058_v6, %v14058_v6  ;;  %v6258_v57 = vmax.f32 %v14034_v55, %v14058_v6  ;;  %3575 = vmatmul.mubr.bf16.gmra.mrb[252].mxu0 %v10928_v60 }
 0x3a1   : > { %v4502_v31 = vrot.slane %v4488_v59, %v18247_v3  ;;  %v5916_v49 = vcombine.low %v5907_v1, %v5914_v45  ;;  %v7520_v42 = vmin.f32 %v14034_v55, %v14058_v6  ;;  %v4080_v39 = vadd.f32 %v14066_v56, %v14038_v54  ;;  %3688 = vmatmul.mubr.bf16.gmra.mrb[252].mxu1 %v10928_v60 }
 0x3a2   : > { %v7247_v36 = vrot.slane %v7149_v26, 7  ;;  %v8503_v20 = vrot.slane %v8411_v58, 7  ;;  %v5466_v43 = vadd.f32 %v4666_v53, %v4634_v11  ;;  %v4668_v12 = vmul.f32 %v14066_v56, %v14066_v56  ;;  %v18373_v58 = vld [vmem:[#allocation76_spill] sm:$0xff] }
 0x3a3   : > { %v4503_v61 = vcombine.low %v14046_v51, %v4502_v31  ;;  %v5930_v5 = vrot.slane %v5916_v49, %v18247_v3  ;;  %v6284_v2 = vmax.f32 %v14038_v54, %v14066_v56  ;;  %v7546_v55 = vmin.f32 %v14038_v54, %v14066_v56 }
 0x3a4   : > { %v18349_v6 = vcombine.low %v14340_v27, %v14370_v22  ;;  %v18350_v7 = vcombine.low %v14350_v21, %v14394_v37  ;;  %v5508_v28 = vadd.f32 %v4668_v12, %v4636_v10  ;;  %v4059_v51 = vadd.f32 %v14091_v25, %v14050_v18 }
 0x3a5   : > { %v5931_v47 = vcombine.low %v14069_v8, %v5930_v5  ;;  %v14703_v56 = vmul.f32 0.0078125, %v4503_v61  ;;  %v4667_v21 = vmul.f32 %v14091_v25, %v14091_v25  ;;  %v6271_v37 = vmax.f32 %v14050_v18, %v14091_v25 }
 0x3a6   : > { %v7248_v29 = vsel %vm7223_vm0, %v7247_v36, %v18349_v6  ;;  %v8504_v32 = vsel %vm7223_vm0, %v8503_v20, %v18350_v7  ;;  %v7533_v16 = vmin.f32 %v14050_v18, %v14091_v25  ;;  %v4101_v10 = vadd.f32 %v14133_v13, %v14052_v9 }
 0x3a7   : > { %v7249_v4 = vsel %vm7225_vm1, %v7247_v36, %v7248_v29  ;;  %v8505_v54 = vsel %vm7225_vm1, %v8503_v20, %v8504_v32  ;;  %v8576_v30 = vmul.f32 0.0078125, %v5931_v47  ;;  %v8580_v50 = vmul.f32 %v14703_v56, %v14703_v56 }
 0x3a8   : > { %v7250_v27 = vsel %vm7227_vm2, %v7247_v36, %v7249_v4  ;;  %v8506_v22 = vsel %vm7227_vm2, %v8503_v20, %v8505_v54  ;;  %v5487_v38 = vadd.f32 %v4667_v21, %v4635_v40  ;;  %v4669_v40 = vmul.f32 %v14133_v13, %v14133_v13  ;;  %v14782_v4 = vpop.f32.mrb[161].mxu0 }
 0x3a9   : > { %v7251_v48 = vsel %vm7229_vm3, %v7247_v36, %v7250_v27  ;;  %v8507_v8 = vsel %vm7229_vm3, %v8503_v20, %v8506_v22  ;;  %v8584_v11 = vsub.f32 %v8576_v30, %v8580_v50  ;;  %v6297_v18 = vmax.f32 %v14052_v9, %v14133_v13  ;;  %18353 = vst [vmem:[#allocation73_spill] sm:$0xff] %v14782_v4 }
 0x3aa   : > { %v8857_v35 = vcombine.high %v7251_v48, %v7251_v48  ;;  %v14718_v1 = vrot.slane %v7251_v48, %v11677_v34  ;;  %v9073_v15 = vcombine.high %v8507_v8, %v8507_v8  ;;  %v14721_v0 = vrot.slane %v8507_v8, %v11677_v34 }
 0x3ab   : > { %v8595_v53 = vadd.f32 1e-05, %v8584_v11  ;;  %v7559_v25 = vmin.f32 %v14052_v9, %v14133_v13  ;;  %v4039_v60 = vadd.f32 %v4038_v46, %v14162_v19  ;;  %v4698_v36 = vmul.f32 %v14162_v19, %v14162_v19 }
 0x3ac   : > { %v14728_v59 = vrot.slane %v8857_v35, %v11677_v34  ;;  %v14733_v26 = vrot.slane %v9073_v15, %v11677_v34  ;;  %v5529_v20 = vadd.f32 %v4669_v40, %v4637_v41  ;;  %v6259_v12 = vmax.f32 %v6258_v57, %v14162_v19  ;;  %v10735_v35 = vld [vmem:[%s13243_s27 + $0x10] ss:$2 sm:$0xff] }
 0x3ad   : > { %10857 = vrsqrt.f32 %v8595_v53  ;;  %v7521_v61 = vmin.f32 %v7520_v42, %v14162_v19  ;;  %v5467_v5 = vadd.f32 %v5466_v43, %v4698_v36  ;;  %v4081_v9 = vadd.f32 %v4080_v39, %v14164_v63  ;;  %v14769_v43 = vpop.f32.mrb[160].mxu1  ;;  %v18370_v40 = vld [vmem:[#allocation19_spill] sm:$0xff] }
 0x3ae   : > { %v4700_v13 = vmul.f32 %v14164_v63, %v14164_v63  ;;  %v6285_v6 = vmax.f32 %v6284_v2, %v14164_v63  ;;  %v7547_v29 = vmin.f32 %v7546_v55, %v14164_v63  ;;  %v4060_v46 = vadd.f32 %v4059_v51, %v14170_v52  ;;  %18352 = vst [vmem:[#allocation72_spill] sm:$0xff] %v14769_v43  ;;  %v14784_v54 = vpop.f32.mrb[161].mxu1 }
 0x3af   : > { %v4699_v7 = vmul.f32 %v14170_v52, %v14170_v52  ;;  %v14761_v41 = vmax.f32 %v6271_v37, %v14170_v52  ;;  %v14764_v19 = vmin.f32 %v7533_v16, %v14170_v52  ;;  %v4102_v42 = vadd.f32 %v4101_v10, %v14172_v44  ;;  %18354 = vst [vmem:[#allocation87_spill] sm:$0xff] %v14784_v54  ;;  %v14791_v37 = vpop.f32.mrb[162].mxu0  ;;  %v14798_v50 = vpop.f32.mrb[162].mxu1 }
 0x3b0   : > { %v5509_v57 = vadd.f32 %v5508_v28, %v4700_v13  ;;  %v4701_v39 = vmul.f32 %v14172_v44, %v14172_v44  ;;  %v14772_v2 = vmax.f32 %v6297_v18, %v14172_v44  ;;  %v14775_v55 = vmin.f32 %v7559_v25, %v14172_v44  ;;  %18355 = vst [vmem:[#allocation88_spill] sm:$0xff] %v14791_v37  ;;  %v18358_v18 = vld [vmem:[#allocation79_spill] sm:$0xff]  ;;  %v18360_v13 = vld [vmem:[#allocation80_spill] sm:$0xff] }
 0x3b1   : > { %v5488_v63 = vadd.f32 %v5487_v38, %v4699_v7  ;;  %v4040_v32 = vadd.f32 %v4039_v60, %v14182_v23  ;;  %v4730_v52 = vmul.f32 %v14182_v23, %v14182_v23  ;;  %v6260_v51 = vmax.f32 %v6259_v12, %v14182_v23  ;;  %18356 = vst [vmem:[#allocation89_spill] sm:$0xff] %v14798_v50  ;;  %v14841_v7 = vpop.f32.mrb[163].mxu1 }
 0x3b2   : > { %v5530_v28 = vadd.f32 %v5529_v20, %v4701_v39  ;;  %v7522_v47 = vmin.f32 %v7521_v61, %v14182_v23  ;;  %v4082_v27 = vadd.f32 %v4081_v9, %v14184_v24  ;;  %v4732_v44 = vmul.f32 %v14184_v24, %v14184_v24  ;;  %18361 = vst [vmem:[#allocation79_spill] sm:$0xff] %v14841_v7 }
 0x3b3   : > { %v6286_v22 = vmax.f32 %v6285_v6, %v14184_v24  ;;  %v7548_v21 = vmin.f32 %v7547_v29, %v14184_v24  ;;  %v5468_v48 = vadd.f32 %v5467_v5, %v4730_v52  ;;  %v4061_v8 = vadd.f32 %v4060_v46, %v14196_v17  ;;  %v18357_v24 = vld [vmem:[#allocation78_spill] sm:$0xff]  ;;  %v14829_v5 = vpop.f32.mrb[163].mxu0 }
 0x3b4   : > { %v4731_v23 = vmul.f32 %v14196_v17, %v14196_v17  ;;  %v14801_v15 = vadd.f32 %v5509_v57, %v4732_v44  ;;  %v14806_v38 = vadd.f32 %v4102_v42, %v18357_v24  ;;  %v4733_v16 = vmul.f32 %v18357_v24, %v18357_v24  ;;  %18359 = vst [vmem:[#allocation78_spill] sm:$0xff] %v14829_v5  ;;  %v10739_v57 = vld [vmem:[%s13243_s27 + $0x11] ss:$2 sm:$0xff] }
 0x3b5   : > { %v14817_v25 = vadd.f32 %v4040_v32, %v18358_v18  ;;  %v4762_v20 = vmul.f32 %v18358_v18, %v18358_v18  ;;  %v14824_v12 = vmax.f32 %v6260_v51, %v18358_v18  ;;  %v14827_v61 = vmin.f32 %v7522_v47, %v18358_v18  ;;  %v18363_v51 = vld [vmem:[#allocation44_spill] sm:$0xff]  ;;  %v18368_v18 = vld [vmem:[#allocation49_spill] sm:$0xff] }
 0x3b6   : > { %v14810_v10 = vadd.f32 %v5488_v63, %v4731_v23  ;;  %v14819_v36 = vadd.f32 %v5530_v28, %v4733_v16  ;;  %v14832_v6 = vadd.f32 %v4082_v27, %v18360_v13  ;;  %v14836_v29 = vmul.f32 %v18360_v13, %v18360_v13  ;;  %v18362_v63 = vld [vmem:[#allocation81_spill] sm:$0xff]  ;;  %v18366_v23 = vld [vmem:[#allocation83_spill] sm:$0xff] }
 0x3b7   : > { %v10858_v60 = vpop.eup %10857  ;;  %v14839_v46 = vmax.f32 %v6286_v22, %v18360_v13  ;;  %v14844_v42 = vadd.f32 %v5468_v48, %v4762_v20  ;;  %v14847_v39 = vmin.f32 %v7548_v21, %v18360_v13  ;;  %v14850_v32 = vadd.f32 %v4061_v8, %v18362_v63  ;;  %v18364_v27 = vld [vmem:[#allocation45_spill] sm:$0xff]  ;;  %v18365_v22 = vld [vmem:[#allocation82_spill] sm:$0xff]  ;;  %v18367_v21 = vld [vmem:[#allocation84_spill] sm:$0xff] }
 0x3b8   : > { %v8603_v9 = vmul.f32 %v10858_v60, %v10735_v35  ;;  %v14854_v28 = vmul.f32 %v18362_v63, %v18362_v63  ;;  %v18369_v20 = vld [vmem:[#allocation54_spill] sm:$0xff]  ;;  %v18374_v45 = vcombine.high %v18373_v58, %v18373_v58  ;;  %v18376_v37 = vcombine.high %v14728_v59, %v14728_v59 }
 0x3ba   : > { %v8615_v52 = vmul.f32 %v8603_v9, %v14703_v56  ;;  %vm8623_vm13 = vcmp.ge.f32.partialorder %v8603_v9, 0.0  ;;  %v8673_v47 = vrot.slane %v8603_v9, %v18363_v51  ;;  %v8677_v44 = vrot.slane %v8603_v9, %v18364_v27  ;;  %v18371_v56 = vld [vmem:[#allocation74_spill] sm:$0xff] }
 0x3bb   : > { %v8681_v48 = vrot.slane %v8603_v9, %v18365_v22  ;;  %v8685_v35 = vrot.slane %v8603_v9, %v18366_v23  ;;  %v8689_v16 = vrot.slane %v8603_v9, %v18367_v21  ;;  %v8693_v8 = vrot.slane %v8603_v9, %v18368_v18 }
 0x3bc   : > { %v14863_v60 = vsub.f32 %v10739_v57, %v8615_v52  ;;  %v8697_v13 = vrot.slane %v8603_v9, %v18369_v20  ;;  %v8701_v53 = vrot.slane %v8603_v9, %v18370_v40  ;;  %v8982_v11 = vmul.f32 %v18371_v56, %v8673_v47 }
 0x3bd   : > { %v18372_v30 = vcombine.high %v18371_v56, %v18371_v56  ;;  %v8984_v31 = vmul.f32 %v18373_v58, %v8681_v48  ;;  %v8985_v7 = vmul.f32 %v18374_v45, %v8685_v35  ;;  %v8986_v5 = vmul.f32 %v14718_v1, %v8689_v16  ;;  %v18377_v56 = vld [vmem:[#allocation75_spill] sm:$0xff]  ;;  %v18379_v58 = vld [vmem:[#allocation77_spill] sm:$0xff] }
 0x3be   : > { %v18375_v57 = vcombine.high %v14718_v1, %v14718_v1  ;;  %v8988_v50 = vmul.f32 %v14728_v59, %v8697_v13  ;;  %v8989_v54 = vmul.f32 %v18376_v37, %v8701_v53  ;;  %v18378_v4 = vcombine.high %v18377_v56, %v18377_v56 }
 0x3bf   : > { %v8983_v49 = vmul.f32 %v18372_v30, %v8677_v44  ;;  %v9198_v30 = vmul.f32 %v18377_v56, %v8673_v47  ;;  %v9200_v45 = vmul.f32 %v18379_v58, %v8681_v48  ;;  %v18380_v33 = vcombine.high %v18379_v58, %v18379_v58  ;;  %v14903_v48 = vpop.f32.mrb[164].mxu1 }
 0x3c0   : > { %v8987_v52 = vmul.f32 %v18375_v57, %v8693_v8  ;;  %v9199_v43 = vmul.f32 %v18378_v4, %v8677_v44  ;;  %v9202_v1 = vmul.f32 %v14721_v0, %v8689_v16  ;;  %v18381_v57 = vcombine.high %v14721_v0, %v14721_v0  ;;  %v14901_v44 = vpop.f32.mrb[164].mxu0 }
 0x3c1   : > { %v9201_v3 = vmul.f32 %v18380_v33, %v8685_v35  ;;  %v9204_v59 = vmul.f32 %v14733_v26, %v8697_v13  ;;  %v18382_v37 = vcombine.high %v14733_v26, %v14733_v26  ;;  %v9223_v4 = vsel %vm8623_vm13, 1, %v18054_v62  ;;  %v14911_v13 = vpop.f32.mrb[165].mxu1 }
 0x3c2   : > { %v9203_v14 = vmul.f32 %v18381_v57, %v8693_v8  ;;  %v9261_v33 = vrot.slane %v9223_v4, %v18363_v51  ;;  %v9265_v35 = vrot.slane %v9223_v4, %v18364_v27  ;;  %v9269_v0 = vrot.slane %v9223_v4, %v18365_v22  ;;  %v14909_v8 = vpop.f32.mrb[165].mxu0  ;;  %18384 = vst [vmem:[#allocation81_spill] sm:$0xff] %v14911_v13 }
 0x3c3   : > { %v9205_v47 = vmul.f32 %v18382_v37, %v8701_v53  ;;  %v9273_v16 = vrot.slane %v9223_v4, %v18366_v23  ;;  %18383 = vst [vmem:[#allocation80_spill] sm:$0xff] %v14909_v8  ;;  %v9277_v26 = vrot.slane %v9223_v4, %v18367_v21  ;;  %v9281_v53 = vrot.slane %v9223_v4, %v18368_v18  ;;  %v14933_v13 = vpop.f32.mrb[166].mxu0  ;;  %v14935_v8 = vpop.f32.mrb[166].mxu1 }
 0x3c4   : > { %v9285_v9 = vrot.slane %v9223_v4, %v18369_v20  ;;  %v9289_v56 = vrot.slane %v9223_v4, %v18370_v40  ;;  %vm14917_vm14 = vcmp.eq.s32.totalorder %v9261_v33, 1  ;;  %vm14921_vm15 = vcmp.eq.s32.totalorder %v9265_v35, 1  ;;  %18393 = vst [vmem:[#allocation74_spill] sm:$0xff] %v14933_v13  ;;  %18394 = vst [vmem:[#allocation76_spill] sm:$0xff] %v14935_v8 }
 0x3c5   : > { %vm14925_vm4 = vcmp.eq.s32.totalorder %v9269_v0, 1  ;;  %vm14929_vm5 = vcmp.eq.s32.totalorder %v9273_v16, 1  ;;  %vm14937_vm6 = vcmp.eq.s32.totalorder %v9277_v26, 1  ;;  %vm14941_vm7 = vcmp.eq.s32.totalorder %v9281_v53, 1 }
 0x3c6   : > { %vm14945_vm8 = vcmp.eq.s32.totalorder %v9285_v9, 1  ;;  %vm14949_vm9 = vcmp.eq.s32.totalorder %v9289_v56, 1  ;;  %v9394_v16 = vsel %vm14917_vm14, %v8982_v11, %v9198_v30  ;;  %v9395_v26 = vsel %vm14921_vm15, %v8983_v49, %v9199_v43  ;;  %v14969_v30 = vpop.f32.mrb[167].mxu0  ;;  %v14971_v49 = vpop.f32.mrb[167].mxu1 }
 0x3c7   : > { %v9396_v53 = vsel %vm14925_vm4, %v8984_v31, %v9200_v45  ;;  %v9397_v8 = vsel %vm14929_vm5, %v8985_v7, %v9201_v3  ;;  %v9398_v9 = vsel %vm14937_vm6, %v8986_v5, %v9202_v1  ;;  %v9399_v56 = vsel %vm14941_vm7, %v8987_v52, %v9203_v14  ;;  %v14989_v37 = vpop.f32.mrb[168].mxu0 }
 0x3c8   : > { %v9400_v13 = vsel %vm14945_vm8, %v8988_v50, %v9204_v59  ;;  %v9401_v11 = vsel %vm14949_vm9, %v8989_v54, %v9205_v47  ;;  %v9457_v62 = vrot.slane %v14863_v60, %v18363_v51  ;;  %v9461_v3 = vrot.slane %v14863_v60, %v18364_v27 }
 0x3c9   : > { %v9465_v31 = vrot.slane %v14863_v60, %v18365_v22  ;;  %v9469_v14 = vrot.slane %v14863_v60, %v18366_v23  ;;  %v9473_v43 = vrot.slane %v14863_v60, %v18367_v21  ;;  %v9477_v54 = vrot.slane %v14863_v60, %v18368_v18 }
 0x3ca   : > { %v9481_v50 = vrot.slane %v14863_v60, %v18369_v20  ;;  %v9485_v5 = vrot.slane %v14863_v60, %v18370_v40  ;;  %v9590_v7 = vadd.f32 %v9457_v62, %v9394_v16  ;;  %v9591_v52 = vadd.f32 %v9461_v3, %v9395_v26  ;;  %v14995_v20 = vpop.f32.mrb[168].mxu1 }
 0x3cb   : > { %v9592_v45 = vadd.f32 %v9465_v31, %v9396_v53  ;;  %v9593_v1 = vadd.f32 %v9469_v14, %v9397_v8  ;;  %v9594_v59 = vadd.f32 %v9473_v43, %v9398_v9  ;;  %v9595_v47 = vadd.f32 %v9477_v54, %v9399_v56  ;;  %v15017_v56 = vpop.f32.mrb[169].mxu1  ;;  %v18408_v43 = vld [vmem:[#allocation50_spill] sm:$0xff] }
 0x3cc   : > { %v9596_v58 = vadd.f32 %v9481_v50, %v9400_v13  ;;  %v9597_v57 = vadd.f32 %v9485_v5, %v9401_v11  ;;  %v9680_v4 = vcombine.low %v9590_v7, %v9591_v52  ;;  %v5511_v35 = vadd.f32 %v14801_v15, %v14836_v29  ;;  %v15009_v15 = vpop.f32.mrb[169].mxu0  ;;  %v15035_v31 = vpop.f32.mrb[170].mxu1 }
 0x3cd   : > { %v9681_v33 = vcombine.low %v9592_v45, %v9593_v1  ;;  %v5490_v0 = vadd.f32 %v14810_v10, %v14854_v28  ;;  %v9697_v60 = vcombine.low %v9594_v59, %v9595_v47  ;;  %v18403_v8 = vmax.f32 %v14761_v41, %v14196_v17  ;;  %v18405_v28 = vld [vmem:[#allocation85_spill] sm:$0xff]  ;;  %v15033_v3 = vpop.f32.mrb[170].mxu0  ;;  %v18410_v47 = vld [vmem:[#allocation86_spill] sm:$0xff] }
 0x3ce   : > { %v9698_v16 = vcombine.low %v9596_v58, %v9597_v57  ;;  %v18404_v26 = vmin.f32 %v14764_v19, %v14196_v17  ;;  %v9688_v10 = vrot.slane %v9680_v4, %v11677_v34  ;;  %v4104_v9 = vadd.f32 %v14806_v38, %v18405_v28  ;;  %v15048_v45 = vpop.f32.mrb[171].mxu0 }
 0x3cf   : > { %v15001_v13 = vmax.f32 %v18403_v8, %v18362_v63  ;;  %v9695_v29 = vrot.slane %v9681_v33, %v11677_v34  ;;  %v4765_v41 = vmul.f32 %v18405_v28, %v18405_v28  ;;  %v9705_v11 = vrot.slane %v9697_v60, %v11677_v34  ;;  %v18412_v60 = vld [vmem:[#allocation59_spill] sm:$0xff] }
 0x3d0   : > { %v15007_v53 = vmin.f32 %v18404_v26, %v18362_v63  ;;  %v9712_v17 = vrot.slane %v9698_v16, %v11677_v34  ;;  %v18406_v19 = vmax.f32 %v14772_v2, %v18357_v24  ;;  %v18407_v62 = vmin.f32 %v14775_v55, %v18357_v24  ;;  %v18409_v24 = vld [vmem:[#allocation53_spill] sm:$0xff] }
 0x3d1   : > { %v5532_v14 = vadd.f32 %v14819_v36, %v4765_v41  ;;  %v4042_v54 = vadd.f32 %v14817_v25, %v18408_v43  ;;  %v4794_v2 = vmul.f32 %v18408_v43, %v18408_v43  ;;  %v6262_v50 = vmax.f32 %v14824_v12, %v18408_v43  ;;  %v15050_v36 = vpop.f32.mrb[171].mxu1 }
 0x3d2   : > { %v15025_v63 = vmax.f32 %v18406_v19, %v18405_v28  ;;  %v15031_v38 = vmin.f32 %v18407_v62, %v18405_v28  ;;  %v10744_v5 = vcombine.low %v9688_v10, %v9705_v11  ;;  %v10745_v7 = vcombine.low %v9695_v29, %v9712_v17  ;;  %v15076_v10 = vpop.f32.mrb[172].mxu0  ;;  %v18415_v29 = vld [vmem:[#allocation60_spill] sm:$0xff] }
 0x3d3   : > { %v7524_v55 = vmin.f32 %v14827_v61, %v18408_v43  ;;  %v4084_v52 = vadd.f32 %v14832_v6, %v18409_v24  ;;  %v5470_v25 = vadd.f32 %v14844_v42, %v4794_v2  ;;  %v4796_v1 = vmul.f32 %v18409_v24, %v18409_v24  ;;  %v18411_v6 = vld [vmem:[#allocation58_spill] sm:$0xff]  ;;  %v15096_v19 = vpop.f32.mrb[173].mxu0 }
 0x3d4   : > { %v6288_v12 = vmax.f32 %v14839_v46, %v18409_v24  ;;  %v7550_v59 = vmin.f32 %v14847_v39, %v18409_v24  ;;  %v9816_v61 = vrot.slane %v10744_v5, %v18410_v47  ;;  %v9823_v58 = vrot.slane %v10745_v7, %v18410_v47  ;;  %v18427_v7 = vld [vmem:[#allocation27_spill] sm:$0xff] }
 0x3d5   : > { %v4063_v57 = vadd.f32 %v14850_v32, %v18411_v6  ;;  %v4795_v4 = vmul.f32 %v18411_v6, %v18411_v6  ;;  %v5512_v42 = vadd.f32 %v5511_v35, %v4796_v1  ;;  %v6275_v33 = vmax.f32 %v15001_v13, %v18411_v6 }
 0x3d6   : > { %v7537_v46 = vmin.f32 %v15007_v53, %v18411_v6  ;;  %v4105_v16 = vadd.f32 %v4104_v9, %v18412_v60  ;;  %v15070_v39 = vcombine.low %v9816_v61, %v9823_v58  ;;  %v15072_v8 = vcombine.high %v9816_v61, %v9823_v58  ;;  %v15085_v9 = vpop.f32.mrb[172].mxu1  ;;  %v18422_v6 = vld [vmem:[#allocation52_spill] sm:$0xff] }
 0x3d7   : > { %v5491_v26 = vadd.f32 %v5490_v0, %v4795_v4  ;;  %v4797_v32 = vmul.f32 %v18412_v60, %v18412_v60  ;;  %v6301_v35 = vmax.f32 %v15025_v63, %v18412_v60  ;;  %v7563_v13 = vmin.f32 %v15031_v38, %v18412_v60  ;;  %v18418_v38 = vld [vmem:[#allocation61_spill] sm:$0xff]  ;;  %v15102_v2 = vpop.f32.mrb[173].mxu1 }
 0x3d8   : > { %18413 = vst [vmem:[#allocation75_spill] sm:$0xff] %v15070_v39  ;;  %18414 = vst [vmem:[#allocation77_spill] sm:$0xff] %v15072_v8  ;;  %v4043_v53 = vadd.f32 %v4042_v54, %v18415_v29  ;;  %v4826_v28 = vmul.f32 %v18415_v29, %v18415_v29  ;;  %v15089_v0 = vmul.f32 %v15070_v39, %v15070_v39 }
 0x3d9   : > { %v15093_v41 = vmul.f32 %v15072_v8, %v15072_v8  ;;  %v5533_v11 = vadd.f32 %v5532_v14, %v4797_v32  ;;  %v6263_v17 = vmax.f32 %v6262_v50, %v18415_v29  ;;  %v7525_v62 = vmin.f32 %v7524_v55, %v18415_v29  ;;  %v15112_v55 = vpop.f32.mrb[174].mxu0 }
 0x3da   : > { %18416 = vst [vmem:[#allocation85_spill] sm:$0xff] %v15089_v0  ;;  %v5471_v63 = vadd.f32 %v5470_v25, %v4826_v28  ;;  %v4085_v43 = vadd.f32 %v4084_v52, %v18418_v38  ;;  %v4828_v54 = vmul.f32 %v18418_v38, %v18418_v38  ;;  %v15114_v52 = vpop.f32.mrb[174].mxu1  ;;  %v6289_v61 = vmax.f32 %v6288_v12, %v18418_v38  ;;  %v15119_v60 = vpop.f32.mrb[175].mxu0  ;;  %v18424_v25 = vld [vmem:[#allocation56_spill] sm:$0xff] }
 0x3db   : > { %18417 = vst [vmem:[#allocation50_spill] sm:$0xff] %v15093_v41  ;;  %18421 = vst [vmem:[#allocation53_spill] sm:$0xff] %v15114_v52  ;;  %v7551_v58 = vmin.f32 %v7550_v59, %v18418_v38  ;;  %v4064_v4 = vadd.f32 %v4063_v57, %v18422_v6  ;;  %v4827_v32 = vmul.f32 %v18422_v6, %v18422_v6  ;;  %v18425_v38 = vld [vmem:[#allocation26_spill] sm:$0xff] }
 0x3dc   : > { %v5513_v1 = vadd.f32 %v5512_v42, %v4828_v54  ;;  %18423 = vst [vmem:[#allocation58_spill] sm:$0xff] %v15119_v60  ;;  %v6276_v29 = vmax.f32 %v6275_v33, %v18422_v6  ;;  %v7538_v28 = vmin.f32 %v7537_v46, %v18422_v6  ;;  %v4106_v24 = vadd.f32 %v4105_v16, %v18424_v25  ;;  %v15133_v54 = vpop.f32.mrb[175].mxu1 }
 0x3dd   : > { %v4829_v42 = vmul.f32 %v18424_v25, %v18424_v25  ;;  %v6302_v12 = vmax.f32 %v6301_v35, %v18424_v25  ;;  %v7564_v59 = vmin.f32 %v7563_v13, %v18424_v25  ;;  %v15131_v57 = vadd.f32 %v4043_v53, %v18425_v38  ;;  %18426 = vst [vmem:[#allocation59_spill] sm:$0xff] %v15133_v54  ;;  %v15161_v18 = vpop.f32.mrb[176].mxu1 }
 0x3de   : > { %v5492_v14 = vadd.f32 %v5491_v26, %v4827_v32  ;;  %v4858_v33 = vmul.f32 %v18425_v38, %v18425_v38  ;;  %v6264_v46 = vmax.f32 %v6263_v17, %v18425_v38  ;;  %v7526_v16 = vmin.f32 %v7525_v62, %v18425_v38  ;;  %v18428_v17 = vld [vmem:[#allocation57_spill] sm:$0xff]  ;;  %18431 = vst [vmem:[#allocation61_spill] sm:$0xff] %v15161_v18 }
 0x3df   : > { %v5534_v6 = vadd.f32 %v5533_v11, %v4829_v42  ;;  %v15140_v8 = vadd.f32 %v4085_v43, %v18427_v7  ;;  %v4860_v35 = vmul.f32 %v18427_v7, %v18427_v7  ;;  %v6290_v13 = vmax.f32 %v6289_v61, %v18427_v7 }
 0x3e0   : > { %v5472_v53 = vadd.f32 %v5471_v63, %v4858_v33  ;;  %v6265_v25 = vrot.slane %v6264_v46, 4  ;;  %v7527_v39 = vrot.slane %v7526_v16, 4  ;;  %v7552_v26 = vmin.f32 %v7551_v58, %v18427_v7  ;;  %v18429_v33 = vld [vmem:[#allocation20_spill] sm:$0xff] }
 0x3e1   : > { %v15146_v32 = vadd.f32 %v5513_v1, %v4860_v35  ;;  %v6291_v41 = vrot.slane %v6290_v13, 4  ;;  %v4065_v50 = vadd.f32 %v4064_v4, %v18428_v17  ;;  %v4859_v11 = vmul.f32 %v18428_v17, %v18428_v17 }
 0x3e2   : > { %v6266_v62 = vmax.f32 %v6264_v46, %v6265_v25  ;;  %v7528_v43 = vmin.f32 %v7526_v16, %v7527_v39  ;;  %v7553_v42 = vrot.slane %v7552_v26, 4  ;;  %v6277_v38 = vmax.f32 %v6276_v29, %v18428_v17 }
 0x3e3   : > { %v6292_v0 = vmax.f32 %v6290_v13, %v6291_v41  ;;  %v15152_v61 = vadd.f32 %v5492_v14, %v4859_v11  ;;  %v7539_v63 = vmin.f32 %v7538_v28, %v18428_v17  ;;  %v4107_v7 = vadd.f32 %v4106_v24, %v18429_v33 }
 0x3e4   : > { %v6267_v1 = vrot.slane %v6266_v62, 2  ;;  %v7529_v58 = vrot.slane %v7528_v43, 2  ;;  %v7554_v35 = vmin.f32 %v7552_v26, %v7553_v42  ;;  %v6278_v5 = vrot.slane %v6277_v38, 4  ;;  %v15159_v42 = vpop.f32.mrb[176].mxu0 }
 0x3e5   : > { %v6293_v4 = vrot.slane %v6292_v0, 2  ;;  %v7540_v47 = vrot.slane %v7539_v63, 4  ;;  %v4861_v46 = vmul.f32 %v18429_v33, %v18429_v33  ;;  %v6303_v39 = vmax.f32 %v6302_v12, %v18429_v33  ;;  %18430 = vst [vmem:[#allocation60_spill] sm:$0xff] %v15159_v42 }
 0x3e6   : > { %v6268_v16 = vmax.f32 %v6266_v62, %v6267_v1  ;;  %v7530_v29 = vmin.f32 %v7528_v43, %v7529_v58  ;;  %v7555_v41 = vrot.slane %v7554_v35, 2  ;;  %v6279_v14 = vmax.f32 %v6277_v38, %v6278_v5  ;;  %v15164_v62 = vpop.f32.mrb[177].mxu0  ;;  %v15166_v5 = vpop.f32.mrb[177].mxu1 }
 0x3e7   : > { %v6294_v13 = vmax.f32 %v6292_v0, %v6293_v4  ;;  %v7541_v25 = vmin.f32 %v7539_v63, %v7540_v47  ;;  %v5535_v28 = vadd.f32 %v5534_v6, %v4861_v46  ;;  %v6304_v17 = vrot.slane %v6303_v39, 4  ;;  %18432 = vst [vmem:[#allocation52_spill] sm:$0xff] %v15164_v62  ;;  %18433 = vst [vmem:[#allocation56_spill] sm:$0xff] %v15166_v5 }
 0x3e8   : > { %v6269_v24 = vrot.slane %v6268_v16, 1  ;;  %v7531_v11 = vrot.slane %v7530_v29, 1  ;;  %v7556_v40 = vmin.f32 %v7554_v35, %v7555_v41  ;;  %v6280_v26 = vrot.slane %v6279_v14, 2  ;;  %v15168_v35 = vpop.f32.mrb[178].mxu0  ;;  %v18435_v41 = vld [vmem:[#allocation28_spill] sm:$0xff] }
 0x3e9   : > { %v6295_v21 = vrot.slane %v6294_v13, 1  ;;  %v7542_v23 = vrot.slane %v7541_v25, 2  ;;  %v6305_v22 = vmax.f32 %v6303_v39, %v6304_v17  ;;  %v7565_v12 = vmin.f32 %v7564_v59, %v18429_v33  ;;  %18434 = vst [vmem:[#allocation26_spill] sm:$0xff] %v15168_v35 }
 0x3ea   : > { %v6270_v47 = vmax.f32 %v6268_v16, %v6269_v24  ;;  %v7532_v0 = vmin.f32 %v7530_v29, %v7531_v11  ;;  %v7557_v6 = vrot.slane %v7556_v40, 1  ;;  %v6281_v43 = vmax.f32 %v6279_v14, %v6280_v26  ;;  %v18436_v29 = vld [vmem:[#allocation29_spill] sm:$0xff]  ;;  %v15179_v24 = vpop.f32.mrb[178].mxu1 }
 0x3eb   : > { %v6296_v38 = vmax.f32 %v6294_v13, %v6295_v21  ;;  %v7543_v63 = vmin.f32 %v7541_v25, %v7542_v23  ;;  %v6306_v1 = vrot.slane %v6305_v22, 2  ;;  %v7566_v58 = vrot.slane %v7565_v12, 4  ;;  %v18437_v25 = vld [vmem:[#allocation21_spill] sm:$0xff]  ;;  %18438 = vst [vmem:[#allocation27_spill] sm:$0xff] %v15179_v24 }
 0x3ec   : > { %v7558_v4 = vmin.f32 %v7556_v40, %v7557_v6  ;;  %v6282_v46 = vrot.slane %v6281_v43, 1  ;;  %v4045_v39 = vadd.f32 %v15131_v57, %v18435_v41  ;;  %v4890_v59 = vmul.f32 %v18435_v41, %v18435_v41 }
 0x3ed   : > { %v7544_v33 = vrot.slane %v7543_v63, 1  ;;  %v6307_v17 = vmax.f32 %v6305_v22, %v6306_v1  ;;  %v7567_v16 = vmin.f32 %v7565_v12, %v7566_v58  ;;  %v4087_v14 = vadd.f32 %v15140_v8, %v18436_v29  ;;  %v18439_v1 = vld [vmem:[#allocation30_spill] sm:$0xff] }
 0x3ee   : > { %v6283_v21 = vmax.f32 %v6281_v43, %v6282_v46  ;;  %v5473_v23 = vadd.f32 %v5472_v53, %v4890_v59  ;;  %v4892_v13 = vmul.f32 %v18436_v29, %v18436_v29  ;;  %v4066_v40 = vadd.f32 %v4065_v50, %v18437_v25  ;;  %v15187_v43 = vpop.f32.mrb[179].mxu0  ;;  %v15190_v59 = vpop.f32.mrb[179].mxu1 }
 0x3ef   : > { %v7545_v11 = vmin.f32 %v7543_v63, %v7544_v33  ;;  %v6308_v57 = vrot.slane %v6307_v17, 1  ;;  %v7568_v26 = vrot.slane %v7567_v16, 2  ;;  %v4891_v6 = vmul.f32 %v18437_v25, %v18437_v25  ;;  %18440 = vst [vmem:[#allocation57_spill] sm:$0xff] %v15187_v43  ;;  %18441 = vst [vmem:[#allocation20_spill] sm:$0xff] %v15190_v59 }
 0x3f0   : > { %v7014_v22 = vcombine.low %v6270_v47, %v6283_v21  ;;  %v5515_v12 = vadd.f32 %v15146_v32, %v4892_v13  ;;  %v4108_v8 = vadd.f32 %v4107_v7, %v18439_v1  ;;  %v4893_v53 = vmul.f32 %v18439_v1, %v18439_v1  ;;  %v18442_v21 = vld [vmem:[#allocation31_spill] sm:$0xff] }
 0x3f1   : > { %v8276_v58 = vcombine.low %v7532_v0, %v7545_v11  ;;  %v6309_v50 = vmax.f32 %v6307_v17, %v6308_v57  ;;  %v7569_v46 = vmin.f32 %v7567_v16, %v7568_v26  ;;  %v5494_v63 = vadd.f32 %v15152_v61, %v4891_v6  ;;  %v18443_v11 = vld [vmem:[#allocation32_spill] sm:$0xff] }
 0x3f2   : > { %v15193_v33 = vrot.slane %v7014_v22, %v11677_v34  ;;  %v5536_v47 = vadd.f32 %v5535_v28, %v4893_v53  ;;  %v4046_v32 = vadd.f32 %v4045_v39, %v18442_v21  ;;  %v4922_v7 = vmul.f32 %v18442_v21, %v18442_v21 }
 0x3f3   : > { %v15199_v13 = vrot.slane %v8276_v58, %v11677_v34  ;;  %v7015_v27 = vcombine.low %v6296_v38, %v6309_v50  ;;  %v7570_v0 = vrot.slane %v7569_v46, 1  ;;  %v6674_v17 = vmax.f32 %v18435_v41, %v18442_v21  ;;  %v15220_v58 = vpop.f32.mrb[180].mxu0 }
 0x3f4   : > { %v5474_v61 = vadd.f32 %v5473_v23, %v4922_v7  ;;  %v7936_v16 = vmin.f32 %v18435_v41, %v18442_v21  ;;  %v4088_v57 = vadd.f32 %v4087_v14, %v18443_v11  ;;  %v4924_v28 = vmul.f32 %v18443_v11, %v18443_v11  ;;  %v18444_v23 = vld [vmem:[#allocation33_spill] sm:$0xff]  ;;  %18445 = vst [vmem:[#allocation28_spill] sm:$0xff] %v15220_v58 }
 0x3f5   : > { %v15209_v39 = vrot.slane %v7015_v27, %v11677_v34  ;;  %v7571_v26 = vmin.f32 %v7569_v46, %v7570_v0  ;;  %v6700_v38 = vmax.f32 %v18436_v29, %v18443_v11  ;;  %v7962_v6 = vmin.f32 %v18436_v29, %v18443_v11  ;;  %v15222_v27 = vpop.f32.mrb[180].mxu1 }
 0x3f6   : > { %v5516_v22 = vadd.f32 %v5515_v12, %v4924_v28  ;;  %v4067_v53 = vadd.f32 %v4066_v40, %v18444_v23  ;;  %v4923_v41 = vmul.f32 %v18444_v23, %v18444_v23  ;;  %v6687_v14 = vmax.f32 %v18437_v25, %v18444_v23  ;;  %18446 = vst [vmem:[#allocation29_spill] sm:$0xff] %v15222_v27  ;;  %v18447_v12 = vld [vmem:[#allocation34_spill] sm:$0xff]  ;;  %v15229_v40 = vpop.f32.mrb[181].mxu0  ;;  %v15237_v51 = vpop.f32.mrb[181].mxu1 }
 0x3f7   : > { %v8277_v46 = vcombine.low %v7558_v4, %v7571_v26  ;;  %v7949_v29 = vmin.f32 %v18437_v25, %v18444_v23  ;;  %v4109_v21 = vadd.f32 %v4108_v8, %v18447_v12  ;;  %18448 = vst [vmem:[#allocation21_spill] sm:$0xff] %v15229_v40  ;;  %v4925_v0 = vmul.f32 %v18447_v12, %v18447_v12  ;;  %v18450_v25 = vld [vmem:[#allocation35_spill] sm:$0xff]  ;;  %v15246_v23 = vpop.f32.mrb[182].mxu0 }
 0x3f8   : > { %v5495_v7 = vadd.f32 %v5494_v63, %v4923_v41  ;;  %v6713_v11 = vmax.f32 %v18439_v1, %v18447_v12  ;;  %v7975_v28 = vmin.f32 %v18439_v1, %v18447_v12  ;;  %18449 = vst [vmem:[#allocation30_spill] sm:$0xff] %v15237_v51  ;;  %v4047_v26 = vadd.f32 %v4046_v32, %v18450_v25  ;;  %v15248_v41 = vpop.f32.mrb[182].mxu1  ;;  %v18453_v1 = vld [vmem:[#allocation22_spill] sm:$0xff]  ;;  %v15258_v58 = vpop.f32.mrb[183].mxu0  ;;  %v18457_v32 = vld [vmem:[#allocation37_spill] sm:$0xff] }
 0x3f9   : > { %v15240_v4 = vrot.slane %v8277_v46, %v11677_v34  ;;  %v4954_v8 = vmul.f32 %v18450_v25, %v18450_v25  ;;  %v6675_v63 = vmax.f32 %v6674_v17, %v18450_v25  ;;  %18451 = vst [vmem:[#allocation31_spill] sm:$0xff] %v15246_v23  ;;  %18452 = vst [vmem:[#allocation32_spill] sm:$0xff] %v15248_v41  ;;  %v15260_v23 = vpop.f32.mrb[183].mxu1 }
 0x3fa   : > { %v5537_v50 = vadd.f32 %v5536_v47, %v4925_v0  ;;  %v7937_v40 = vmin.f32 %v7936_v16, %v18450_v25  ;;  %v4089_v12 = vadd.f32 %v4088_v57, %v18453_v1  ;;  %v4956_v46 = vmul.f32 %v18453_v1, %v18453_v1  ;;  %18454 = vst [vmem:[#allocation33_spill] sm:$0xff] %v15258_v58  ;;  %v18456_v0 = vld [vmem:[#allocation36_spill] sm:$0xff]  ;;  %v15278_v58 = vpop.f32.mrb[184].mxu0 }
 0x3fb   : > { %v5475_v51 = vadd.f32 %v5474_v61, %v4954_v8  ;;  %v6701_v27 = vmax.f32 %v6700_v38, %v18453_v1  ;;  %v7963_v17 = vmin.f32 %v7962_v6, %v18453_v1  ;;  %18455 = vst [vmem:[#allocation34_spill] sm:$0xff] %v15260_v23  ;;  %v4068_v16 = vadd.f32 %v4067_v53, %v18456_v0 }
 0x3fc   : > { %v5517_v47 = vadd.f32 %v5516_v22, %v4956_v46  ;;  %v4955_v57 = vmul.f32 %v18456_v0, %v18456_v0  ;;  %v6688_v25 = vmax.f32 %v6687_v14, %v18456_v0  ;;  %v7950_v41 = vmin.f32 %v7949_v29, %v18456_v0  ;;  %v18458_v22 = vld [vmem:[#allocation38_spill] sm:$0xff]  ;;  %v18459_v0 = vld [vmem:[#allocation39_spill] sm:$0xff]  ;;  %18460 = vst [vmem:[#allocation35_spill] sm:$0xff] %v15278_v58 }
 0x3fd   : > { %v4110_v61 = vadd.f32 %v4109_v21, %v18457_v32  ;;  %v4957_v38 = vmul.f32 %v18457_v32, %v18457_v32  ;;  %v6714_v6 = vmax.f32 %v6713_v11, %v18457_v32  ;;  %v7976_v1 = vmin.f32 %v7975_v28, %v18457_v32  ;;  %v18462_v32 = vld [vmem:[#allocation40_spill] sm:$0xff] }
 0x3fe   : > { %v5496_v8 = vadd.f32 %v5495_v7, %v4955_v57  ;;  %v4048_v46 = vadd.f32 %v4047_v26, %v18458_v22  ;;  %v4986_v53 = vmul.f32 %v18458_v22, %v18458_v22  ;;  %v6676_v14 = vmax.f32 %v6675_v63, %v18458_v22  ;;  %v15284_v26 = vpop.f32.mrb[184].mxu1 }
 0x3ff   : > { %v5538_v23 = vadd.f32 %v5537_v50, %v4957_v38  ;;  %v7938_v29 = vmin.f32 %v7937_v40, %v18458_v22  ;;  %v4090_v21 = vadd.f32 %v4089_v12, %v18459_v0  ;;  %v4988_v7 = vmul.f32 %v18459_v0, %v18459_v0  ;;  %18461 = vst [vmem:[#allocation22_spill] sm:$0xff] %v15284_v26  ;;  %v15301_v58 = vpop.f32.mrb[185].mxu1 }
 0x400   : > { %v5476_v59 = vadd.f32 %v5475_v51, %v4986_v53  ;;  %v6702_v11 = vmax.f32 %v6701_v27, %v18459_v0  ;;  %v7964_v28 = vmin.f32 %v7963_v17, %v18459_v0  ;;  %v4069_v50 = vadd.f32 %v4068_v16, %v18462_v32  ;;  %v18463_v51 = vld [vmem:[#allocation41_spill] sm:$0xff]  ;;  %v15295_v17 = vpop.f32.mrb[185].mxu0  ;;  %v18465_v0 = vld [vmem:[#allocation42_spill] sm:$0xff]  ;;  %18466 = vst [vmem:[#allocation37_spill] sm:$0xff] %v15301_v58 }
 0x401   : > { %v4987_v63 = vmul.f32 %v18462_v32, %v18462_v32  ;;  %v6689_v40 = vmax.f32 %v6688_v25, %v18462_v32  ;;  %v7951_v12 = vmin.f32 %v7950_v41, %v18462_v32  ;;  %v5518_v57 = vadd.f32 %v5517_v47, %v4988_v7  ;;  %18464 = vst [vmem:[#allocation36_spill] sm:$0xff] %v15295_v17  ;;  %v18467_v7 = vld [vmem:[#allocation23_spill] sm:$0xff]  ;;  %v15308_v17 = vpop.f32.mrb[186].mxu1 }
 0x402   : > { %v4111_v38 = vadd.f32 %v4110_v61, %v18463_v51  ;;  %v4989_v22 = vmul.f32 %v18463_v51, %v18463_v51  ;;  %v6715_v27 = vmax.f32 %v6714_v6, %v18463_v51  ;;  %v7977_v16 = vmin.f32 %v7976_v1, %v18463_v51  ;;  %v15306_v6 = vpop.f32.mrb[186].mxu0  ;;  %18469 = vst [vmem:[#allocation39_spill] sm:$0xff] %v15308_v17 }
 0x403   : > { %v5497_v53 = vadd.f32 %v5496_v8, %v4987_v63  ;;  %v4049_v26 = vadd.f32 %v4048_v46, %v18465_v0  ;;  %v5018_v25 = vmul.f32 %v18465_v0, %v18465_v0  ;;  %v6677_v47 = vmax.f32 %v6676_v14, %v18465_v0  ;;  %18468 = vst [vmem:[#allocation38_spill] sm:$0xff] %v15306_v6  ;;  %v15314_v51 = vpop.f32.mrb[187].mxu0  ;;  %v18472_v14 = vld [vmem:[#allocation43_spill] sm:$0xff] }
 0x404   : > { %v5539_v41 = vadd.f32 %v5538_v23, %v4989_v22  ;;  %v7939_v61 = vmin.f32 %v7938_v29, %v18465_v0  ;;  %v4091_v32 = vadd.f32 %v4090_v21, %v18467_v7  ;;  %v5020_v1 = vmul.f32 %v18467_v7, %v18467_v7  ;;  %18470 = vst [vmem:[#allocation40_spill] sm:$0xff] %v15314_v51  ;;  %v15316_v23 = vpop.f32.mrb[187].mxu1  ;;  %v18474_v51 = vld [vmem:[#allocation47_spill] sm:$0xff] }
 0x405   : > { %v5477_v8 = vadd.f32 %v5476_v59, %v5018_v25  ;;  %v6703_v46 = vmax.f32 %v6702_v11, %v18467_v7  ;;  %v7965_v63 = vmin.f32 %v7964_v28, %v18467_v7  ;;  %18471 = vst [vmem:[#allocation41_spill] sm:$0xff] %v15316_v23  ;;  %v4070_v29 = vadd.f32 %v4069_v50, %v18472_v14  ;;  %v18473_v25 = vld [vmem:[#allocation46_spill] sm:$0xff] }
 0x406   : > { %v5019_v21 = vmul.f32 %v18472_v14, %v18472_v14  ;;  %v6690_v22 = vmax.f32 %v6689_v40, %v18472_v14  ;;  %v7952_v59 = vmin.f32 %v7951_v12, %v18472_v14  ;;  %v5519_v0 = vadd.f32 %v5518_v57, %v5020_v1  ;;  %v18475_v57 = vld [vmem:[#allocation48_spill] sm:$0xff]  ;;  %v15334_v1 = vpop.f32.mrb[188].mxu0 }
 0x407   : > { %v4112_v17 = vadd.f32 %v4111_v38, %v18473_v25  ;;  %v5021_v11 = vmul.f32 %v18473_v25, %v18473_v25  ;;  %v6716_v28 = vmax.f32 %v6715_v27, %v18473_v25  ;;  %v7978_v23 = vmin.f32 %v7977_v16, %v18473_v25  ;;  %18476 = vst [vmem:[#allocation42_spill] sm:$0xff] %v15334_v1  ;;  %v15340_v16 = vpop.f32.mrb[188].mxu1 }
 0x408   : > { %v5498_v7 = vadd.f32 %v5497_v53, %v5019_v21  ;;  %v4050_v50 = vadd.f32 %v4049_v26, %v18474_v51  ;;  %v5050_v6 = vmul.f32 %v18474_v51, %v18474_v51  ;;  %v6678_v40 = vmax.f32 %v6677_v47, %v18474_v51  ;;  %18477 = vst [vmem:[#allocation23_spill] sm:$0xff] %v15340_v16  ;;  %v18478_v21 = vld [vmem:[#allocation17_spill] sm:$0xff]  ;;  %v15357_v1 = vpop.f32.mrb[189].mxu1 }
 0x409   : > { %v5540_v58 = vadd.f32 %v5539_v41, %v5021_v11  ;;  %v7940_v12 = vmin.f32 %v7939_v61, %v18474_v51  ;;  %v4092_v38 = vadd.f32 %v4091_v32, %v18475_v57  ;;  %v5052_v27 = vmul.f32 %v18475_v57, %v18475_v57  ;;  %18482 = vst [vmem:[#allocation46_spill] sm:$0xff] %v15357_v1 }
 0x40a   : > { %v5478_v14 = vadd.f32 %v5477_v8, %v5050_v6  ;;  %v6704_v53 = vmax.f32 %v6703_v46, %v18475_v57  ;;  %v7966_v26 = vmin.f32 %v7965_v63, %v18475_v57  ;;  %v4071_v41 = vadd.f32 %v4070_v29, %v18478_v21  ;;  %v18479_v6 = vld [vmem:[#allocation62_spill] sm:$0xff]  ;;  %v15351_v63 = vpop.f32.mrb[189].mxu0  ;;  %v18481_v57 = vld [vmem:[#allocation63_spill] sm:$0xff] }
 0x40b   : > { %v5051_v47 = vmul.f32 %v18478_v21, %v18478_v21  ;;  %v6691_v61 = vmax.f32 %v6690_v22, %v18478_v21  ;;  %v7953_v32 = vmin.f32 %v7952_v59, %v18478_v21  ;;  %v5520_v51 = vadd.f32 %v5519_v0, %v5052_v27  ;;  %18480 = vst [vmem:[#allocation43_spill] sm:$0xff] %v15351_v63  ;;  %v18483_v27 = vld [vmem:[#allocation64_spill] sm:$0xff]  ;;  %v15364_v63 = vpop.f32.mrb[190].mxu1 }
 0x40c   : > { %v4113_v8 = vadd.f32 %v4112_v17, %v18479_v6  ;;  %v5053_v25 = vmul.f32 %v18479_v6, %v18479_v6  ;;  %v6717_v46 = vmax.f32 %v6716_v28, %v18479_v6  ;;  %v7979_v29 = vmin.f32 %v7978_v23, %v18479_v6  ;;  %v15362_v28 = vpop.f32.mrb[190].mxu0  ;;  %18485 = vst [vmem:[#allocation48_spill] sm:$0xff] %v15364_v63  ;;  %v18486_v6 = vld [vmem:[#allocation65_spill] sm:$0xff] }
 0x40d   : > { %v5499_v11 = vadd.f32 %v5498_v7, %v5051_v47  ;;  %v4051_v16 = vadd.f32 %v4050_v50, %v18481_v57  ;;  %v5082_v22 = vmul.f32 %v18481_v57, %v18481_v57  ;;  %v6679_v17 = vmax.f32 %v6678_v40, %v18481_v57  ;;  %18484 = vst [vmem:[#allocation47_spill] sm:$0xff] %v15362_v28 }
 0x40e   : > { %v5541_v59 = vadd.f32 %v5540_v58, %v5053_v25  ;;  %v7941_v0 = vmin.f32 %v7940_v12, %v18481_v57  ;;  %v4093_v21 = vadd.f32 %v4092_v38, %v18483_v27  ;;  %v5084_v23 = vmul.f32 %v18483_v27, %v18483_v27  ;;  %v18488_v57 = vld [vmem:[#allocation66_spill] sm:$0xff] }
 0x40f   : > { %v5479_v7 = vadd.f32 %v5478_v14, %v5082_v22  ;;  %v6705_v50 = vmax.f32 %v6704_v53, %v18483_v27  ;;  %v7967_v47 = vmin.f32 %v7966_v26, %v18483_v27  ;;  %v15371_v58 = vadd.f32 %v4071_v41, %v18486_v6  ;;  %v15381_v14 = vpop.f32.mrb[191].mxu0  ;;  %v18489_v27 = vld [vmem:[#allocation67_spill] sm:$0xff] }
 0x410   : > { %v5083_v40 = vmul.f32 %v18486_v6, %v18486_v6  ;;  %v15376_v12 = vmax.f32 %v6691_v61, %v18486_v6  ;;  %v15379_v38 = vmin.f32 %v7953_v32, %v18486_v6  ;;  %18487 = vst [vmem:[#allocation17_spill] sm:$0xff] %v15381_v14  ;;  %v5521_v25 = vadd.f32 %v5520_v51, %v5084_v23  ;;  %v18490_v14 = vld [vmem:[#allocation68_spill] sm:$0xff] }
 0x411   : > { %v15384_v22 = vadd.f32 %v4113_v8, %v18488_v57  ;;  %v5085_v53 = vmul.f32 %v18488_v57, %v18488_v57  ;;  %v15389_v26 = vmax.f32 %v6717_v46, %v18488_v57  ;;  %v15394_v61 = vmin.f32 %v7979_v29, %v18488_v57 }
 0x412   : > { %v15391_v41 = vadd.f32 %v5499_v11, %v5083_v40  ;;  %v4052_v32 = vadd.f32 %v4051_v16, %v18489_v27  ;;  %v5114_v6 = vmul.f32 %v18489_v27, %v18489_v27  ;;  %v6680_v8 = vmax.f32 %v6679_v17, %v18489_v27 }
 0x413   : > { %v15399_v51 = vadd.f32 %v5541_v59, %v5085_v53  ;;  %v7942_v23 = vmin.f32 %v7941_v0, %v18489_v27  ;;  %v4094_v63 = vadd.f32 %v4093_v21, %v18490_v14  ;;  %v5116_v11 = vmul.f32 %v18490_v14, %v18490_v14 }
 0x414   : > { %v4053_v46 = vrot.slane %v4052_v32, 4  ;;  %v5480_v28 = vadd.f32 %v5479_v7, %v5114_v6  ;;  %v6706_v29 = vmax.f32 %v6705_v50, %v18490_v14  ;;  %v6681_v40 = vrot.slane %v6680_v8, 4 }
 0x415   : > { %v7943_v16 = vrot.slane %v7942_v23, 4  ;;  %v4095_v57 = vrot.slane %v4094_v63, 4  ;;  %v7968_v1 = vmin.f32 %v7967_v47, %v18490_v14  ;;  %v5522_v43 = vadd.f32 %v5521_v25, %v5116_v11 }
 0x416   : > { %v4054_v59 = vadd.f32 %v4053_v46, %v4052_v32  ;;  %v5481_v53 = vrot.slane %v5480_v28, 4  ;;  %v6707_v17 = vrot.slane %v6706_v29, 4  ;;  %v6682_v24 = vmax.f32 %v6680_v8, %v6681_v40  ;;  %v15408_v8 = vpop.f32.mrb[191].mxu1 }
 0x417   : > { %v7944_v0 = vmin.f32 %v7942_v23, %v7943_v16  ;;  %v4096_v27 = vadd.f32 %v4095_v57, %v4094_v63  ;;  %v7969_v21 = vrot.slane %v7968_v1, 4  ;;  %v5523_v6 = vrot.slane %v5522_v43, 4 }
 0x418   : > { %v4055_v35 = vrot.slane %v4054_v59, 2  ;;  %v5482_v7 = vadd.f32 %v5481_v53, %v5480_v28  ;;  %v6708_v5 = vmax.f32 %v6706_v29, %v6707_v17  ;;  %v6683_v62 = vrot.slane %v6682_v24, 2 }
 0x419   : > { %v7945_v18 = vrot.slane %v7944_v0, 2  ;;  %v4097_v50 = vrot.slane %v4096_v27, 2  ;;  %v7970_v42 = vmin.f32 %v7968_v1, %v7969_v21  ;;  %v5524_v52 = vadd.f32 %v5523_v6, %v5522_v43 }
 0x41a   : > { %v4056_v54 = vadd.f32 %v4055_v35, %v4054_v59  ;;  %v5483_v60 = vrot.slane %v5482_v7, 2  ;;  %v6709_v47 = vrot.slane %v6708_v5, 2  ;;  %v6684_v14 = vmax.f32 %v6682_v24, %v6683_v62 }
 0x41b   : > { %v7946_v32 = vmin.f32 %v7944_v0, %v7945_v18  ;;  %v4098_v25 = vadd.f32 %v4097_v50, %v4096_v27  ;;  %v7971_v46 = vrot.slane %v7970_v42, 2  ;;  %v5525_v11 = vrot.slane %v5524_v52, 2  ;;  %v18491_v0 = vld [vmem:[#allocation69_spill] sm:$0xff]  ;;  %v18492_v50 = vld [vmem:[#allocation70_spill] sm:$0xff] }
 0x41c   : > { %v4057_v63 = vrot.slane %v4056_v54, 1  ;;  %v5484_v23 = vadd.f32 %v5483_v60, %v5482_v7  ;;  %v6710_v28 = vmax.f32 %v6708_v5, %v6709_v47  ;;  %v6685_v40 = vrot.slane %v6684_v14, 1 }
 0x41d   : > { %v7947_v29 = vrot.slane %v7946_v32, 1  ;;  %v4099_v16 = vrot.slane %v4098_v25, 1  ;;  %v7972_v57 = vmin.f32 %v7970_v42, %v7971_v46  ;;  %v5526_v1 = vadd.f32 %v5525_v11, %v5524_v52 }
 0x41e   : > { %v15410_v53 = vadd.f32 %v4057_v63, %v4056_v54  ;;  %v5485_v35 = vrot.slane %v5484_v23, 1  ;;  %v6711_v43 = vrot.slane %v6710_v28, 1  ;;  %v15412_v59 = vmax.f32 %v6684_v14, %v6685_v40 }
 0x41f   : > { %v15414_v18 = vmin.f32 %v7946_v32, %v7947_v29  ;;  %v15416_v62 = vadd.f32 %v4099_v16, %v4098_v25  ;;  %v7973_v24 = vrot.slane %v7972_v57, 1  ;;  %v5527_v60 = vrot.slane %v5526_v1, 1 }
 0x420   : > { %v15418_v17 = vadd.f32 %v5485_v35, %v5484_v23  ;;  %v15420_v5 = vmax.f32 %v6710_v28, %v6711_v43  ;;  %v4073_v42 = vadd.f32 %v15371_v58, %v18491_v0  ;;  %v5115_v52 = vmul.f32 %v18491_v0, %v18491_v0 }
 0x421   : > { %v15424_v54 = vmin.f32 %v7972_v57, %v7973_v24  ;;  %v6693_v27 = vmax.f32 %v15376_v12, %v18491_v0  ;;  %v7955_v21 = vmin.f32 %v15379_v38, %v18491_v0  ;;  %v15432_v7 = vadd.f32 %v5527_v60, %v5526_v1 }
 0x422   : > { %v4074_v6 = vrot.slane %v4073_v42, 4  ;;  %v4115_v47 = vadd.f32 %v15384_v22, %v18492_v50  ;;  %v5117_v58 = vmul.f32 %v18492_v50, %v18492_v50  ;;  %v5501_v14 = vadd.f32 %v15391_v41, %v5115_v52 }
 0x423   : > { %v6694_v32 = vrot.slane %v6693_v27, 4  ;;  %v7956_v25 = vrot.slane %v7955_v21, 4  ;;  %v6719_v46 = vmax.f32 %v15389_v26, %v18492_v50  ;;  %v7981_v23 = vmin.f32 %v15394_v61, %v18492_v50 }
 0x424   : > { %v4075_v12 = vadd.f32 %v4074_v6, %v4073_v42  ;;  %v4116_v63 = vrot.slane %v4115_v47, 4  ;;  %v5543_v38 = vadd.f32 %v15399_v51, %v5117_v58  ;;  %v5502_v11 = vrot.slane %v5501_v14, 4 }
 0x425   : > { %v6695_v28 = vmax.f32 %v6693_v27, %v6694_v32  ;;  %v7957_v22 = vmin.f32 %v7955_v21, %v7956_v25  ;;  %v6720_v40 = vrot.slane %v6719_v46, 4  ;;  %v7982_v41 = vrot.slane %v7981_v23, 4 }
 0x426   : > { %v4076_v29 = vrot.slane %v4075_v12, 2  ;;  %v4117_v16 = vadd.f32 %v4116_v63, %v4115_v47  ;;  %v5544_v57 = vrot.slane %v5543_v38, 4  ;;  %v5503_v35 = vadd.f32 %v5502_v11, %v5501_v14  ;;  %v15444_v14 = vpop.f32.mrb[192].mxu0 }
 0x427   : > { %v6696_v1 = vrot.slane %v6695_v28, 2  ;;  %v7958_v43 = vrot.slane %v7957_v22, 2  ;;  %v6721_v24 = vmax.f32 %v6719_v46, %v6720_v40  ;;  %v7983_v42 = vmin.f32 %v7981_v23, %v7982_v41 }
 0x428   : > { %v4077_v26 = vadd.f32 %v4076_v29, %v4075_v12  ;;  %v4118_v60 = vrot.slane %v4117_v16, 2  ;;  %v5545_v0 = vadd.f32 %v5544_v57, %v5543_v38  ;;  %v5504_v51 = vrot.slane %v5503_v35, 2  ;;  %v15446_v38 = vpop.f32.mrb[192].mxu1 }
 0x429   : > { %v6697_v52 = vmax.f32 %v6695_v28, %v6696_v1  ;;  %v7959_v6 = vmin.f32 %v7957_v22, %v7958_v43  ;;  %v6722_v61 = vrot.slane %v6721_v24, 2  ;;  %v7984_v58 = vrot.slane %v7983_v42, 2  ;;  %v15449_v1 = vpop.f32.mrb[193].mxu0  ;;  %v15451_v43 = vpop.f32.mrb[193].mxu1 }
 0x42a   : > { %v4078_v50 = vrot.slane %v4077_v26, 1  ;;  %v4119_v27 = vadd.f32 %v4118_v60, %v4117_v16  ;;  %v5546_v21 = vrot.slane %v5545_v0, 2  ;;  %v5505_v32 = vadd.f32 %v5504_v51, %v5503_v35  ;;  %v18493_v51 = vld [vmem:[#allocation18_spill] sm:$0xff] }
 0x42b   : > { %v6698_v47 = vrot.slane %v6697_v52, 1  ;;  %v7960_v25 = vrot.slane %v7959_v6, 1  ;;  %v6723_v63 = vmax.f32 %v6721_v24, %v6722_v61  ;;  %v7985_v40 = vmin.f32 %v7983_v42, %v7984_v58  ;;  %v15455_v42 = vpop.f32.mrb[194].mxu0 }
 0x42c   : > { %v4079_v11 = vadd.f32 %v4078_v50, %v4077_v26  ;;  %v4120_v46 = vrot.slane %v4119_v27, 1  ;;  %v5547_v12 = vadd.f32 %v5546_v21, %v5545_v0  ;;  %v5506_v23 = vrot.slane %v5505_v32, 1  ;;  %v15459_v50 = vpop.f32.mrb[194].mxu1 }
 0x42d   : > { %v6699_v28 = vmax.f32 %v6697_v52, %v6698_v47  ;;  %v7961_v22 = vmin.f32 %v7959_v6, %v7960_v25  ;;  %v6724_v29 = vrot.slane %v6723_v63, 1  ;;  %v7986_v35 = vrot.slane %v7985_v40, 1  ;;  %v18494_v25 = vld [vmem:[#allocation71_spill] sm:$0xff] }
 0x42e   : > { %v4504_v16 = vcombine.low %v15410_v53, %v4079_v11  ;;  %v4121_v57 = vadd.f32 %v4120_v46, %v4119_v27  ;;  %v5548_v41 = vrot.slane %v5547_v12, 1  ;;  %v5507_v24 = vadd.f32 %v5506_v23, %v5505_v32 }
 0x42f   : > { %v7150_v26 = vcombine.low %v15412_v59, %v6699_v28  ;;  %v8412_v60 = vcombine.low %v15414_v18, %v7961_v22  ;;  %v6725_v0 = vmax.f32 %v6723_v63, %v6724_v29  ;;  %v7987_v61 = vmin.f32 %v7985_v40, %v7986_v35  ;;  %v18497_v28 = vld [vmem:[#allocation87_spill] sm:$0xff]  ;;  %v15480_v22 = vpop.f32.mrb[195].mxu0 }
 0x430   : > { %v4514_v52 = vrot.slane %v4504_v16, %v18493_v51  ;;  %v4505_v6 = vcombine.low %v15416_v62, %v4121_v57  ;;  %v5549_v53 = vadd.f32 %v5548_v41, %v5547_v12  ;;  %v5932_v27 = vcombine.low %v15418_v17, %v5507_v24  ;;  %v18495_v17 = vld [vmem:[#allocation72_spill] sm:$0xff]  ;;  %v18496_v12 = vld [vmem:[#allocation73_spill] sm:$0xff] }
 0x431   : > { %v7158_v21 = vrot.slane %v7150_v26, %v11677_v34  ;;  %v8420_v58 = vrot.slane %v8412_v60, %v11677_v34  ;;  %v7151_v59 = vcombine.low %v15420_v5, %v6725_v0  ;;  %v8413_v47 = vcombine.low %v15424_v54, %v7987_v61  ;;  %v18498_v16 = vld [vmem:[#allocation88_spill] sm:$0xff] }
 0x432   : > { %v4521_v18 = vrot.slane %v4505_v6, %v18493_v51  ;;  %v5933_v32 = vcombine.low %v15432_v7, %v5549_v53  ;;  %v4638_v62 = vmul.f32 %v18494_v25, %v18494_v25  ;;  %v5942_v63 = vrot.slane %v5932_v27, %v18493_v51  ;;  %v18499_v53 = vld [vmem:[#allocation89_spill] sm:$0xff] }
 0x433   : > { %v7165_v11 = vrot.slane %v7151_v59, %v11677_v34  ;;  %v4640_v46 = vmul.f32 %v18495_v17, %v18495_v17  ;;  %v4639_v40 = vmul.f32 %v18496_v12, %v18496_v12  ;;  %v8427_v7 = vrot.slane %v8413_v47, %v11677_v34 }
 0x434   : > { %v4536_v5 = vcombine.low %v4514_v52, %v4521_v18  ;;  %v5949_v23 = vrot.slane %v5933_v32, %v18493_v51  ;;  %v4641_v54 = vmul.f32 %v18497_v28, %v18497_v28  ;;  %v4122_v57 = vadd.f32 %v18498_v16, %v18494_v25  ;;  %v15504_v32 = vpop.f32.mrb[195].mxu1 }
 0x435   : > { %v7166_v29 = vcombine.low %v7158_v21, %v7165_v11  ;;  %v4670_v41 = vmul.f32 %v18498_v16, %v18498_v16  ;;  %v6310_v35 = vmax.f32 %v18494_v25, %v18498_v16  ;;  %v8428_v60 = vcombine.low %v8420_v58, %v8427_v7 }
 0x436   : > { %v15489_v24 = vrot.slane %v4536_v5, %v18493_v51  ;;  %v5964_v26 = vcombine.low %v5942_v63, %v5949_v23  ;;  %v7572_v0 = vmin.f32 %v18494_v25, %v18498_v16  ;;  %v4164_v61 = vadd.f32 %v18499_v53, %v18495_v17  ;;  %v18501_v63 = vld [vmem:[#allocation78_spill] sm:$0xff] }
 0x437   : > { %v7254_v52 = vrot.slane %v7166_v29, 7  ;;  %v5550_v6 = vadd.f32 %v4670_v41, %v4638_v62  ;;  %v4672_v27 = vmul.f32 %v18499_v53, %v18499_v53  ;;  %v8510_v59 = vrot.slane %v8428_v60, 7  ;;  %v18503_v41 = vld [vmem:[#allocation79_spill] sm:$0xff] }
 0x438   : > { %v15498_v21 = vrot.slane %v5964_v26, %v18493_v51  ;;  %v6336_v18 = vmax.f32 %v18495_v17, %v18499_v53  ;;  %v7598_v58 = vmin.f32 %v18495_v17, %v18499_v53  ;;  %v18500_v47 = vcombine.low %v15193_v33, %v15209_v39 }
 0x439   : > { %v5592_v62 = vadd.f32 %v4672_v27, %v4640_v46  ;;  %v4143_v11 = vadd.f32 %v18501_v63, %v18496_v12  ;;  %v4671_v5 = vmul.f32 %v18501_v63, %v18501_v63  ;;  %v18502_v7 = vcombine.low %v15199_v13, %v15240_v4 }
 0x43a   : > { %v7255_v25 = vsel %vm7223_vm0, %v7254_v52, %v18500_v47  ;;  %v6323_v29 = vmax.f32 %v18496_v12, %v18501_v63  ;;  %v7585_v33 = vmin.f32 %v18496_v12, %v18501_v63  ;;  %v4185_v26 = vadd.f32 %v18503_v41, %v18497_v28 }
 0x43b   : > { %v7256_v23 = vsel %vm7225_vm1, %v7254_v52, %v7255_v25  ;;  %v8511_v17 = vsel %vm7223_vm0, %v8510_v59, %v18502_v7  ;;  %v5571_v16 = vadd.f32 %v4671_v5, %v4639_v40  ;;  %v4673_v4 = vmul.f32 %v18503_v41, %v18503_v41 }
 0x43c   : > { %v7257_v39 = vsel %vm7227_vm2, %v7254_v52, %v7256_v23  ;;  %v8512_v46 = vsel %vm7225_vm1, %v8510_v59, %v8511_v17  ;;  %v6349_v53 = vmax.f32 %v18497_v28, %v18503_v41  ;;  %v7611_v40 = vmin.f32 %v18497_v28, %v18503_v41  ;;  %v15560_v41 = vpop.f32.mrb[196].mxu1 }
 0x43d   : > { %v7258_v60 = vsel %vm7229_vm3, %v7254_v52, %v7257_v39  ;;  %v8513_v13 = vsel %vm7227_vm2, %v8510_v59, %v8512_v46  ;;  %v5613_v63 = vadd.f32 %v4673_v4, %v4641_v54  ;;  %v4123_v5 = vadd.f32 %v4122_v57, %v14901_v44  ;;  %v15558_v46 = vpop.f32.mrb[196].mxu0 }
 0x43e   : > { %v8514_v12 = vsel %vm7229_vm3, %v8510_v59, %v8513_v13  ;;  %v8874_v27 = vcombine.high %v7258_v60, %v7258_v60  ;;  %v15535_v47 = vrot.slane %v7258_v60, %v11677_v34  ;;  %v4702_v7 = vmul.f32 %v14901_v44, %v14901_v44 }
 0x43f   : > { %v9090_v25 = vcombine.high %v8514_v12, %v8514_v12  ;;  %v15540_v52 = vrot.slane %v8514_v12, %v11677_v34  ;;  %v6311_v17 = vmax.f32 %v6310_v35, %v14901_v44  ;;  %v7573_v54 = vmin.f32 %v7572_v0, %v14901_v44  ;;  %v15567_v12 = vpop.f32.mrb[197].mxu0 }
 0x440   : > { %18504 = vst [vmem:[#allocation62_spill] sm:$0xff] %v15535_v47  ;;  %v15544_v23 = vrot.slane %v8874_v27, %v11677_v34  ;;  %v4165_v57 = vadd.f32 %v4164_v61, %v14903_v48  ;;  %v5551_v13 = vadd.f32 %v5550_v6, %v4702_v7  ;;  %v4704_v35 = vmul.f32 %v14903_v48, %v14903_v48  ;;  %v15569_v27 = vpop.f32.mrb[197].mxu1  ;;  %v18508_v61 = vld [vmem:[#allocation80_spill] sm:$0xff]  ;;  %v15577_v6 = vpop.f32.mrb[198].mxu0 }
 0x441   : > { %18505 = vst [vmem:[#allocation63_spill] sm:$0xff] %v15540_v52  ;;  %v15552_v28 = vrot.slane %v9090_v25, %v11677_v34  ;;  %v6337_v4 = vmax.f32 %v6336_v18, %v14903_v48  ;;  %v7599_v0 = vmin.f32 %v7598_v58, %v14903_v48  ;;  %v4144_v25 = vadd.f32 %v4143_v11, %v18508_v61  ;;  %v15579_v7 = vpop.f32.mrb[198].mxu1  ;;  %v18510_v52 = vld [vmem:[#allocation81_spill] sm:$0xff]  ;;  %v15588_v44 = vpop.f32.mrb[199].mxu0 }
 0x442   : > { %18506 = vst [vmem:[#allocation64_spill] sm:$0xff] %v15544_v23  ;;  %v4703_v39 = vmul.f32 %v18508_v61, %v18508_v61  ;;  %18509 = vst [vmem:[#allocation66_spill] sm:$0xff] %v15579_v7  ;;  %v5593_v60 = vadd.f32 %v5592_v62, %v4704_v35  ;;  %v6324_v18 = vmax.f32 %v6323_v29, %v18508_v61  ;;  %v18513_v7 = vld [vmem:[#allocation74_spill] sm:$0xff] }
 0x443   : > { %18507 = vst [vmem:[#allocation65_spill] sm:$0xff] %v15552_v28  ;;  %v7586_v59 = vmin.f32 %v7585_v33, %v18508_v61  ;;  %v4186_v23 = vadd.f32 %v4185_v26, %v18510_v52  ;;  %v4705_v48 = vmul.f32 %v18510_v52, %v18510_v52  ;;  %v6350_v58 = vmax.f32 %v6349_v53, %v18510_v52  ;;  %v15590_v28 = vpop.f32.mrb[199].mxu1 }
 0x444   : > { %v5572_v47 = vadd.f32 %v5571_v16, %v4703_v39  ;;  %v7612_v11 = vmin.f32 %v7611_v40, %v18510_v52  ;;  %18511 = vst [vmem:[#allocation67_spill] sm:$0xff] %v15588_v44  ;;  %18512 = vst [vmem:[#allocation68_spill] sm:$0xff] %v15590_v28  ;;  %v4124_v62 = vadd.f32 %v4123_v5, %v18513_v7  ;;  %v18514_v39 = vld [vmem:[#allocation76_spill] sm:$0xff] }
 0x445   : > { %v4734_v29 = vmul.f32 %v18513_v7, %v18513_v7  ;;  %v6312_v33 = vmax.f32 %v6311_v17, %v18513_v7  ;;  %v7574_v16 = vmin.f32 %v7573_v54, %v18513_v7  ;;  %v5614_v26 = vadd.f32 %v5613_v63, %v4705_v48 }
 0x446   : > { %v4166_v35 = vadd.f32 %v4165_v57, %v18514_v39  ;;  %v4736_v53 = vmul.f32 %v18514_v39, %v18514_v39  ;;  %v6338_v40 = vmax.f32 %v6337_v4, %v18514_v39  ;;  %v7600_v61 = vmin.f32 %v7599_v0, %v18514_v39 }
 0x447   : > { %v5552_v52 = vadd.f32 %v5551_v13, %v4734_v29  ;;  %v4145_v5 = vadd.f32 %v4144_v25, %v14969_v30  ;;  %v4735_v28 = vmul.f32 %v14969_v30, %v14969_v30  ;;  %v6325_v17 = vmax.f32 %v6324_v18, %v14969_v30 }
 0x448   : > { %v5594_v44 = vadd.f32 %v5593_v60, %v4736_v53  ;;  %v7587_v63 = vmin.f32 %v7586_v59, %v14969_v30  ;;  %v4187_v54 = vadd.f32 %v4186_v23, %v14971_v49  ;;  %v4737_v7 = vmul.f32 %v14971_v49, %v14971_v49  ;;  %v15617_v30 = vpop.f32.mrb[200].mxu0  ;;  %v15619_v23 = vpop.f32.mrb[200].mxu1 }
 0x449   : > { %v5573_v57 = vadd.f32 %v5572_v47, %v4735_v28  ;;  %v6351_v13 = vmax.f32 %v6350_v58, %v14971_v49  ;;  %v7613_v4 = vmin.f32 %v7612_v11, %v14971_v49  ;;  %v4125_v0 = vadd.f32 %v4124_v62, %v14989_v37 }
 0x44a   : > { %v4766_v25 = vmul.f32 %v14989_v37, %v14989_v37  ;;  %v6313_v60 = vmax.f32 %v6312_v33, %v14989_v37  ;;  %v7575_v18 = vmin.f32 %v7574_v16, %v14989_v37  ;;  %v5615_v47 = vadd.f32 %v5614_v26, %v4737_v7 }
 0x44b   : > { %v4167_v59 = vadd.f32 %v4166_v35, %v14995_v20  ;;  %v4768_v28 = vmul.f32 %v14995_v20, %v14995_v20  ;;  %v6339_v49 = vmax.f32 %v6338_v40, %v14995_v20  ;;  %v7601_v58 = vmin.f32 %v7600_v61, %v14995_v20 }
 0x44c   : > { %v5553_v48 = vadd.f32 %v5552_v52, %v4766_v25  ;;  %v4146_v11 = vadd.f32 %v4145_v5, %v15009_v15  ;;  %v4767_v37 = vmul.f32 %v15009_v15, %v15009_v15  ;;  %v6326_v29 = vmax.f32 %v6325_v17, %v15009_v15 }
 0x44d   : > { %v5595_v62 = vadd.f32 %v5594_v44, %v4768_v28  ;;  %v7588_v33 = vmin.f32 %v7587_v63, %v15009_v15  ;;  %v4188_v16 = vadd.f32 %v4187_v54, %v15017_v56  ;;  %v4769_v39 = vmul.f32 %v15017_v56, %v15017_v56 }
 0x44e   : > { %v5574_v26 = vadd.f32 %v5573_v57, %v4767_v37  ;;  %v6352_v35 = vmax.f32 %v6351_v13, %v15017_v56  ;;  %v7614_v20 = vmin.f32 %v7613_v4, %v15017_v56  ;;  %v4126_v53 = vadd.f32 %v4125_v0, %v15033_v3 }
 0x44f   : > { %v4798_v40 = vmul.f32 %v15033_v3, %v15033_v3  ;;  %v6314_v44 = vmax.f32 %v6313_v60, %v15033_v3  ;;  %v7576_v52 = vmin.f32 %v7575_v18, %v15033_v3  ;;  %v5616_v15 = vadd.f32 %v5615_v47, %v4769_v39 }
 0x450   : > { %v4168_v61 = vadd.f32 %v4167_v59, %v15035_v31  ;;  %v4800_v5 = vmul.f32 %v15035_v31, %v15035_v31  ;;  %v6340_v17 = vmax.f32 %v6339_v49, %v15035_v31  ;;  %v7602_v56 = vmin.f32 %v7601_v58, %v15035_v31 }
 0x451   : > { %v5554_v63 = vadd.f32 %v5553_v48, %v4798_v40  ;;  %v4147_v54 = vadd.f32 %v4146_v11, %v15048_v45  ;;  %v4799_v57 = vmul.f32 %v15048_v45, %v15048_v45  ;;  %v6327_v13 = vmax.f32 %v6326_v29, %v15048_v45 }
 0x452   : > { %v5596_v7 = vadd.f32 %v5595_v62, %v4800_v5  ;;  %v7589_v3 = vmin.f32 %v7588_v33, %v15048_v45  ;;  %v4189_v4 = vadd.f32 %v4188_v16, %v15050_v36  ;;  %v4801_v25 = vmul.f32 %v15050_v36, %v15050_v36 }
 0x453   : > { %v5575_v0 = vadd.f32 %v5574_v26, %v4799_v57  ;;  %v6353_v60 = vmax.f32 %v6352_v35, %v15050_v36  ;;  %v7615_v31 = vmin.f32 %v7614_v20, %v15050_v36  ;;  %v4127_v18 = vadd.f32 %v4126_v53, %v15076_v10  ;;  %v15694_v57 = vpop.f32.mrb[201].mxu1 }
 0x454   : > { %v4830_v47 = vmul.f32 %v15076_v10, %v15076_v10  ;;  %v6315_v59 = vmax.f32 %v6314_v44, %v15076_v10  ;;  %v7577_v28 = vmin.f32 %v7576_v52, %v15076_v10  ;;  %v5617_v45 = vadd.f32 %v5616_v15, %v4801_v25  ;;  %v15683_v44 = vpop.f32.mrb[201].mxu0  ;;  %v18516_v15 = vld [vmem:[#allocation53_spill] sm:$0xff]  ;;  %18517 = vst [vmem:[#allocation70_spill] sm:$0xff] %v15694_v57 }
 0x455   : > { %v4169_v49 = vadd.f32 %v4168_v61, %v15085_v9  ;;  %v4832_v48 = vmul.f32 %v15085_v9, %v15085_v9  ;;  %v6341_v58 = vmax.f32 %v6340_v17, %v15085_v9  ;;  %v7603_v36 = vmin.f32 %v7602_v56, %v15085_v9  ;;  %18515 = vst [vmem:[#allocation69_spill] sm:$0xff] %v15683_v44 }
 0x456   : > { %v5555_v11 = vadd.f32 %v5554_v63, %v4830_v47  ;;  %v4148_v37 = vadd.f32 %v4147_v54, %v15096_v19  ;;  %v4831_v62 = vmul.f32 %v15096_v19, %v15096_v19  ;;  %v6328_v33 = vmax.f32 %v6327_v13, %v15096_v19  ;;  %v18518_v13 = vld [vmem:[#allocation58_spill] sm:$0xff] }
 0x457   : > { %v5597_v29 = vadd.f32 %v5596_v7, %v4832_v48  ;;  %v7590_v10 = vmin.f32 %v7589_v3, %v15096_v19  ;;  %v4190_v16 = vadd.f32 %v4189_v4, %v15102_v2  ;;  %v4833_v39 = vmul.f32 %v15102_v2, %v15102_v2 }
 0x458   : > { %v5576_v26 = vadd.f32 %v5575_v0, %v4831_v62  ;;  %v6354_v35 = vmax.f32 %v6353_v60, %v15102_v2  ;;  %v7616_v9 = vmin.f32 %v7615_v31, %v15102_v2  ;;  %v15677_v20 = vadd.f32 %v4127_v18, %v15112_v55 }
 0x459   : > { %v4862_v53 = vmul.f32 %v15112_v55, %v15112_v55  ;;  %v6316_v40 = vmax.f32 %v6315_v59, %v15112_v55  ;;  %v7578_v19 = vmin.f32 %v7577_v28, %v15112_v55  ;;  %v5618_v52 = vadd.f32 %v5617_v45, %v4833_v39  ;;  %v18519_v28 = vld [vmem:[#allocation59_spill] sm:$0xff] }
 0x45a   : > { %v15686_v61 = vadd.f32 %v4169_v49, %v18516_v15  ;;  %v4864_v5 = vmul.f32 %v18516_v15, %v18516_v15  ;;  %v6342_v2 = vmax.f32 %v6341_v58, %v18516_v15  ;;  %v7604_v54 = vmin.f32 %v7603_v36, %v18516_v15  ;;  %v15706_v36 = vpop.f32.mrb[202].mxu0 }
 0x45b   : > { %v15691_v17 = vadd.f32 %v5555_v11, %v4862_v53  ;;  %v6317_v63 = vrot.slane %v6316_v40, 4  ;;  %v7579_v56 = vrot.slane %v7578_v19, 4  ;;  %v4149_v3 = vadd.f32 %v4148_v37, %v18518_v13  ;;  %18520 = vst [vmem:[#allocation18_spill] sm:$0xff] %v15706_v36  ;;  %v15708_v37 = vpop.f32.mrb[202].mxu1 }
 0x45c   : > { %v15696_v55 = vadd.f32 %v5597_v29, %v4864_v5  ;;  %v6343_v7 = vrot.slane %v6342_v2, 4  ;;  %v4863_v4 = vmul.f32 %v18518_v13, %v18518_v13  ;;  %v7605_v60 = vrot.slane %v7604_v54, 4  ;;  %18521 = vst [vmem:[#allocation71_spill] sm:$0xff] %v15708_v37 }
 0x45d   : > { %v6318_v0 = vmax.f32 %v6316_v40, %v6317_v63  ;;  %v7580_v25 = vmin.f32 %v7578_v19, %v7579_v56  ;;  %v6329_v31 = vmax.f32 %v6328_v33, %v18518_v13  ;;  %v7591_v59 = vmin.f32 %v7590_v10, %v18518_v13  ;;  %v15715_v63 = vpop.f32.mrb[203].mxu1 }
 0x45e   : > { %v6344_v18 = vmax.f32 %v6342_v2, %v6343_v7  ;;  %v15702_v47 = vadd.f32 %v5576_v26, %v4863_v4  ;;  %v4191_v45 = vadd.f32 %v4190_v16, %v18519_v28  ;;  %v7606_v58 = vmin.f32 %v7604_v54, %v7605_v60  ;;  %v15713_v2 = vpop.f32.mrb[203].mxu0  ;;  %18523 = vst [vmem:[#allocation73_spill] sm:$0xff] %v15715_v63 }
 0x45f   : > { %v6319_v49 = vrot.slane %v6318_v0, 2  ;;  %v7581_v48 = vrot.slane %v7580_v25, 2  ;;  %v6330_v11 = vrot.slane %v6329_v31, 4  ;;  %v7592_v29 = vrot.slane %v7591_v59, 4  ;;  %18522 = vst [vmem:[#allocation72_spill] sm:$0xff] %v15713_v2 }
 0x460   : > { %v6345_v62 = vrot.slane %v6344_v18, 2  ;;  %v4865_v33 = vmul.f32 %v18519_v28, %v18519_v28  ;;  %v6355_v26 = vmax.f32 %v6354_v35, %v18519_v28  ;;  %v7607_v10 = vrot.slane %v7606_v58, 2 }
 0x461   : > { %v6320_v39 = vmax.f32 %v6318_v0, %v6319_v49  ;;  %v7582_v53 = vmin.f32 %v7580_v25, %v7581_v48  ;;  %v6331_v40 = vmax.f32 %v6329_v31, %v6330_v11  ;;  %v7593_v19 = vmin.f32 %v7591_v59, %v7592_v29  ;;  %v15718_v11 = vpop.f32.mrb[204].mxu0 }
 0x462   : > { %v6346_v16 = vmax.f32 %v6344_v18, %v6345_v62  ;;  %v5619_v15 = vadd.f32 %v5618_v52, %v4865_v33  ;;  %v6356_v5 = vrot.slane %v6355_v26, 4  ;;  %v7608_v7 = vmin.f32 %v7606_v58, %v7607_v10  ;;  %18524 = vst [vmem:[#allocation87_spill] sm:$0xff] %v15718_v11  ;;  %v18525_v33 = vld [vmem:[#allocation60_spill] sm:$0xff] }
 0x463   : > { %v6321_v56 = vrot.slane %v6320_v39, 1  ;;  %v7583_v54 = vrot.slane %v7582_v53, 1  ;;  %v6332_v13 = vrot.slane %v6331_v40, 2  ;;  %v7594_v60 = vrot.slane %v7593_v19, 2 }
 0x464   : > { %v6347_v4 = vrot.slane %v6346_v16, 1  ;;  %v6357_v37 = vmax.f32 %v6355_v26, %v6356_v5  ;;  %v7617_v35 = vmin.f32 %v7616_v9, %v18519_v28  ;;  %v7609_v31 = vrot.slane %v7608_v7, 1 }
 0x465   : > { %v6322_v0 = vmax.f32 %v6320_v39, %v6321_v56  ;;  %v7584_v25 = vmin.f32 %v7582_v53, %v7583_v54  ;;  %v6333_v18 = vmax.f32 %v6331_v40, %v6332_v13  ;;  %v7595_v52 = vmin.f32 %v7593_v19, %v7594_v60  ;;  %v18526_v39 = vld [vmem:[#allocation61_spill] sm:$0xff]  ;;  %v15726_v40 = vpop.f32.mrb[204].mxu1  ;;  %v18528_v56 = vld [vmem:[#allocation52_spill] sm:$0xff] }
 0x466   : > { %v6348_v59 = vmax.f32 %v6346_v16, %v6347_v4  ;;  %v6358_v49 = vrot.slane %v6357_v37, 2  ;;  %v7618_v48 = vrot.slane %v7617_v35, 4  ;;  %v7610_v62 = vmin.f32 %v7608_v7, %v7609_v31  ;;  %18527 = vst [vmem:[#allocation88_spill] sm:$0xff] %v15726_v40  ;;  %v15736_v60 = vpop.f32.mrb[205].mxu1  ;;  %v18531_v31 = vld [vmem:[#allocation56_spill] sm:$0xff] }
 0x467   : > { %v6334_v29 = vrot.slane %v6333_v18, 1  ;;  %v4129_v58 = vadd.f32 %v15677_v20, %v18525_v33  ;;  %v4894_v26 = vmul.f32 %v18525_v33, %v18525_v33  ;;  %v7596_v10 = vrot.slane %v7595_v52, 1  ;;  %v15732_v20 = vpop.f32.mrb[205].mxu0  ;;  %18530 = vst [vmem:[#allocation78_spill] sm:$0xff] %v15736_v60 }
 0x468   : > { %v6359_v9 = vmax.f32 %v6357_v37, %v6358_v49  ;;  %v7619_v28 = vmin.f32 %v7617_v35, %v7618_v48  ;;  %v4171_v53 = vadd.f32 %v15686_v61, %v18526_v39  ;;  %v4896_v5 = vmul.f32 %v18526_v39, %v18526_v39  ;;  %18529 = vst [vmem:[#allocation89_spill] sm:$0xff] %v15732_v20  ;;  %v15742_v49 = vpop.f32.mrb[206].mxu0 }
 0x469   : > { %v6335_v16 = vmax.f32 %v6333_v18, %v6334_v29  ;;  %v5557_v19 = vadd.f32 %v15691_v17, %v4894_v26  ;;  %v4150_v54 = vadd.f32 %v4149_v3, %v18528_v56  ;;  %v7597_v7 = vmin.f32 %v7595_v52, %v7596_v10  ;;  %18532 = vst [vmem:[#allocation79_spill] sm:$0xff] %v15742_v49  ;;  %v15744_v3 = vpop.f32.mrb[206].mxu1 }
 0x46a   : > { %v6360_v13 = vrot.slane %v6359_v9, 1  ;;  %v7620_v4 = vrot.slane %v7619_v28, 2  ;;  %v4895_v37 = vmul.f32 %v18528_v56, %v18528_v56  ;;  %v5599_v35 = vadd.f32 %v15696_v55, %v4896_v5  ;;  %18533 = vst [vmem:[#allocation80_spill] sm:$0xff] %v15744_v3  ;;  %v15753_v5 = vpop.f32.mrb[207].mxu0 }
 0x46b   : > { %v7031_v61 = vcombine.low %v6322_v0, %v6335_v16  ;;  %v4192_v17 = vadd.f32 %v4191_v45, %v18531_v31  ;;  %v4897_v18 = vmul.f32 %v18531_v31, %v18531_v31  ;;  %v8293_v52 = vcombine.low %v7584_v25, %v7597_v7  ;;  %v18534_v16 = vld [vmem:[#allocation26_spill] sm:$0xff]  ;;  %18535 = vst [vmem:[#allocation81_spill] sm:$0xff] %v15753_v5  ;;  %v18542_v5 = vld [vmem:[#allocation21_spill] sm:$0xff] }
 0x46c   : > { %v6361_v48 = vmax.f32 %v6359_v9, %v6360_v13  ;;  %v7621_v29 = vmin.f32 %v7619_v28, %v7620_v4  ;;  %v5578_v26 = vadd.f32 %v15702_v47, %v4895_v37  ;;  %v4130_v55 = vadd.f32 %v4129_v58, %v18534_v16  ;;  %v15765_v13 = vpop.f32.mrb[207].mxu1 }
 0x46d   : > { %v15748_v10 = vrot.slane %v7031_v61, %v11677_v34  ;;  %v5620_v0 = vadd.f32 %v5619_v15, %v4897_v18  ;;  %v4926_v45 = vmul.f32 %v18534_v16, %v18534_v16  ;;  %v15756_v49 = vrot.slane %v8293_v52, %v11677_v34  ;;  %v18536_v15 = vld [vmem:[#allocation27_spill] sm:$0xff]  ;;  %18537 = vst [vmem:[#allocation74_spill] sm:$0xff] %v15765_v13  ;;  %v18538_v18 = vld [vmem:[#allocation57_spill] sm:$0xff] }
 0x46e   : > { %v7032_v3 = vcombine.low %v6348_v59, %v6361_v48  ;;  %v7622_v25 = vrot.slane %v7621_v29, 1  ;;  %v6726_v9 = vmax.f32 %v18525_v33, %v18534_v16  ;;  %v7988_v28 = vmin.f32 %v18525_v33, %v18534_v16  ;;  %v18539_v16 = vld [vmem:[#allocation20_spill] sm:$0xff] }
 0x46f   : > { %v5558_v47 = vadd.f32 %v5557_v19, %v4926_v45  ;;  %v4172_v7 = vadd.f32 %v4171_v53, %v18536_v15  ;;  %v4928_v58 = vmul.f32 %v18536_v15, %v18536_v15  ;;  %v6752_v59 = vmax.f32 %v18526_v39, %v18536_v15 }
 0x470   : > { %v15768_v4 = vrot.slane %v7032_v3, %v11677_v34  ;;  %v7623_v37 = vmin.f32 %v7621_v29, %v7622_v25  ;;  %v8014_v19 = vmin.f32 %v18526_v39, %v18536_v15  ;;  %v4151_v33 = vadd.f32 %v4150_v54, %v18538_v18 }
 0x471   : > { %v5600_v61 = vadd.f32 %v5599_v35, %v4928_v58  ;;  %v4927_v53 = vmul.f32 %v18538_v18, %v18538_v18  ;;  %v6739_v52 = vmax.f32 %v18528_v56, %v18538_v18  ;;  %v8001_v29 = vmin.f32 %v18528_v56, %v18538_v18  ;;  %v18540_v58 = vld [vmem:[#allocation28_spill] sm:$0xff]  ;;  %v18541_v18 = vld [vmem:[#allocation29_spill] sm:$0xff] }
 0x472   : > { %v8294_v48 = vcombine.low %v7610_v62, %v7623_v37  ;;  %v4193_v45 = vadd.f32 %v4192_v17, %v18539_v16  ;;  %v4929_v39 = vmul.f32 %v18539_v16, %v18539_v16  ;;  %v6765_v54 = vmax.f32 %v18531_v31, %v18539_v16 }
 0x473   : > { %v5579_v25 = vadd.f32 %v5578_v26, %v4927_v53  ;;  %v8027_v35 = vmin.f32 %v18531_v31, %v18539_v16  ;;  %v4131_v62 = vadd.f32 %v4130_v55, %v18540_v58  ;;  %v4958_v56 = vmul.f32 %v18540_v58, %v18540_v58  ;;  %v15823_v31 = vpop.f32.mrb[208].mxu1 }
 0x474   : > { %v15791_v15 = vrot.slane %v8294_v48, %v11677_v34  ;;  %v6727_v17 = vmax.f32 %v6726_v9, %v18540_v58  ;;  %v5621_v26 = vadd.f32 %v5620_v0, %v4929_v39  ;;  %v7989_v37 = vmin.f32 %v7988_v28, %v18540_v58  ;;  %18547 = vst [vmem:[#allocation53_spill] sm:$0xff] %v15823_v31 }
 0x475   : > { %v4173_v53 = vadd.f32 %v4172_v7, %v18541_v18  ;;  %v4960_v3 = vmul.f32 %v18541_v18, %v18541_v18  ;;  %v5559_v48 = vadd.f32 %v5558_v47, %v4958_v56  ;;  %v6753_v16 = vmax.f32 %v6752_v59, %v18541_v18  ;;  %v18543_v7 = vld [vmem:[#allocation30_spill] sm:$0xff] }
 0x476   : > { %v8015_v55 = vmin.f32 %v8014_v19, %v18541_v18  ;;  %v4152_v60 = vadd.f32 %v4151_v33, %v18542_v5  ;;  %v4959_v0 = vmul.f32 %v18542_v5, %v18542_v5  ;;  %v6740_v9 = vmax.f32 %v6739_v52, %v18542_v5  ;;  %v15821_v18 = vpop.f32.mrb[208].mxu0 }
 0x477   : > { %v5601_v13 = vadd.f32 %v5600_v61, %v4960_v3  ;;  %v8002_v28 = vmin.f32 %v8001_v29, %v18542_v5  ;;  %v4194_v39 = vadd.f32 %v4193_v45, %v18543_v7  ;;  %v4961_v58 = vmul.f32 %v18543_v7, %v18543_v7  ;;  %v18544_v61 = vld [vmem:[#allocation31_spill] sm:$0xff]  ;;  %v18545_v29 = vld [vmem:[#allocation32_spill] sm:$0xff]  ;;  %18546 = vst [vmem:[#allocation76_spill] sm:$0xff] %v15821_v18 }
 0x478   : > { %v6766_v47 = vmax.f32 %v6765_v54, %v18543_v7  ;;  %v5580_v59 = vadd.f32 %v5579_v25, %v4959_v0  ;;  %v8028_v19 = vmin.f32 %v8027_v35, %v18543_v7  ;;  %v4132_v3 = vadd.f32 %v4131_v62, %v18544_v61  ;;  %v15829_v0 = vpop.f32.mrb[209].mxu0 }
 0x479   : > { %v4990_v33 = vmul.f32 %v18544_v61, %v18544_v61  ;;  %v5622_v56 = vadd.f32 %v5621_v26, %v4961_v58  ;;  %v6728_v52 = vmax.f32 %v6727_v17, %v18544_v61  ;;  %v7990_v5 = vmin.f32 %v7989_v37, %v18544_v61  ;;  %18548 = vst [vmem:[#allocation58_spill] sm:$0xff] %v15829_v0  ;;  %v18549_v26 = vld [vmem:[#allocation33_spill] sm:$0xff]  ;;  %v15836_v58 = vpop.f32.mrb[209].mxu1  ;;  %v18551_v61 = vld [vmem:[#allocation34_spill] sm:$0xff]  ;;  %v18552_v0 = vld [vmem:[#allocation35_spill] sm:$0xff]  ;;  %v15846_v18 = vpop.f32.mrb[210].mxu0 }
 0x47a   : > { %v4174_v45 = vadd.f32 %v4173_v53, %v18545_v29  ;;  %v4992_v25 = vmul.f32 %v18545_v29, %v18545_v29  ;;  %v6754_v35 = vmax.f32 %v6753_v16, %v18545_v29  ;;  %v8016_v62 = vmin.f32 %v8015_v55, %v18545_v29  ;;  %18550 = vst [vmem:[#allocation59_spill] sm:$0xff] %v15836_v58 }
 0x47b   : > { %v5560_v54 = vadd.f32 %v5559_v48, %v4990_v33  ;;  %v4153_v17 = vadd.f32 %v4152_v60, %v18549_v26  ;;  %v4991_v37 = vmul.f32 %v18549_v26, %v18549_v26  ;;  %v6741_v53 = vmax.f32 %v6740_v9, %v18549_v26  ;;  %18553 = vst [vmem:[#allocation60_spill] sm:$0xff] %v15846_v18  ;;  %v15870_v18 = vpop.f32.mrb[211].mxu0 }
 0x47c   : > { %v8003_v7 = vmin.f32 %v8002_v28, %v18549_v26  ;;  %v5602_v48 = vadd.f32 %v5601_v13, %v4992_v25  ;;  %v4195_v33 = vadd.f32 %v4194_v39, %v18551_v61  ;;  %v4993_v16 = vmul.f32 %v18551_v61, %v18551_v61  ;;  %v18554_v25 = vld [vmem:[#allocation22_spill] sm:$0xff]  ;;  %18559 = vst [vmem:[#allocation52_spill] sm:$0xff] %v15870_v18  ;;  %v15894_v18 = vpop.f32.mrb[212].mxu0 }
 0x47d   : > { %v6767_v55 = vmax.f32 %v6766_v47, %v18551_v61  ;;  %v5581_v29 = vadd.f32 %v5580_v59, %v4991_v37  ;;  %v8029_v60 = vmin.f32 %v8028_v19, %v18551_v61  ;;  %v4133_v31 = vadd.f32 %v4132_v3, %v18552_v0  ;;  %v15855_v3 = vpop.f32.mrb[210].mxu1  ;;  %v18556_v37 = vld [vmem:[#allocation36_spill] sm:$0xff]  ;;  %18565 = vst [vmem:[#allocation26_spill] sm:$0xff] %v15894_v18 }
 0x47e   : > { %v5022_v9 = vmul.f32 %v18552_v0, %v18552_v0  ;;  %v5623_v28 = vadd.f32 %v5622_v56, %v4993_v16  ;;  %v6729_v13 = vmax.f32 %v6728_v52, %v18552_v0  ;;  %v7991_v39 = vmin.f32 %v7990_v5, %v18552_v0  ;;  %18555 = vst [vmem:[#allocation61_spill] sm:$0xff] %v15855_v3 }
 0x47f   : > { %v4175_v26 = vadd.f32 %v4174_v45, %v18554_v25  ;;  %v5024_v47 = vmul.f32 %v18554_v25, %v18554_v25  ;;  %v6755_v59 = vmax.f32 %v6754_v35, %v18554_v25  ;;  %v8017_v19 = vmin.f32 %v8016_v62, %v18554_v25  ;;  %v18558_v25 = vld [vmem:[#allocation38_spill] sm:$0xff] }
 0x480   : > { %v5561_v58 = vadd.f32 %v5560_v54, %v5022_v9  ;;  %v4154_v61 = vadd.f32 %v4153_v17, %v18556_v37  ;;  %v5023_v56 = vmul.f32 %v18556_v37, %v18556_v37  ;;  %v6742_v52 = vmax.f32 %v6741_v53, %v18556_v37  ;;  %v18557_v54 = vld [vmem:[#allocation37_spill] sm:$0xff]  ;;  %v15872_v53 = vpop.f32.mrb[211].mxu1 }
 0x481   : > { %v8004_v5 = vmin.f32 %v8003_v7, %v18556_v37  ;;  %v5603_v45 = vadd.f32 %v5602_v48, %v5024_v47  ;;  %v4196_v0 = vadd.f32 %v4195_v33, %v18557_v54  ;;  %v5025_v16 = vmul.f32 %v18557_v54, %v18557_v54  ;;  %18560 = vst [vmem:[#allocation56_spill] sm:$0xff] %v15872_v53  ;;  %v18561_v47 = vld [vmem:[#allocation39_spill] sm:$0xff] }
 0x482   : > { %v6768_v35 = vmax.f32 %v6767_v55, %v18557_v54  ;;  %v5582_v62 = vadd.f32 %v5581_v29, %v5023_v56  ;;  %v8030_v9 = vmin.f32 %v8029_v60, %v18557_v54  ;;  %v4134_v17 = vadd.f32 %v4133_v31, %v18558_v25  ;;  %v18562_v56 = vld [vmem:[#allocation40_spill] sm:$0xff] }
 0x483   : > { %v5054_v3 = vmul.f32 %v18558_v25, %v18558_v25  ;;  %v5624_v7 = vadd.f32 %v5623_v28, %v5025_v16  ;;  %v6730_v48 = vmax.f32 %v6729_v13, %v18558_v25  ;;  %v7992_v33 = vmin.f32 %v7991_v39, %v18558_v25  ;;  %v18563_v16 = vld [vmem:[#allocation41_spill] sm:$0xff]  ;;  %v18564_v25 = vld [vmem:[#allocation42_spill] sm:$0xff] }
 0x484   : > { %v4176_v37 = vadd.f32 %v4175_v26, %v18561_v47  ;;  %v5056_v29 = vmul.f32 %v18561_v47, %v18561_v47  ;;  %v6756_v31 = vmax.f32 %v6755_v59, %v18561_v47  ;;  %v8018_v60 = vmin.f32 %v8017_v19, %v18561_v47 }
 0x485   : > { %v5562_v55 = vadd.f32 %v5561_v58, %v5054_v3  ;;  %v4155_v54 = vadd.f32 %v4154_v61, %v18562_v56  ;;  %v5055_v53 = vmul.f32 %v18562_v56, %v18562_v56  ;;  %v6743_v28 = vmax.f32 %v6742_v52, %v18562_v56  ;;  %v15896_v52 = vpop.f32.mrb[212].mxu1 }
 0x486   : > { %v8005_v13 = vmin.f32 %v8004_v5, %v18562_v56  ;;  %v5604_v39 = vadd.f32 %v5603_v45, %v5056_v29  ;;  %v4197_v26 = vadd.f32 %v4196_v0, %v18563_v16  ;;  %v5057_v58 = vmul.f32 %v18563_v16, %v18563_v16  ;;  %18566 = vst [vmem:[#allocation27_spill] sm:$0xff] %v15896_v52  ;;  %v18567_v29 = vld [vmem:[#allocation23_spill] sm:$0xff] }
 0x487   : > { %v6769_v3 = vmax.f32 %v6768_v35, %v18563_v16  ;;  %v5583_v59 = vadd.f32 %v5582_v62, %v5055_v53  ;;  %v8031_v19 = vmin.f32 %v8030_v9, %v18563_v16  ;;  %v4135_v61 = vadd.f32 %v4134_v17, %v18564_v25  ;;  %v15905_v53 = vpop.f32.mrb[213].mxu0  ;;  %v18569_v16 = vld [vmem:[#allocation43_spill] sm:$0xff] }
 0x488   : > { %v5086_v47 = vmul.f32 %v18564_v25, %v18564_v25  ;;  %v5625_v5 = vadd.f32 %v5624_v7, %v5057_v58  ;;  %v6731_v45 = vmax.f32 %v6730_v48, %v18564_v25  ;;  %v7993_v0 = vmin.f32 %v7992_v33, %v18564_v25  ;;  %18568 = vst [vmem:[#allocation57_spill] sm:$0xff] %v15905_v53  ;;  %v15928_v25 = vpop.f32.mrb[214].mxu0 }
 0x489   : > { %v4177_v56 = vadd.f32 %v4176_v37, %v18567_v29  ;;  %v5088_v62 = vmul.f32 %v18567_v29, %v18567_v29  ;;  %v6757_v9 = vmax.f32 %v6756_v31, %v18567_v29  ;;  %v8019_v17 = vmin.f32 %v8018_v60, %v18567_v29  ;;  %v15918_v37 = vpop.f32.mrb[213].mxu1  ;;  %v18571_v31 = vld [vmem:[#allocation46_spill] sm:$0xff]  ;;  %18572 = vst [vmem:[#allocation28_spill] sm:$0xff] %v15928_v25  ;;  %v18574_v29 = vld [vmem:[#allocation47_spill] sm:$0xff] }
 0x48a   : > { %v5563_v35 = vadd.f32 %v5562_v55, %v5086_v47  ;;  %v15908_v18 = vadd.f32 %v4155_v54, %v18569_v16  ;;  %v5087_v7 = vmul.f32 %v18569_v16, %v18569_v16  ;;  %v15913_v48 = vmax.f32 %v6743_v28, %v18569_v16  ;;  %18570 = vst [vmem:[#allocation20_spill] sm:$0xff] %v15918_v37  ;;  %v15930_v47 = vpop.f32.mrb[214].mxu1  ;;  %v18576_v37 = vld [vmem:[#allocation48_spill] sm:$0xff] }
 0x48b   : > { %v15916_v33 = vmin.f32 %v8005_v13, %v18569_v16  ;;  %v5605_v55 = vadd.f32 %v5604_v39, %v5088_v62  ;;  %v15921_v58 = vadd.f32 %v4197_v26, %v18571_v31  ;;  %v5089_v60 = vmul.f32 %v18571_v31, %v18571_v31  ;;  %18573 = vst [vmem:[#allocation29_spill] sm:$0xff] %v15930_v47  ;;  %v15940_v62 = vpop.f32.mrb[215].mxu0 }
 0x48c   : > { %v15926_v54 = vmax.f32 %v6769_v3, %v18571_v31  ;;  %v15932_v28 = vadd.f32 %v5583_v59, %v5087_v7  ;;  %v15935_v13 = vmin.f32 %v8031_v19, %v18571_v31  ;;  %v4136_v39 = vadd.f32 %v4135_v61, %v18574_v29  ;;  %18575 = vst [vmem:[#allocation21_spill] sm:$0xff] %v15940_v62  ;;  %v15947_v59 = vpop.f32.mrb[215].mxu1 }
 0x48d   : > { %v5118_v26 = vmul.f32 %v18574_v29, %v18574_v29  ;;  %v15942_v16 = vadd.f32 %v5625_v5, %v5089_v60  ;;  %v6732_v3 = vmax.f32 %v6731_v45, %v18574_v29  ;;  %v7994_v25 = vmin.f32 %v7993_v0, %v18574_v29  ;;  %18577 = vst [vmem:[#allocation30_spill] sm:$0xff] %v15947_v59  ;;  %v15953_v29 = vpop.f32.mrb[216].mxu0 }
 0x48e   : > { %v4178_v47 = vadd.f32 %v4177_v56, %v18576_v37  ;;  %v4137_v7 = vrot.slane %v4136_v39, 4  ;;  %v5120_v61 = vmul.f32 %v18576_v37, %v18576_v37  ;;  %v6758_v31 = vmax.f32 %v6757_v9, %v18576_v37  ;;  %18578 = vst [vmem:[#allocation31_spill] sm:$0xff] %v15953_v29  ;;  %v15955_v9 = vpop.f32.mrb[216].mxu1 }
 0x48f   : > { %v5564_v19 = vadd.f32 %v5563_v35, %v5118_v26  ;;  %v6733_v53 = vrot.slane %v6732_v3, 4  ;;  %v7995_v52 = vrot.slane %v7994_v25, 4  ;;  %v8020_v5 = vmin.f32 %v8019_v17, %v18576_v37  ;;  %18579 = vst [vmem:[#allocation32_spill] sm:$0xff] %v15955_v9  ;;  %v15957_v37 = vpop.f32.mrb[217].mxu0 }
 0x490   : > { %v4179_v62 = vrot.slane %v4178_v47, 4  ;;  %v4138_v60 = vadd.f32 %v4137_v7, %v4136_v39  ;;  %v5606_v20 = vadd.f32 %v5605_v55, %v5120_v61  ;;  %v6759_v0 = vrot.slane %v6758_v31, 4  ;;  %18580 = vst [vmem:[#allocation33_spill] sm:$0xff] %v15957_v37 }
 0x491   : > { %v5565_v45 = vrot.slane %v5564_v19, 4  ;;  %v6734_v56 = vmax.f32 %v6732_v3, %v6733_v53  ;;  %v7996_v59 = vmin.f32 %v7994_v25, %v7995_v52  ;;  %v8021_v35 = vrot.slane %v8020_v5, 4  ;;  %v15959_v53 = vpop.f32.mrb[217].mxu1  ;;  %v15961_v3 = vpop.f32.mrb[218].mxu0 }
 0x492   : > { %v4180_v40 = vadd.f32 %v4179_v62, %v4178_v47  ;;  %v4139_v26 = vrot.slane %v4138_v60, 2  ;;  %v5607_v63 = vrot.slane %v5606_v20, 4  ;;  %v6760_v2 = vmax.f32 %v6758_v31, %v6759_v0  ;;  %18581 = vst [vmem:[#allocation34_spill] sm:$0xff] %v15959_v53  ;;  %18582 = vst [vmem:[#allocation35_spill] sm:$0xff] %v15961_v3 }
 0x493   : > { %v5566_v11 = vadd.f32 %v5565_v45, %v5564_v19  ;;  %v6735_v36 = vrot.slane %v6734_v56, 2  ;;  %v7997_v57 = vrot.slane %v7996_v59, 2  ;;  %v8022_v17 = vmin.f32 %v8020_v5, %v8021_v35  ;;  %v15963_v19 = vpop.f32.mrb[218].mxu1  ;;  %v15965_v35 = vpop.f32.mrb[219].mxu0 }
 0x494   : > { %v4181_v44 = vrot.slane %v4180_v40, 2  ;;  %v4140_v55 = vadd.f32 %v4139_v26, %v4138_v60  ;;  %v5608_v7 = vadd.f32 %v5607_v63, %v5606_v20  ;;  %v6761_v61 = vrot.slane %v6760_v2, 2  ;;  %18583 = vst [vmem:[#allocation22_spill] sm:$0xff] %v15963_v19  ;;  %18584 = vst [vmem:[#allocation36_spill] sm:$0xff] %v15965_v35  ;;  %v15967_v37 = vpop.f32.mrb[219].mxu1 }
 0x495   : > { %v5567_v39 = vrot.slane %v5566_v11, 2  ;;  %v6736_v52 = vmax.f32 %v6734_v56, %v6735_v36  ;;  %v7998_v25 = vmin.f32 %v7996_v59, %v7997_v57  ;;  %v8023_v62 = vrot.slane %v8022_v17, 2  ;;  %18585 = vst [vmem:[#allocation37_spill] sm:$0xff] %v15967_v37 }
 0x496   : > { %v4182_v47 = vadd.f32 %v4181_v44, %v4180_v40  ;;  %v4141_v31 = vrot.slane %v4140_v55, 1  ;;  %v5609_v0 = vrot.slane %v5608_v7, 2  ;;  %v6762_v5 = vmax.f32 %v6760_v2, %v6761_v61 }
 0x497   : > { %v5568_v45 = vadd.f32 %v5567_v39, %v5566_v11  ;;  %v6737_v60 = vrot.slane %v6736_v52, 1  ;;  %v7999_v26 = vrot.slane %v7998_v25, 1  ;;  %v8024_v20 = vmin.f32 %v8022_v17, %v8023_v62  ;;  %v18586_v17 = vld [vmem:[#allocation17_spill] sm:$0xff] }
 0x498   : > { %v4183_v63 = vrot.slane %v4182_v47, 1  ;;  %v15969_v36 = vadd.f32 %v4141_v31, %v4140_v55  ;;  %v5610_v57 = vadd.f32 %v5609_v0, %v5608_v7  ;;  %v6763_v40 = vrot.slane %v6762_v5, 1  ;;  %v15983_v55 = vpop.f32.mrb[220].mxu0 }
 0x499   : > { %v5569_v44 = vrot.slane %v5568_v45, 1  ;;  %v15971_v59 = vmax.f32 %v6736_v52, %v6737_v60  ;;  %v15973_v56 = vmin.f32 %v7998_v25, %v7999_v26  ;;  %v8025_v2 = vrot.slane %v8024_v20, 1  ;;  %18587 = vst [vmem:[#allocation38_spill] sm:$0xff] %v15983_v55 }
 0x49a   : > { %v15975_v11 = vadd.f32 %v4183_v63, %v4182_v47  ;;  %v5611_v61 = vrot.slane %v5610_v57, 1  ;;  %v15979_v35 = vmax.f32 %v6762_v5, %v6763_v40  ;;  %v4157_v62 = vadd.f32 %v15908_v18, %v18586_v17  ;;  %v15999_v5 = vpop.f32.mrb[220].mxu1 }
 0x49b   : > { %v15977_v39 = vadd.f32 %v5569_v44, %v5568_v45  ;;  %v15985_v31 = vmin.f32 %v8024_v20, %v8025_v2  ;;  %v5119_v7 = vmul.f32 %v18586_v17, %v18586_v17  ;;  %v6745_v52 = vmax.f32 %v15913_v48, %v18586_v17  ;;  %18588 = vst [vmem:[#allocation39_spill] sm:$0xff] %v15999_v5  ;;  %v16004_v20 = vpop.f32.mrb[221].mxu0  ;;  %v16009_v40 = vpop.f32.mrb[221].mxu1 }
 0x49c   : > { %v8007_v25 = vmin.f32 %v15916_v33, %v18586_v17  ;;  %v15993_v47 = vadd.f32 %v5611_v61, %v5610_v57  ;;  %v4158_v45 = vrot.slane %v4157_v62, 4  ;;  %v4199_v0 = vadd.f32 %v15921_v58, %v15408_v8  ;;  %18589 = vst [vmem:[#allocation40_spill] sm:$0xff] %v16004_v20  ;;  %18590 = vst [vmem:[#allocation41_spill] sm:$0xff] %v16009_v40  ;;  %v16013_v5 = vpop.f32.mrb[222].mxu1 }
 0x49d   : > { %v5121_v18 = vmul.f32 %v15408_v8, %v15408_v8  ;;  %v5585_v60 = vadd.f32 %v15932_v28, %v5119_v7  ;;  %v6746_v26 = vrot.slane %v6745_v52, 4  ;;  %v6771_v48 = vmax.f32 %v15926_v54, %v15408_v8  ;;  %v16011_v7 = vpop.f32.mrb[222].mxu0  ;;  %18592 = vst [vmem:[#allocation23_spill] sm:$0xff] %v16013_v5 }
 0x49e   : > { %v8008_v63 = vrot.slane %v8007_v25, 4  ;;  %v4159_v33 = vadd.f32 %v4158_v45, %v4157_v62  ;;  %v4200_v44 = vrot.slane %v4199_v0, 4  ;;  %v8033_v58 = vmin.f32 %v15935_v13, %v15408_v8  ;;  %18591 = vst [vmem:[#allocation42_spill] sm:$0xff] %v16011_v7  ;;  %v16015_v19 = vpop.f32.mrb[223].mxu0 }
 0x49f   : > { %v5627_v57 = vadd.f32 %v15942_v16, %v5121_v18  ;;  %v5586_v2 = vrot.slane %v5585_v60, 4  ;;  %v6747_v61 = vmax.f32 %v6745_v52, %v6746_v26  ;;  %v6772_v28 = vrot.slane %v6771_v48, 4  ;;  %18593 = vst [vmem:[#allocation43_spill] sm:$0xff] %v16015_v19 }
 0x4a0   : > { %v8009_v17 = vmin.f32 %v8007_v25, %v8008_v63  ;;  %v4160_v54 = vrot.slane %v4159_v33, 2  ;;  %v4201_v55 = vadd.f32 %v4200_v44, %v4199_v0  ;;  %v8034_v62 = vrot.slane %v8033_v58, 4 }
 0x4a1   : > { %v5628_v20 = vrot.slane %v5627_v57, 4  ;;  %v5587_v45 = vadd.f32 %v5586_v2, %v5585_v60  ;;  %v6748_v37 = vrot.slane %v6747_v61, 2  ;;  %v6773_v18 = vmax.f32 %v6771_v48, %v6772_v28 }
 0x4a2   : > { %v8010_v16 = vrot.slane %v8009_v17, 2  ;;  %v4161_v8 = vadd.f32 %v4160_v54, %v4159_v33  ;;  %v4202_v13 = vrot.slane %v4201_v55, 2  ;;  %v8035_v52 = vmin.f32 %v8033_v58, %v8034_v62 }
 0x4a3   : > { %v5629_v40 = vadd.f32 %v5628_v20, %v5627_v57  ;;  %v5588_v25 = vrot.slane %v5587_v45, 2  ;;  %v6749_v26 = vmax.f32 %v6747_v61, %v6748_v37  ;;  %v6774_v7 = vrot.slane %v6773_v18, 2 }
 0x4a4   : > { %v8011_v63 = vmin.f32 %v8009_v17, %v8010_v16  ;;  %v4162_v3 = vrot.slane %v4161_v8, 1  ;;  %v4203_v5 = vadd.f32 %v4202_v13, %v4201_v55  ;;  %v8036_v0 = vrot.slane %v8035_v52, 2 }
 0x4a5   : > { %v5630_v53 = vrot.slane %v5629_v40, 2  ;;  %v5589_v44 = vadd.f32 %v5588_v25, %v5587_v45  ;;  %v6750_v9 = vrot.slane %v6749_v26, 1  ;;  %v6775_v2 = vmax.f32 %v6773_v18, %v6774_v7 }
 0x4a6   : > { %v8012_v60 = vrot.slane %v8011_v63, 1  ;;  %v4163_v29 = vadd.f32 %v4162_v3, %v4161_v8  ;;  %v4204_v48 = vrot.slane %v4203_v5, 1  ;;  %v8037_v19 = vmin.f32 %v8035_v52, %v8036_v0 }
 0x4a7   : > { %v5631_v28 = vadd.f32 %v5630_v53, %v5629_v40  ;;  %v5590_v33 = vrot.slane %v5589_v44, 1  ;;  %v6751_v54 = vmax.f32 %v6749_v26, %v6750_v9  ;;  %v6776_v57 = vrot.slane %v6775_v2, 1 }
 0x4a8   : > { %v8013_v20 = vmin.f32 %v8011_v63, %v8012_v60  ;;  %v4506_v37 = vcombine.low %v15969_v36, %v4163_v29  ;;  %v4205_v58 = vadd.f32 %v4204_v48, %v4203_v5  ;;  %v8038_v17 = vrot.slane %v8037_v19, 1 }
 0x4a9   : > { %v5632_v61 = vrot.slane %v5631_v28, 1  ;;  %v5591_v55 = vadd.f32 %v5590_v33, %v5589_v44  ;;  %v7167_v62 = vcombine.low %v15971_v59, %v6751_v54  ;;  %v6777_v16 = vmax.f32 %v6775_v2, %v6776_v57 }
 0x4aa   : > { %v8429_v45 = vcombine.low %v15973_v56, %v8013_v20  ;;  %v4528_v3 = vrot.slane %v4506_v37, %v18493_v51  ;;  %v4507_v53 = vcombine.low %v15975_v11, %v4205_v58  ;;  %v8039_v7 = vmin.f32 %v8037_v19, %v8038_v17 }
 0x4ab   : > { %v5633_v40 = vadd.f32 %v5632_v61, %v5631_v28  ;;  %v5934_v9 = vcombine.low %v15977_v39, %v5591_v55  ;;  %v7175_v18 = vrot.slane %v7167_v62, %v11677_v34  ;;  %v7168_v36 = vcombine.low %v15979_v35, %v6777_v16  ;;  %v16037_v35 = vpop.f32.mrb[223].mxu1 }
 0x4ac   : > { %v8437_v29 = vrot.slane %v8429_v45, %v11677_v34  ;;  %v4535_v5 = vrot.slane %v4507_v53, %v18493_v51  ;;  %v8430_v56 = vcombine.low %v15985_v31, %v8039_v7  ;;  %v4642_v8 = vmul.f32 %v15444_v14, %v15444_v14 }
 0x4ad   : > { %v5935_v59 = vcombine.low %v15993_v47, %v5633_v40  ;;  %v5956_v11 = vrot.slane %v5934_v9, %v18493_v51  ;;  %v7182_v19 = vrot.slane %v7168_v36, %v11677_v34  ;;  %v4644_v39 = vmul.f32 %v15446_v38, %v15446_v38 }
 0x4ae   : > { %v4643_v13 = vmul.f32 %v15449_v1, %v15449_v1  ;;  %v4537_v52 = vcombine.low %v4528_v3, %v4535_v5  ;;  %v8444_v31 = vrot.slane %v8430_v56, %v11677_v34  ;;  %v4645_v25 = vmul.f32 %v15451_v43, %v15451_v43 }
 0x4af   : > { %v5963_v47 = vrot.slane %v5935_v59, %v18493_v51  ;;  %v7183_v26 = vcombine.low %v7175_v18, %v7182_v19  ;;  %v4206_v63 = vadd.f32 %v15455_v42, %v15444_v14  ;;  %v4674_v0 = vmul.f32 %v15455_v42, %v15455_v42 }
 0x4b0   : > { %v6362_v44 = vmax.f32 %v15444_v14, %v15455_v42  ;;  %v4551_v60 = vrot.slane %v4537_v52, %v18493_v51  ;;  %v8445_v48 = vcombine.low %v8437_v29, %v8444_v31  ;;  %v7624_v28 = vmin.f32 %v15444_v14, %v15455_v42 }
 0x4b1   : > { %v5965_v2 = vcombine.low %v5956_v11, %v5963_v47  ;;  %v7261_v33 = vrot.slane %v7183_v26, 7  ;;  %v5634_v54 = vadd.f32 %v4674_v0, %v4642_v8  ;;  %v4248_v20 = vadd.f32 %v15459_v50, %v15446_v38 }
 0x4b2   : > { %v4676_v57 = vmul.f32 %v15459_v50, %v15459_v50  ;;  %v4552_v37 = vcombine.low %v15489_v24, %v4551_v60  ;;  %v8517_v61 = vrot.slane %v8445_v48, 7  ;;  %v6388_v17 = vmax.f32 %v15446_v38, %v15459_v50 }
 0x4b3   : > { %v5979_v58 = vrot.slane %v5965_v2, %v18493_v51  ;;  %v18594_v55 = vcombine.low %v15748_v10, %v15768_v4  ;;  %v7650_v62 = vmin.f32 %v15446_v38, %v15459_v50  ;;  %v4227_v45 = vadd.f32 %v15480_v22, %v15449_v1  ;;  %v16076_v10 = vpop.f32.mrb[224].mxu0 }
 0x4b4   : > { %v5676_v42 = vadd.f32 %v4676_v57, %v4644_v39  ;;  %v18595_v3 = vcombine.low %v15756_v49, %v15791_v15  ;;  %v16074_v40 = vmul.f32 0.0078125, %v4552_v37  ;;  %18596 = vst [vmem:[#allocation46_spill] sm:$0xff] %v16076_v10  ;;  %v4675_v50 = vmul.f32 %v15480_v22, %v15480_v22 }
 0x4b5   : > { %v7262_v14 = vsel %vm7223_vm0, %v7261_v33, %v18594_v55  ;;  %v5980_v24 = vcombine.low %v15498_v21, %v5979_v58  ;;  %v6375_v21 = vmax.f32 %v15449_v1, %v15480_v22  ;;  %v7637_v11 = vmin.f32 %v15449_v1, %v15480_v22 }
 0x4b6   : > { %v7263_v16 = vsel %vm7225_vm1, %v7261_v33, %v7262_v14  ;;  %v8518_v53 = vsel %vm7223_vm0, %v8517_v61, %v18595_v3  ;;  %v8581_v9 = vmul.f32 %v16074_v40, %v16074_v40  ;;  %v5655_v5 = vadd.f32 %v4675_v50, %v4643_v13  ;;  %v18602_v50 = vld [vmem:[#allocation66_spill] sm:$0xff] }
 0x4b7   : > { %v7264_v4 = vsel %vm7227_vm2, %v7261_v33, %v7263_v16  ;;  %v8519_v38 = vsel %vm7225_vm1, %v8517_v61, %v8518_v53  ;;  %v8577_v15 = vmul.f32 0.0078125, %v5980_v24  ;;  %v4269_v52 = vadd.f32 %v15504_v32, %v15451_v43 }
 0x4b8   : > { %v7265_v7 = vsel %vm7229_vm3, %v7261_v33, %v7264_v4  ;;  %v8520_v49 = vsel %vm7227_vm2, %v8517_v61, %v8519_v38  ;;  %v4677_v13 = vmul.f32 %v15504_v32, %v15504_v32  ;;  %v6401_v1 = vmax.f32 %v15451_v43, %v15504_v32 }
 0x4b9   : > { %v8521_v18 = vsel %vm7229_vm3, %v8517_v61, %v8520_v49  ;;  %v8891_v29 = vcombine.high %v7265_v7, %v7265_v7  ;;  %v16090_v36 = vrot.slane %v7265_v7, %v11677_v34  ;;  %v8585_v59 = vsub.f32 %v8577_v15, %v8581_v9  ;;  %v18603_v9 = vld [vmem:[#allocation67_spill] sm:$0xff] }
 0x4ba   : > { %v9107_v56 = vcombine.high %v8521_v18, %v8521_v18  ;;  %v16093_v8 = vrot.slane %v8521_v18, %v11677_v34  ;;  %v5697_v0 = vadd.f32 %v4677_v13, %v4645_v25  ;;  %v7663_v60 = vmin.f32 %v15451_v43, %v15504_v32  ;;  %v16128_v32 = vpop.f32.mrb[224].mxu1 }
 0x4bb   : > { %v16098_v19 = vrot.slane %v8891_v29, %v11677_v34  ;;  %v8596_v47 = vadd.f32 1e-05, %v8585_v59  ;;  %v4207_v2 = vadd.f32 %v4206_v63, %v15558_v46  ;;  %v4706_v33 = vmul.f32 %v15558_v46, %v15558_v46  ;;  %18597 = vst [vmem:[#allocation47_spill] sm:$0xff] %v16128_v32  ;;  %v16143_v24 = vpop.f32.mrb[225].mxu1  ;;  %v18618_v59 = vld [vmem:[#allocation64_spill] sm:$0xff] }
 0x4bc   : > { %v16107_v31 = vrot.slane %v9107_v56, %v11677_v34  ;;  %v6363_v57 = vmax.f32 %v6362_v44, %v15558_v46  ;;  %v7625_v37 = vmin.f32 %v7624_v28, %v15558_v46  ;;  %v4249_v58 = vadd.f32 %v4248_v20, %v15560_v41  ;;  %18599 = vst [vmem:[#allocation17_spill] sm:$0xff] %v16143_v24  ;;  %v16160_v4 = vpop.f32.mrb[226].mxu1 }
 0x4bd   : > { %10859 = vrsqrt.f32 %v8596_v47  ;;  %v4708_v25 = vmul.f32 %v15560_v41, %v15560_v41  ;;  %v6389_v43 = vmax.f32 %v6388_v17, %v15560_v41  ;;  %v5635_v63 = vadd.f32 %v5634_v54, %v4706_v33  ;;  %v16141_v17 = vpop.f32.mrb[225].mxu0  ;;  %18601 = vst [vmem:[#allocation91_spill] sm:$0xff] %v16160_v4 }
 0x4be   : > { %v7651_v61 = vmin.f32 %v7650_v62, %v15560_v41  ;;  %v4228_v55 = vadd.f32 %v4227_v45, %v15567_v12  ;;  %v4707_v14 = vmul.f32 %v15567_v12, %v15567_v12  ;;  %v16135_v46 = vmax.f32 %v6375_v21, %v15567_v12  ;;  %18598 = vst [vmem:[#allocation48_spill] sm:$0xff] %v16141_v17  ;;  %v16153_v45 = vpop.f32.mrb[226].mxu0 }
 0x4bf   : > { %v5677_v44 = vadd.f32 %v5676_v42, %v4708_v25  ;;  %v16138_v28 = vmin.f32 %v7637_v11, %v15567_v12  ;;  %v4270_v20 = vadd.f32 %v4269_v52, %v15569_v27  ;;  %v4709_v41 = vmul.f32 %v15569_v27, %v15569_v27  ;;  %18600 = vst [vmem:[#allocation90_spill] sm:$0xff] %v16153_v45  ;;  %v18604_v11 = vld [vmem:[#allocation68_spill] sm:$0xff]  ;;  %v16180_v13 = vpop.f32.mrb[227].mxu0  ;;  %v16201_v25 = vpop.f32.mrb[227].mxu1 }
 0x4c0   : > { %v5656_v54 = vadd.f32 %v5655_v5, %v4707_v14  ;;  %v16148_v62 = vmax.f32 %v6401_v1, %v15569_v27  ;;  %v16151_v42 = vmin.f32 %v7663_v60, %v15569_v27  ;;  %v4208_v12 = vadd.f32 %v4207_v2, %v15577_v6  ;;  %v10736_v5 = vld [vmem:[%s13243_s27 + $0x20] ss:$2 sm:$0xff]  ;;  %18605 = vst [vmem:[#allocation66_spill] sm:$0xff] %v16180_v13  ;;  %v10740_v14 = vld [vmem:[%s13243_s27 + $0x21] ss:$2 sm:$0xff]  ;;  %v16262_v10 = vpop.f32.mrb[228].mxu1 }
 0x4c1   : > { %v4738_v16 = vmul.f32 %v15577_v6, %v15577_v6  ;;  %v6364_v3 = vmax.f32 %v6363_v57, %v15577_v6  ;;  %v7626_v53 = vmin.f32 %v7625_v37, %v15577_v6  ;;  %v5698_v38 = vadd.f32 %v5697_v0, %v4709_v41  ;;  %18606 = vst [vmem:[#allocation67_spill] sm:$0xff] %v16201_v25 }
 0x4c2   : > { %v4250_v21 = vadd.f32 %v4249_v58, %v18602_v50  ;;  %v4740_v27 = vmul.f32 %v18602_v50, %v18602_v50  ;;  %v6390_v7 = vmax.f32 %v6389_v43, %v18602_v50  ;;  %v7652_v15 = vmin.f32 %v7651_v61, %v18602_v50  ;;  %v18610_v50 = vld [vmem:[#allocation82_spill] sm:$0xff]  ;;  %18626 = vst [vmem:[#allocation68_spill] sm:$0xff] %v16262_v10 }
 0x4c3   : > { %v5636_v49 = vadd.f32 %v5635_v63, %v4738_v16  ;;  %v4229_v18 = vadd.f32 %v4228_v55, %v18603_v9  ;;  %v4739_v29 = vmul.f32 %v18603_v9, %v18603_v9  ;;  %v16178_v52 = vadd.f32 %v4270_v20, %v18604_v11  ;;  %v18608_v16 = vld [vmem:[#allocation44_spill] sm:$0xff] }
 0x4c4   : > { %v16171_v6 = vadd.f32 %v5677_v44, %v4740_v27  ;;  %v4741_v1 = vmul.f32 %v18604_v11, %v18604_v11  ;;  %v16191_v33 = vadd.f32 %v4208_v12, %v15617_v30  ;;  %v4770_v57 = vmul.f32 %v15617_v30, %v15617_v30  ;;  %v18611_v27 = vld [vmem:[#allocation83_spill] sm:$0xff] }
 0x4c5   : > { %v16182_v47 = vadd.f32 %v5656_v54, %v4739_v29  ;;  %v16196_v37 = vmax.f32 %v6364_v3, %v15617_v30  ;;  %v16199_v58 = vmin.f32 %v7626_v53, %v15617_v30  ;;  %v16206_v61 = vadd.f32 %v4250_v21, %v15619_v23  ;;  %v18607_v54 = vld [vmem:[#allocation69_spill] sm:$0xff]  ;;  %v18612_v29 = vld [vmem:[#allocation84_spill] sm:$0xff] }
 0x4c6   : > { %v16203_v63 = vadd.f32 %v5698_v38, %v4741_v1  ;;  %v16210_v55 = vmul.f32 %v15619_v23, %v15619_v23  ;;  %v16213_v44 = vadd.f32 %v5636_v49, %v4770_v57  ;;  %v16216_v20 = vmax.f32 %v6390_v7, %v15619_v23  ;;  %v18609_v53 = vld [vmem:[#allocation45_spill] sm:$0xff] }
 0x4c7   : > { %v10860_v2 = vpop.eup %10859  ;;  %v16219_v30 = vmin.f32 %v7652_v15, %v15619_v23  ;;  %v16222_v41 = vadd.f32 %v4229_v18, %v18607_v54  ;;  %v18614_v15 = vld [vmem:[#allocation54_spill] sm:$0xff]  ;;  %v18619_v26 = vcombine.high %v18618_v59, %v18618_v59  ;;  %v18621_v13 = vcombine.high %v16098_v19, %v16098_v19 }
 0x4c8   : > { %v8604_v43 = vmul.f32 %v10860_v2, %v10736_v5  ;;  %v18613_v5 = vld [vmem:[#allocation49_spill] sm:$0xff]  ;;  %v18615_v2 = vld [vmem:[#allocation19_spill] sm:$0xff] }
 0x4ca   : > { %v8616_v12 = vmul.f32 %v8604_v43, %v16074_v40  ;;  %vm8624_vm10 = vcmp.ge.f32.partialorder %v8604_v43, 0.0  ;;  %v8705_v3 = vrot.slane %v8604_v43, %v18608_v16  ;;  %v8709_v38 = vrot.slane %v8604_v43, %v18609_v53  ;;  %v18616_v40 = vld [vmem:[#allocation62_spill] sm:$0xff] }
 0x4cb   : > { %v8713_v21 = vrot.slane %v8604_v43, %v18610_v50  ;;  %v8717_v49 = vrot.slane %v8604_v43, %v18611_v27  ;;  %v8721_v7 = vrot.slane %v8604_v43, %v18612_v29  ;;  %v8725_v1 = vrot.slane %v8604_v43, %v18613_v5 }
 0x4cc   : > { %v16231_v23 = vsub.f32 %v10740_v14, %v8616_v12  ;;  %v8729_v18 = vrot.slane %v8604_v43, %v18614_v15  ;;  %v8733_v57 = vrot.slane %v8604_v43, %v18615_v2  ;;  %v8990_v60 = vmul.f32 %v18616_v40, %v8705_v3 }
 0x4cd   : > { %v18617_v0 = vcombine.high %v18616_v40, %v18616_v40  ;;  %v8992_v48 = vmul.f32 %v18618_v59, %v8713_v21  ;;  %v8993_v22 = vmul.f32 %v18619_v26, %v8717_v49  ;;  %v8994_v39 = vmul.f32 %v16090_v36, %v8721_v7  ;;  %v18622_v40 = vld [vmem:[#allocation63_spill] sm:$0xff]  ;;  %v18624_v59 = vld [vmem:[#allocation65_spill] sm:$0xff] }
 0x4ce   : > { %v18620_v14 = vcombine.high %v16090_v36, %v16090_v36  ;;  %v8996_v25 = vmul.f32 %v16098_v19, %v8729_v18  ;;  %v8997_v24 = vmul.f32 %v18621_v13, %v8733_v57  ;;  %v18623_v4 = vcombine.high %v18622_v40, %v18622_v40 }
 0x4cf   : > { %v8991_v56 = vmul.f32 %v18617_v0, %v8709_v38  ;;  %v9206_v0 = vmul.f32 %v18622_v40, %v8705_v3  ;;  %v9208_v26 = vmul.f32 %v18624_v59, %v8713_v21  ;;  %v18625_v45 = vcombine.high %v18624_v59, %v18624_v59 }
 0x4d0   : > { %v8995_v12 = vmul.f32 %v18620_v14, %v8725_v1  ;;  %v9207_v17 = vmul.f32 %v18623_v4, %v8709_v38  ;;  %v9210_v36 = vmul.f32 %v16093_v8, %v8721_v7  ;;  %v16260_v14 = vpop.f32.mrb[228].mxu0  ;;  %v18627_v19 = vcombine.high %v16093_v8, %v16093_v8 }
 0x4d1   : > { %v9209_v32 = vmul.f32 %v18625_v45, %v8717_v49  ;;  %v9212_v3 = vmul.f32 %v16107_v31, %v8729_v18  ;;  %v18628_v4 = vcombine.high %v16107_v31, %v16107_v31  ;;  %v18629_v21 = vmov 0   ;;  %v16273_v45 = vpop.f32.mrb[229].mxu0  ;;  %v16275_v49 = vpop.f32.mrb[229].mxu1 }
 0x4d2   : > { %v9211_v13 = vmul.f32 %v18627_v19, %v8725_v1  ;;  %v9224_v40 = vsel %vm8624_vm10, 1, %v18629_v21  ;;  %18630 = vst [vmem:[#allocation69_spill] sm:$0xff] %v16273_v45  ;;  %18631 = vst [vmem:[#allocation62_spill] sm:$0xff] %v16275_v49  ;;  %v16281_v18 = vpop.f32.mrb[230].mxu0 }
 0x4d3   : > { %v9213_v38 = vmul.f32 %v18628_v4, %v8733_v57  ;;  %v9293_v7 = vrot.slane %v9224_v40, %v18608_v16  ;;  %v9297_v59 = vrot.slane %v9224_v40, %v18609_v53  ;;  %v9301_v8 = vrot.slane %v9224_v40, %v18610_v50  ;;  %18632 = vst [vmem:[#allocation64_spill] sm:$0xff] %v16281_v18  ;;  %v16287_v4 = vpop.f32.mrb[230].mxu1 }
 0x4d4   : > { %v9305_v1 = vrot.slane %v9224_v40, %v18611_v27  ;;  %v9309_v31 = vrot.slane %v9224_v40, %v18612_v29  ;;  %v9313_v57 = vrot.slane %v9224_v40, %v18613_v5  ;;  %v9317_v43 = vrot.slane %v9224_v40, %v18614_v15  ;;  %18633 = vst [vmem:[#allocation63_spill] sm:$0xff] %v16287_v4  ;;  %v16323_v4 = vpop.f32.mrb[231].mxu1 }
 0x4d5   : > { %v9321_v19 = vrot.slane %v9224_v40, %v18615_v2  ;;  %vm16289_vm11 = vcmp.eq.s32.totalorder %v9293_v7, 1  ;;  %vm16293_vm12 = vcmp.eq.s32.totalorder %v9297_v59, 1  ;;  %vm16297_vm13 = vcmp.eq.s32.totalorder %v9301_v8, 1  ;;  %18651 = vst [vmem:[#allocation92_spill] sm:$0xff] %v16323_v4 }
 0x4d6   : > { %vm16301_vm14 = vcmp.eq.s32.totalorder %v9305_v1, 1  ;;  %vm16305_vm15 = vcmp.eq.s32.totalorder %v9309_v31, 1  ;;  %vm16309_vm4 = vcmp.eq.s32.totalorder %v9313_v57, 1  ;;  %vm16313_vm5 = vcmp.eq.s32.totalorder %v9317_v43, 1  ;;  %v16321_v1 = vpop.f32.mrb[231].mxu0 }
 0x4d7   : > { %vm16317_vm6 = vcmp.eq.s32.totalorder %v9321_v19, 1  ;;  %18650 = vst [vmem:[#allocation65_spill] sm:$0xff] %v16321_v1  ;;  %v9402_v31 = vsel %vm16289_vm11, %v8990_v60, %v9206_v0  ;;  %v9403_v57 = vsel %vm16293_vm12, %v8991_v56, %v9207_v17  ;;  %v9404_v43 = vsel %vm16297_vm13, %v8992_v48, %v9208_v26 }
 0x4d8   : > { %v9405_v10 = vsel %vm16301_vm14, %v8993_v22, %v9209_v32  ;;  %v9406_v19 = vsel %vm16305_vm15, %v8994_v39, %v9210_v36  ;;  %v9407_v1 = vsel %vm16309_vm4, %v8995_v12, %v9211_v13  ;;  %v9408_v4 = vsel %vm16313_vm5, %v8996_v25, %v9212_v3  ;;  %v16357_v12 = vpop.f32.mrb[232].mxu0  ;;  %v16359_v3 = vpop.f32.mrb[232].mxu1 }
 0x4d9   : > { %v9409_v60 = vsel %vm16317_vm6, %v8997_v24, %v9213_v38  ;;  %v9489_v17 = vrot.slane %v16231_v23, %v18608_v16  ;;  %v9493_v48 = vrot.slane %v16231_v23, %v18609_v53  ;;  %v9497_v22 = vrot.slane %v16231_v23, %v18610_v50  ;;  %v16361_v18 = vpop.f32.mrb[233].mxu0  ;;  %v16367_v8 = vpop.f32.mrb[233].mxu1 }
 0x4da   : > { %v9501_v39 = vrot.slane %v16231_v23, %v18611_v27  ;;  %v9505_v32 = vrot.slane %v16231_v23, %v18612_v29  ;;  %v9509_v56 = vrot.slane %v16231_v23, %v18613_v5  ;;  %v9513_v24 = vrot.slane %v16231_v23, %v18614_v15 }
 0x4db   : > { %v9517_v25 = vrot.slane %v16231_v23, %v18615_v2  ;;  %v9598_v0 = vadd.f32 %v9489_v17, %v9402_v31  ;;  %v9599_v26 = vadd.f32 %v9493_v48, %v9403_v57  ;;  %v9600_v36 = vadd.f32 %v9497_v22, %v9404_v43  ;;  %v18654_v48 = vld [vmem:[#allocation70_spill] sm:$0xff] }
 0x4dc   : > { %v9601_v13 = vadd.f32 %v9501_v39, %v9405_v10  ;;  %v9602_v38 = vadd.f32 %v9505_v32, %v9406_v19  ;;  %v9603_v21 = vadd.f32 %v9509_v56, %v9407_v1  ;;  %v9604_v45 = vadd.f32 %v9513_v24, %v9408_v4  ;;  %v16377_v19 = vpop.f32.mrb[234].mxu0  ;;  %v18657_v24 = vld [vmem:[#allocation18_spill] sm:$0xff] }
 0x4dd   : > { %v9605_v49 = vadd.f32 %v9517_v25, %v9409_v60  ;;  %v9714_v40 = vcombine.low %v9598_v0, %v9599_v26  ;;  %v5679_v59 = vadd.f32 %v16171_v6, %v16210_v55  ;;  %v4771_v23 = vmul.f32 %v18607_v54, %v18607_v54  ;;  %v16379_v6 = vpop.f32.mrb[234].mxu1  ;;  %v16394_v32 = vpop.f32.mrb[235].mxu0 }
 0x4de   : > { %v9715_v7 = vcombine.low %v9600_v36, %v9601_v13  ;;  %v9731_v31 = vcombine.low %v9602_v38, %v9603_v21  ;;  %v18652_v1 = vmax.f32 %v16135_v46, %v18603_v9  ;;  %v18653_v57 = vmin.f32 %v16138_v28, %v18603_v9  ;;  %v16396_v56 = vpop.f32.mrb[235].mxu1 }
 0x4df   : > { %v9732_v10 = vcombine.low %v9604_v45, %v9605_v49  ;;  %v9722_v55 = vrot.slane %v9714_v40, %v11677_v34  ;;  %v5658_v17 = vadd.f32 %v16182_v47, %v4771_v23  ;;  %v4272_v22 = vadd.f32 %v16178_v52, %v18654_v48  ;;  %v18659_v49 = vld [vmem:[#allocation86_spill] sm:$0xff] }
 0x4e0   : > { %v6378_v4 = vmax.f32 %v18652_v1, %v18607_v54  ;;  %v7640_v43 = vmin.f32 %v18653_v57, %v18607_v54  ;;  %v9729_v60 = vrot.slane %v9715_v7, %v11677_v34  ;;  %v9739_v46 = vrot.slane %v9731_v31, %v11677_v34  ;;  %v18660_v7 = vld [vmem:[#allocation72_spill] sm:$0xff] }
 0x4e1   : > { %v9746_v39 = vrot.slane %v9732_v10, %v11677_v34  ;;  %v4773_v28 = vmul.f32 %v18654_v48, %v18654_v48  ;;  %v18655_v9 = vmax.f32 %v16148_v62, %v18604_v11  ;;  %v18656_v52 = vmin.f32 %v16151_v42, %v18604_v11  ;;  %v18658_v42 = vld [vmem:[#allocation71_spill] sm:$0xff]  ;;  %v16430_v10 = vpop.f32.mrb[236].mxu1 }
 0x4e2   : > { %v4210_v25 = vadd.f32 %v16191_v33, %v18657_v24  ;;  %v4802_v0 = vmul.f32 %v18657_v24, %v18657_v24  ;;  %v6366_v26 = vmax.f32 %v16196_v37, %v18657_v24  ;;  %v10746_v62 = vcombine.low %v9722_v55, %v9739_v46  ;;  %v18664_v46 = vld [vmem:[#allocation87_spill] sm:$0xff] }
 0x4e3   : > { %v6404_v54 = vmax.f32 %v18655_v9, %v18654_v48  ;;  %v7666_v47 = vmin.f32 %v18656_v52, %v18654_v48  ;;  %v10747_v36 = vcombine.low %v9729_v60, %v9746_v39  ;;  %v5700_v13 = vadd.f32 %v16203_v63, %v4773_v28  ;;  %v16444_v39 = vpop.f32.mrb[237].mxu1 }
 0x4e4   : > { %v7628_v38 = vmin.f32 %v16199_v58, %v18657_v24  ;;  %v5638_v21 = vadd.f32 %v16213_v44, %v4802_v0  ;;  %v4252_v11 = vadd.f32 %v16206_v61, %v18658_v42  ;;  %v4804_v33 = vmul.f32 %v18658_v42, %v18658_v42  ;;  %v16424_v44 = vpop.f32.mrb[236].mxu0  ;;  %v18665_v0 = vld [vmem:[#allocation88_spill] sm:$0xff] }
 0x4e5   : > { %v6392_v45 = vmax.f32 %v16216_v20, %v18658_v42  ;;  %v9834_v37 = vrot.slane %v10746_v62, %v18659_v49  ;;  %v9841_v40 = vrot.slane %v10747_v36, %v18659_v49  ;;  %v7654_v63 = vmin.f32 %v16219_v30, %v18658_v42  ;;  %v18663_v30 = vld [vmem:[#allocation73_spill] sm:$0xff]  ;;  %v16439_v60 = vpop.f32.mrb[237].mxu0 }
 0x4e6   : > { %v4231_v58 = vadd.f32 %v16222_v41, %v18660_v7  ;;  %v5680_v23 = vadd.f32 %v5679_v59, %v4804_v33  ;;  %v4803_v61 = vmul.f32 %v18660_v7, %v18660_v7  ;;  %v6379_v31 = vmax.f32 %v6378_v4, %v18660_v7  ;;  %v16448_v52 = vpop.f32.mrb[238].mxu0 }
 0x4e7   : > { %v7641_v20 = vmin.f32 %v7640_v43, %v18660_v7  ;;  %v16432_v1 = vcombine.low %v9834_v37, %v9841_v40  ;;  %v16434_v57 = vcombine.high %v9834_v37, %v9841_v40  ;;  %v4273_v55 = vadd.f32 %v4272_v22, %v18663_v30  ;;  %v16450_v22 = vpop.f32.mrb[238].mxu1  ;;  %v16460_v33 = vpop.f32.mrb[239].mxu0  ;;  %v18667_v40 = vld [vmem:[#allocation78_spill] sm:$0xff] }
 0x4e8   : > { %v4805_v41 = vmul.f32 %v18663_v30, %v18663_v30  ;;  %v5659_v59 = vadd.f32 %v5658_v17, %v4803_v61  ;;  %v6405_v48 = vmax.f32 %v6404_v54, %v18663_v30  ;;  %v7667_v4 = vmin.f32 %v7666_v47, %v18663_v30 }
 0x4e9   : > { %18661 = vst [vmem:[#allocation70_spill] sm:$0xff] %v16432_v1  ;;  %18662 = vst [vmem:[#allocation18_spill] sm:$0xff] %v16434_v57  ;;  %v4211_v43 = vadd.f32 %v4210_v25, %v18664_v46  ;;  %v4834_v9 = vmul.f32 %v18664_v46, %v18664_v46  ;;  %v6367_v24 = vmax.f32 %v6366_v26, %v18664_v46 }
 0x4ea   : > { %v5701_v28 = vadd.f32 %v5700_v13, %v4805_v41  ;;  %v7629_v17 = vmin.f32 %v7628_v38, %v18664_v46  ;;  %v4253_v54 = vadd.f32 %v4252_v11, %v18665_v0  ;;  %v4836_v47 = vmul.f32 %v18665_v0, %v18665_v0  ;;  %v18666_v13 = vld [vmem:[#allocation89_spill] sm:$0xff]  ;;  %v18670_v46 = vld [vmem:[#allocation80_spill] sm:$0xff] }
 0x4eb   : > { %v5639_v25 = vadd.f32 %v5638_v21, %v4834_v9  ;;  %v6393_v62 = vmax.f32 %v6392_v45, %v18665_v0  ;;  %v7655_v36 = vmin.f32 %v7654_v63, %v18665_v0  ;;  %v4232_v42 = vadd.f32 %v4231_v58, %v18666_v13  ;;  %v16471_v58 = vpop.f32.mrb[239].mxu1 }
 0x4ec   : > { %v5681_v37 = vadd.f32 %v5680_v23, %v4836_v47  ;;  %v4835_v26 = vmul.f32 %v18666_v13, %v18666_v13  ;;  %v6380_v38 = vmax.f32 %v6379_v31, %v18666_v13  ;;  %v7642_v11 = vmin.f32 %v7641_v20, %v18666_v13  ;;  %18668 = vst [vmem:[#allocation71_spill] sm:$0xff] %v16471_v58  ;;  %v18669_v23 = vld [vmem:[#allocation79_spill] sm:$0xff] }
 0x4ed   : > { %v4274_v7 = vadd.f32 %v4273_v55, %v18667_v40  ;;  %v4837_v21 = vmul.f32 %v18667_v40, %v18667_v40  ;;  %v6406_v45 = vmax.f32 %v6405_v48, %v18667_v40  ;;  %v7668_v63 = vmin.f32 %v7667_v4, %v18667_v40 }
 0x4ee   : > { %v5660_v61 = vadd.f32 %v5659_v59, %v4835_v26  ;;  %v4212_v30 = vadd.f32 %v4211_v43, %v18669_v23  ;;  %v4866_v41 = vmul.f32 %v18669_v23, %v18669_v23  ;;  %v6368_v31 = vmax.f32 %v6367_v24, %v18669_v23  ;;  %v18671_v24 = vld [vmem:[#allocation81_spill] sm:$0xff] }
 0x4ef   : > { %v5702_v20 = vadd.f32 %v5701_v28, %v4837_v21  ;;  %v7630_v55 = vmin.f32 %v7629_v17, %v18669_v23  ;;  %v16479_v9 = vadd.f32 %v4253_v54, %v18670_v46  ;;  %v4868_v48 = vmul.f32 %v18670_v46, %v18670_v46 }
 0x4f0   : > { %v16483_v4 = vadd.f32 %v5639_v25, %v4866_v41  ;;  %v6369_v0 = vrot.slane %v6368_v31, 4  ;;  %v6394_v59 = vmax.f32 %v6393_v62, %v18670_v46  ;;  %v7656_v43 = vmin.f32 %v7655_v36, %v18670_v46  ;;  %v18672_v41 = vld [vmem:[#allocation74_spill] sm:$0xff] }
 0x4f1   : > { %v7631_v47 = vrot.slane %v7630_v55, 4  ;;  %v16487_v13 = vadd.f32 %v5681_v37, %v4868_v48  ;;  %v4233_v28 = vadd.f32 %v4232_v42, %v18671_v24  ;;  %v4867_v17 = vmul.f32 %v18671_v24, %v18671_v24 }
 0x4f2   : > { %v6370_v54 = vmax.f32 %v6368_v31, %v6369_v0  ;;  %v6395_v26 = vrot.slane %v6394_v59, 4  ;;  %v7657_v40 = vrot.slane %v7656_v43, 4  ;;  %v6381_v21 = vmax.f32 %v6380_v38, %v18671_v24 }
 0x4f3   : > { %v7632_v25 = vmin.f32 %v7630_v55, %v7631_v47  ;;  %v16493_v23 = vadd.f32 %v5660_v61, %v4867_v17  ;;  %v7643_v62 = vmin.f32 %v7642_v11, %v18671_v24  ;;  %v4275_v36 = vadd.f32 %v4274_v7, %v18672_v41 }
 0x4f4   : > { %v6371_v46 = vrot.slane %v6370_v54, 2  ;;  %v6396_v37 = vmax.f32 %v6394_v59, %v6395_v26  ;;  %v7658_v48 = vmin.f32 %v7656_v43, %v7657_v40  ;;  %v6382_v57 = vrot.slane %v6381_v21, 4  ;;  %v16500_v26 = vpop.f32.mrb[240].mxu0  ;;  %v16502_v40 = vpop.f32.mrb[240].mxu1 }
 0x4f5   : > { %v7633_v42 = vrot.slane %v7632_v25, 2  ;;  %v7644_v1 = vrot.slane %v7643_v62, 4  ;;  %v4869_v31 = vmul.f32 %v18672_v41, %v18672_v41  ;;  %v6407_v0 = vmax.f32 %v6406_v45, %v18672_v41  ;;  %18673 = vst [vmem:[#allocation72_spill] sm:$0xff] %v16500_v26  ;;  %18674 = vst [vmem:[#allocation73_spill] sm:$0xff] %v16502_v40 }
 0x4f6   : > { %v6372_v49 = vmax.f32 %v6370_v54, %v6371_v46  ;;  %v6397_v38 = vrot.slane %v6396_v37, 2  ;;  %v7659_v55 = vrot.slane %v7658_v48, 2  ;;  %v6383_v61 = vmax.f32 %v6381_v21, %v6382_v57  ;;  %v16505_v54 = vpop.f32.mrb[241].mxu0 }
 0x4f7   : > { %v7634_v47 = vmin.f32 %v7632_v25, %v7633_v42  ;;  %v7645_v17 = vmin.f32 %v7643_v62, %v7644_v1  ;;  %v5703_v11 = vadd.f32 %v5702_v20, %v4869_v31  ;;  %v6408_v24 = vrot.slane %v6407_v0, 4  ;;  %18675 = vst [vmem:[#allocation87_spill] sm:$0xff] %v16505_v54  ;;  %v16507_v25 = vpop.f32.mrb[241].mxu1 }
 0x4f8   : > { %v6373_v7 = vrot.slane %v6372_v49, 1  ;;  %v6398_v2 = vmax.f32 %v6396_v37, %v6397_v38  ;;  %v7660_v59 = vmin.f32 %v7658_v48, %v7659_v55  ;;  %v6384_v43 = vrot.slane %v6383_v61, 2  ;;  %18676 = vst [vmem:[#allocation88_spill] sm:$0xff] %v16507_v25  ;;  %v18677_v55 = vld [vmem:[#allocation76_spill] sm:$0xff] }
 0x4f9   : > { %v7635_v15 = vrot.slane %v7634_v47, 1  ;;  %v7646_v5 = vrot.slane %v7645_v17, 2  ;;  %v6409_v29 = vmax.f32 %v6407_v0, %v6408_v24  ;;  %v7669_v45 = vmin.f32 %v7668_v63, %v18672_v41  ;;  %v16510_v0 = vpop.f32.mrb[242].mxu0 }
 0x4fa   : > { %v6374_v57 = vmax.f32 %v6372_v49, %v6373_v7  ;;  %v6399_v21 = vrot.slane %v6398_v2, 1  ;;  %v7661_v1 = vrot.slane %v7660_v59, 1  ;;  %v6385_v20 = vmax.f32 %v6383_v61, %v6384_v43  ;;  %18678 = vst [vmem:[#allocation89_spill] sm:$0xff] %v16510_v0  ;;  %v18679_v7 = vld [vmem:[#allocation53_spill] sm:$0xff]  ;;  %v16528_v50 = vpop.f32.mrb[243].mxu0 }
 0x4fb   : > { %v7636_v62 = vmin.f32 %v7634_v47, %v7635_v15  ;;  %v7647_v46 = vmin.f32 %v7645_v17, %v7646_v5  ;;  %v6410_v37 = vrot.slane %v6409_v29, 2  ;;  %v7670_v48 = vrot.slane %v7669_v45, 4  ;;  %v16519_v17 = vpop.f32.mrb[242].mxu1  ;;  %18683 = vst [vmem:[#allocation79_spill] sm:$0xff] %v16528_v50 }
 0x4fc   : > { %v6400_v42 = vmax.f32 %v6398_v2, %v6399_v21  ;;  %v7662_v31 = vmin.f32 %v7660_v59, %v7661_v1  ;;  %v6386_v38 = vrot.slane %v6385_v20, 1  ;;  %v4213_v27 = vadd.f32 %v4212_v30, %v18677_v55  ;;  %v18680_v2 = vld [vmem:[#allocation58_spill] sm:$0xff]  ;;  %18681 = vst [vmem:[#allocation78_spill] sm:$0xff] %v16519_v17 }
 0x4fd   : > { %v7648_v63 = vrot.slane %v7647_v46, 1  ;;  %v6411_v41 = vmax.f32 %v6409_v29, %v6410_v37  ;;  %v7671_v24 = vmin.f32 %v7669_v45, %v7670_v48  ;;  %v4898_v49 = vmul.f32 %v18677_v55, %v18677_v55 }
 0x4fe   : > { %v6387_v61 = vmax.f32 %v6385_v20, %v6386_v38  ;;  %v4255_v15 = vadd.f32 %v16479_v9, %v18679_v7  ;;  %v4900_v5 = vmul.f32 %v18679_v7, %v18679_v7  ;;  %v4234_v47 = vadd.f32 %v4233_v28, %v18680_v2  ;;  %v18682_v20 = vld [vmem:[#allocation59_spill] sm:$0xff] }
 0x4ff   : > { %v7649_v30 = vmin.f32 %v7647_v46, %v7648_v63  ;;  %v6412_v59 = vrot.slane %v6411_v41, 1  ;;  %v7672_v43 = vrot.slane %v7671_v24, 2  ;;  %v5641_v29 = vadd.f32 %v16483_v4, %v4898_v49  ;;  %v16530_v46 = vpop.f32.mrb[243].mxu1 }
 0x500   : > { %v7048_v45 = vcombine.low %v6374_v57, %v6387_v61  ;;  %v5683_v21 = vadd.f32 %v16487_v13, %v4900_v5  ;;  %v4899_v1 = vmul.f32 %v18680_v2, %v18680_v2  ;;  %v4276_v9 = vadd.f32 %v4275_v36, %v18682_v20  ;;  %18684 = vst [vmem:[#allocation80_spill] sm:$0xff] %v16530_v46  ;;  %v18685_v57 = vld [vmem:[#allocation60_spill] sm:$0xff] }
 0x501   : > { %v8310_v37 = vcombine.low %v7636_v62, %v7649_v30  ;;  %v6413_v48 = vmax.f32 %v6411_v41, %v6412_v59  ;;  %v7673_v38 = vmin.f32 %v7671_v24, %v7672_v43  ;;  %v4901_v28 = vmul.f32 %v18682_v20, %v18682_v20  ;;  %v18686_v59 = vld [vmem:[#allocation61_spill] sm:$0xff] }
 0x502   : > { %v16533_v4 = vrot.slane %v7048_v45, %v11677_v34  ;;  %v5662_v13 = vadd.f32 %v16493_v23, %v4899_v1  ;;  %v4214_v63 = vadd.f32 %v4213_v27, %v18685_v57  ;;  %v4930_v36 = vmul.f32 %v18685_v57, %v18685_v57 }
 0x503   : > { %v16540_v62 = vrot.slane %v8310_v37, %v11677_v34  ;;  %v7049_v41 = vcombine.low %v6400_v42, %v6413_v48  ;;  %v7674_v24 = vrot.slane %v7673_v38, 1  ;;  %v5704_v49 = vadd.f32 %v5703_v11, %v4901_v28  ;;  %v16561_v37 = vpop.f32.mrb[244].mxu0  ;;  %v16563_v48 = vpop.f32.mrb[244].mxu1 }
 0x504   : > { %v5642_v61 = vadd.f32 %v5641_v29, %v4930_v36  ;;  %v6778_v5 = vmax.f32 %v18677_v55, %v18685_v57  ;;  %v8040_v30 = vmin.f32 %v18677_v55, %v18685_v57  ;;  %v4256_v23 = vadd.f32 %v4255_v15, %v18686_v59  ;;  %v18687_v29 = vld [vmem:[#allocation52_spill] sm:$0xff]  ;;  %18688 = vst [vmem:[#allocation81_spill] sm:$0xff] %v16561_v37  ;;  %v16574_v53 = vpop.f32.mrb[245].mxu0 }
 0x505   : > { %v16548_v27 = vrot.slane %v7049_v41, %v11677_v34  ;;  %v7675_v43 = vmin.f32 %v7673_v38, %v7674_v24  ;;  %v4932_v45 = vmul.f32 %v18686_v59, %v18686_v59  ;;  %v6804_v42 = vmax.f32 %v18679_v7, %v18686_v59  ;;  %18689 = vst [vmem:[#allocation74_spill] sm:$0xff] %v16563_v48 }
 0x506   : > { %v8066_v11 = vmin.f32 %v18679_v7, %v18686_v59  ;;  %v4235_v1 = vadd.f32 %v4234_v47, %v18687_v29  ;;  %v4931_v55 = vmul.f32 %v18687_v29, %v18687_v29  ;;  %v6791_v15 = vmax.f32 %v18680_v2, %v18687_v29  ;;  %v18690_v47 = vld [vmem:[#allocation56_spill] sm:$0xff]  ;;  %18691 = vst [vmem:[#allocation76_spill] sm:$0xff] %v16574_v53  ;;  %v16589_v53 = vpop.f32.mrb[246].mxu0 }
 0x507   : > { %v8311_v28 = vcombine.low %v7662_v31, %v7675_v43  ;;  %v5684_v57 = vadd.f32 %v5683_v21, %v4932_v45  ;;  %v8053_v7 = vmin.f32 %v18680_v2, %v18687_v29  ;;  %v4277_v41 = vadd.f32 %v4276_v9, %v18690_v47  ;;  %v18692_v21 = vld [vmem:[#allocation26_spill] sm:$0xff]  ;;  %v16584_v9 = vpop.f32.mrb[245].mxu1  ;;  %18695 = vst [vmem:[#allocation58_spill] sm:$0xff] %v16589_v53 }
 0x508   : > { %v5663_v36 = vadd.f32 %v5662_v13, %v4931_v55  ;;  %v4933_v24 = vmul.f32 %v18690_v47, %v18690_v47  ;;  %v6817_v59 = vmax.f32 %v18682_v20, %v18690_v47  ;;  %v8079_v31 = vmin.f32 %v18682_v20, %v18690_v47  ;;  %18693 = vst [vmem:[#allocation53_spill] sm:$0xff] %v16584_v9  ;;  %v18694_v55 = vld [vmem:[#allocation27_spill] sm:$0xff] }
 0x509   : > { %v16577_v16 = vrot.slane %v8311_v28, %v11677_v34  ;;  %v4215_v43 = vadd.f32 %v4214_v63, %v18692_v21  ;;  %v4962_v2 = vmul.f32 %v18692_v21, %v18692_v21  ;;  %v6779_v45 = vmax.f32 %v6778_v5, %v18692_v21  ;;  %v16591_v28 = vpop.f32.mrb[246].mxu1 }
 0x50a   : > { %v5705_v13 = vadd.f32 %v5704_v49, %v4933_v24  ;;  %v8041_v29 = vmin.f32 %v8040_v30, %v18692_v21  ;;  %v4257_v38 = vadd.f32 %v4256_v23, %v18694_v55  ;;  %18696 = vst [vmem:[#allocation59_spill] sm:$0xff] %v16591_v28  ;;  %v4964_v47 = vmul.f32 %v18694_v55, %v18694_v55  ;;  %v16598_v49 = vpop.f32.mrb[247].mxu0  ;;  %v18698_v30 = vld [vmem:[#allocation57_spill] sm:$0xff]  ;;  %v16605_v28 = vpop.f32.mrb[247].mxu1 }
 0x50b   : > { %v5643_v63 = vadd.f32 %v5642_v61, %v4962_v2  ;;  %v6805_v9 = vmax.f32 %v6804_v42, %v18694_v55  ;;  %18697 = vst [vmem:[#allocation60_spill] sm:$0xff] %v16598_v49  ;;  %v8067_v5 = vmin.f32 %v8066_v11, %v18694_v55  ;;  %v4236_v24 = vadd.f32 %v4235_v1, %v18698_v30  ;;  %v18700_v2 = vld [vmem:[#allocation20_spill] sm:$0xff] }
 0x50c   : > { %v4963_v23 = vmul.f32 %v18698_v30, %v18698_v30  ;;  %v6792_v21 = vmax.f32 %v6791_v15, %v18698_v30  ;;  %18699 = vst [vmem:[#allocation61_spill] sm:$0xff] %v16605_v28  ;;  %v5685_v20 = vadd.f32 %v5684_v57, %v4964_v47  ;;  %v8054_v61 = vmin.f32 %v8053_v7, %v18698_v30  ;;  %v18701_v55 = vld [vmem:[#allocation28_spill] sm:$0xff]  ;;  %v16618_v47 = vpop.f32.mrb[248].mxu0 }
 0x50d   : > { %v4278_v53 = vadd.f32 %v4277_v41, %v18700_v2  ;;  %v4965_v42 = vmul.f32 %v18700_v2, %v18700_v2  ;;  %v6818_v11 = vmax.f32 %v6817_v59, %v18700_v2  ;;  %v8080_v1 = vmin.f32 %v8079_v31, %v18700_v2  ;;  %18702 = vst [vmem:[#allocation52_spill] sm:$0xff] %v16618_v47  ;;  %v18703_v41 = vld [vmem:[#allocation29_spill] sm:$0xff]  ;;  %v16635_v28 = vpop.f32.mrb[249].mxu0 }
 0x50e   : > { %v5664_v49 = vadd.f32 %v5663_v36, %v4963_v23  ;;  %v4216_v48 = vadd.f32 %v4215_v43, %v18701_v55  ;;  %v4994_v15 = vmul.f32 %v18701_v55, %v18701_v55  ;;  %v6780_v57 = vmax.f32 %v6779_v45, %v18701_v55  ;;  %18707 = vst [vmem:[#allocation26_spill] sm:$0xff] %v16635_v28 }
 0x50f   : > { %v5706_v37 = vadd.f32 %v5705_v13, %v4965_v42  ;;  %v8042_v7 = vmin.f32 %v8041_v29, %v18701_v55  ;;  %v4258_v30 = vadd.f32 %v4257_v38, %v18703_v41  ;;  %v4996_v36 = vmul.f32 %v18703_v41, %v18703_v41  ;;  %v18704_v13 = vld [vmem:[#allocation21_spill] sm:$0xff]  ;;  %v16629_v29 = vpop.f32.mrb[248].mxu1  ;;  %v18706_v55 = vld [vmem:[#allocation30_spill] sm:$0xff] }
 0x510   : > { %v6806_v59 = vmax.f32 %v6805_v9, %v18703_v41  ;;  %v8068_v31 = vmin.f32 %v8067_v5, %v18703_v41  ;;  %v5644_v43 = vadd.f32 %v5643_v63, %v4994_v15  ;;  %v4237_v23 = vadd.f32 %v4236_v24, %v18704_v13  ;;  %18705 = vst [vmem:[#allocation56_spill] sm:$0xff] %v16629_v29  ;;  %v18708_v15 = vld [vmem:[#allocation31_spill] sm:$0xff] }
 0x511   : > { %v4995_v2 = vmul.f32 %v18704_v13, %v18704_v13  ;;  %v6793_v45 = vmax.f32 %v6792_v21, %v18704_v13  ;;  %v5686_v42 = vadd.f32 %v5685_v20, %v4996_v36  ;;  %v8055_v38 = vmin.f32 %v8054_v61, %v18704_v13  ;;  %v16640_v21 = vpop.f32.mrb[249].mxu1  ;;  %v16646_v36 = vpop.f32.mrb[250].mxu0 }
 0x512   : > { %v4279_v47 = vadd.f32 %v4278_v53, %v18706_v55  ;;  %v4997_v9 = vmul.f32 %v18706_v55, %v18706_v55  ;;  %v6819_v5 = vmax.f32 %v6818_v11, %v18706_v55  ;;  %v8081_v24 = vmin.f32 %v8080_v1, %v18706_v55  ;;  %18709 = vst [vmem:[#allocation27_spill] sm:$0xff] %v16640_v21  ;;  %v16648_v13 = vpop.f32.mrb[250].mxu1  ;;  %v18716_v21 = vld [vmem:[#allocation34_spill] sm:$0xff] }
 0x513   : > { %v5665_v63 = vadd.f32 %v5664_v49, %v4995_v2  ;;  %v4217_v41 = vadd.f32 %v4216_v48, %v18708_v15  ;;  %v5026_v20 = vmul.f32 %v18708_v15, %v18708_v15  ;;  %v6781_v53 = vmax.f32 %v6780_v57, %v18708_v15  ;;  %18710 = vst [vmem:[#allocation57_spill] sm:$0xff] %v16646_v36  ;;  %v18712_v49 = vld [vmem:[#allocation32_spill] sm:$0xff]  ;;  %v16655_v2 = vpop.f32.mrb[251].mxu0 }
 0x514   : > { %v5707_v29 = vadd.f32 %v5706_v37, %v4997_v9  ;;  %v8043_v61 = vmin.f32 %v8042_v7, %v18708_v15  ;;  %18711 = vst [vmem:[#allocation20_spill] sm:$0xff] %v16648_v13  ;;  %v4259_v11 = vadd.f32 %v4258_v30, %v18712_v49  ;;  %v5028_v1 = vmul.f32 %v18712_v49, %v18712_v49  ;;  %v18714_v9 = vld [vmem:[#allocation33_spill] sm:$0xff]  ;;  %v16661_v13 = vpop.f32.mrb[251].mxu1 }
 0x515   : > { %v6807_v48 = vmax.f32 %v6806_v59, %v18712_v49  ;;  %v8069_v37 = vmin.f32 %v8068_v31, %v18712_v49  ;;  %18713 = vst [vmem:[#allocation28_spill] sm:$0xff] %v16655_v2  ;;  %v5645_v55 = vadd.f32 %v5644_v43, %v5026_v20  ;;  %v4238_v57 = vadd.f32 %v4237_v23, %v18714_v9  ;;  %v18717_v20 = vld [vmem:[#allocation35_spill] sm:$0xff] }
 0x516   : > { %v5027_v7 = vmul.f32 %v18714_v9, %v18714_v9  ;;  %v6794_v15 = vmax.f32 %v6793_v45, %v18714_v9  ;;  %18715 = vst [vmem:[#allocation29_spill] sm:$0xff] %v16661_v13  ;;  %v5687_v30 = vadd.f32 %v5686_v42, %v5028_v1  ;;  %v8056_v36 = vmin.f32 %v8055_v38, %v18714_v9  ;;  %v16674_v1 = vpop.f32.mrb[252].mxu0 }
 0x517   : > { %v4280_v28 = vadd.f32 %v4279_v47, %v18716_v21  ;;  %v5029_v59 = vmul.f32 %v18716_v21, %v18716_v21  ;;  %v6820_v43 = vmax.f32 %v6819_v5, %v18716_v21  ;;  %v8082_v23 = vmin.f32 %v8081_v24, %v18716_v21  ;;  %18718 = vst [vmem:[#allocation21_spill] sm:$0xff] %v16674_v1  ;;  %v18719_v47 = vld [vmem:[#allocation22_spill] sm:$0xff]  ;;  %v16691_v13 = vpop.f32.mrb[253].mxu0 }
 0x518   : > { %v5666_v31 = vadd.f32 %v5665_v63, %v5027_v7  ;;  %v4218_v49 = vadd.f32 %v4217_v41, %v18717_v20  ;;  %v5058_v45 = vmul.f32 %v18717_v20, %v18717_v20  ;;  %v6782_v42 = vmax.f32 %v6781_v53, %v18717_v20  ;;  %18723 = vst [vmem:[#allocation31_spill] sm:$0xff] %v16691_v13 }
 0x519   : > { %v5708_v2 = vadd.f32 %v5707_v29, %v5029_v59  ;;  %v8044_v38 = vmin.f32 %v8043_v61, %v18717_v20  ;;  %v4260_v9 = vadd.f32 %v4259_v11, %v18719_v47  ;;  %v5060_v63 = vmul.f32 %v18719_v47, %v18719_v47  ;;  %v18720_v29 = vld [vmem:[#allocation36_spill] sm:$0xff]  ;;  %v16685_v61 = vpop.f32.mrb[252].mxu1  ;;  %v18722_v20 = vld [vmem:[#allocation37_spill] sm:$0xff] }
 0x51a   : > { %v6808_v5 = vmax.f32 %v6807_v48, %v18719_v47  ;;  %v8070_v24 = vmin.f32 %v8069_v37, %v18719_v47  ;;  %v5646_v41 = vadd.f32 %v5645_v55, %v5058_v45  ;;  %v4239_v21 = vadd.f32 %v4238_v57, %v18720_v29  ;;  %18721 = vst [vmem:[#allocation30_spill] sm:$0xff] %v16685_v61  ;;  %v16693_v37 = vpop.f32.mrb[253].mxu1  ;;  %v16698_v61 = vpop.f32.mrb[254].mxu0 }
 0x51b   : > { %v5059_v7 = vmul.f32 %v18720_v29, %v18720_v29  ;;  %v6795_v53 = vmax.f32 %v6794_v15, %v18720_v29  ;;  %v5688_v59 = vadd.f32 %v5687_v30, %v5060_v63  ;;  %v8057_v11 = vmin.f32 %v8056_v36, %v18720_v29  ;;  %18724 = vst [vmem:[#allocation32_spill] sm:$0xff] %v16693_v37  ;;  %v18725_v15 = vld [vmem:[#allocation38_spill] sm:$0xff]  ;;  %v16704_v29 = vpop.f32.mrb[254].mxu1  ;;  %v18728_v37 = vld [vmem:[#allocation39_spill] sm:$0xff] }
 0x51c   : > { %v4281_v1 = vadd.f32 %v4280_v28, %v18722_v20  ;;  %v5061_v48 = vmul.f32 %v18722_v20, %v18722_v20  ;;  %v6821_v57 = vmax.f32 %v6820_v43, %v18722_v20  ;;  %v8083_v45 = vmin.f32 %v8082_v23, %v18722_v20  ;;  %18726 = vst [vmem:[#allocation33_spill] sm:$0xff] %v16698_v61  ;;  %v18730_v20 = vld [vmem:[#allocation40_spill] sm:$0xff] }
 0x51d   : > { %v5667_v55 = vadd.f32 %v5666_v31, %v5059_v7  ;;  %v4219_v47 = vadd.f32 %v4218_v49, %v18725_v15  ;;  %v5090_v28 = vmul.f32 %v18725_v15, %v18725_v15  ;;  %v6783_v36 = vmax.f32 %v6782_v42, %v18725_v15  ;;  %18727 = vst [vmem:[#allocation34_spill] sm:$0xff] %v16704_v29  ;;  %v16711_v7 = vpop.f32.mrb[255].mxu0  ;;  %v18731_v29 = vld [vmem:[#allocation41_spill] sm:$0xff] }
 0x51e   : > { %v5709_v30 = vadd.f32 %v5708_v2, %v5061_v48  ;;  %v8045_v63 = vmin.f32 %v8044_v38, %v18725_v15  ;;  %v4261_v31 = vadd.f32 %v4260_v9, %v18728_v37  ;;  %v5092_v43 = vmul.f32 %v18728_v37, %v18728_v37  ;;  %18729 = vst [vmem:[#allocation35_spill] sm:$0xff] %v16711_v7 }
 0x51f   : > { %v6809_v23 = vmax.f32 %v6808_v5, %v18728_v37  ;;  %v8071_v49 = vmin.f32 %v8070_v24, %v18728_v37  ;;  %v5647_v2 = vadd.f32 %v5646_v41, %v5090_v28  ;;  %v16714_v48 = vadd.f32 %v4239_v21, %v18730_v20 }
 0x520   : > { %v5091_v42 = vmul.f32 %v18730_v20, %v18730_v20  ;;  %v16719_v38 = vmax.f32 %v6795_v53, %v18730_v20  ;;  %v5689_v9 = vadd.f32 %v5688_v59, %v5092_v43  ;;  %v16722_v15 = vmin.f32 %v8057_v11, %v18730_v20  ;;  %v18732_v53 = vld [vmem:[#allocation42_spill] sm:$0xff] }
 0x521   : > { %v16725_v5 = vadd.f32 %v4281_v1, %v18731_v29  ;;  %v5093_v24 = vmul.f32 %v18731_v29, %v18731_v29  ;;  %v16732_v21 = vmax.f32 %v6821_v57, %v18731_v29  ;;  %v16735_v37 = vmin.f32 %v8083_v45, %v18731_v29 }
 0x522   : > { %v16729_v41 = vadd.f32 %v5667_v55, %v5091_v42  ;;  %v4220_v28 = vadd.f32 %v4219_v47, %v18732_v53  ;;  %v5122_v11 = vmul.f32 %v18732_v53, %v18732_v53  ;;  %v6784_v1 = vmax.f32 %v6783_v36, %v18732_v53  ;;  %v18733_v55 = vld [vmem:[#allocation23_spill] sm:$0xff] }
 0x523   : > { %v16738_v59 = vadd.f32 %v5709_v30, %v5093_v24  ;;  %v8046_v43 = vmin.f32 %v8045_v63, %v18732_v53  ;;  %v4262_v42 = vadd.f32 %v4261_v31, %v18733_v55  ;;  %v5124_v57 = vmul.f32 %v18733_v55, %v18733_v55 }
 0x524   : > { %v4221_v20 = vrot.slane %v4220_v28, 4  ;;  %v6810_v45 = vmax.f32 %v6809_v23, %v18733_v55  ;;  %v5648_v29 = vadd.f32 %v5647_v2, %v5122_v11  ;;  %v6785_v7 = vrot.slane %v6784_v1, 4 }
 0x525   : > { %v8047_v47 = vrot.slane %v8046_v43, 4  ;;  %v8072_v30 = vmin.f32 %v8071_v49, %v18733_v55  ;;  %v4263_v61 = vrot.slane %v4262_v42, 4  ;;  %v5690_v13 = vadd.f32 %v5689_v9, %v5124_v57 }
 0x526   : > { %v4222_v24 = vadd.f32 %v4221_v20, %v4220_v28  ;;  %v6811_v46 = vrot.slane %v6810_v45, 4  ;;  %v5649_v36 = vrot.slane %v5648_v29, 4  ;;  %v6786_v50 = vmax.f32 %v6784_v1, %v6785_v7 }
 0x527   : > { %v8048_v63 = vmin.f32 %v8046_v43, %v8047_v47  ;;  %v8073_v53 = vrot.slane %v8072_v30, 4  ;;  %v4264_v31 = vadd.f32 %v4263_v61, %v4262_v42  ;;  %v5691_v0 = vrot.slane %v5690_v13, 4  ;;  %v16749_v47 = vpop.f32.mrb[255].mxu1 }
 0x528   : > { %v4223_v17 = vrot.slane %v4222_v24, 2  ;;  %v6812_v25 = vmax.f32 %v6810_v45, %v6811_v46  ;;  %v5650_v54 = vadd.f32 %v5649_v36, %v5648_v29  ;;  %v6787_v40 = vrot.slane %v6786_v50, 2 }
 0x529   : > { %v8049_v23 = vrot.slane %v8048_v63, 2  ;;  %v8074_v2 = vmin.f32 %v8072_v30, %v8073_v53  ;;  %v4265_v26 = vrot.slane %v4264_v31, 2  ;;  %v5692_v58 = vadd.f32 %v5691_v0, %v5690_v13 }
 0x52a   : > { %v4224_v11 = vadd.f32 %v4223_v17, %v4222_v24  ;;  %v6813_v49 = vrot.slane %v6812_v25, 2  ;;  %v5651_v28 = vrot.slane %v5650_v54, 2  ;;  %v6788_v20 = vmax.f32 %v6786_v50, %v6787_v40 }
 0x52b   : > { %v8050_v9 = vmin.f32 %v8048_v63, %v8049_v23  ;;  %v8075_v55 = vrot.slane %v8074_v2, 2  ;;  %v4266_v7 = vadd.f32 %v4265_v26, %v4264_v31  ;;  %v5693_v1 = vrot.slane %v5692_v58, 2 }
 0x52c   : > { %v4225_v57 = vrot.slane %v4224_v11, 1  ;;  %v6814_v43 = vmax.f32 %v6812_v25, %v6813_v49  ;;  %v5652_v61 = vadd.f32 %v5651_v28, %v5650_v54  ;;  %v6789_v46 = vrot.slane %v6788_v20, 1  ;;  %v18734_v54 = vld [vmem:[#allocation43_spill] sm:$0xff] }
 0x52d   : > { %v8051_v42 = vrot.slane %v8050_v9, 1  ;;  %v8076_v45 = vmin.f32 %v8074_v2, %v8075_v55  ;;  %v4267_v17 = vrot.slane %v4266_v7, 1  ;;  %v5694_v30 = vadd.f32 %v5693_v1, %v5692_v58 }
 0x52e   : > { %v16751_v29 = vadd.f32 %v4225_v57, %v4224_v11  ;;  %v6815_v0 = vrot.slane %v6814_v43, 1  ;;  %v5653_v13 = vrot.slane %v5652_v61, 1  ;;  %v16753_v24 = vmax.f32 %v6788_v20, %v6789_v46 }
 0x52f   : > { %v16755_v50 = vmin.f32 %v8050_v9, %v8051_v42  ;;  %v8077_v40 = vrot.slane %v8076_v45, 1  ;;  %v16757_v26 = vadd.f32 %v4267_v17, %v4266_v7  ;;  %v5695_v25 = vrot.slane %v5694_v30, 1 }
 0x530   : > { %v16759_v36 = vmax.f32 %v6814_v43, %v6815_v0  ;;  %v4241_v63 = vadd.f32 %v16714_v48, %v18734_v54  ;;  %v16763_v53 = vadd.f32 %v5653_v13, %v5652_v61  ;;  %v5123_v58 = vmul.f32 %v18734_v54, %v18734_v54 }
 0x531   : > { %v16765_v31 = vmin.f32 %v8076_v45, %v8077_v40  ;;  %v6797_v23 = vmax.f32 %v16719_v38, %v18734_v54  ;;  %v16771_v2 = vadd.f32 %v5695_v25, %v5694_v30  ;;  %v8059_v49 = vmin.f32 %v16722_v15, %v18734_v54 }
 0x532   : > { %v4242_v11 = vrot.slane %v4241_v63, 4  ;;  %v4283_v28 = vadd.f32 %v16725_v5, %v16037_v35  ;;  %v5669_v48 = vadd.f32 %v16729_v41, %v5123_v58  ;;  %v5125_v9 = vmul.f32 %v16037_v35, %v16037_v35 }
 0x533   : > { %v6798_v20 = vrot.slane %v6797_v23, 4  ;;  %v6823_v55 = vmax.f32 %v16732_v21, %v16037_v35  ;;  %v8060_v38 = vrot.slane %v8059_v49, 4  ;;  %v8085_v1 = vmin.f32 %v16735_v37, %v16037_v35 }
 0x534   : > { %v4243_v57 = vadd.f32 %v4242_v11, %v4241_v63  ;;  %v4284_v7 = vrot.slane %v4283_v28, 4  ;;  %v5670_v43 = vrot.slane %v5669_v48, 4  ;;  %v5711_v61 = vadd.f32 %v16738_v59, %v5125_v9 }
 0x535   : > { %v6799_v15 = vmax.f32 %v6797_v23, %v6798_v20  ;;  %v6824_v5 = vrot.slane %v6823_v55, 4  ;;  %v8061_v41 = vmin.f32 %v8059_v49, %v8060_v38  ;;  %v8086_v45 = vrot.slane %v8085_v1, 4 }
 0x536   : > { %v4244_v46 = vrot.slane %v4243_v57, 2  ;;  %v4285_v42 = vadd.f32 %v4284_v7, %v4283_v28  ;;  %v5671_v17 = vadd.f32 %v5670_v43, %v5669_v48  ;;  %v5712_v0 = vrot.slane %v5711_v61, 4 }
 0x537   : > { %v6800_v30 = vrot.slane %v6799_v15, 2  ;;  %v6825_v13 = vmax.f32 %v6823_v55, %v6824_v5  ;;  %v8062_v40 = vrot.slane %v8061_v41, 2  ;;  %v8087_v54 = vmin.f32 %v8085_v1, %v8086_v45 }
 0x538   : > { %v4245_v21 = vadd.f32 %v4244_v46, %v4243_v57  ;;  %v4286_v25 = vrot.slane %v4285_v42, 2  ;;  %v5672_v63 = vrot.slane %v5671_v17, 2  ;;  %v5713_v35 = vadd.f32 %v5712_v0, %v5711_v61 }
 0x539   : > { %v6801_v58 = vmax.f32 %v6799_v15, %v6800_v30  ;;  %v6826_v37 = vrot.slane %v6825_v13, 2  ;;  %v8063_v11 = vmin.f32 %v8061_v41, %v8062_v40  ;;  %v8088_v20 = vrot.slane %v8087_v54, 2 }
 0x53a   : > { %v4246_v23 = vrot.slane %v4245_v21, 1  ;;  %v4287_v59 = vadd.f32 %v4286_v25, %v4285_v42  ;;  %v5673_v9 = vadd.f32 %v5672_v63, %v5671_v17  ;;  %v5714_v28 = vrot.slane %v5713_v35, 2 }
 0x53b   : > { %v6802_v49 = vrot.slane %v6801_v58, 1  ;;  %v6827_v38 = vmax.f32 %v6825_v13, %v6826_v37  ;;  %v8064_v7 = vrot.slane %v8063_v11, 1  ;;  %v8089_v55 = vmin.f32 %v8087_v54, %v8088_v20  ;;  %v18736_v20 = vld [vmem:[#allocation47_spill] sm:$0xff] }
 0x53c   : > { %v4247_v48 = vadd.f32 %v4246_v23, %v4245_v21  ;;  %v4288_v43 = vrot.slane %v4287_v59, 1  ;;  %v5674_v57 = vrot.slane %v5673_v9, 1  ;;  %v5715_v46 = vadd.f32 %v5714_v28, %v5713_v35  ;;  %v18737_v28 = vld [vmem:[#allocation90_spill] sm:$0xff] }
 0x53d   : > { %v6803_v5 = vmax.f32 %v6801_v58, %v6802_v49  ;;  %v6828_v1 = vrot.slane %v6827_v38, 1  ;;  %v8065_v61 = vmin.f32 %v8063_v11, %v8064_v7  ;;  %v8090_v30 = vrot.slane %v8089_v55, 1  ;;  %v18738_v7 = vld [vmem:[#allocation48_spill] sm:$0xff] }
 0x53e   : > { %v4553_v15 = vcombine.low %v16751_v29, %v4247_v48  ;;  %v4289_v45 = vadd.f32 %v4288_v43, %v4287_v59  ;;  %v5675_v41 = vadd.f32 %v5674_v57, %v5673_v9  ;;  %v5716_v17 = vrot.slane %v5715_v46, 1 }
 0x53f   : > { %v7184_v42 = vcombine.low %v16753_v24, %v6803_v5  ;;  %v6829_v0 = vmax.f32 %v6827_v38, %v6828_v1  ;;  %v8446_v21 = vcombine.low %v16755_v50, %v8065_v61  ;;  %v8091_v25 = vmin.f32 %v8089_v55, %v8090_v30 }
 0x540   : > { %v16788_v13 = vrot.slane %v4553_v15, %v18493_v51  ;;  %v4554_v40 = vcombine.low %v16757_v26, %v4289_v45  ;;  %v5981_v54 = vcombine.low %v16763_v53, %v5675_v41  ;;  %v5717_v63 = vadd.f32 %v5716_v17, %v5715_v46  ;;  %v18739_v15 = vld [vmem:[#allocation91_spill] sm:$0xff] }
 0x541   : > { %v7192_v29 = vrot.slane %v7184_v42, %v11677_v34  ;;  %v7185_v58 = vcombine.low %v16759_v36, %v6829_v0  ;;  %v8454_v35 = vrot.slane %v8446_v21, %v11677_v34  ;;  %v8447_v37 = vcombine.low %v16765_v31, %v8091_v25  ;;  %v18735_v36 = vld [vmem:[#allocation46_spill] sm:$0xff]  ;;  %v18741_v21 = vld [vmem:[#allocation17_spill] sm:$0xff] }
 0x542   : > { %v16797_v24 = vrot.slane %v4554_v40, %v18493_v51  ;;  %v16801_v23 = vrot.slane %v5981_v54, %v18493_v51  ;;  %v5982_v50 = vcombine.low %v16771_v2, %v5717_v63  ;;  %v4646_v59 = vmul.f32 %v18735_v36, %v18735_v36  ;;  %v18742_v25 = vld [vmem:[#allocation66_spill] sm:$0xff] }
 0x543   : > { %v7199_v26 = vrot.slane %v7185_v58, %v11677_v34  ;;  %v8461_v11 = vrot.slane %v8447_v37, %v11677_v34  ;;  %v4648_v9 = vmul.f32 %v18736_v20, %v18736_v20  ;;  %v4290_v2 = vadd.f32 %v18737_v28, %v18735_v36 }
 0x544   : > { %v16813_v31 = vrot.slane %v5982_v50, %v18493_v51  ;;  %v4678_v38 = vmul.f32 %v18737_v28, %v18737_v28  ;;  %v4647_v43 = vmul.f32 %v18738_v7, %v18738_v7  ;;  %v6414_v55 = vmax.f32 %v18735_v36, %v18737_v28 }
 0x545   : > { %v7200_v49 = vcombine.low %v7192_v29, %v7199_v26  ;;  %v8462_v48 = vcombine.low %v8454_v35, %v8461_v11  ;;  %v7676_v57 = vmin.f32 %v18735_v36, %v18737_v28  ;;  %v4332_v61 = vadd.f32 %v18739_v15, %v18736_v20 }
 0x546   : > { %v5718_v1 = vadd.f32 %v4678_v38, %v4646_v59  ;;  %v4680_v30 = vmul.f32 %v18739_v15, %v18739_v15  ;;  %v6440_v41 = vmax.f32 %v18736_v20, %v18739_v15  ;;  %v7702_v42 = vmin.f32 %v18736_v20, %v18739_v15 }
 0x547   : > { %v7268_v46 = vrot.slane %v7200_v49, 7  ;;  %v8524_v45 = vrot.slane %v8462_v48, 7  ;;  %v18740_v17 = vcombine.low %v16533_v4, %v16548_v27  ;;  %v4649_v40 = vmul.f32 %v18741_v21, %v18741_v21 }
 0x548   : > { %v4311_v54 = vadd.f32 %v18742_v25, %v18738_v7  ;;  %v4679_v29 = vmul.f32 %v18742_v25, %v18742_v25  ;;  %v18743_v58 = vcombine.low %v16540_v62, %v16577_v16  ;;  %v5760_v37 = vadd.f32 %v4680_v30, %v4648_v9  ;;  %v18744_v16 = vld [vmem:[#allocation67_spill] sm:$0xff]  ;;  %v18745_v30 = vld [vmem:[#allocation68_spill] sm:$0xff] }
 0x549   : > { %v7269_v0 = vsel %vm7223_vm0, %v7268_v46, %v18740_v17  ;;  %v6427_v4 = vmax.f32 %v18738_v7, %v18742_v25  ;;  %v7689_v11 = vmin.f32 %v18738_v7, %v18742_v25  ;;  %v4353_v62 = vadd.f32 %v18744_v16, %v18741_v21 }
 0x54a   : > { %v7270_v63 = vsel %vm7225_vm1, %v7268_v46, %v7269_v0  ;;  %v8525_v35 = vsel %vm7223_vm0, %v8524_v45, %v18743_v58  ;;  %v5739_v26 = vadd.f32 %v4679_v29, %v4647_v43  ;;  %v4681_v20 = vmul.f32 %v18744_v16, %v18744_v16  ;;  %v18748_v58 = vld [vmem:[#allocation64_spill] sm:$0xff] }
 0x54b   : > { %v7271_v27 = vsel %vm7227_vm2, %v7268_v46, %v7270_v63  ;;  %v8526_v50 = vsel %vm7225_vm1, %v8524_v45, %v8525_v35  ;;  %v6453_v49 = vmax.f32 %v18741_v21, %v18744_v16  ;;  %v7715_v38 = vmin.f32 %v18741_v21, %v18744_v16  ;;  %v18746_v21 = vld [vmem:[#allocation69_spill] sm:$0xff] }
 0x54c   : > { %v16857_v36 = vsel %vm7229_vm3, %v7268_v46, %v7271_v27  ;;  %v8527_v59 = vsel %vm7227_vm2, %v8524_v45, %v8526_v50  ;;  %v5781_v28 = vadd.f32 %v4681_v20, %v4649_v40  ;;  %v4291_v48 = vadd.f32 %v4290_v2, %v16260_v14  ;;  %v18749_v50 = vld [vmem:[#allocation63_spill] sm:$0xff]  ;;  %v18750_v20 = vld [vmem:[#allocation65_spill] sm:$0xff] }
 0x54d   : > { %v16865_v9 = vsel %vm7229_vm3, %v8524_v45, %v8527_v59  ;;  %v4710_v7 = vmul.f32 %v16260_v14, %v16260_v14  ;;  %v6415_v43 = vmax.f32 %v6414_v55, %v16260_v14  ;;  %v7677_v46 = vmin.f32 %v7676_v57, %v16260_v14  ;;  %v18747_v57 = vld [vmem:[#allocation62_spill] sm:$0xff] }
 0x54e   : > { %v4333_v45 = vadd.f32 %v4332_v61, %v18745_v30  ;;  %v4712_v17 = vmul.f32 %v18745_v30, %v18745_v30  ;;  %v6441_v0 = vmax.f32 %v6440_v41, %v18745_v30  ;;  %v7703_v40 = vmin.f32 %v7702_v42, %v18745_v30 }
 0x54f   : > { %v5719_v15 = vadd.f32 %v5718_v1, %v4710_v7  ;;  %v4312_v25 = vadd.f32 %v4311_v54, %v18746_v21  ;;  %v4711_v29 = vmul.f32 %v18746_v21, %v18746_v21  ;;  %v6428_v55 = vmax.f32 %v6427_v4, %v18746_v21 }
 0x550   : > { %v5761_v2 = vadd.f32 %v5760_v37, %v4712_v17  ;;  %v7690_v14 = vmin.f32 %v7689_v11, %v18746_v21  ;;  %v4354_v1 = vadd.f32 %v4353_v62, %v18747_v57  ;;  %v4713_v61 = vmul.f32 %v18747_v57, %v18747_v57 }
 0x551   : > { %v6454_v63 = vmax.f32 %v6453_v49, %v18747_v57  ;;  %v7716_v41 = vmin.f32 %v7715_v38, %v18747_v57  ;;  %v5740_v42 = vadd.f32 %v5739_v26, %v4711_v29  ;;  %v4292_v54 = vadd.f32 %v4291_v48, %v18748_v58 }
 0x552   : > { %v4742_v35 = vmul.f32 %v18748_v58, %v18748_v58  ;;  %v6416_v37 = vmax.f32 %v6415_v43, %v18748_v58  ;;  %v5782_v4 = vadd.f32 %v5781_v28, %v4713_v61  ;;  %v7678_v27 = vmin.f32 %v7677_v46, %v18748_v58  ;;  %v18751_v43 = vld [vmem:[#allocation92_spill] sm:$0xff] }
 0x553   : > { %v4334_v11 = vadd.f32 %v4333_v45, %v18749_v50  ;;  %v4744_v59 = vmul.f32 %v18749_v50, %v18749_v50  ;;  %v6442_v62 = vmax.f32 %v6441_v0, %v18749_v50  ;;  %v7704_v26 = vmin.f32 %v7703_v40, %v18749_v50 }
 0x554   : > { %v5720_v16 = vadd.f32 %v5719_v15, %v4742_v35  ;;  %v4313_v49 = vadd.f32 %v4312_v25, %v18750_v20  ;;  %v4743_v48 = vmul.f32 %v18750_v20, %v18750_v20  ;;  %v6429_v28 = vmax.f32 %v6428_v55, %v18750_v20 }
 0x555   : > { %v5762_v38 = vadd.f32 %v5761_v2, %v4744_v59  ;;  %v7691_v7 = vmin.f32 %v7690_v14, %v18750_v20  ;;  %v4355_v46 = vadd.f32 %v4354_v1, %v18751_v43  ;;  %v4745_v30 = vmul.f32 %v18751_v43, %v18751_v43 }
 0x556   : > { %v6455_v15 = vmax.f32 %v6454_v63, %v18751_v43  ;;  %v7717_v45 = vmin.f32 %v7716_v41, %v18751_v43  ;;  %v5741_v17 = vadd.f32 %v5740_v42, %v4743_v48  ;;  %v4293_v0 = vadd.f32 %v4292_v54, %v16357_v12 }
 0x557   : > { %v4774_v40 = vmul.f32 %v16357_v12, %v16357_v12  ;;  %v6417_v21 = vmax.f32 %v6416_v37, %v16357_v12  ;;  %v5783_v25 = vadd.f32 %v5782_v4, %v4745_v30  ;;  %v7679_v2 = vmin.f32 %v7678_v27, %v16357_v12 }
 0x558   : > { %v4335_v29 = vadd.f32 %v4334_v11, %v16359_v3  ;;  %v4776_v55 = vmul.f32 %v16359_v3, %v16359_v3  ;;  %v6443_v57 = vmax.f32 %v6442_v62, %v16359_v3  ;;  %v7705_v1 = vmin.f32 %v7704_v26, %v16359_v3 }
 0x559   : > { %v5721_v14 = vadd.f32 %v5720_v16, %v4774_v40  ;;  %v4314_v61 = vadd.f32 %v4313_v49, %v16361_v18  ;;  %v4775_v41 = vmul.f32 %v16361_v18, %v16361_v18  ;;  %v6430_v42 = vmax.f32 %v6429_v28, %v16361_v18 }
 0x55a   : > { %v5763_v63 = vadd.f32 %v5762_v38, %v4776_v55  ;;  %v7692_v12 = vmin.f32 %v7691_v7, %v16361_v18  ;;  %v4356_v58 = vadd.f32 %v4355_v46, %v16367_v8  ;;  %v4777_v54 = vmul.f32 %v16367_v8, %v16367_v8 }
 0x55b   : > { %v6456_v35 = vmax.f32 %v6455_v15, %v16367_v8  ;;  %v7718_v37 = vmin.f32 %v7717_v45, %v16367_v8  ;;  %v5742_v3 = vadd.f32 %v5741_v17, %v4775_v41  ;;  %v4294_v4 = vadd.f32 %v4293_v0, %v16377_v19 }
 0x55c   : > { %v4806_v27 = vmul.f32 %v16377_v19, %v16377_v19  ;;  %v6418_v50 = vmax.f32 %v6417_v21, %v16377_v19  ;;  %v5784_v11 = vadd.f32 %v5783_v25, %v4777_v54  ;;  %v7680_v18 = vmin.f32 %v7679_v2, %v16377_v19 }
 0x55d   : > { %v4336_v59 = vadd.f32 %v4335_v29, %v16379_v6  ;;  %v4808_v16 = vmul.f32 %v16379_v6, %v16379_v6  ;;  %v6444_v26 = vmax.f32 %v6443_v57, %v16379_v6  ;;  %v7706_v8 = vmin.f32 %v7705_v1, %v16379_v6 }
 0x55e   : > { %v5722_v62 = vadd.f32 %v5721_v14, %v4806_v27  ;;  %v4315_v20 = vadd.f32 %v4314_v61, %v16394_v32  ;;  %v4807_v38 = vmul.f32 %v16394_v32, %v16394_v32  ;;  %v6431_v48 = vmax.f32 %v6430_v42, %v16394_v32 }
 0x55f   : > { %v5764_v49 = vadd.f32 %v5763_v63, %v4808_v16  ;;  %v7693_v19 = vmin.f32 %v7692_v12, %v16394_v32  ;;  %v4357_v28 = vadd.f32 %v4356_v58, %v16396_v56  ;;  %v4809_v7 = vmul.f32 %v16396_v56, %v16396_v56 }
 0x560   : > { %v6457_v43 = vmax.f32 %v6456_v35, %v16396_v56  ;;  %v7719_v46 = vmin.f32 %v7718_v37, %v16396_v56  ;;  %v5743_v6 = vadd.f32 %v5742_v3, %v4807_v38  ;;  %v4295_v30 = vadd.f32 %v4294_v4, %v16424_v44 }
 0x561   : > { %v4838_v15 = vmul.f32 %v16424_v44, %v16424_v44  ;;  %v6419_v45 = vmax.f32 %v6418_v50, %v16424_v44  ;;  %v5785_v17 = vadd.f32 %v5784_v11, %v4809_v7  ;;  %v7681_v32 = vmin.f32 %v7680_v18, %v16424_v44 }
 0x562   : > { %v4337_v0 = vadd.f32 %v4336_v59, %v16430_v10  ;;  %v4840_v40 = vmul.f32 %v16430_v10, %v16430_v10  ;;  %v6445_v25 = vmax.f32 %v6444_v26, %v16430_v10  ;;  %v7707_v56 = vmin.f32 %v7706_v8, %v16430_v10 }
 0x563   : > { %v5723_v21 = vadd.f32 %v5722_v62, %v4838_v15  ;;  %v4316_v2 = vadd.f32 %v4315_v20, %v16439_v60  ;;  %v4839_v55 = vmul.f32 %v16439_v60, %v16439_v60  ;;  %v6432_v14 = vmax.f32 %v6431_v48, %v16439_v60 }
 0x564   : > { %v5765_v29 = vadd.f32 %v5764_v49, %v4840_v40  ;;  %v7694_v44 = vmin.f32 %v7693_v19, %v16439_v60  ;;  %v4358_v57 = vadd.f32 %v4357_v28, %v16444_v39  ;;  %v4841_v1 = vmul.f32 %v16444_v39, %v16444_v39  ;;  %v18752_v49 = vld [vmem:[#allocation71_spill] sm:$0xff] }
 0x565   : > { %v6458_v61 = vmax.f32 %v6457_v43, %v16444_v39  ;;  %v7720_v63 = vmin.f32 %v7719_v46, %v16444_v39  ;;  %v5744_v10 = vadd.f32 %v5743_v6, %v4839_v55  ;;  %v4296_v41 = vadd.f32 %v4295_v30, %v16448_v52 }
 0x566   : > { %v4870_v42 = vmul.f32 %v16448_v52, %v16448_v52  ;;  %v6420_v12 = vmax.f32 %v6419_v45, %v16448_v52  ;;  %v5786_v58 = vadd.f32 %v5785_v17, %v4841_v1  ;;  %v7682_v60 = vmin.f32 %v7681_v32, %v16448_v52 }
 0x567   : > { %v4338_v54 = vadd.f32 %v4337_v0, %v16450_v22  ;;  %v4872_v35 = vmul.f32 %v16450_v22, %v16450_v22  ;;  %v6446_v39 = vmax.f32 %v6445_v25, %v16450_v22  ;;  %v7708_v4 = vmin.f32 %v7707_v56, %v16450_v22 }
 0x568   : > { %v16979_v37 = vadd.f32 %v5723_v21, %v4870_v42  ;;  %v6421_v3 = vrot.slane %v6420_v12, 4  ;;  %v7683_v27 = vrot.slane %v7682_v60, 4  ;;  %v4317_v11 = vadd.f32 %v4316_v2, %v16460_v33 }
 0x569   : > { %v5766_v50 = vadd.f32 %v5765_v29, %v4872_v35  ;;  %v4871_v18 = vmul.f32 %v16460_v33, %v16460_v33  ;;  %v6447_v59 = vrot.slane %v6446_v39, 4  ;;  %v7709_v16 = vrot.slane %v7708_v4, 4 }
 0x56a   : > { %v6422_v52 = vmax.f32 %v6420_v12, %v6421_v3  ;;  %v6433_v62 = vmax.f32 %v6432_v14, %v16460_v33  ;;  %v7684_v26 = vmin.f32 %v7682_v60, %v7683_v27  ;;  %v7695_v20 = vmin.f32 %v7694_v44, %v16460_v33 }
 0x56b   : > { %v5745_v8 = vadd.f32 %v5744_v10, %v4871_v18  ;;  %v4359_v38 = vadd.f32 %v4358_v57, %v18752_v49  ;;  %v6448_v22 = vmax.f32 %v6446_v39, %v6447_v59  ;;  %v7710_v19 = vmin.f32 %v7708_v4, %v7709_v16  ;;  %v18753_v4 = vld [vmem:[#allocation72_spill] sm:$0xff] }
 0x56c   : > { %v6423_v48 = vrot.slane %v6422_v52, 2  ;;  %v6434_v28 = vrot.slane %v6433_v62, 4  ;;  %v7685_v7 = vrot.slane %v7684_v26, 2  ;;  %v7696_v43 = vrot.slane %v7695_v20, 4 }
 0x56d   : > { %v4873_v46 = vmul.f32 %v18752_v49, %v18752_v49  ;;  %v6459_v6 = vmax.f32 %v6458_v61, %v18752_v49  ;;  %v6449_v15 = vrot.slane %v6448_v22, 2  ;;  %v7711_v45 = vrot.slane %v7710_v19, 2 }
 0x56e   : > { %v6424_v30 = vmax.f32 %v6422_v52, %v6423_v48  ;;  %v6435_v17 = vmax.f32 %v6433_v62, %v6434_v28  ;;  %v7686_v32 = vmin.f32 %v7684_v26, %v7685_v7  ;;  %v7697_v0 = vmin.f32 %v7695_v20, %v7696_v43  ;;  %v18754_v62 = vld [vmem:[#allocation73_spill] sm:$0xff] }
 0x56f   : > { %v5787_v33 = vadd.f32 %v5786_v58, %v4873_v46  ;;  %v6460_v40 = vrot.slane %v6459_v6, 4  ;;  %v6450_v25 = vmax.f32 %v6448_v22, %v6449_v15  ;;  %v7712_v56 = vmin.f32 %v7710_v19, %v7711_v45 }
 0x570   : > { %v6425_v21 = vrot.slane %v6424_v30, 1  ;;  %v6436_v2 = vrot.slane %v6435_v17, 2  ;;  %v7687_v29 = vrot.slane %v7686_v32, 1  ;;  %v7698_v55 = vrot.slane %v7697_v0, 2 }
 0x571   : > { %v6461_v14 = vmax.f32 %v6459_v6, %v6460_v40  ;;  %v7721_v44 = vmin.f32 %v7720_v63, %v18752_v49  ;;  %v6451_v1 = vrot.slane %v6450_v25, 1  ;;  %v7713_v61 = vrot.slane %v7712_v56, 1  ;;  %v18755_v49 = vld [vmem:[#allocation87_spill] sm:$0xff]  ;;  %v18756_v6 = vld [vmem:[#allocation88_spill] sm:$0xff] }
 0x572   : > { %v6426_v57 = vmax.f32 %v6424_v30, %v6425_v21  ;;  %v6437_v10 = vmax.f32 %v6435_v17, %v6436_v2  ;;  %v7688_v42 = vmin.f32 %v7686_v32, %v7687_v29  ;;  %v7699_v12 = vmin.f32 %v7697_v0, %v7698_v55  ;;  %v18757_v0 = vld [vmem:[#allocation89_spill] sm:$0xff]  ;;  %v18758_v55 = vld [vmem:[#allocation78_spill] sm:$0xff] }
 0x573   : > { %v6462_v60 = vrot.slane %v6461_v14, 2  ;;  %v7722_v35 = vrot.slane %v7721_v44, 4  ;;  %v6452_v3 = vmax.f32 %v6450_v25, %v6451_v1  ;;  %v7714_v58 = vmin.f32 %v7712_v56, %v7713_v61  ;;  %v18759_v61 = vld [vmem:[#allocation79_spill] sm:$0xff] }
 0x574   : > { %v6438_v39 = vrot.slane %v6437_v10, 1  ;;  %v4297_v27 = vadd.f32 %v4296_v41, %v18753_v4  ;;  %v7700_v18 = vrot.slane %v7699_v12, 1  ;;  %v4902_v16 = vmul.f32 %v18753_v4, %v18753_v4 }
 0x575   : > { %v6463_v52 = vmax.f32 %v6461_v14, %v6462_v60  ;;  %v7723_v59 = vmin.f32 %v7721_v44, %v7722_v35  ;;  %v4339_v26 = vadd.f32 %v4338_v54, %v18754_v62  ;;  %v4904_v20 = vmul.f32 %v18754_v62, %v18754_v62 }
 0x576   : > { %v6439_v63 = vmax.f32 %v6437_v10, %v6438_v39  ;;  %v4318_v48 = vadd.f32 %v4317_v11, %v18755_v49  ;;  %v7701_v22 = vmin.f32 %v7699_v12, %v7700_v18  ;;  %v5725_v7 = vadd.f32 %v16979_v37, %v4902_v16 }
 0x577   : > { %v6464_v19 = vrot.slane %v6463_v52, 1  ;;  %v7724_v28 = vrot.slane %v7723_v59, 2  ;;  %v5767_v43 = vadd.f32 %v5766_v50, %v4904_v20  ;;  %v4903_v46 = vmul.f32 %v18755_v49, %v18755_v49 }
 0x578   : > { %v7065_v41 = vcombine.low %v6426_v57, %v6439_v63  ;;  %v4360_v30 = vadd.f32 %v4359_v38, %v18756_v6  ;;  %v8327_v15 = vcombine.low %v7688_v42, %v7701_v22  ;;  %v4905_v17 = vmul.f32 %v18756_v6, %v18756_v6  ;;  %v18762_v22 = vld [vmem:[#allocation74_spill] sm:$0xff] }
 0x579   : > { %v6465_v45 = vmax.f32 %v6463_v52, %v6464_v19  ;;  %v7725_v54 = vmin.f32 %v7723_v59, %v7724_v28  ;;  %v5746_v32 = vadd.f32 %v5745_v8, %v4903_v46  ;;  %v4298_v40 = vadd.f32 %v4297_v27, %v18757_v0  ;;  %v18760_v27 = vld [vmem:[#allocation80_spill] sm:$0xff] }
 0x57a   : > { %v17007_v11 = vrot.slane %v7065_v41, %v11677_v34  ;;  %v4934_v37 = vmul.f32 %v18757_v0, %v18757_v0  ;;  %v17013_v50 = vrot.slane %v8327_v15, %v11677_v34  ;;  %v5788_v25 = vadd.f32 %v5787_v33, %v4905_v17 }
 0x57b   : > { %v7066_v21 = vcombine.low %v6452_v3, %v6465_v45  ;;  %v7726_v38 = vrot.slane %v7725_v54, 1  ;;  %v6830_v2 = vmax.f32 %v18753_v4, %v18757_v0  ;;  %v8092_v29 = vmin.f32 %v18753_v4, %v18757_v0 }
 0x57c   : > { %v5726_v56 = vadd.f32 %v5725_v7, %v4934_v37  ;;  %v4340_v8 = vadd.f32 %v4339_v26, %v18758_v55  ;;  %v4936_v57 = vmul.f32 %v18758_v55, %v18758_v55  ;;  %v6856_v1 = vmax.f32 %v18754_v62, %v18758_v55 }
 0x57d   : > { %v17021_v14 = vrot.slane %v7066_v21, %v11677_v34  ;;  %v7727_v44 = vmin.f32 %v7725_v54, %v7726_v38  ;;  %v8118_v33 = vmin.f32 %v18754_v62, %v18758_v55  ;;  %v4319_v10 = vadd.f32 %v4318_v48, %v18759_v61 }
 0x57e   : > { %v4935_v42 = vmul.f32 %v18759_v61, %v18759_v61  ;;  %v6843_v12 = vmax.f32 %v18755_v49, %v18759_v61  ;;  %v5768_v3 = vadd.f32 %v5767_v43, %v4936_v57  ;;  %v8105_v39 = vmin.f32 %v18755_v49, %v18759_v61 }
 0x57f   : > { %v8328_v35 = vcombine.low %v7714_v58, %v7727_v44  ;;  %v4361_v18 = vadd.f32 %v4360_v30, %v18760_v27  ;;  %v4937_v52 = vmul.f32 %v18760_v27, %v18760_v27  ;;  %v6869_v59 = vmax.f32 %v18756_v6, %v18760_v27  ;;  %v18761_v58 = vld [vmem:[#allocation81_spill] sm:$0xff]  ;;  %v18766_v44 = vld [vmem:[#allocation59_spill] sm:$0xff] }
 0x580   : > { %v5747_v4 = vadd.f32 %v5746_v32, %v4935_v42  ;;  %v8131_v63 = vmin.f32 %v18756_v6, %v18760_v27  ;;  %v4299_v62 = vadd.f32 %v4298_v40, %v18761_v58  ;;  %v4966_v26 = vmul.f32 %v18761_v58, %v18761_v58  ;;  %v18763_v6 = vld [vmem:[#allocation76_spill] sm:$0xff]  ;;  %v18764_v32 = vld [vmem:[#allocation53_spill] sm:$0xff] }
 0x581   : > { %v17044_v16 = vrot.slane %v8328_v35, %v11677_v34  ;;  %v5789_v20 = vadd.f32 %v5788_v25, %v4937_v52  ;;  %v6831_v49 = vmax.f32 %v6830_v2, %v18761_v58  ;;  %v8093_v48 = vmin.f32 %v8092_v29, %v18761_v58  ;;  %v18765_v25 = vld [vmem:[#allocation58_spill] sm:$0xff]  ;;  %v18767_v42 = vld [vmem:[#allocation60_spill] sm:$0xff]  ;;  %v18768_v27 = vld [vmem:[#allocation61_spill] sm:$0xff] }
 0x582   : > { %v4341_v19 = vadd.f32 %v4340_v8, %v18762_v22  ;;  %v5727_v7 = vadd.f32 %v5726_v56, %v4966_v26  ;;  %v4968_v41 = vmul.f32 %v18762_v22, %v18762_v22  ;;  %v6857_v43 = vmax.f32 %v6856_v1, %v18762_v22 }
 0x583   : > { %v8119_v46 = vmin.f32 %v8118_v33, %v18762_v22  ;;  %v4320_v30 = vadd.f32 %v4319_v10, %v18763_v6  ;;  %v4967_v15 = vmul.f32 %v18763_v6, %v18763_v6  ;;  %v6844_v45 = vmax.f32 %v6843_v12, %v18763_v6 }
 0x584   : > { %v5769_v54 = vadd.f32 %v5768_v3, %v4968_v41  ;;  %v8106_v17 = vmin.f32 %v8105_v39, %v18763_v6  ;;  %v4362_v0 = vadd.f32 %v4361_v18, %v18764_v32  ;;  %v4969_v40 = vmul.f32 %v18764_v32, %v18764_v32 }
 0x585   : > { %v5748_v37 = vadd.f32 %v5747_v4, %v4967_v15  ;;  %v6870_v21 = vmax.f32 %v6869_v59, %v18764_v32  ;;  %v8132_v38 = vmin.f32 %v8131_v63, %v18764_v32  ;;  %v4300_v56 = vadd.f32 %v4299_v62, %v18765_v25  ;;  %v18769_v62 = vld [vmem:[#allocation52_spill] sm:$0xff] }
 0x586   : > { %v5790_v2 = vadd.f32 %v5789_v20, %v4969_v40  ;;  %v4998_v29 = vmul.f32 %v18765_v25, %v18765_v25  ;;  %v6832_v55 = vmax.f32 %v6831_v49, %v18765_v25  ;;  %v8094_v8 = vmin.f32 %v8093_v48, %v18765_v25 }
 0x587   : > { %v4342_v57 = vadd.f32 %v4341_v19, %v18766_v44  ;;  %v5000_v1 = vmul.f32 %v18766_v44, %v18766_v44  ;;  %v6858_v33 = vmax.f32 %v6857_v43, %v18766_v44  ;;  %v8120_v61 = vmin.f32 %v8119_v46, %v18766_v44  ;;  %v18770_v19 = vld [vmem:[#allocation56_spill] sm:$0xff] }
 0x588   : > { %v5728_v10 = vadd.f32 %v5727_v7, %v4998_v29  ;;  %v4321_v12 = vadd.f32 %v4320_v30, %v18767_v42  ;;  %v4999_v35 = vmul.f32 %v18767_v42, %v18767_v42  ;;  %v6845_v3 = vmax.f32 %v6844_v45, %v18767_v42  ;;  %v18771_v30 = vld [vmem:[#allocation26_spill] sm:$0xff] }
 0x589   : > { %v5770_v39 = vadd.f32 %v5769_v54, %v5000_v1  ;;  %v8107_v4 = vmin.f32 %v8106_v17, %v18767_v42  ;;  %v4363_v18 = vadd.f32 %v4362_v0, %v18768_v27  ;;  %v5001_v52 = vmul.f32 %v18768_v27, %v18768_v27  ;;  %v18772_v0 = vld [vmem:[#allocation27_spill] sm:$0xff] }
 0x58a   : > { %v5749_v59 = vadd.f32 %v5748_v37, %v4999_v35  ;;  %v6871_v63 = vmax.f32 %v6870_v21, %v18768_v27  ;;  %v8133_v58 = vmin.f32 %v8132_v38, %v18768_v27  ;;  %v4301_v26 = vadd.f32 %v4300_v56, %v18769_v62  ;;  %v18773_v56 = vld [vmem:[#allocation57_spill] sm:$0xff] }
 0x58b   : > { %v5791_v20 = vadd.f32 %v5790_v2, %v5001_v52  ;;  %v5030_v49 = vmul.f32 %v18769_v62, %v18769_v62  ;;  %v6833_v48 = vmax.f32 %v6832_v55, %v18769_v62  ;;  %v8095_v22 = vmin.f32 %v8094_v8, %v18769_v62 }
 0x58c   : > { %v4343_v7 = vadd.f32 %v4342_v57, %v18770_v19  ;;  %v5032_v41 = vmul.f32 %v18770_v19, %v18770_v19  ;;  %v6859_v43 = vmax.f32 %v6858_v33, %v18770_v19  ;;  %v8121_v46 = vmin.f32 %v8120_v61, %v18770_v19  ;;  %v18774_v57 = vld [vmem:[#allocation20_spill] sm:$0xff] }
 0x58d   : > { %v5729_v6 = vadd.f32 %v5728_v10, %v5030_v49  ;;  %v4322_v15 = vadd.f32 %v4321_v12, %v18771_v30  ;;  %v5031_v45 = vmul.f32 %v18771_v30, %v18771_v30  ;;  %v17104_v54 = vmax.f32 %v6845_v3, %v18771_v30  ;;  %v18775_v12 = vld [vmem:[#allocation28_spill] sm:$0xff] }
 0x58e   : > { %v5771_v17 = vadd.f32 %v5770_v39, %v5032_v41  ;;  %v17107_v32 = vmin.f32 %v8107_v4, %v18771_v30  ;;  %v4364_v40 = vadd.f32 %v4363_v18, %v18772_v0  ;;  %v5033_v37 = vmul.f32 %v18772_v0, %v18772_v0  ;;  %v18776_v18 = vld [vmem:[#allocation29_spill] sm:$0xff] }
 0x58f   : > { %v5750_v21 = vadd.f32 %v5749_v59, %v5031_v45  ;;  %v17113_v38 = vmax.f32 %v6871_v63, %v18772_v0  ;;  %v17116_v25 = vmin.f32 %v8133_v58, %v18772_v0  ;;  %v4302_v2 = vadd.f32 %v4301_v26, %v18773_v56  ;;  %v18777_v26 = vld [vmem:[#allocation21_spill] sm:$0xff] }
 0x590   : > { %v5792_v29 = vadd.f32 %v5791_v20, %v5033_v37  ;;  %v5062_v55 = vmul.f32 %v18773_v56, %v18773_v56  ;;  %v6834_v8 = vmax.f32 %v6833_v48, %v18773_v56  ;;  %v8096_v44 = vmin.f32 %v8095_v22, %v18773_v56 }
 0x591   : > { %v4344_v1 = vadd.f32 %v4343_v7, %v18774_v57  ;;  %v5064_v33 = vmul.f32 %v18774_v57, %v18774_v57  ;;  %v6860_v61 = vmax.f32 %v6859_v43, %v18774_v57  ;;  %v8122_v10 = vmin.f32 %v8121_v46, %v18774_v57  ;;  %v18778_v7 = vld [vmem:[#allocation30_spill] sm:$0xff] }
 0x592   : > { %v5730_v42 = vadd.f32 %v5729_v6, %v5062_v55  ;;  %v17129_v35 = vadd.f32 %v4322_v15, %v18775_v12  ;;  %v5063_v3 = vmul.f32 %v18775_v12, %v18775_v12  ;;  %v6847_v39 = vmax.f32 %v17104_v54, %v18775_v12  ;;  %v18779_v15 = vld [vmem:[#allocation31_spill] sm:$0xff] }
 0x593   : > { %v5772_v4 = vadd.f32 %v5771_v17, %v5064_v33  ;;  %v8109_v27 = vmin.f32 %v17107_v32, %v18775_v12  ;;  %v17138_v52 = vadd.f32 %v4364_v40, %v18776_v18  ;;  %v5065_v59 = vmul.f32 %v18776_v18, %v18776_v18  ;;  %v18780_v17 = vld [vmem:[#allocation32_spill] sm:$0xff]  ;;  %v18781_v40 = vld [vmem:[#allocation33_spill] sm:$0xff] }
 0x594   : > { %v17142_v63 = vadd.f32 %v5750_v21, %v5063_v3  ;;  %v6873_v58 = vmax.f32 %v17113_v38, %v18776_v18  ;;  %v8135_v62 = vmin.f32 %v17116_v25, %v18776_v18  ;;  %v4303_v20 = vadd.f32 %v4302_v2, %v18777_v26 }
 0x595   : > { %v17149_v49 = vadd.f32 %v5792_v29, %v5065_v59  ;;  %v5094_v48 = vmul.f32 %v18777_v26, %v18777_v26  ;;  %v6835_v22 = vmax.f32 %v6834_v8, %v18777_v26  ;;  %v8097_v19 = vmin.f32 %v8096_v44, %v18777_v26  ;;  %v18782_v8 = vld [vmem:[#allocation34_spill] sm:$0xff] }
 0x596   : > { %v4345_v41 = vadd.f32 %v4344_v1, %v18778_v7  ;;  %v5096_v43 = vmul.f32 %v18778_v7, %v18778_v7  ;;  %v6861_v46 = vmax.f32 %v6860_v61, %v18778_v7  ;;  %v8123_v6 = vmin.f32 %v8122_v10, %v18778_v7 }
 0x597   : > { %v5731_v30 = vadd.f32 %v5730_v42, %v5094_v48  ;;  %v5095_v45 = vmul.f32 %v18779_v15, %v18779_v15  ;;  %v17164_v0 = vmul.f32 %v18780_v17, %v18780_v17  ;;  %v4304_v37 = vadd.f32 %v4303_v20, %v18781_v40 }
 0x598   : > { %v5773_v21 = vadd.f32 %v5772_v4, %v5096_v43  ;;  %v5126_v56 = vmul.f32 %v18781_v40, %v18781_v40  ;;  %v6836_v2 = vmax.f32 %v6835_v22, %v18781_v40  ;;  %v8098_v29 = vmin.f32 %v8097_v19, %v18781_v40 }
 0x599   : > { %v4305_v55 = vrot.slane %v4304_v37, 4  ;;  %v4346_v44 = vadd.f32 %v4345_v41, %v18782_v8  ;;  %v5128_v57 = vmul.f32 %v18782_v8, %v18782_v8  ;;  %v6862_v1 = vmax.f32 %v6861_v46, %v18782_v8 }
 0x59a   : > { %v5732_v33 = vadd.f32 %v5731_v30, %v5126_v56  ;;  %v6837_v61 = vrot.slane %v6836_v2, 4  ;;  %v8099_v10 = vrot.slane %v8098_v29, 4  ;;  %v8124_v42 = vmin.f32 %v8123_v6, %v18782_v8 }
 0x59b   : > { %v4306_v3 = vadd.f32 %v4305_v55, %v4304_v37  ;;  %v4347_v4 = vrot.slane %v4346_v44, 4  ;;  %v5774_v59 = vadd.f32 %v5773_v21, %v5128_v57  ;;  %v6863_v26 = vrot.slane %v6862_v1, 4 }
 0x59c   : > { %v5733_v20 = vrot.slane %v5732_v33, 4  ;;  %v6838_v48 = vmax.f32 %v6836_v2, %v6837_v61  ;;  %v8100_v22 = vmin.f32 %v8098_v29, %v8099_v10  ;;  %v8125_v19 = vrot.slane %v8124_v42, 4 }
 0x59d   : > { %v4307_v7 = vrot.slane %v4306_v3, 2  ;;  %v4348_v41 = vadd.f32 %v4347_v4, %v4346_v44  ;;  %v5775_v43 = vrot.slane %v5774_v59, 4  ;;  %v6864_v40 = vmax.f32 %v6862_v1, %v6863_v26 }
 0x59e   : > { %v5734_v28 = vadd.f32 %v5733_v20, %v5732_v33  ;;  %v6839_v60 = vrot.slane %v6838_v48, 2  ;;  %v8101_v46 = vrot.slane %v8100_v22, 2  ;;  %v8126_v30 = vmin.f32 %v8124_v42, %v8125_v19 }
 0x59f   : > { %v4308_v56 = vadd.f32 %v4307_v7, %v4306_v3  ;;  %v4349_v5 = vrot.slane %v4348_v41, 2  ;;  %v5776_v53 = vadd.f32 %v5775_v43, %v5774_v59  ;;  %v6865_v6 = vrot.slane %v6864_v40, 2 }
 0x5a0   : > { %v5735_v37 = vrot.slane %v5734_v28, 2  ;;  %v6840_v55 = vmax.f32 %v6838_v48, %v6839_v60  ;;  %v8102_v21 = vmin.f32 %v8100_v22, %v8101_v46  ;;  %v8127_v8 = vrot.slane %v8126_v30, 2 }
 0x5a1   : > { %v4309_v57 = vrot.slane %v4308_v56, 1  ;;  %v4350_v2 = vadd.f32 %v4349_v5, %v4348_v41  ;;  %v5777_v29 = vrot.slane %v5776_v53, 2  ;;  %v6866_v61 = vmax.f32 %v6864_v40, %v6865_v6 }
 0x5a2   : > { %v5736_v10 = vadd.f32 %v5735_v37, %v5734_v28  ;;  %v6841_v44 = vrot.slane %v6840_v55, 1  ;;  %v8103_v4 = vrot.slane %v8102_v21, 1  ;;  %v8128_v1 = vmin.f32 %v8126_v30, %v8127_v8 }
 0x5a3   : > { %v17176_v33 = vadd.f32 %v4309_v57, %v4308_v56  ;;  %v4351_v26 = vrot.slane %v4350_v2, 1  ;;  %v5778_v42 = vadd.f32 %v5777_v29, %v5776_v53  ;;  %v6867_v3 = vrot.slane %v6866_v61, 1  ;;  %v18783_v53 = vld [vmem:[#allocation35_spill] sm:$0xff] }
 0x5a4   : > { %v5737_v20 = vrot.slane %v5736_v10, 1  ;;  %v17178_v59 = vmax.f32 %v6840_v55, %v6841_v44  ;;  %v17180_v19 = vmin.f32 %v8102_v21, %v8103_v4  ;;  %v8129_v60 = vrot.slane %v8128_v1, 1 }
 0x5a5   : > { %v17182_v48 = vadd.f32 %v4351_v26, %v4350_v2  ;;  %v5779_v5 = vrot.slane %v5778_v42, 1  ;;  %v17184_v22 = vmax.f32 %v6866_v61, %v6867_v3  ;;  %v4324_v28 = vadd.f32 %v17129_v35, %v18779_v15 }
 0x5a6   : > { %v17188_v7 = vadd.f32 %v5737_v20, %v5736_v10  ;;  %v17190_v41 = vmin.f32 %v8128_v1, %v8129_v60  ;;  %v5127_v43 = vmul.f32 %v18783_v53, %v18783_v53  ;;  %v5752_v40 = vadd.f32 %v17142_v63, %v5095_v45 }
 0x5a7   : > { %v17195_v46 = vadd.f32 %v5779_v5, %v5778_v42  ;;  %v4325_v30 = vadd.f32 %v4324_v28, %v18783_v53  ;;  %v6848_v56 = vmax.f32 %v6847_v39, %v18779_v15  ;;  %v8110_v35 = vmin.f32 %v8109_v27, %v18779_v15 }
 0x5a8   : > { %v5753_v6 = vadd.f32 %v5752_v40, %v5127_v43  ;;  %v4366_v37 = vadd.f32 %v17138_v52, %v18780_v17  ;;  %v5129_v63 = vmul.f32 %v16749_v47, %v16749_v47  ;;  %v5794_v45 = vadd.f32 %v17149_v49, %v17164_v0 }
 0x5a9   : > { %v4326_v55 = vrot.slane %v4325_v30, 4  ;;  %v6849_v21 = vmax.f32 %v6848_v56, %v18783_v53  ;;  %v8111_v54 = vmin.f32 %v8110_v35, %v18783_v53  ;;  %v6874_v32 = vmax.f32 %v6873_v58, %v18780_v17 }
 0x5aa   : > { %v5754_v12 = vrot.slane %v5753_v6, 4  ;;  %v4367_v39 = vadd.f32 %v4366_v37, %v16749_v47  ;;  %v5795_v27 = vadd.f32 %v5794_v45, %v5129_v63  ;;  %v8136_v52 = vmin.f32 %v8135_v62, %v18780_v17 }
 0x5ab   : > { %v4327_v49 = vadd.f32 %v4326_v55, %v4325_v30  ;;  %v6850_v15 = vrot.slane %v6849_v21, 4  ;;  %v8112_v0 = vrot.slane %v8111_v54, 4  ;;  %v6875_v8 = vmax.f32 %v6874_v32, %v16749_v47 }
 0x5ac   : > { %v5755_v57 = vadd.f32 %v5754_v12, %v5753_v6  ;;  %v4368_v2 = vrot.slane %v4367_v39, 4  ;;  %v5796_v29 = vrot.slane %v5795_v27, 4  ;;  %v8137_v38 = vmin.f32 %v8136_v52, %v16749_v47 }
 0x5ad   : > { %v4328_v58 = vrot.slane %v4327_v49, 2  ;;  %v6851_v61 = vmax.f32 %v6849_v21, %v6850_v15  ;;  %v8113_v10 = vmin.f32 %v8111_v54, %v8112_v0  ;;  %v6876_v44 = vrot.slane %v6875_v8, 4 }
 0x5ae   : > { %v5756_v4 = vrot.slane %v5755_v57, 2  ;;  %v4369_v1 = vadd.f32 %v4368_v2, %v4367_v39  ;;  %v5797_v26 = vadd.f32 %v5796_v29, %v5795_v27  ;;  %v8138_v42 = vrot.slane %v8137_v38, 4 }
 0x5af   : > { %v4329_v25 = vadd.f32 %v4328_v58, %v4327_v49  ;;  %v6852_v18 = vrot.slane %v6851_v61, 2  ;;  %v8114_v62 = vrot.slane %v8113_v10, 2  ;;  %v6877_v17 = vmax.f32 %v6875_v8, %v6876_v44 }
 0x5b0   : > { %v5757_v3 = vadd.f32 %v5756_v4, %v5755_v57  ;;  %v4370_v20 = vrot.slane %v4369_v1, 2  ;;  %v5798_v60 = vrot.slane %v5797_v26, 2  ;;  %v8139_v5 = vmin.f32 %v8137_v38, %v8138_v42 }
 0x5b1   : > { %v4330_v28 = vrot.slane %v4329_v25, 1  ;;  %v6853_v53 = vmax.f32 %v6851_v61, %v6852_v18  ;;  %v8115_v43 = vmin.f32 %v8113_v10, %v8114_v62  ;;  %v6878_v47 = vrot.slane %v6877_v17, 2 }
 0x5b2   : > { %v5758_v40 = vrot.slane %v5757_v3, 1  ;;  %v4371_v30 = vadd.f32 %v4370_v20, %v4369_v1  ;;  %v5799_v56 = vadd.f32 %v5798_v60, %v5797_v26  ;;  %v8140_v35 = vrot.slane %v8139_v5, 2 }
 0x5b3   : > { %v4331_v6 = vadd.f32 %v4330_v28, %v4329_v25  ;;  %v6854_v37 = vrot.slane %v6853_v53, 1  ;;  %v8116_v63 = vrot.slane %v8115_v43, 1  ;;  %v6879_v45 = vmax.f32 %v6877_v17, %v6878_v47 }
 0x5b4   : > { %v5759_v55 = vadd.f32 %v5758_v40, %v5757_v3  ;;  %v4372_v21 = vrot.slane %v4371_v30, 1  ;;  %v5800_v54 = vrot.slane %v5799_v56, 1  ;;  %v8141_v32 = vmin.f32 %v8139_v5, %v8140_v35 }
 0x5b5   : > { %v4555_v12 = vcombine.low %v17176_v33, %v4331_v6  ;;  %v6855_v39 = vmax.f32 %v6853_v53, %v6854_v37  ;;  %v8117_v27 = vmin.f32 %v8115_v43, %v8116_v63  ;;  %v6880_v52 = vrot.slane %v6879_v45, 1 }
 0x5b6   : > { %v5983_v49 = vcombine.low %v17188_v7, %v5759_v55  ;;  %v4373_v15 = vadd.f32 %v4372_v21, %v4371_v30  ;;  %v5801_v0 = vadd.f32 %v5800_v54, %v5799_v56  ;;  %v8142_v8 = vrot.slane %v8141_v32, 1 }
 0x5b7   : > { %v4577_v57 = vrot.slane %v4555_v12, %v18493_v51  ;;  %v7201_v2 = vcombine.low %v17178_v59, %v6855_v39  ;;  %v8463_v29 = vcombine.low %v17180_v19, %v8117_v27  ;;  %v6881_v38 = vmax.f32 %v6879_v45, %v6880_v52  ;;  %v10737_v12 = vld [vmem:[%s13243_s27 + $0x30] ss:$2 sm:$0xff] }
 0x5b8   : > { %v6005_v58 = vrot.slane %v5983_v49, %v18493_v51  ;;  %v4556_v61 = vcombine.low %v17182_v48, %v4373_v15  ;;  %v5984_v33 = vcombine.low %v17195_v46, %v5801_v0  ;;  %v8143_v10 = vmin.f32 %v8141_v32, %v8142_v8 }
 0x5b9   : > { %v7209_v44 = vrot.slane %v7201_v2, %v11677_v34  ;;  %v7202_v7 = vcombine.low %v17184_v22, %v6881_v38  ;;  %v8471_v4 = vrot.slane %v8463_v29, %v11677_v34  ;;  %v18784_v46 = vcombine.low %v16788_v13, %v16797_v24  ;;  %v10741_v29 = vld [vmem:[%s13243_s27 + $0x31] ss:$2 sm:$0xff] }
 0x5ba   : > { %v4584_v1 = vrot.slane %v4556_v61, %v18493_v51  ;;  %v6012_v59 = vrot.slane %v5984_v33, %v18493_v51  ;;  %v8464_v19 = vcombine.low %v17190_v41, %v8143_v10  ;;  %v18785_v62 = vcombine.low %v16801_v23, %v16813_v31  ;;  %v18788_v10 = vld [vmem:[#allocation44_spill] sm:$0xff] }
 0x5bb   : > { %v7216_v26 = vrot.slane %v7202_v7, %v11677_v34  ;;  %v4593_v18 = vrot.slane %v18784_v46, %v18493_v51  ;;  %v18786_v43 = vcombine.low %v17007_v11, %v17021_v14  ;;  %v18787_v23 = vcombine.low %v17013_v50, %v17044_v16  ;;  %v18789_v7 = vld [vmem:[#allocation45_spill] sm:$0xff] }
 0x5bc   : > { %v4586_v42 = vcombine.low %v4577_v57, %v4584_v1  ;;  %v6014_v25 = vcombine.low %v6005_v58, %v6012_v59  ;;  %v8478_v48 = vrot.slane %v8464_v19, %v11677_v34  ;;  %v6021_v17 = vrot.slane %v18785_v62, %v18493_v51  ;;  %v18790_v1 = vld [vmem:[#allocation82_spill] sm:$0xff]  ;;  %v18791_v19 = vld [vmem:[#allocation83_spill] sm:$0xff] }
 0x5bd   : > { %v7217_v22 = vcombine.low %v7209_v44, %v7216_v26  ;;  %v8908_v50 = vcombine.high %v16857_v36, %v16857_v36  ;;  %v9124_v16 = vcombine.high %v16865_v9, %v16865_v9  ;;  %v8915_v55 = vrot.slane %v16857_v36, %v11677_v34 }
 0x5be   : > { %v4600_v3 = vrot.slane %v4586_v42, %v18493_v51  ;;  %v6028_v41 = vrot.slane %v6014_v25, %v18493_v51  ;;  %v8479_v20 = vcombine.low %v8471_v4, %v8478_v48  ;;  %v9131_v54 = vrot.slane %v16865_v9, %v11677_v34  ;;  %v18792_v42 = vld [vmem:[#allocation84_spill] sm:$0xff]  ;;  %v18793_v48 = vld [vmem:[#allocation49_spill] sm:$0xff] }
 0x5bf   : > { %v7275_v60 = vrot.slane %v7217_v22, 7  ;;  %v8922_v21 = vrot.slane %v8908_v50, %v11677_v34  ;;  %v9138_v32 = vrot.slane %v9124_v16, %v11677_v34  ;;  %v8923_v0 = vcombine.high %v8915_v55, %v8915_v55  ;;  %v18794_v22 = vld [vmem:[#allocation54_spill] sm:$0xff] }
 0x5c0   : > { %v4601_v5 = vcombine.low %v4593_v18, %v4600_v3  ;;  %v6029_v28 = vcombine.low %v6021_v17, %v6028_v41  ;;  %v8531_v53 = vrot.slane %v8479_v20, 7  ;;  %v9139_v36 = vcombine.high %v9131_v54, %v9131_v54  ;;  %v18795_v17 = vld [vmem:[#allocation19_spill] sm:$0xff] }
 0x5c1   : > { %v7276_v13 = vsel %vm7223_vm0, %v7275_v60, %v18786_v43  ;;  %v8924_v8 = vcombine.high %v8922_v21, %v8922_v21  ;;  %v9140_v57 = vcombine.high %v9138_v32, %v9138_v32 }
 0x5c2   : > { %v7277_v24 = vsel %vm7225_vm1, %v7275_v60, %v7276_v13  ;;  %v8532_v31 = vsel %vm7223_vm0, %v8531_v53, %v18787_v23  ;;  %v8570_v47 = vmul.f32 0.0078125, %v4601_v5  ;;  %v8578_v40 = vmul.f32 0.0078125, %v6029_v28 }
 0x5c3   : > { %v7278_v51 = vsel %vm7227_vm2, %v7275_v60, %v7277_v24  ;;  %v8533_v30 = vsel %vm7225_vm1, %v8531_v53, %v8532_v31 }
 0x5c4   : > { %v7279_v56 = vsel %vm7229_vm3, %v7275_v60, %v7278_v51  ;;  %v8534_v11 = vsel %vm7227_vm2, %v8531_v53, %v8533_v30  ;;  %v8582_v14 = vmul.f32 %v8570_v47, %v8570_v47 }
 0x5c5   : > { %v8535_v35 = vsel %vm7229_vm3, %v8531_v53, %v8534_v11  ;;  %v8925_v63 = vcombine.high %v7279_v56, %v7279_v56  ;;  %v8932_v39 = vrot.slane %v7279_v56, %v11677_v34  ;;  %v18796_v11 = vmov 0  }
 0x5c6   : > { %v8586_v6 = vsub.f32 %v8578_v40, %v8582_v14  ;;  %v9141_v45 = vcombine.high %v8535_v35, %v8535_v35  ;;  %v9148_v52 = vrot.slane %v8535_v35, %v11677_v34 }
 0x5c7   : > { %v8939_v27 = vrot.slane %v8925_v63, %v11677_v34  ;;  %v8940_v38 = vcombine.high %v8932_v39, %v8932_v39 }
 0x5c8   : > { %v8597_v37 = vadd.f32 1e-05, %v8586_v6  ;;  %v9155_v49 = vrot.slane %v9141_v45, %v11677_v34  ;;  %v9156_v58 = vcombine.high %v9148_v52, %v9148_v52 }
 0x5c9   : > { %v8941_v9 = vcombine.high %v8939_v27, %v8939_v27 }
 0x5ca   : > { %10861 = vrsqrt.f32 %v8597_v37  ;;  %v9157_v61 = vcombine.high %v9155_v49, %v9155_v49 }
 0x5d4   : > { %v10862_v15 = vpop.eup %10861 }
 0x5d5   : > { %v8605_v2 = vmul.f32 %v10862_v15, %v10737_v12 }
 0x5d7   : > { %v8617_v33 = vmul.f32 %v8605_v2, %v8570_v47  ;;  %vm8625_vm0 = vcmp.ge.f32.partialorder %v8605_v2, 0.0  ;;  %v8737_v44 = vrot.slane %v8605_v2, %v18788_v10  ;;  %v8741_v4 = vrot.slane %v8605_v2, %v18789_v7 }
 0x5d8   : > { %v8745_v59 = vrot.slane %v8605_v2, %v18790_v1  ;;  %v8749_v26 = vrot.slane %v8605_v2, %v18791_v19  ;;  %v8753_v25 = vrot.slane %v8605_v2, %v18792_v42  ;;  %v8757_v46 = vrot.slane %v8605_v2, %v18793_v48 }
 0x5d9   : > { %v8621_v18 = vsub.f32 %v10741_v29, %v8617_v33  ;;  %v8761_v62 = vrot.slane %v8605_v2, %v18794_v22  ;;  %v8765_v3 = vrot.slane %v8605_v2, %v18795_v17  ;;  %v8998_v41 = vmul.f32 %v8915_v55, %v8737_v44 }
 0x5da   : > { %v8999_v20 = vmul.f32 %v8923_v0, %v8741_v4  ;;  %v9000_v60 = vmul.f32 %v8922_v21, %v8745_v59  ;;  %v9001_v5 = vmul.f32 %v8924_v8, %v8749_v26  ;;  %v9002_v28 = vmul.f32 %v8932_v39, %v8753_v25  ;;  %v18820_v39 = vld [vmem:[#allocation55_spill] sm:$0xff] }
 0x5db   : > { %v9003_v53 = vmul.f32 %v8940_v38, %v8757_v46  ;;  %v9004_v43 = vmul.f32 %v8939_v27, %v8761_v62  ;;  %v9005_v13 = vmul.f32 %v8941_v9, %v8765_v3  ;;  %v9214_v24 = vmul.f32 %v9131_v54, %v8737_v44  ;;  %v18821_v27 = vld [vmem:[#allocation50_spill] sm:$0xff] }
 0x5dc   : > { %v9215_v23 = vmul.f32 %v9139_v36, %v8741_v4  ;;  %v9216_v31 = vmul.f32 %v9138_v32, %v8745_v59  ;;  %v9217_v47 = vmul.f32 %v9140_v57, %v8749_v26  ;;  %v9218_v40 = vmul.f32 %v9148_v52, %v8753_v25 }
 0x5dd   : > { %v9219_v51 = vmul.f32 %v9156_v58, %v8757_v46  ;;  %v9220_v30 = vmul.f32 %v9155_v49, %v8761_v62  ;;  %v9221_v56 = vmul.f32 %v9157_v61, %v8765_v3  ;;  %v9225_v14 = vsel %vm8625_vm0, 1, %v18796_v11 }
 0x5de   : > { %v9325_v35 = vrot.slane %v9225_v14, %v18788_v10  ;;  %v9329_v6 = vrot.slane %v9225_v14, %v18789_v7  ;;  %v9333_v37 = vrot.slane %v9225_v14, %v18790_v1  ;;  %v9337_v50 = vrot.slane %v9225_v14, %v18791_v19 }
 0x5df   : > { %v9341_v16 = vrot.slane %v9225_v14, %v18792_v42  ;;  %v9345_v63 = vrot.slane %v9225_v14, %v18793_v48  ;;  %v9349_v45 = vrot.slane %v9225_v14, %v18794_v22  ;;  %v9353_v55 = vrot.slane %v9225_v14, %v18795_v17 }
 0x5e0   : > { %vm17299_vm1 = vcmp.eq.s32.totalorder %v9325_v35, 1  ;;  %vm17303_vm2 = vcmp.eq.s32.totalorder %v9329_v6, 1  ;;  %vm17307_vm3 = vcmp.eq.s32.totalorder %v9333_v37, 1  ;;  %vm17311_vm7 = vcmp.eq.s32.totalorder %v9337_v50, 1  ;;  %v18816_v37 = vld [vmem:[#allocation51_spill] sm:$0xff]  ;;  %v18817_v50 = vld [vmem:[#allocation85_spill] sm:$0xff] }
 0x5e1   : > { %vm17315_vm8 = vcmp.eq.s32.totalorder %v9341_v16, 1  ;;  %vm17319_vm9 = vcmp.eq.s32.totalorder %v9345_v63, 1  ;;  %vm17323_vm10 = vcmp.eq.s32.totalorder %v9349_v45, 1  ;;  %vm17327_vm11 = vcmp.eq.s32.totalorder %v9353_v55, 1 }
 0x5e2   : > { %v9410_v15 = vsel %vm17299_vm1, %v8998_v41, %v9214_v24  ;;  %v9411_v0 = vsel %vm17303_vm2, %v8999_v20, %v9215_v23  ;;  %v9412_v8 = vsel %vm17307_vm3, %v9000_v60, %v9216_v31  ;;  %v9413_v36 = vsel %vm17311_vm7, %v9001_v5, %v9217_v47  ;;  %v18814_v31 = vld [vmem:[#allocation70_spill] sm:$0xff] }
 0x5e3   : > { %v9414_v57 = vsel %vm17315_vm8, %v9002_v28, %v9218_v40  ;;  %v9415_v2 = vsel %vm17319_vm9, %v9003_v53, %v9219_v51  ;;  %v9416_v29 = vsel %vm17323_vm10, %v9004_v43, %v9220_v30  ;;  %v9417_v38 = vsel %vm17327_vm11, %v9005_v13, %v9221_v56  ;;  %v18813_v53 = vld [vmem:[#allocation86_spill] sm:$0xff] }
 0x5e4   : > { %v9521_v9 = vrot.slane %v8621_v18, %v18788_v10  ;;  %v9525_v58 = vrot.slane %v8621_v18, %v18789_v7  ;;  %v9529_v61 = vrot.slane %v8621_v18, %v18790_v1  ;;  %v9533_v33 = vrot.slane %v8621_v18, %v18791_v19  ;;  %v18815_v40 = vld [vmem:[#allocation18_spill] sm:$0xff] }
 0x5e5   : > { %v9537_v44 = vrot.slane %v8621_v18, %v18792_v42  ;;  %v9541_v4 = vrot.slane %v8621_v18, %v18793_v48  ;;  %v9545_v59 = vrot.slane %v8621_v18, %v18794_v22  ;;  %v9549_v26 = vrot.slane %v8621_v18, %v18795_v17 }
 0x5e6   : > { %v9606_v25 = vadd.f32 %v9521_v9, %v9410_v15  ;;  %v9607_v46 = vadd.f32 %v9525_v58, %v9411_v0  ;;  %v9608_v62 = vadd.f32 %v9529_v61, %v9412_v8  ;;  %v9609_v3 = vadd.f32 %v9533_v33, %v9413_v36 }
 0x5e7   : > { %v9610_v41 = vadd.f32 %v9537_v44, %v9414_v57  ;;  %v9611_v10 = vadd.f32 %v9541_v4, %v9415_v2  ;;  %v9612_v20 = vadd.f32 %v9545_v59, %v9416_v29  ;;  %v9613_v7 = vadd.f32 %v9549_v26, %v9417_v38 }
 0x5e8   : > { %v9748_v60 = vcombine.low %v9606_v25, %v9607_v46  ;;  %v9749_v1 = vcombine.low %v9608_v62, %v9609_v3  ;;  %v9864_v47 = vmul.f32 %v18814_v31, %v18814_v31  ;;  %v9868_v51 = vmul.f32 %v18815_v40, %v18815_v40 }
 0x5e9   : > { %v9765_v5 = vcombine.low %v9610_v41, %v9611_v10  ;;  %v9766_v19 = vcombine.low %v9612_v20, %v9613_v7  ;;  %v18818_v16 = vcombine.low %v18816_v37, %v18817_v50  ;;  %v18819_v45 = vcombine.high %v18816_v37, %v18817_v50 }
 0x5ea   : > { %v9756_v42 = vrot.slane %v9748_v60, %v11677_v34  ;;  %v9763_v48 = vrot.slane %v9749_v1, %v11677_v34  ;;  %v18822_v52 = vcombine.low %v18820_v39, %v18821_v27  ;;  %v18823_v15 = vcombine.high %v18820_v39, %v18821_v27 }
 0x5eb   : > { %v9773_v22 = vrot.slane %v9765_v5, %v11677_v34  ;;  %v9780_v18 = vrot.slane %v9766_v19, %v11677_v34  ;;  %v9888_v63 = vrot.slane %v18818_v16, %v11677_v34  ;;  %v9895_v55 = vrot.slane %v18819_v45, %v11677_v34 }
 0x5ec   : > { %v9924_v49 = vrot.slane %v18822_v52, %v11677_v34  ;;  %v9931_v0 = vrot.slane %v18823_v15, %v11677_v34 }
 0x5ed   : > { %v10748_v17 = vcombine.low %v9756_v42, %v9773_v22  ;;  %v10749_v28 = vcombine.low %v9763_v48, %v9780_v18 }
 0x5ef   : > { %v9852_v43 = vrot.slane %v10748_v17, %v18813_v53  ;;  %v9859_v13 = vrot.slane %v10749_v28, %v18813_v53 }
 0x5f1   : > { %v17361_v24 = vcombine.low %v9852_v43, %v9859_v13  ;;  %v17363_v23 = vcombine.high %v9852_v43, %v9859_v13 }
 0x5f3   : > { %v9865_v30 = vmul.f32 %v17361_v24, %v17361_v24  ;;  %v9869_v56 = vmul.f32 %v17363_v23, %v17363_v23 }
 0x5f5   : > { %v9880_v11 = vcombine.low %v9864_v47, %v9865_v30  ;;  %v9881_v14 = vcombine.high %v9864_v47, %v9865_v30  ;;  %v9916_v35 = vcombine.low %v9868_v51, %v9869_v56  ;;  %v9917_v6 = vcombine.high %v9868_v51, %v9869_v56 }
 0x5f7   : > { %v9902_v21 = vrot.slane %v9880_v11, %v11677_v34  ;;  %v9909_v54 = vrot.slane %v9881_v14, %v11677_v34  ;;  %v9938_v32 = vrot.slane %v9916_v35, %v11677_v34  ;;  %v9945_v12 = vrot.slane %v9917_v6, %v11677_v34 }
 0x5f9   : > { %v9910_v8 = vcombine.low %v9888_v63, %v9902_v21  ;;  %v9911_v36 = vcombine.high %v9888_v63, %v9902_v21  ;;  %v9912_v57 = vcombine.low %v9895_v55, %v9909_v54  ;;  %v9913_v2 = vcombine.high %v9895_v55, %v9909_v54 }
 0x5fa   : > { %v9946_v29 = vcombine.low %v9924_v49, %v9938_v32  ;;  %v9947_v38 = vcombine.high %v9924_v49, %v9938_v32  ;;  %v9948_v9 = vcombine.low %v9931_v0, %v9945_v12  ;;  %v9949_v58 = vcombine.high %v9931_v0, %v9945_v12 }
 0x5fb   : > { %v9958_v61 = vrot.slane %v9910_v8, 4  ;;  %v9964_v33 = vrot.slane %v9911_v36, 4  ;;  %v9970_v44 = vrot.slane %v9912_v57, 4  ;;  %v9976_v4 = vrot.slane %v9913_v2, 4 }
 0x5fc   : > { %v9982_v59 = vrot.slane %v9946_v29, 4  ;;  %v9988_v26 = vrot.slane %v9947_v38, 4  ;;  %v9994_v25 = vrot.slane %v9948_v9, 4  ;;  %v10000_v46 = vrot.slane %v9949_v58, 4 }
 0x5fd   : > { %v9959_v62 = vadd.f32 %v9958_v61, %v9910_v8  ;;  %v9965_v3 = vadd.f32 %v9964_v33, %v9911_v36  ;;  %v9971_v41 = vadd.f32 %v9970_v44, %v9912_v57  ;;  %v9977_v10 = vadd.f32 %v9976_v4, %v9913_v2 }
 0x5fe   : > { %v9983_v20 = vadd.f32 %v9982_v59, %v9946_v29  ;;  %v9989_v7 = vadd.f32 %v9988_v26, %v9947_v38  ;;  %v9995_v60 = vadd.f32 %v9994_v25, %v9948_v9  ;;  %v10001_v1 = vadd.f32 %v10000_v46, %v9949_v58 }
 0x5ff   : > { %v9960_v5 = vrot.slane %v9959_v62, 2  ;;  %v9966_v19 = vrot.slane %v9965_v3, 2  ;;  %v9972_v42 = vrot.slane %v9971_v41, 2  ;;  %v9978_v48 = vrot.slane %v9977_v10, 2 }
 0x600   : > { %v9984_v22 = vrot.slane %v9983_v20, 2  ;;  %v9990_v18 = vrot.slane %v9989_v7, 2  ;;  %v9996_v17 = vrot.slane %v9995_v60, 2  ;;  %v10002_v28 = vrot.slane %v10001_v1, 2 }
 0x601   : > { %v9961_v53 = vadd.f32 %v9960_v5, %v9959_v62  ;;  %v9967_v43 = vadd.f32 %v9966_v19, %v9965_v3  ;;  %v9973_v13 = vadd.f32 %v9972_v42, %v9971_v41  ;;  %v9979_v47 = vadd.f32 %v9978_v48, %v9977_v10 }
 0x602   : > { %v9985_v51 = vadd.f32 %v9984_v22, %v9983_v20  ;;  %v9991_v30 = vadd.f32 %v9990_v18, %v9989_v7  ;;  %v9997_v56 = vadd.f32 %v9996_v17, %v9995_v60  ;;  %v10003_v11 = vadd.f32 %v10002_v28, %v10001_v1 }
 0x603   : > { %v9962_v14 = vrot.slane %v9961_v53, 1  ;;  %v9968_v35 = vrot.slane %v9967_v43, 1  ;;  %v9974_v6 = vrot.slane %v9973_v13, 1  ;;  %v9980_v37 = vrot.slane %v9979_v47, 1 }
 0x604   : > { %v9986_v50 = vrot.slane %v9985_v51, 1  ;;  %v9992_v16 = vrot.slane %v9991_v30, 1  ;;  %v9998_v21 = vrot.slane %v9997_v56, 1  ;;  %v10004_v32 = vrot.slane %v10003_v11, 1 }
 0x605   : > { %v9963_v63 = vadd.f32 %v9962_v14, %v9961_v53  ;;  %v9969_v45 = vadd.f32 %v9968_v35, %v9967_v43  ;;  %v9975_v55 = vadd.f32 %v9974_v6, %v9973_v13  ;;  %v9981_v54 = vadd.f32 %v9980_v37, %v9979_v47 }
 0x606   : > { %v9987_v12 = vadd.f32 %v9986_v50, %v9985_v51  ;;  %v9993_v39 = vadd.f32 %v9992_v16, %v9991_v30  ;;  %v9999_v27 = vadd.f32 %v9998_v21, %v9997_v56  ;;  %v10005_v52 = vadd.f32 %v10004_v32, %v10003_v11  ;;  %v18824_v50 = vld [vmem:[#allocation24_spill] sm:$0xff] }
 0x607   : > { %10863 = vrsqrt.f32 %v9963_v63  ;;  %v10118_v49 = vadd.f32 1.0, %v9963_v63  ;;  %v10119_v15 = vadd.f32 1.0, %v9969_v45  ;;  %v10120_v0 = vadd.f32 1.0, %v9975_v55 }
 0x608   : > { %10865 = vrsqrt.f32 %v9969_v45  ;;  %v10121_v8 = vadd.f32 1.0, %v9981_v54  ;;  %v10122_v36 = vadd.f32 1.0, %v9987_v12  ;;  %v10123_v57 = vadd.f32 1.0, %v9993_v39 }
 0x609   : > { %10867 = vrsqrt.f32 %v9975_v55  ;;  %v10124_v29 = vadd.f32 1.0, %v9999_v27  ;;  %v10125_v58 = vadd.f32 1.0, %v10005_v52 }
 0x60a   : > { %10869 = vrsqrt.f32 %v9981_v54 }
 0x60b   : > { %10871 = vrsqrt.f32 %v9987_v12 }
 0x60c   : > { %10873 = vrsqrt.f32 %v9993_v39 }
 0x60d   : > { %10875 = vrsqrt.f32 %v9999_v27 }
 0x60e   : > { %10877 = vrsqrt.f32 %v10005_v52 }
 0x60f   : > { %10879 = vrcp.f32 %v10118_v49 }
 0x610   : > { %10881 = vrcp.f32 %v10119_v15 }
 0x611   : > { %v10864_v2 = vpop.eup %10863  ;;  %10883 = vrcp.f32 %v10120_v0 }
 0x612   : > { %v10866_v38 = vpop.eup %10865  ;;  %v10014_v9 = vmul.f32 %v10864_v2, %v9963_v63  ;;  %10885 = vrcp.f32 %v10121_v8  ;;  %v18825_v63 = vld [vmem:[#allocation75_spill] sm:$0xff] }
 0x613   : > { %v10868_v61 = vpop.eup %10867  ;;  %v10015_v33 = vmul.f32 %v10866_v38, %v9969_v45  ;;  %10887 = vrcp.f32 %v10122_v36 }
 0x614   : > { %v10870_v44 = vpop.eup %10869  ;;  %v10016_v4 = vmul.f32 %v10868_v61, %v9975_v55  ;;  %10889 = vrcp.f32 %v10123_v57  ;;  %v18826_v61 = vld [vmem:[#allocation25_spill] sm:$0xff] }
 0x615   : > { %v10872_v59 = vpop.eup %10871  ;;  %v10017_v26 = vmul.f32 %v10870_v44, %v9981_v54  ;;  %v10030_v25 = vcombine.low %v10014_v9, %v10015_v33  ;;  %v10031_v46 = vcombine.high %v10014_v9, %v10015_v33  ;;  %10891 = vrcp.f32 %v10124_v29  ;;  %v18827_v44 = vld [vmem:[#allocation77_spill] sm:$0xff] }
 0x616   : > { %v10874_v62 = vpop.eup %10873  ;;  %v10018_v3 = vmul.f32 %v10872_v59, %v9987_v12  ;;  %10893 = vrcp.f32 %v10125_v58 }
 0x617   : > { %v10876_v41 = vpop.eup %10875  ;;  %v10019_v10 = vmul.f32 %v10874_v62, %v9993_v39  ;;  %v10032_v20 = vcombine.low %v10016_v4, %v10017_v26  ;;  %v10033_v7 = vcombine.high %v10016_v4, %v10017_v26  ;;  %v10040_v60 = vrot.slane %v10030_v25, %v11677_v34 }
 0x618   : > { %v10878_v1 = vpop.eup %10877  ;;  %v10020_v5 = vmul.f32 %v10876_v41, %v9999_v27  ;;  %v10047_v19 = vrot.slane %v10031_v46, %v11677_v34 }
 0x619   : > { %v10880_v42 = vpop.eup %10879  ;;  %v10021_v48 = vmul.f32 %v10878_v1, %v10005_v52  ;;  %v10054_v22 = vrot.slane %v10032_v20, %v11677_v34  ;;  %v10061_v18 = vrot.slane %v10033_v7, %v11677_v34  ;;  %v10066_v17 = vcombine.low %v10018_v3, %v10019_v10 }
 0x61a   : > { %v10882_v28 = vpop.eup %10881  ;;  %v10067_v53 = vcombine.high %v10018_v3, %v10019_v10 }
 0x61b   : > { %v10884_v43 = vpop.eup %10883  ;;  %v10062_v13 = vcombine.low %v10040_v60, %v10054_v22  ;;  %v10063_v47 = vcombine.high %v10040_v60, %v10054_v22  ;;  %v10064_v51 = vcombine.low %v10047_v19, %v10061_v18  ;;  %v10065_v30 = vcombine.high %v10047_v19, %v10061_v18 }
 0x61c   : > { %v10886_v56 = vpop.eup %10885  ;;  %v10068_v11 = vcombine.low %v10020_v5, %v10021_v48  ;;  %v10069_v14 = vcombine.high %v10020_v5, %v10021_v48  ;;  %v10076_v35 = vrot.slane %v10066_v17, %v11677_v34  ;;  %v10083_v6 = vrot.slane %v10067_v53, %v11677_v34 }
 0x61d   : > { %v10888_v37 = vpop.eup %10887  ;;  %v10110_v16 = vmul.f32 %v10062_v13, %v18824_v50  ;;  %v10111_v45 = vmul.f32 %v10063_v47, %v18825_v63  ;;  %v10112_v55 = vmul.f32 %v10064_v51, %v18814_v31  ;;  %v10113_v21 = vmul.f32 %v10065_v30, %v17361_v24 }
 0x61e   : > { %v10890_v54 = vpop.eup %10889  ;;  %v10090_v32 = vrot.slane %v10068_v11, %v11677_v34  ;;  %v10097_v12 = vrot.slane %v10069_v14, %v11677_v34  ;;  %v10142_v39 = vcombine.low %v10880_v42, %v10882_v28  ;;  %v10143_v27 = vcombine.high %v10880_v42, %v10882_v28 }
 0x61f   : > { %v10892_v52 = vpop.eup %10891  ;;  %v10144_v49 = vcombine.low %v10884_v43, %v10886_v56  ;;  %v10145_v15 = vcombine.high %v10884_v43, %v10886_v56  ;;  %v10178_v0 = vcombine.low %v10888_v37, %v10890_v54  ;;  %v10179_v8 = vcombine.high %v10888_v37, %v10890_v54 }
 0x620   : > { %v10894_v36 = vpop.eup %10893  ;;  %v10098_v57 = vcombine.low %v10076_v35, %v10090_v32  ;;  %v10099_v2 = vcombine.high %v10076_v35, %v10090_v32  ;;  %v10100_v29 = vcombine.low %v10083_v6, %v10097_v12  ;;  %v10101_v38 = vcombine.high %v10083_v6, %v10097_v12 }
 0x621   : > { %v10152_v31 = vrot.slane %v10142_v39, %v11677_v34  ;;  %v10159_v24 = vrot.slane %v10143_v27, %v11677_v34  ;;  %v10166_v9 = vrot.slane %v10144_v49, %v11677_v34  ;;  %v10173_v58 = vrot.slane %v10145_v15, %v11677_v34 }
 0x622   : > { %v10114_v33 = vmul.f32 %v10098_v57, %v18826_v61  ;;  %v10115_v4 = vmul.f32 %v10099_v2, %v18827_v44  ;;  %v10116_v59 = vmul.f32 %v10100_v29, %v18815_v40  ;;  %v10117_v26 = vmul.f32 %v10101_v38, %v17363_v23 }
 0x623   : > { %v10174_v25 = vcombine.low %v10152_v31, %v10166_v9  ;;  %v10175_v46 = vcombine.high %v10152_v31, %v10166_v9  ;;  %v10176_v62 = vcombine.low %v10159_v24, %v10173_v58  ;;  %v10177_v3 = vcombine.high %v10159_v24, %v10173_v58 }
 0x624   : > { %v10180_v41 = vcombine.low %v10892_v52, %v10894_v36  ;;  %v10181_v10 = vcombine.high %v10892_v52, %v10894_v36  ;;  %v10188_v20 = vrot.slane %v10178_v0, %v11677_v34  ;;  %v10195_v7 = vrot.slane %v10179_v8, %v11677_v34 }
 0x625   : > { %v10222_v60 = vmul.f32 %v10174_v25, %v10110_v16  ;;  %v10223_v1 = vmul.f32 %v10175_v46, %v10111_v45  ;;  %v10224_v5 = vmul.f32 %v10176_v62, %v10112_v55  ;;  %v10225_v19 = vmul.f32 %v10177_v3, %v10113_v21 }
 0x626   : > { %v10202_v42 = vrot.slane %v10180_v41, %v11677_v34  ;;  %v10209_v40 = vrot.slane %v10181_v10, %v11677_v34 }
 0x627   : > { %v10238_v48 = vcombine.low %v10222_v60, %v10223_v1  ;;  %v10239_v23 = vcombine.high %v10222_v60, %v10223_v1  ;;  %v10240_v22 = vcombine.low %v10224_v5, %v10225_v19  ;;  %v10241_v18 = vcombine.high %v10224_v5, %v10225_v19 }
 0x628   : > { %v10210_v17 = vcombine.low %v10188_v20, %v10202_v42  ;;  %v10211_v28 = vcombine.high %v10188_v20, %v10202_v42  ;;  %v10212_v53 = vcombine.low %v10195_v7, %v10209_v40  ;;  %v10213_v43 = vcombine.high %v10195_v7, %v10209_v40 }
 0x629   : > { %v10248_v13 = vrot.slane %v10238_v48, %v11677_v34  ;;  %v10255_v47 = vrot.slane %v10239_v23, %v11677_v34  ;;  %v10262_v51 = vrot.slane %v10240_v22, %v11677_v34  ;;  %v10269_v30 = vrot.slane %v10241_v18, %v11677_v34 }
 0x62a   : > { %v10226_v56 = vmul.f32 %v10210_v17, %v10114_v33  ;;  %v10227_v11 = vmul.f32 %v10211_v28, %v10115_v4  ;;  %v10228_v14 = vmul.f32 %v10212_v53, %v10116_v59  ;;  %v10229_v35 = vmul.f32 %v10213_v43, %v10117_v26 }
 0x62b   : > { %v10270_v6 = vcombine.low %v10248_v13, %v10262_v51  ;;  %v10271_v37 = vcombine.high %v10248_v13, %v10262_v51  ;;  %v10272_v50 = vcombine.low %v10255_v47, %v10269_v30  ;;  %v10273_v16 = vcombine.high %v10255_v47, %v10269_v30 }
 0x62c   : > { %v10274_v63 = vcombine.low %v10226_v56, %v10227_v11  ;;  %v10275_v45 = vcombine.high %v10226_v56, %v10227_v11  ;;  %v10276_v55 = vcombine.low %v10228_v14, %v10229_v35  ;;  %v10277_v21 = vcombine.high %v10228_v14, %v10229_v35 }
 0x62d   : > { %10318 = vst [vmem:[%s258_s7] sm:$0xff] %v10270_v6  ;;  %10319 = vst [vmem:[%s258_s7 + $0x8] sm:$0xff] %v10271_v37 }
 0x62e   : > { %10320 = vst [vmem:[%s258_s7 + $0x10] sm:$0xff] %v10272_v50  ;;  %10321 = vst [vmem:[%s258_s7 + $0x18] sm:$0xff] %v10273_v16  ;;  %v10284_v54 = vrot.slane %v10274_v63, %v11677_v34  ;;  %v10291_v32 = vrot.slane %v10275_v45, %v11677_v34  ;;  %v10298_v12 = vrot.slane %v10276_v55, %v11677_v34 }
 0x62f   : > { %v10305_v39 = vrot.slane %v10277_v21, %v11677_v34 }
 0x630   : > { %v10306_v27 = vcombine.low %v10284_v54, %v10298_v12  ;;  %v10307_v52 = vcombine.high %v10284_v54, %v10298_v12 }
 0x631   : > { %v10308_v49 = vcombine.low %v10291_v32, %v10305_v39  ;;  %v10309_v15 = vcombine.high %v10291_v32, %v10305_v39 }
 0x632   : > { %10322 = vst [vmem:[%s258_s7 + $0x20] sm:$0xff] %v10306_v27  ;;  %10323 = vst [vmem:[%s258_s7 + $0x28] sm:$0xff] %v10307_v52 }
 0x633   : > { %10324 = vst [vmem:[%s258_s7 + $0x30] sm:$0xff] %v10308_v49  ;;  %10325 = vst [vmem:[%s258_s7 + $0x38] sm:$0xff] %v10309_v15 }
 0x634   : > { %11030 = shalt.err (!%p11027_p8)
}
 0x635   : > { %s11031_s1 = scalar_lea.hbm %s17431_s22, 1024  ;;  %s11035_s29 = scalar_lea.hbm %s17485_s3, 2048 }
 0x636   : > { %p11032_p10 = scmp.ne.s32.totalorder %s17431_s22, %s11031_s1  ;;  %p11036_p3 = scmp.lt.u32.totalorder %s17431_s22, %s17485_s3 }
 0x637   : > { %p11037_p2 = scmp.lt.u32.totalorder %s11035_s29, %s11031_s1  ;;  %p11039_p4 = scmp.lt.u32.totalorder %s11031_s1, %s17431_s22 }
 0x638   : > { %p11033_p13 = pnand %p11032_p10, %p18828_p5 }
 0x639   : > { %p11038_p11 = por %p11037_p2, %p11036_p3 }
 0x63a   : > { %p11034_p7 = pneg %p11033_p13 }
 0x63b   : > { %p11040_p1 = por %p11039_p4, %p11038_p11 }
 0x63d   : > { %p11041_p12 = pnand %p11040_p1, %p11034_p7 }
 0x63f   : > { %11044 = shalt.err (!%p11041_p12)
}
 0x640   : > { %s11117_s5 = smov 512   ;;  %s11118_s27 = smov 1024  }
 0x641   : > { %s11119_s6 = smov 32  }
 0x642   : > { %10766 = dma.vmem_to_hbm [thread:$0]  (%p18828_p5), %s17433_s23, 1024, %s17431_s22, %s10327_s20, %s11117_s5, %s11118_s27, %s11119_s6  }
 0x643 PF: > { %s10355_s7 = sand.u32 1, %s11083_s12   ;;  %p18829_p0 = scmp.ne.s32.totalorder %s17917_s4, 0 }
 0x644   : > { %p18830_p9 = scmp.ge.s32.totalorder %s11103_s17, 2  ;;  %s10356_s15 = scalar_lea.sflag [#allocation8], %s10355_s7 }
 0x646   : > { %p10780_p6 = pnand %p18830_p9, %p18829_p0 }
 0x648   : > { %11078 = dma.done.wait (!%p10780_p6), %s10356_s15, 1024  }
 0x649   : > { %11080 = vsyncadd (!%p10780_p6), %s10356_s15, 4294966272  ;;  %s20_s17 = sadd.s32 1, %s11103_s17   ;;  %s18831_s28 = sld [smem:[#allocation16_spill]] }
 0x64a   : > { %p17_p8 = scmp.ge.s32.totalorder %s20_s17, 4   ;;  %s18832_s12 = smov %s11087_s13 }
 0x64b   : > { %s18833_s13 = smov %s11091_s14  ;;  %s18834_s14 = smov %s11188_s24 }
 0x64c   : > { %s18835_s15 = smov %s11099_s16  ;;  %19 = sbr.rel (!%p17_p8) target bundleno = 9 (0x9), region = 109 }
 0x64f   : > { %s18836_s16 = smov %s18831_s28 }
 0x653   :  { %10361 = vsyncpa [#allocation7], 1 }
 0x654   :  { %10363 = vsyncpa [#allocation7 + $0x1], 1 }
 0x655   :  { %10364 = vsyncpa [#allocation10], 1 }
 0x656   :  { %10366 = vsyncpa [#allocation10 + $0x1], 1 }
 0x657   :  { %10367 = vsyncpa [#allocation8], 1 }
 0x658   :  { %10369 = vsyncpa [#allocation8 + $0x1], 1 }

</bundles_post_ra>
